<compile_context>
chip_gen: v7x
topology: tpu7x:2x2x1
jax: 0.10.0
libtpu: 0.0.40
codegen_flags: <defaults>
</compile_context>

<pallas_src>
import jax
import jax.numpy as jnp
from jax import lax
from jax.experimental import pallas as pl
from jax.experimental.pallas import tpu as pltpu


def _make_block_kernel(B, cin, n_ind, p_rows, p_stride, tap_offsets, h, w, wp):
    """Per-grid-step kernel (B images) with static tap row-offsets baked in."""
    n_taps = len(tap_offsets)            # 9
    id_base = n_taps * cin               # identity-residual columns
    ind_base = id_base + cin             # indicator / ones columns
    centre_off = tap_offsets[n_taps // 2]

    def kernel(x_ref, w_ref, ind_ref, o_ref, lhs_ref, acc_ref):
        # x_ref:   (B, R, Cin)   bf16  row-flattened zero-padded image (+margin)
        # w_ref:   (K, CP)       bf16  folded conv / identity / bias RHS
        # ind_ref: (P, n_ind)    bf16  border-validity indicators + ones column
        # o_ref:   (B, h*w, CP)  bf16  interior output (lane dense)
        # lhs_ref: (B*PS, K)     bf16  packed-K scratch (im2col in VMEM)
        # acc_ref: (B*PS, CP)    f32   matmul accumulator

        # ---- pack K = 9*Cin (taps) + Cin (identity) + n_ind (bias) ---------
        # Shifted copies act on the narrow Cin-wide data (load/XLU slots);
        # the 128-lane accumulator is never touched by the packing.
        for b in range(B):
            rb = b * p_stride
            for t, off in enumerate(tap_offsets):
                lhs_ref[rb:rb + p_rows, t * cin:(t + 1) * cin] = (
                    x_ref[b, pl.ds(off, p_rows), :])
            # identity residual: duplicate of the centre tap against eye() RHS
            lhs_ref[rb:rb + p_rows, id_base:id_base + cin] = (
                x_ref[b, pl.ds(centre_off, p_rows), :])
            # shift/BN bias: per-pixel tap-validity indicators + ones column
            lhs_ref[rb:rb + p_rows, ind_base:ind_base + n_ind] = ind_ref[...]

        # ---- single fused MXU matmul over the whole B-image block ----------
        acc_ref[...] = jnp.dot(lhs_ref[...], w_ref[...],
                               preferred_element_type=jnp.float32)

        # ---- hardtanh + bf16 cast, interior rows only (lane-dense stores) --
        for b in range(B):
            rb = b * p_stride
            for ph in range(h):
                src = rb + (ph + 1) * wp + 1
                o_ref[b, ph * w:(ph + 1) * w, :] = jnp.clip(
                    acc_ref[src:src + w, :], -1.0, 1.0).astype(o_ref.dtype)

    return kernel


def _pick_images_per_step(n, per_image_bytes, budget=8 * 1024 * 1024):
    """Largest B that divides n, keeps >=2 grid steps (megacore), fits VMEM."""
    for b in (8, 4, 2):
        if n % b == 0 and n // b >= 2 and b * per_image_bytes <= budget:
            return b
    return 1


def basic_block_forward(x, shift1, shift2, w_bin, scale_w1, bn_scale, bn_bias,
                        stride=1, compute_dtype=jnp.bfloat16,
                        images_per_step=None):
    """x: NCHW float32.  Identity-residual path (stride==1, Cin==Cout).

    Returns NCHW bfloat16 (post-hardtanh activation for a binary-weight net).
    """
    n, cin, h, w = x.shape
    cout = w_bin.shape[0]
    assert stride == 1 and cin == cout, "identity-residual path only"

    f32 = jnp.float32
    cp = max(128, ((cout + 127) // 128) * 128)     # lane-dense output channels
    hp, wp = h + 2, w + 2
    p_rows = hp * wp                               # padded-grid rows (compute grid)
    margin = ((wp + 1 + 7) // 8) * 8               # covers tap offsets +-(wp+1)
    r_rows = p_rows + 2 * margin
    n_ind = 10                                     # 9 validity cols + ones col
    k_taps = 9 * cin
    k_tot = k_taps + cin + n_ind                   # taps + identity + bias

    # ---- constant folds (exact, done once outside the kernel) --------------
    #   conv(x+s1,W)*bn_s + scale*bn_s*conv(x+s2,W) + bn_b + x
    #     = conv(x, W1+W2) + bias(h,w) + x,  W1 = W*bn_s, W2 = W*scale*bn_s,
    #   bias = conv(s1_bcast,W1) + conv(s2_bcast,W2) + bn_b with border taps
    #   masked (shifts are added before zero padding).
    bn_s = bn_scale.reshape(cout, 1, 1, 1).astype(f32)
    w1 = w_bin.astype(f32) * bn_s
    w2 = w_bin.astype(f32) * (scale_w1.reshape(cout, 1, 1, 1).astype(f32) * bn_s)
    w_sum = w1 + w2                                              # (Cout,Cin,3,3)

    # RHS of the fused matmul, row blocks matching the packed-LHS column blocks.
    rhs_taps = w_sum.transpose(2, 3, 1, 0).reshape(k_taps, cout)  # t=kh*3+kw major
    rhs_id = jnp.eye(cin, cout, dtype=f32)                        # identity residual
    t_sum = (jnp.einsum('c,ocij->oij', shift1.reshape(cin).astype(f32), w1) +
             jnp.einsum('c,ocij->oij', shift2.reshape(cin).astype(f32), w2))  # (Cout,3,3)
    rhs_bias = jnp.concatenate(
        [t_sum.transpose(1, 2, 0).reshape(9, cout),
         bn_bias.reshape(1, cout).astype(f32)], axis=0)           # (10, Cout)
    rhs = jnp.concatenate([rhs_taps, rhs_id, rhs_bias], axis=0)   # (K, Cout)
    rhs = jnp.pad(rhs, ((0, 0), (0, cp - cout))).astype(compute_dtype)

    # Border-validity indicators: which taps of the (constant) shift image land
    # inside the un-padded input for each interior output pixel.
    k3 = jnp.arange(3)
    vh = ((jnp.arange(h)[:, None] + k3[None, :] - 1 >= 0) &
          (jnp.arange(h)[:, None] + k3[None, :] - 1 < h))                  # (H,3)
    vw = ((jnp.arange(w)[:, None] + k3[None, :] - 1 >= 0) &
          (jnp.arange(w)[:, None] + k3[None, :] - 1 < w))                  # (W,3)
    valid = (vh[:, None, :, None] & vw[None, :, None, :]).astype(f32)      # (H,W,3,3)
    ind_hw = jnp.concatenate([valid.reshape(h, w, 9),
                              jnp.ones((h, w, 1), f32)], axis=-1)          # (H,W,10)
    ind = jnp.pad(ind_hw, ((1, 1), (1, 1), (0, 0))).reshape(p_rows, n_ind)
    ind = ind.astype(compute_dtype)

    # ---- activations: NCHW -> zero-padded, row-flattened NHWC (+margin), bf16
    x_pad = jnp.pad(x.transpose(0, 2, 3, 1), ((0, 0), (1, 1), (1, 1), (0, 0)))
    x_flat = jnp.pad(x_pad.reshape(n, p_rows, cin),
                     ((0, 0), (margin, margin), (0, 0))).astype(compute_dtype)

    # tap t=(kh,kw) reads padded-grid row  p + (kh-1)*(W+2) + (kw-1)
    tap_offsets = tuple(margin + (t // 3 - 1) * wp + (t % 3 - 1) for t in range(9))

    p_stride = ((p_rows + 7) // 8) * 8             # aligned per-image row stride
    per_image_bytes = (p_stride * (k_tot * 2 + cp * 4)          # lhs + acc scratch
                       + 2 * (r_rows * cin * 2 + h * w * cp * 2))  # dbl-buffered IO
    B = images_per_step or _pick_images_per_step(n, per_image_bytes)
    assert n % B == 0

    kernel = _make_block_kernel(B, cin, n_ind, p_rows, p_stride, tap_offsets,
                                h, w, wp)

    cost = pl.CostEstimate(
        flops=2 * n * p_rows * k_tot * cp,
        transcendentals=0,
        bytes_accessed=(x_flat.size * 2 + rhs.size * 2 + ind.size * 2
                        + n * h * w * cp * 2))

    out_flat = pl.pallas_call(
        kernel,
        out_shape=jax.ShapeDtypeStruct((n, h * w, cp), compute_dtype),
        grid_spec=pltpu.PrefetchScalarGridSpec(
            num_scalar_prefetch=0,
            grid=(n // B,),
            in_specs=[
                pl.BlockSpec((B, r_rows, cin), lambda i: (i, 0, 0)),   # image rows
                pl.BlockSpec((k_tot, cp), lambda i: (0, 0)),           # fused RHS
                pl.BlockSpec((p_rows, n_ind), lambda i: (0, 0)),       # indicators
            ],
            out_specs=pl.BlockSpec((B, h * w, cp), lambda i: (i, 0, 0)),
            scratch_shapes=[
                pltpu.VMEM((B * p_stride, k_tot), compute_dtype),      # packed LHS
                pltpu.VMEM((B * p_stride, cp), jnp.float32),           # f32 accum
            ],
        ),
        compiler_params=pltpu.CompilerParams(
            dimension_semantics=("parallel",),     # v7x: 2 TCs split the batch
            vmem_limit_bytes=32 * 1024 * 1024),    # raise v5e's 16 MiB default
        cost_estimate=cost,
    )(x_flat, rhs, ind)

    # interior output -> NCHW, drop the lane padding (single-block test only).
    out = out_flat.reshape(n, h, w, cp)[:, :, :, :cout]
    return out.transpose(0, 3, 1, 2)


def reference_forward(x, shift1, shift2, w_bin, scale_w1, bn_scale, bn_bias, stride=1):
    dn = ('NCHW', 'OIHW', 'NCHW')

    def conv(inp):
        return lax.conv_general_dilated(inp, w_bin, (stride, stride),
                                        ((1, 1), (1, 1)), dimension_numbers=dn)

    out1 = conv(x + shift1)
    out2 = conv(x + shift2)
    out = out1 + scale_w1 * out2
    c = w_bin.shape[0]
    out = out * bn_scale.reshape(1, c, 1, 1) + bn_bias.reshape(1, c, 1, 1)
    out = out + x
    return jnp.clip(out, -1.0, 1.0)


if __name__ == "__main__":
    # Small shapes: batch=2, inplanes=planes=8 (identity residual), spatial=16.
    N, C, H, W = 2, 8, 16, 16
    planes, stride = 8, 1

    key = jax.random.PRNGKey(0)
    k_x, k_w, k_s1, k_s2, k_scale = jax.random.split(key, 5)

    x = jax.random.normal(k_x, (N, C, H, W), dtype=jnp.float32)

    # Parameters (module __init__ shapes; small random values so both branches matter).
    shift1 = 0.01 * jax.random.normal(k_s1, (1, C, 1, 1), dtype=jnp.float32)
    shift2 = 0.01 * jax.random.normal(k_s2, (1, C, 1, 1), dtype=jnp.float32)
    w_full = 0.1 * jax.random.normal(k_w, (planes, C, 3, 3), dtype=jnp.float32)
    scale_w1 = jax.random.uniform(k_scale, (1, planes, 1, 1), dtype=jnp.float32) * 0.001

    # Binarize conv weight: sign(w) * mean(|w|) per output channel.
    alpha = jnp.mean(jnp.abs(w_full), axis=(1, 2, 3), keepdims=True)
    w_bin = jnp.sign(w_full) * alpha

    # BatchNorm (inference): gamma=1, beta=0, running_mean=0, running_var=1.
    gamma = jnp.ones((planes,), jnp.float32)
    beta = jnp.zeros((planes,), jnp.float32)
    run_mean = jnp.zeros((planes,), jnp.float32)
    run_var = jnp.ones((planes,), jnp.float32)
    eps = 1e-5
    bn_scale = gamma / jnp.sqrt(run_var + eps)
    bn_bias = beta - run_mean * bn_scale

    out = jax.jit(basic_block_forward)(x, shift1, shift2, w_bin, scale_w1,
                                       bn_scale, bn_bias)
    out = jax.block_until_ready(out)

    ref = reference_forward(x, shift1, shift2, w_bin, scale_w1, bn_scale, bn_bias,
                            stride=stride)
    ref = jax.block_until_ready(ref)

    assert out.shape == (N, planes, H, W), out.shape
    # bf16 matmul inputs / bf16 output vs f32 reference -> loosened tolerance.
    err = jnp.max(jnp.abs(out.astype(jnp.float32) - ref))
    assert jnp.allclose(out.astype(jnp.float32), ref, atol=5e-2, rtol=5e-2), \
        f"max abs err {err}"

    print("KERNEL_OK")
</pallas_src>

<mosaic_0001>
module attributes {stable_mosaic.version = 11 : i64} {
  func.func @kernel(%arg0: i32, %arg1: memref<1x372x8xbf16, #tpu.memory_space<vmem>>, %arg2: memref<90x128xbf16, #tpu.memory_space<vmem>>, %arg3: memref<324x10xbf16, #tpu.memory_space<vmem>>, %arg4: memref<1x256x128xbf16, #tpu.memory_space<vmem>>, %arg5: memref<328x90xbf16, #tpu.memory_space<vmem>>, %arg6: memref<328x128xf32, #tpu.memory_space<vmem>>) attributes {dimension_semantics = [#tpu.dimension_semantics<parallel>], iteration_bounds = array<i64: 2>, scalar_prefetch = 0 : i64, scratch_operands = 2 : i64, tpu.core_type = #tpu.core_type<tc>, window_params = [{transform_indices = @transform_0, window_bounds = array<i64: 1, 372, 8>}, {pipeline_mode = #tpu.pipeline_mode<synchronous>, transform_indices = @transform_1, window_bounds = array<i64: 90, 128>}, {pipeline_mode = #tpu.pipeline_mode<synchronous>, transform_indices = @transform_2, window_bounds = array<i64: 324, 10>}, {transform_indices = @transform_3, window_bounds = array<i64: 1, 256, 128>}]} {
    %c0 = arith.constant 0 : index
    %c5 = arith.constant 5 : index
    %c0_0 = arith.constant 0 : index
    %0 = vector.load %arg1[%c0, %c5, %c0_0] : memref<1x372x8xbf16, #tpu.memory_space<vmem>>, vector<1x324x8xbf16>
    %1 = vector.shape_cast %0 : vector<1x324x8xbf16> to vector<324x8xbf16>
    %c0_1 = arith.constant 0 : index
    %c0_2 = arith.constant 0 : index
    %2 = vector.load %arg5[%c0_1, %c0_2] : memref<328x90xbf16, #tpu.memory_space<vmem>>, vector<324x8xbf16>
    tpu.vector_store %arg5[%c0_1, %c0_2], %1 {strides = array<i32>} : memref<328x90xbf16, #tpu.memory_space<vmem>>, vector<324x8xbf16>,
    %c0_3 = arith.constant 0 : index
    %c6 = arith.constant 6 : index
    %c0_4 = arith.constant 0 : index
    %3 = vector.load %arg1[%c0_3, %c6, %c0_4] : memref<1x372x8xbf16, #tpu.memory_space<vmem>>, vector<1x324x8xbf16>
    %4 = vector.shape_cast %3 : vector<1x324x8xbf16> to vector<324x8xbf16>
    %c0_5 = arith.constant 0 : index
    %c8 = arith.constant 8 : index
    %5 = vector.load %arg5[%c0_5, %c8] : memref<328x90xbf16, #tpu.memory_space<vmem>>, vector<324x8xbf16>
    tpu.vector_store %arg5[%c0_5, %c8], %4 {strides = array<i32>} : memref<328x90xbf16, #tpu.memory_space<vmem>>, vector<324x8xbf16>,
    %c0_6 = arith.constant 0 : index
    %c7 = arith.constant 7 : index
    %c0_7 = arith.constant 0 : index
    %6 = vector.load %arg1[%c0_6, %c7, %c0_7] : memref<1x372x8xbf16, #tpu.memory_space<vmem>>, vector<1x324x8xbf16>
    %7 = vector.shape_cast %6 : vector<1x324x8xbf16> to vector<324x8xbf16>
    %c0_8 = arith.constant 0 : index
    %c16 = arith.constant 16 : index
    %8 = vector.load %arg5[%c0_8, %c16] : memref<328x90xbf16, #tpu.memory_space<vmem>>, vector<324x8xbf16>
    tpu.vector_store %arg5[%c0_8, %c16], %7 {strides = array<i32>} : memref<328x90xbf16, #tpu.memory_space<vmem>>, vector<324x8xbf16>,
    %c0_9 = arith.constant 0 : index
    %c23 = arith.constant 23 : index
    %c0_10 = arith.constant 0 : index
    %9 = vector.load %arg1[%c0_9, %c23, %c0_10] : memref<1x372x8xbf16, #tpu.memory_space<vmem>>, vector<1x324x8xbf16>
    %10 = vector.shape_cast %9 : vector<1x324x8xbf16> to vector<324x8xbf16>
    %c0_11 = arith.constant 0 : index
    %c24 = arith.constant 24 : index
    %11 = vector.load %arg5[%c0_11, %c24] : memref<328x90xbf16, #tpu.memory_space<vmem>>, vector<324x8xbf16>
    tpu.vector_store %arg5[%c0_11, %c24], %10 {strides = array<i32>} : memref<328x90xbf16, #tpu.memory_space<vmem>>, vector<324x8xbf16>,
    %c0_12 = arith.constant 0 : index
    %c24_13 = arith.constant 24 : index
    %c0_14 = arith.constant 0 : index
    %12 = vector.load %arg1[%c0_12, %c24_13, %c0_14] : memref<1x372x8xbf16, #tpu.memory_space<vmem>>, vector<1x324x8xbf16>
    %13 = vector.shape_cast %12 : vector<1x324x8xbf16> to vector<324x8xbf16>
    %c0_15 = arith.constant 0 : index
    %c32 = arith.constant 32 : index
    %14 = vector.load %arg5[%c0_15, %c32] : memref<328x90xbf16, #tpu.memory_space<vmem>>, vector<324x8xbf16>
    tpu.vector_store %arg5[%c0_15, %c32], %13 {strides = array<i32>} : memref<328x90xbf16, #tpu.memory_space<vmem>>, vector<324x8xbf16>,
    %c0_16 = arith.constant 0 : index
    %c25 = arith.constant 25 : index
    %c0_17 = arith.constant 0 : index
    %15 = vector.load %arg1[%c0_16, %c25, %c0_17] : memref<1x372x8xbf16, #tpu.memory_space<vmem>>, vector<1x324x8xbf16>
    %16 = vector.shape_cast %15 : vector<1x324x8xbf16> to vector<324x8xbf16>
    %c0_18 = arith.constant 0 : index
    %c40 = arith.constant 40 : index
    %17 = vector.load %arg5[%c0_18, %c40] : memref<328x90xbf16, #tpu.memory_space<vmem>>, vector<324x8xbf16>
    tpu.vector_store %arg5[%c0_18, %c40], %16 {strides = array<i32>} : memref<328x90xbf16, #tpu.memory_space<vmem>>, vector<324x8xbf16>,
    %c0_19 = arith.constant 0 : index
    %c41 = arith.constant 41 : index
    %c0_20 = arith.constant 0 : index
    %18 = vector.load %arg1[%c0_19, %c41, %c0_20] : memref<1x372x8xbf16, #tpu.memory_space<vmem>>, vector<1x324x8xbf16>
    %19 = vector.shape_cast %18 : vector<1x324x8xbf16> to vector<324x8xbf16>
    %c0_21 = arith.constant 0 : index
    %c48 = arith.constant 48 : index
    %20 = vector.load %arg5[%c0_21, %c48] : memref<328x90xbf16, #tpu.memory_space<vmem>>, vector<324x8xbf16>
    tpu.vector_store %arg5[%c0_21, %c48], %19 {strides = array<i32>} : memref<328x90xbf16, #tpu.memory_space<vmem>>, vector<324x8xbf16>,
    %c0_22 = arith.constant 0 : index
    %c42 = arith.constant 42 : index
    %c0_23 = arith.constant 0 : index
    %21 = vector.load %arg1[%c0_22, %c42, %c0_23] : memref<1x372x8xbf16, #tpu.memory_space<vmem>>, vector<1x324x8xbf16>
    %22 = vector.shape_cast %21 : vector<1x324x8xbf16> to vector<324x8xbf16>
    %c0_24 = arith.constant 0 : index
    %c56 = arith.constant 56 : index
    %23 = vector.load %arg5[%c0_24, %c56] : memref<328x90xbf16, #tpu.memory_space<vmem>>, vector<324x8xbf16>
    tpu.vector_store %arg5[%c0_24, %c56], %22 {strides = array<i32>} : memref<328x90xbf16, #tpu.memory_space<vmem>>, vector<324x8xbf16>,
    %c0_25 = arith.constant 0 : index
    %c43 = arith.constant 43 : index
    %c0_26 = arith.constant 0 : index
    %24 = vector.load %arg1[%c0_25, %c43, %c0_26] : memref<1x372x8xbf16, #tpu.memory_space<vmem>>, vector<1x324x8xbf16>
    %25 = vector.shape_cast %24 : vector<1x324x8xbf16> to vector<324x8xbf16>
    %c0_27 = arith.constant 0 : index
    %c64 = arith.constant 64 : index
    %26 = vector.load %arg5[%c0_27, %c64] : memref<328x90xbf16, #tpu.memory_space<vmem>>, vector<324x8xbf16>
    tpu.vector_store %arg5[%c0_27, %c64], %25 {strides = array<i32>} : memref<328x90xbf16, #tpu.memory_space<vmem>>, vector<324x8xbf16>,
    %c0_28 = arith.constant 0 : index
    %c24_29 = arith.constant 24 : index
    %c0_30 = arith.constant 0 : index
    %27 = vector.load %arg1[%c0_28, %c24_29, %c0_30] : memref<1x372x8xbf16, #tpu.memory_space<vmem>>, vector<1x324x8xbf16>
    %28 = vector.shape_cast %27 : vector<1x324x8xbf16> to vector<324x8xbf16>
    %c0_31 = arith.constant 0 : index
    %c72 = arith.constant 72 : index
    %29 = vector.load %arg5[%c0_31, %c72] : memref<328x90xbf16, #tpu.memory_space<vmem>>, vector<324x8xbf16>
    tpu.vector_store %arg5[%c0_31, %c72], %28 {strides = array<i32>} : memref<328x90xbf16, #tpu.memory_space<vmem>>, vector<324x8xbf16>,
    %c0_32 = arith.constant 0 : index
    %c0_33 = arith.constant 0 : index
    %30 = vector.load %arg3[%c0_32, %c0_33] : memref<324x10xbf16, #tpu.memory_space<vmem>>, vector<324x10xbf16>
    %c0_34 = arith.constant 0 : index
    %c80 = arith.constant 80 : index
    %31 = vector.load %arg5[%c0_34, %c80] : memref<328x90xbf16, #tpu.memory_space<vmem>>, vector<324x10xbf16>
    tpu.vector_store %arg5[%c0_34, %c80], %30 {strides = array<i32>} : memref<328x90xbf16, #tpu.memory_space<vmem>>, vector<324x10xbf16>,
    %c0_35 = arith.constant 0 : index
    %c0_36 = arith.constant 0 : index
    %32 = vector.load %arg5[%c0_35, %c0_36] : memref<328x90xbf16, #tpu.memory_space<vmem>>, vector<328x90xbf16>
    %c0_37 = arith.constant 0 : index
    %c0_38 = arith.constant 0 : index
    %33 = vector.load %arg2[%c0_37, %c0_38] : memref<90x128xbf16, #tpu.memory_space<vmem>>, vector<90x128xbf16>
    %cst = arith.constant dense<0.000000e+00> : vector<328x128xf32>
    %34 = tpu.matmul %32, %33, %cst {dimension_numbers = #tpu.dot_dimension_numbers<[1], [0], [0], [1], [0, 0, 1, 1], [], []>} : vector<328x90xbf16>, vector<90x128xbf16>, vector<328x128xf32> -> vector<328x128xf32>
    %c0_39 = arith.constant 0 : index
    %c0_40 = arith.constant 0 : index
    %35 = vector.load %arg6[%c0_39, %c0_40] : memref<328x128xf32, #tpu.memory_space<vmem>>, vector<328x128xf32>
    tpu.vector_store %arg6[%c0_39, %c0_40], %34 {strides = array<i32>} : memref<328x128xf32, #tpu.memory_space<vmem>>, vector<328x128xf32>,
    %c19 = arith.constant 19 : index
    %c0_41 = arith.constant 0 : index
    %36 = vector.load %arg6[%c19, %c0_41] : memref<328x128xf32, #tpu.memory_space<vmem>>, vector<16x128xf32>
    %cst_42 = arith.constant -1.000000e+00 : f32
    %cst_43 = arith.constant 1.000000e+00 : f32
    %37 = vector.broadcast %cst_42 : f32 to vector<16x128xf32>
    %38 = arith.maximumf %37, %36 : vector<16x128xf32>
    %39 = vector.broadcast %cst_43 : f32 to vector<16x128xf32>
    %40 = arith.minimumf %39, %38 : vector<16x128xf32>
    %41 = arith.truncf %40 : vector<16x128xf32> to vector<16x128xbf16>
    %c0_44 = arith.constant 0 : index
    %c0_45 = arith.constant 0 : index
    %c0_46 = arith.constant 0 : index
    %42 = vector.load %arg4[%c0_44, %c0_45, %c0_46] : memref<1x256x128xbf16, #tpu.memory_space<vmem>>, vector<1x16x128xbf16>
    %43 = vector.shape_cast %42 : vector<1x16x128xbf16> to vector<16x128xbf16>
    %44 = vector.shape_cast %41 : vector<16x128xbf16> to vector<1x16x128xbf16>
    tpu.vector_store %arg4[%c0_44, %c0_45, %c0_46], %44 {strides = array<i32>} : memref<1x256x128xbf16, #tpu.memory_space<vmem>>, vector<1x16x128xbf16>,
    %c37 = arith.constant 37 : index
    %c0_47 = arith.constant 0 : index
    %45 = vector.load %arg6[%c37, %c0_47] : memref<328x128xf32, #tpu.memory_space<vmem>>, vector<16x128xf32>
    %cst_48 = arith.constant -1.000000e+00 : f32
    %cst_49 = arith.constant 1.000000e+00 : f32
    %46 = vector.broadcast %cst_48 : f32 to vector<16x128xf32>
    %47 = arith.maximumf %46, %45 : vector<16x128xf32>
    %48 = vector.broadcast %cst_49 : f32 to vector<16x128xf32>
    %49 = arith.minimumf %48, %47 : vector<16x128xf32>
    %50 = arith.truncf %49 : vector<16x128xf32> to vector<16x128xbf16>
    %c0_50 = arith.constant 0 : index
    %c16_51 = arith.constant 16 : index
    %c0_52 = arith.constant 0 : index
    %51 = vector.load %arg4[%c0_50, %c16_51, %c0_52] : memref<1x256x128xbf16, #tpu.memory_space<vmem>>, vector<1x16x128xbf16>
    %52 = vector.shape_cast %51 : vector<1x16x128xbf16> to vector<16x128xbf16>
    %53 = vector.shape_cast %50 : vector<16x128xbf16> to vector<1x16x128xbf16>
    tpu.vector_store %arg4[%c0_50, %c16_51, %c0_52], %53 {strides = array<i32>} : memref<1x256x128xbf16, #tpu.memory_space<vmem>>, vector<1x16x128xbf16>,
    %c55 = arith.constant 55 : index
    %c0_53 = arith.constant 0 : index
    %54 = vector.load %arg6[%c55, %c0_53] : memref<328x128xf32, #tpu.memory_space<vmem>>, vector<16x128xf32>
    %cst_54 = arith.constant -1.000000e+00 : f32
    %cst_55 = arith.constant 1.000000e+00 : f32
    %55 = vector.broadcast %cst_54 : f32 to vector<16x128xf32>
    %56 = arith.maximumf %55, %54 : vector<16x128xf32>
    %57 = vector.broadcast %cst_55 : f32 to vector<16x128xf32>
    %58 = arith.minimumf %57, %56 : vector<16x128xf32>
    %59 = arith.truncf %58 : vector<16x128xf32> to vector<16x128xbf16>
    %c0_56 = arith.constant 0 : index
    %c32_57 = arith.constant 32 : index
    %c0_58 = arith.constant 0 : index
    %60 = vector.load %arg4[%c0_56, %c32_57, %c0_58] : memref<1x256x128xbf16, #tpu.memory_space<vmem>>, vector<1x16x128xbf16>
    %61 = vector.shape_cast %60 : vector<1x16x128xbf16> to vector<16x128xbf16>
    %62 = vector.shape_cast %59 : vector<16x128xbf16> to vector<1x16x128xbf16>
    tpu.vector_store %arg4[%c0_56, %c32_57, %c0_58], %62 {strides = array<i32>} : memref<1x256x128xbf16, #tpu.memory_space<vmem>>, vector<1x16x128xbf16>,
    %c73 = arith.constant 73 : index
    %c0_59 = arith.constant 0 : index
    %63 = vector.load %arg6[%c73, %c0_59] : memref<328x128xf32, #tpu.memory_space<vmem>>, vector<16x128xf32>
    %cst_60 = arith.constant -1.000000e+00 : f32
    %cst_61 = arith.constant 1.000000e+00 : f32
    %64 = vector.broadcast %cst_60 : f32 to vector<16x128xf32>
    %65 = arith.maximumf %64, %63 : vector<16x128xf32>
    %66 = vector.broadcast %cst_61 : f32 to vector<16x128xf32>
    %67 = arith.minimumf %66, %65 : vector<16x128xf32>
    %68 = arith.truncf %67 : vector<16x128xf32> to vector<16x128xbf16>
    %c0_62 = arith.constant 0 : index
    %c48_63 = arith.constant 48 : index
    %c0_64 = arith.constant 0 : index
    %69 = vector.load %arg4[%c0_62, %c48_63, %c0_64] : memref<1x256x128xbf16, #tpu.memory_space<vmem>>, vector<1x16x128xbf16>
    %70 = vector.shape_cast %69 : vector<1x16x128xbf16> to vector<16x128xbf16>
    %71 = vector.shape_cast %68 : vector<16x128xbf16> to vector<1x16x128xbf16>
    tpu.vector_store %arg4[%c0_62, %c48_63, %c0_64], %71 {strides = array<i32>} : memref<1x256x128xbf16, #tpu.memory_space<vmem>>, vector<1x16x128xbf16>,
    %c91 = arith.constant 91 : index
    %c0_65 = arith.constant 0 : index
    %72 = vector.load %arg6[%c91, %c0_65] : memref<328x128xf32, #tpu.memory_space<vmem>>, vector<16x128xf32>
    %cst_66 = arith.constant -1.000000e+00 : f32
    %cst_67 = arith.constant 1.000000e+00 : f32
    %73 = vector.broadcast %cst_66 : f32 to vector<16x128xf32>
    %74 = arith.maximumf %73, %72 : vector<16x128xf32>
    %75 = vector.broadcast %cst_67 : f32 to vector<16x128xf32>
    %76 = arith.minimumf %75, %74 : vector<16x128xf32>
    %77 = arith.truncf %76 : vector<16x128xf32> to vector<16x128xbf16>
    %c0_68 = arith.constant 0 : index
    %c64_69 = arith.constant 64 : index
    %c0_70 = arith.constant 0 : index
    %78 = vector.load %arg4[%c0_68, %c64_69, %c0_70] : memref<1x256x128xbf16, #tpu.memory_space<vmem>>, vector<1x16x128xbf16>
    %79 = vector.shape_cast %78 : vector<1x16x128xbf16> to vector<16x128xbf16>
    %80 = vector.shape_cast %77 : vector<16x128xbf16> to vector<1x16x128xbf16>
    tpu.vector_store %arg4[%c0_68, %c64_69, %c0_70], %80 {strides = array<i32>} : memref<1x256x128xbf16, #tpu.memory_space<vmem>>, vector<1x16x128xbf16>,
    %c109 = arith.constant 109 : index
    %c0_71 = arith.constant 0 : index
    %81 = vector.load %arg6[%c109, %c0_71] : memref<328x128xf32, #tpu.memory_space<vmem>>, vector<16x128xf32>
    %cst_72 = arith.constant -1.000000e+00 : f32
    %cst_73 = arith.constant 1.000000e+00 : f32
    %82 = vector.broadcast %cst_72 : f32 to vector<16x128xf32>
    %83 = arith.maximumf %82, %81 : vector<16x128xf32>
    %84 = vector.broadcast %cst_73 : f32 to vector<16x128xf32>
    %85 = arith.minimumf %84, %83 : vector<16x128xf32>
    %86 = arith.truncf %85 : vector<16x128xf32> to vector<16x128xbf16>
    %c0_74 = arith.constant 0 : index
    %c80_75 = arith.constant 80 : index
    %c0_76 = arith.constant 0 : index
    %87 = vector.load %arg4[%c0_74, %c80_75, %c0_76] : memref<1x256x128xbf16, #tpu.memory_space<vmem>>, vector<1x16x128xbf16>
    %88 = vector.shape_cast %87 : vector<1x16x128xbf16> to vector<16x128xbf16>
    %89 = vector.shape_cast %86 : vector<16x128xbf16> to vector<1x16x128xbf16>
    tpu.vector_store %arg4[%c0_74, %c80_75, %c0_76], %89 {strides = array<i32>} : memref<1x256x128xbf16, #tpu.memory_space<vmem>>, vector<1x16x128xbf16>,
    %c127 = arith.constant 127 : index
    %c0_77 = arith.constant 0 : index
    %90 = vector.load %arg6[%c127, %c0_77] : memref<328x128xf32, #tpu.memory_space<vmem>>, vector<16x128xf32>
    %cst_78 = arith.constant -1.000000e+00 : f32
    %cst_79 = arith.constant 1.000000e+00 : f32
    %91 = vector.broadcast %cst_78 : f32 to vector<16x128xf32>
    %92 = arith.maximumf %91, %90 : vector<16x128xf32>
    %93 = vector.broadcast %cst_79 : f32 to vector<16x128xf32>
    %94 = arith.minimumf %93, %92 : vector<16x128xf32>
    %95 = arith.truncf %94 : vector<16x128xf32> to vector<16x128xbf16>
    %c0_80 = arith.constant 0 : index
    %c96 = arith.constant 96 : index
    %c0_81 = arith.constant 0 : index
    %96 = vector.load %arg4[%c0_80, %c96, %c0_81] : memref<1x256x128xbf16, #tpu.memory_space<vmem>>, vector<1x16x128xbf16>
    %97 = vector.shape_cast %96 : vector<1x16x128xbf16> to vector<16x128xbf16>
    %98 = vector.shape_cast %95 : vector<16x128xbf16> to vector<1x16x128xbf16>
    tpu.vector_store %arg4[%c0_80, %c96, %c0_81], %98 {strides = array<i32>} : memref<1x256x128xbf16, #tpu.memory_space<vmem>>, vector<1x16x128xbf16>,
    %c145 = arith.constant 145 : index
    %c0_82 = arith.constant 0 : index
    %99 = vector.load %arg6[%c145, %c0_82] : memref<328x128xf32, #tpu.memory_space<vmem>>, vector<16x128xf32>
    %cst_83 = arith.constant -1.000000e+00 : f32
    %cst_84 = arith.constant 1.000000e+00 : f32
    %100 = vector.broadcast %cst_83 : f32 to vector<16x128xf32>
    %101 = arith.maximumf %100, %99 : vector<16x128xf32>
    %102 = vector.broadcast %cst_84 : f32 to vector<16x128xf32>
    %103 = arith.minimumf %102, %101 : vector<16x128xf32>
    %104 = arith.truncf %103 : vector<16x128xf32> to vector<16x128xbf16>
    %c0_85 = arith.constant 0 : index
    %c112 = arith.constant 112 : index
    %c0_86 = arith.constant 0 : index
    %105 = vector.load %arg4[%c0_85, %c112, %c0_86] : memref<1x256x128xbf16, #tpu.memory_space<vmem>>, vector<1x16x128xbf16>
    %106 = vector.shape_cast %105 : vector<1x16x128xbf16> to vector<16x128xbf16>
    %107 = vector.shape_cast %104 : vector<16x128xbf16> to vector<1x16x128xbf16>
    tpu.vector_store %arg4[%c0_85, %c112, %c0_86], %107 {strides = array<i32>} : memref<1x256x128xbf16, #tpu.memory_space<vmem>>, vector<1x16x128xbf16>,
    %c163 = arith.constant 163 : index
    %c0_87 = arith.constant 0 : index
    %108 = vector.load %arg6[%c163, %c0_87] : memref<328x128xf32, #tpu.memory_space<vmem>>, vector<16x128xf32>
    %cst_88 = arith.constant -1.000000e+00 : f32
    %cst_89 = arith.constant 1.000000e+00 : f32
    %109 = vector.broadcast %cst_88 : f32 to vector<16x128xf32>
    %110 = arith.maximumf %109, %108 : vector<16x128xf32>
    %111 = vector.broadcast %cst_89 : f32 to vector<16x128xf32>
    %112 = arith.minimumf %111, %110 : vector<16x128xf32>
    %113 = arith.truncf %112 : vector<16x128xf32> to vector<16x128xbf16>
    %c0_90 = arith.constant 0 : index
    %c128 = arith.constant 128 : index
    %c0_91 = arith.constant 0 : index
    %114 = vector.load %arg4[%c0_90, %c128, %c0_91] : memref<1x256x128xbf16, #tpu.memory_space<vmem>>, vector<1x16x128xbf16>
    %115 = vector.shape_cast %114 : vector<1x16x128xbf16> to vector<16x128xbf16>
    %116 = vector.shape_cast %113 : vector<16x128xbf16> to vector<1x16x128xbf16>
    tpu.vector_store %arg4[%c0_90, %c128, %c0_91], %116 {strides = array<i32>} : memref<1x256x128xbf16, #tpu.memory_space<vmem>>, vector<1x16x128xbf16>,
    %c181 = arith.constant 181 : index
    %c0_92 = arith.constant 0 : index
    %117 = vector.load %arg6[%c181, %c0_92] : memref<328x128xf32, #tpu.memory_space<vmem>>, vector<16x128xf32>
    %cst_93 = arith.constant -1.000000e+00 : f32
    %cst_94 = arith.constant 1.000000e+00 : f32
    %118 = vector.broadcast %cst_93 : f32 to vector<16x128xf32>
    %119 = arith.maximumf %118, %117 : vector<16x128xf32>
    %120 = vector.broadcast %cst_94 : f32 to vector<16x128xf32>
    %121 = arith.minimumf %120, %119 : vector<16x128xf32>
    %122 = arith.truncf %121 : vector<16x128xf32> to vector<16x128xbf16>
    %c0_95 = arith.constant 0 : index
    %c144 = arith.constant 144 : index
    %c0_96 = arith.constant 0 : index
    %123 = vector.load %arg4[%c0_95, %c144, %c0_96] : memref<1x256x128xbf16, #tpu.memory_space<vmem>>, vector<1x16x128xbf16>
    %124 = vector.shape_cast %123 : vector<1x16x128xbf16> to vector<16x128xbf16>
    %125 = vector.shape_cast %122 : vector<16x128xbf16> to vector<1x16x128xbf16>
    tpu.vector_store %arg4[%c0_95, %c144, %c0_96], %125 {strides = array<i32>} : memref<1x256x128xbf16, #tpu.memory_space<vmem>>, vector<1x16x128xbf16>,
    %c199 = arith.constant 199 : index
    %c0_97 = arith.constant 0 : index
    %126 = vector.load %arg6[%c199, %c0_97] : memref<328x128xf32, #tpu.memory_space<vmem>>, vector<16x128xf32>
    %cst_98 = arith.constant -1.000000e+00 : f32
    %cst_99 = arith.constant 1.000000e+00 : f32
    %127 = vector.broadcast %cst_98 : f32 to vector<16x128xf32>
    %128 = arith.maximumf %127, %126 : vector<16x128xf32>
    %129 = vector.broadcast %cst_99 : f32 to vector<16x128xf32>
    %130 = arith.minimumf %129, %128 : vector<16x128xf32>
    %131 = arith.truncf %130 : vector<16x128xf32> to vector<16x128xbf16>
    %c0_100 = arith.constant 0 : index
    %c160 = arith.constant 160 : index
    %c0_101 = arith.constant 0 : index
    %132 = vector.load %arg4[%c0_100, %c160, %c0_101] : memref<1x256x128xbf16, #tpu.memory_space<vmem>>, vector<1x16x128xbf16>
    %133 = vector.shape_cast %132 : vector<1x16x128xbf16> to vector<16x128xbf16>
    %134 = vector.shape_cast %131 : vector<16x128xbf16> to vector<1x16x128xbf16>
    tpu.vector_store %arg4[%c0_100, %c160, %c0_101], %134 {strides = array<i32>} : memref<1x256x128xbf16, #tpu.memory_space<vmem>>, vector<1x16x128xbf16>,
    %c217 = arith.constant 217 : index
    %c0_102 = arith.constant 0 : index
    %135 = vector.load %arg6[%c217, %c0_102] : memref<328x128xf32, #tpu.memory_space<vmem>>, vector<16x128xf32>
    %cst_103 = arith.constant -1.000000e+00 : f32
    %cst_104 = arith.constant 1.000000e+00 : f32
    %136 = vector.broadcast %cst_103 : f32 to vector<16x128xf32>
    %137 = arith.maximumf %136, %135 : vector<16x128xf32>
    %138 = vector.broadcast %cst_104 : f32 to vector<16x128xf32>
    %139 = arith.minimumf %138, %137 : vector<16x128xf32>
    %140 = arith.truncf %139 : vector<16x128xf32> to vector<16x128xbf16>
    %c0_105 = arith.constant 0 : index
    %c176 = arith.constant 176 : index
    %c0_106 = arith.constant 0 : index
    %141 = vector.load %arg4[%c0_105, %c176, %c0_106] : memref<1x256x128xbf16, #tpu.memory_space<vmem>>, vector<1x16x128xbf16>
    %142 = vector.shape_cast %141 : vector<1x16x128xbf16> to vector<16x128xbf16>
    %143 = vector.shape_cast %140 : vector<16x128xbf16> to vector<1x16x128xbf16>
    tpu.vector_store %arg4[%c0_105, %c176, %c0_106], %143 {strides = array<i32>} : memref<1x256x128xbf16, #tpu.memory_space<vmem>>, vector<1x16x128xbf16>,
    %c235 = arith.constant 235 : index
    %c0_107 = arith.constant 0 : index
    %144 = vector.load %arg6[%c235, %c0_107] : memref<328x128xf32, #tpu.memory_space<vmem>>, vector<16x128xf32>
    %cst_108 = arith.constant -1.000000e+00 : f32
    %cst_109 = arith.constant 1.000000e+00 : f32
    %145 = vector.broadcast %cst_108 : f32 to vector<16x128xf32>
    %146 = arith.maximumf %145, %144 : vector<16x128xf32>
    %147 = vector.broadcast %cst_109 : f32 to vector<16x128xf32>
    %148 = arith.minimumf %147, %146 : vector<16x128xf32>
    %149 = arith.truncf %148 : vector<16x128xf32> to vector<16x128xbf16>
    %c0_110 = arith.constant 0 : index
    %c192 = arith.constant 192 : index
    %c0_111 = arith.constant 0 : index
    %150 = vector.load %arg4[%c0_110, %c192, %c0_111] : memref<1x256x128xbf16, #tpu.memory_space<vmem>>, vector<1x16x128xbf16>
    %151 = vector.shape_cast %150 : vector<1x16x128xbf16> to vector<16x128xbf16>
    %152 = vector.shape_cast %149 : vector<16x128xbf16> to vector<1x16x128xbf16>
    tpu.vector_store %arg4[%c0_110, %c192, %c0_111], %152 {strides = array<i32>} : memref<1x256x128xbf16, #tpu.memory_space<vmem>>, vector<1x16x128xbf16>,
    %c253 = arith.constant 253 : index
    %c0_112 = arith.constant 0 : index
    %153 = vector.load %arg6[%c253, %c0_112] : memref<328x128xf32, #tpu.memory_space<vmem>>, vector<16x128xf32>
    %cst_113 = arith.constant -1.000000e+00 : f32
    %cst_114 = arith.constant 1.000000e+00 : f32
    %154 = vector.broadcast %cst_113 : f32 to vector<16x128xf32>
    %155 = arith.maximumf %154, %153 : vector<16x128xf32>
    %156 = vector.broadcast %cst_114 : f32 to vector<16x128xf32>
    %157 = arith.minimumf %156, %155 : vector<16x128xf32>
    %158 = arith.truncf %157 : vector<16x128xf32> to vector<16x128xbf16>
    %c0_115 = arith.constant 0 : index
    %c208 = arith.constant 208 : index
    %c0_116 = arith.constant 0 : index
    %159 = vector.load %arg4[%c0_115, %c208, %c0_116] : memref<1x256x128xbf16, #tpu.memory_space<vmem>>, vector<1x16x128xbf16>
    %160 = vector.shape_cast %159 : vector<1x16x128xbf16> to vector<16x128xbf16>
    %161 = vector.shape_cast %158 : vector<16x128xbf16> to vector<1x16x128xbf16>
    tpu.vector_store %arg4[%c0_115, %c208, %c0_116], %161 {strides = array<i32>} : memref<1x256x128xbf16, #tpu.memory_space<vmem>>, vector<1x16x128xbf16>,
    %c271 = arith.constant 271 : index
    %c0_117 = arith.constant 0 : index
    %162 = vector.load %arg6[%c271, %c0_117] : memref<328x128xf32, #tpu.memory_space<vmem>>, vector<16x128xf32>
    %cst_118 = arith.constant -1.000000e+00 : f32
    %cst_119 = arith.constant 1.000000e+00 : f32
    %163 = vector.broadcast %cst_118 : f32 to vector<16x128xf32>
    %164 = arith.maximumf %163, %162 : vector<16x128xf32>
    %165 = vector.broadcast %cst_119 : f32 to vector<16x128xf32>
    %166 = arith.minimumf %165, %164 : vector<16x128xf32>
    %167 = arith.truncf %166 : vector<16x128xf32> to vector<16x128xbf16>
    %c0_120 = arith.constant 0 : index
    %c224 = arith.constant 224 : index
    %c0_121 = arith.constant 0 : index
    %168 = vector.load %arg4[%c0_120, %c224, %c0_121] : memref<1x256x128xbf16, #tpu.memory_space<vmem>>, vector<1x16x128xbf16>
    %169 = vector.shape_cast %168 : vector<1x16x128xbf16> to vector<16x128xbf16>
    %170 = vector.shape_cast %167 : vector<16x128xbf16> to vector<1x16x128xbf16>
    tpu.vector_store %arg4[%c0_120, %c224, %c0_121], %170 {strides = array<i32>} : memref<1x256x128xbf16, #tpu.memory_space<vmem>>, vector<1x16x128xbf16>,
    %c289 = arith.constant 289 : index
    %c0_122 = arith.constant 0 : index
    %171 = vector.load %arg6[%c289, %c0_122] : memref<328x128xf32, #tpu.memory_space<vmem>>, vector<16x128xf32>
    %cst_123 = arith.constant -1.000000e+00 : f32
    %cst_124 = arith.constant 1.000000e+00 : f32
    %172 = vector.broadcast %cst_123 : f32 to vector<16x128xf32>
    %173 = arith.maximumf %172, %171 : vector<16x128xf32>
    %174 = vector.broadcast %cst_124 : f32 to vector<16x128xf32>
    %175 = arith.minimumf %174, %173 : vector<16x128xf32>
    %176 = arith.truncf %175 : vector<16x128xf32> to vector<16x128xbf16>
    %c0_125 = arith.constant 0 : index
    %c240 = arith.constant 240 : index
    %c0_126 = arith.constant 0 : index
    %177 = vector.load %arg4[%c0_125, %c240, %c0_126] : memref<1x256x128xbf16, #tpu.memory_space<vmem>>, vector<1x16x128xbf16>
    %178 = vector.shape_cast %177 : vector<1x16x128xbf16> to vector<16x128xbf16>
    %179 = vector.shape_cast %176 : vector<16x128xbf16> to vector<1x16x128xbf16>
    tpu.vector_store %arg4[%c0_125, %c240, %c0_126], %179 {strides = array<i32>} : memref<1x256x128xbf16, #tpu.memory_space<vmem>>, vector<1x16x128xbf16>,
    return
  }
  func.func @transform_0(%arg0: i32) -> (i32, i32, i32) {
    %c0_i32 = arith.constant 0 : i32
    %c0_i32_0 = arith.constant 0 : i32
    %c0_i32_1 = arith.constant 0 : i32
    return %arg0, %c0_i32, %c0_i32_0 : i32, i32, i32
  }
  func.func @transform_1(%arg0: i32) -> (i32, i32) {
    %c0_i32 = arith.constant 0 : i32
    %c0_i32_0 = arith.constant 0 : i32
    %c0_i32_1 = arith.constant 0 : i32
    return %c0_i32, %c0_i32_0 : i32, i32
  }
  func.func @transform_2(%arg0: i32) -> (i32, i32) {
    %c0_i32 = arith.constant 0 : i32
    %c0_i32_0 = arith.constant 0 : i32
    %c0_i32_1 = arith.constant 0 : i32
    return %c0_i32, %c0_i32_0 : i32, i32
  }
  func.func @transform_3(%arg0: i32) -> (i32, i32, i32) {
    %c0_i32 = arith.constant 0 : i32
    %c0_i32_0 = arith.constant 0 : i32
    %c0_i32_1 = arith.constant 0 : i32
    return %arg0, %c0_i32, %c0_i32_0 : i32, i32, i32
  }
}

</mosaic_0001>

<bundles_post_ra>
// kernel: basic_block_forward.1
= control target key start
LH: loop header
LB: loop body
LE: loop exit
PB: predicated region body
PF: predicated region fallthrough
CT: control target
= control target key end

     0   :  { %s6517_s12 = smov 0   ;;  %s9615_s0 = inlined_call_operand.vmem [shape: bf16[2,372,8], index: 0, kind: input, shape index: {}]   ;;  %s9616_s1 = inlined_call_operand.vmem [shape: bf16[90,128], index: 1, kind: input, shape index: {}]   ;;  %s9617_s2 = inlined_call_operand.vmem [shape: bf16[324,10], index: 2, kind: input, shape index: {}]   ;;  %s9618_s3 = inlined_call_operand.vmem [shape: bf16[2,256,128], index: 3, kind: output, shape index: {}]  }
   0x1 LB: > { %s6039_s13 = sadd.s32 4294967295, %s6483_s12   ;;  %p6043_p0 = scmp.ge.s32.totalorder %s6483_s12, 1  ;;  %s6483_s12 = sphi %s6517_s12, %s13_s12  }
   0x2   : > { %p137_p1 = scmp.lt.s32.totalorder %s6483_s12, 3 }
   0x4   : > { %p138_p2 = pnand %p6043_p0, %p137_p1 }
   0x5   : > { %p161_p3 = scmp.lt.s32.totalorder (!%p138_p2), %s6039_s13, 1  ;;  %vm799_vm0 = vcmask (!%p138_p2), 1040384   ;;  %vm800_vm1 = vcmask (!%p138_p2), 1044484   ;;  %s6485_s18 = smov (!%p138_p2), 8   ;;  %vm1134_vm3 = vsmask.f32 (!%p138_p2), 256 }
   0x6   : > { %141 = sbr.rel (%p138_p2) target bundleno = 1177 (0x499), region = 32  ;;  %vm6528_vm2 = vmor (!%p138_p2), %vm799_vm0, %vm800_vm1  ;;  %vm1135_vm4 = vsmask.f32 (!%p138_p2), 4368  ;;  %vm214_vm6 = vsmask.f32 (!%p138_p2), 1280  ;;  %vm672_vm8 = vcmask (!%p138_p2), 60416  }
   0x7   : > { %vm6749_vm5 = vmor (!%p138_p2), %vm1134_vm3, %vm1135_vm4  ;;  %vm215_vm7 = vsmask.f32 (!%p138_p2), 5392  ;;  %s6486_s19 = smov (!%p138_p2), 16   ;;  %vm1049_vm10 = vcmask (!%p138_p2), 126016   ;;  %s6487_s20 = smov (!%p138_p2), 24   ;;  %vm713_vm11 = vcmask (!%p138_p2), 58368  }
   0x8   : > { %vm6881_vm9 = vmor (!%p138_p2), %vm214_vm6, %vm215_vm7  ;;  %vm1090_vm12 = vcmask (!%p138_p2), 123968   ;;  %vm1633_vm13 = vcmask (!%p138_p2), 191616   ;;  %s6488_s21 = smov (!%p138_p2), 32   ;;  %vm1674_vm14 = vcmask (!%p138_p2), 189568   ;;  %vm2214_vm15 = vcmask (!%p138_p2), 257216   ;;  %s6489_s22 = smov (!%p138_p2), 40  }
   0x9   : > { %vm2546_vm0 = vsmask.f32 (!%p138_p2), 3328  ;;  %vm2547_vm1 = vsmask.f32 (!%p138_p2), 7440  ;;  %vm2255_vm3 = vcmask (!%p138_p2), 255168   ;;  %vm2462_vm4 = vcmask (!%p138_p2), 322816  }
   0xa   : > { %s6490_s23 = smov (!%p138_p2), 48   ;;  %vm3823_vm6 = vcmask (!%p138_p2), 1046532   ;;  %vm2503_vm7 = vcmask (!%p138_p2), 320768   ;;  %s6492_s5 = smov (!%p138_p2), 56  }
   0xb   : > { %s6493_s8 = smov (!%p138_p2), 64   ;;  %s6494_s11 = smov (!%p138_p2), 72  }
   0xd   : > { %s9632_s13 = smov (!%p161_p3, %s6039_s13), 1 }
   0xe   : > { %s6428_s14 = smul.u32 188, %s9632_s13 }
  0x10   : > { %s6535_s17 = scalar_lea.vmem %s9615_s0, %s6428_s14 }
  0x11   : > { %v715_v1 = vld [vmem:[%s6535_s17] sm:$0x8]  ;;  %v716_v2 = vld [vmem:[%s6535_s17 + $0x4] sm:$0xf]  ;;  %v717_v3 = vld [vmem:[%s6535_s17 + $0x8] sm:$0xf] }
  0x12   : > { %v6047_v4 = vrot.slane %v715_v1, 11  ;;  %v804_v5 = vrot.slane %v716_v2, 7  ;;  %v718_v6 = vld [vmem:[%s6535_s17 + $0xc] sm:$0xf]  ;;  %v807_v7 = vrot.slane %v717_v3, 7 }
  0x13   : > { %v810_v8 = vrot.slane %v718_v6, 7  ;;  %v719_v9 = vld [vmem:[%s6535_s17 + $0x10] sm:$0xf]  ;;  %v720_v10 = vld [vmem:[%s6535_s17 + $0x14] sm:$0xf] }
  0x14   : > { %v805_v11 = vsel %vm6528_vm2, %v6047_v4, %v804_v5  ;;  %v809_v12 = vrot.slane %v807_v7, 4  ;;  %v806_v13 = vrot.slane %v804_v5, 4  ;;  %v813_v14 = vrot.slane %v719_v9, 7  ;;  %v721_v15 = vld [vmem:[%s6535_s17 + $0x18] sm:$0xf] }
  0x15   : > { %926 = vrot.lane.b32.xlu0 %v805_v11, %s6485_s18  ;;  %v812_v16 = vrot.slane %v810_v8, 4  ;;  %v816_v17 = vrot.slane %v720_v10, 7  ;;  %v819_v18 = vrot.slane %v721_v15, 7  ;;  %v722_v19 = vld [vmem:[%s6535_s17 + $0x1c] sm:$0xf] }
  0x16   : > { %v811_v20 = vsel %vm6528_vm2, %v809_v12, %v810_v8  ;;  %v808_v21 = vsel %vm6528_vm2, %v806_v13, %v807_v7  ;;  %v815_v22 = vrot.slane %v813_v14, 4  ;;  %v822_v23 = vrot.slane %v722_v19, 7  ;;  %v723_v24 = vld [vmem:[%s6535_s17 + $0x20] sm:$0xf]  ;;  %v724_v25 = vld [vmem:[%s6535_s17 + $0x24] sm:$0xf] }
  0x17   : > { %930 = vrot.lane.b32.xlu1 %v811_v20, %s6485_s18  ;;  %v818_v26 = vrot.slane %v816_v17, 4  ;;  %v821_v27 = vrot.slane %v819_v18, 4  ;;  %v825_v28 = vrot.slane %v723_v24, 7  ;;  %v725_v29 = vld [vmem:[%s6535_s17 + $0x28] sm:$0xf]  ;;  %v814_v30 = vsel %vm6528_vm2, %v812_v16, %v813_v14 }
  0x18   : > { %v824_v31 = vrot.slane %v822_v23, 4  ;;  %v828_v32 = vrot.slane %v724_v25, 7  ;;  %v831_v33 = vrot.slane %v725_v29, 7  ;;  %v726_v34 = vld [vmem:[%s6535_s17 + $0x2c] sm:$0xf]  ;;  %v817_v35 = vsel %vm6528_vm2, %v815_v22, %v816_v17 }
  0x19   : > { %928 = vrot.lane.b32.xlu0 %v808_v21, %s6485_s18  ;;  %v827_v36 = vrot.slane %v825_v28, 4  ;;  %v834_v37 = vrot.slane %v726_v34, 7  ;;  %v727_v38 = vld [vmem:[%s6535_s17 + $0x30] sm:$0xf]  ;;  %v728_v39 = vld [vmem:[%s6535_s17 + $0x34] sm:$0xf]  ;;  %v820_v40 = vsel %vm6528_vm2, %v818_v26, %v819_v18  ;;  %v823_v45 = vsel %vm6528_vm2, %v821_v27, %v822_v23 }
  0x1a   : > { %v830_v41 = vrot.slane %v828_v32, 4  ;;  %v833_v42 = vrot.slane %v831_v33, 4  ;;  %v837_v43 = vrot.slane %v727_v38, 7  ;;  %v729_v44 = vld [vmem:[%s6535_s17 + $0x38] sm:$0xf]  ;;  %v840_v47 = vrot.slane %v728_v39, 7 }
  0x1b   : > { %932 = vrot.lane.b32.xlu1 %v814_v30, %s6485_s18  ;;  %v836_v46 = vrot.slane %v834_v37, 4  ;;  %v843_v48 = vrot.slane %v729_v44, 7  ;;  %v730_v49 = vld [vmem:[%s6535_s17 + $0x3c] sm:$0xf]  ;;  %v826_v50 = vsel %vm6528_vm2, %v824_v31, %v825_v28  ;;  %v829_v51 = vsel %vm6528_vm2, %v827_v36, %v828_v32  ;;  %v731_v54 = vld [vmem:[%s6535_s17 + $0x40] sm:$0xf] }
  0x1c   : > { %v839_v52 = vrot.slane %v837_v43, 4  ;;  %v846_v53 = vrot.slane %v730_v49, 7  ;;  %v732_v55 = vld [vmem:[%s6535_s17 + $0x44] sm:$0xf]  ;;  %v832_v56 = vsel %vm6528_vm2, %v830_v41, %v831_v33  ;;  %v842_v57 = vrot.slane %v840_v47, 4 }
  0x1d   : > { %934 = vrot.lane.b32.xlu0 %v817_v35, %s6485_s18  ;;  %v845_v58 = vrot.slane %v843_v48, 4  ;;  %v849_v59 = vrot.slane %v731_v54, 7  ;;  %v733_v60 = vld [vmem:[%s6535_s17 + $0x48] sm:$0xf]  ;;  %v6583_v61 = vsel %vm6528_vm2, %v833_v42, %v834_v37  ;;  %v852_v63 = vrot.slane %v732_v55, 7 }
  0x1e   : > { %v848_v62 = vrot.slane %v846_v53, 4  ;;  %v855_v1 = vrot.slane %v733_v60, 7  ;;  %v734_v2 = vld [vmem:[%s6535_s17 + $0x4c] sm:$0xf]  ;;  %v6589_v3 = vsel %vm6528_vm2, %v836_v46, %v837_v43  ;;  %v6593_v4 = vsel %vm6528_vm2, %v839_v52, %v840_v47  ;;  %v735_v7 = vld [vmem:[%s6535_s17 + $0x50] sm:$0xf] }
  0x1f   : > { %936 = vrot.lane.b32.xlu1 %v820_v40, %s6485_s18  ;;  %v851_v5 = vrot.slane %v849_v59, 4  ;;  %v858_v6 = vrot.slane %v734_v2, 7  ;;  %v736_v8 = vld [vmem:[%s6535_s17 + $0x54] sm:$0xf]  ;;  %v6599_v9 = vsel %vm6528_vm2, %v842_v57, %v843_v48  ;;  %v854_v10 = vrot.slane %v852_v63, 4 }
  0x20   : > { %v857_v11 = vrot.slane %v855_v1, 4  ;;  %v861_v12 = vrot.slane %v735_v7, 7  ;;  %v737_v13 = vld [vmem:[%s6535_s17 + $0x58] sm:$0xf]  ;;  %v6605_v14 = vsel %vm6528_vm2, %v845_v58, %v846_v53  ;;  %v864_v16 = vrot.slane %v736_v8, 7 }
  0x21   : > { %938 = vrot.lane.b32.xlu0 %v823_v45, %s6485_s18  ;;  %v860_v15 = vrot.slane %v858_v6, 4  ;;  %v867_v17 = vrot.slane %v737_v13, 7  ;;  %v738_v18 = vld [vmem:[%s6535_s17 + $0x5c] sm:$0xf]  ;;  %v6610_v19 = vsel %vm6528_vm2, %v848_v62, %v849_v59  ;;  %v6614_v20 = vsel %vm6528_vm2, %v851_v5, %v852_v63  ;;  %v739_v23 = vld [vmem:[%s6535_s17 + $0x60] sm:$0xf] }
  0x22   : > { %v863_v21 = vrot.slane %v861_v12, 4  ;;  %v870_v22 = vrot.slane %v738_v18, 7  ;;  %v740_v24 = vld [vmem:[%s6535_s17 + $0x64] sm:$0xf]  ;;  %v6621_v25 = vsel %vm6528_vm2, %v854_v10, %v855_v1  ;;  %v866_v26 = vrot.slane %v864_v16, 4 }
  0x23   : > { %940 = vrot.lane.b32.xlu1 %v826_v50, %s6485_s18  ;;  %v869_v27 = vrot.slane %v867_v17, 4  ;;  %v873_v28 = vrot.slane %v739_v23, 7  ;;  %v741_v29 = vld [vmem:[%s6535_s17 + $0x68] sm:$0xf]  ;;  %v6626_v30 = vsel %vm6528_vm2, %v857_v11, %v858_v6  ;;  %v876_v32 = vrot.slane %v740_v24, 7 }
  0x24   : > { %v872_v31 = vrot.slane %v870_v22, 4  ;;  %v879_v33 = vrot.slane %v741_v29, 7  ;;  %v742_v34 = vld [vmem:[%s6535_s17 + $0x6c] sm:$0xf]  ;;  %v6632_v35 = vsel %vm6528_vm2, %v860_v15, %v861_v12  ;;  %v6636_v36 = vsel %vm6528_vm2, %v863_v21, %v864_v16  ;;  %v743_v39 = vld [vmem:[%s6535_s17 + $0x70] sm:$0xf] }
  0x25   : > { %942 = vrot.lane.b32.xlu0 %v829_v51, %s6485_s18  ;;  %v875_v37 = vrot.slane %v873_v28, 4  ;;  %v882_v38 = vrot.slane %v742_v34, 7  ;;  %v744_v40 = vld [vmem:[%s6535_s17 + $0x74] sm:$0xf]  ;;  %v6642_v41 = vsel %vm6528_vm2, %v866_v26, %v867_v17  ;;  %v878_v42 = vrot.slane %v876_v32, 4 }
  0x26   : > { %v881_v43 = vrot.slane %v879_v33, 4  ;;  %v885_v44 = vrot.slane %v743_v39, 7  ;;  %v745_v45 = vld [vmem:[%s6535_s17 + $0x78] sm:$0xf]  ;;  %v6648_v46 = vsel %vm6528_vm2, %v869_v27, %v870_v22  ;;  %v888_v48 = vrot.slane %v744_v40, 7 }
  0x27   : > { %944 = vrot.lane.b32.xlu1 %v832_v56, %s6485_s18  ;;  %v884_v47 = vrot.slane %v882_v38, 4  ;;  %v891_v49 = vrot.slane %v745_v45, 7  ;;  %v746_v50 = vld [vmem:[%s6535_s17 + $0x7c] sm:$0xf]  ;;  %v6653_v51 = vsel %vm6528_vm2, %v872_v31, %v873_v28  ;;  %v6657_v52 = vsel %vm6528_vm2, %v875_v37, %v876_v32  ;;  %v747_v55 = vld [vmem:[%s6535_s17 + $0x80] sm:$0xf] }
  0x28   : > { %v887_v53 = vrot.slane %v885_v44, 4  ;;  %v894_v54 = vrot.slane %v746_v50, 7  ;;  %v748_v56 = vld [vmem:[%s6535_s17 + $0x84] sm:$0xf]  ;;  %v6665_v57 = vsel %vm6528_vm2, %v878_v42, %v879_v33  ;;  %v890_v58 = vrot.slane %v888_v48, 4 }
  0x29   : > { %946 = vrot.lane.b32.xlu0 %v6583_v61, %s6485_s18  ;;  %v893_v59 = vrot.slane %v891_v49, 4  ;;  %v897_v60 = vrot.slane %v747_v55, 7  ;;  %v749_v62 = vld [vmem:[%s6535_s17 + $0x88] sm:$0xf]  ;;  %v6670_v63 = vsel %vm6528_vm2, %v881_v43, %v882_v38  ;;  %v900_v2 = vrot.slane %v748_v56, 7 }
  0x2a   : > { %v896_v1 = vrot.slane %v894_v54, 4  ;;  %v903_v5 = vrot.slane %v749_v62, 7  ;;  %v750_v6 = vld [vmem:[%s6535_s17 + $0x8c] sm:$0xf]  ;;  %v6677_v61 = vsel %vm6528_vm2, %v884_v47, %v885_v44  ;;  %v6681_v7 = vsel %vm6528_vm2, %v887_v53, %v888_v48  ;;  %v751_v11 = vld [vmem:[%s6535_s17 + $0x90] sm:$0xf] }
  0x2b   : > { %948 = vrot.lane.b32.xlu1 %v6589_v3, %s6485_s18  ;;  %v899_v8 = vrot.slane %v897_v60, 4  ;;  %v906_v10 = vrot.slane %v750_v6, 7  ;;  %v752_v12 = vld [vmem:[%s6535_s17 + $0x94] sm:$0xf]  ;;  %v6687_v13 = vsel %vm6528_vm2, %v890_v58, %v891_v49  ;;  %v902_v3 = vrot.slane %v900_v2, 4 }
  0x2c   : > { %v905_v15 = vrot.slane %v903_v5, 4  ;;  %v909_v16 = vrot.slane %v751_v11, 7  ;;  %v753_v17 = vld [vmem:[%s6535_s17 + $0x98] sm:$0xf]  ;;  %v6694_v18 = vsel %vm6528_vm2, %v893_v59, %v894_v54  ;;  %v912_v22 = vrot.slane %v752_v12, 7 }
  0x2d   : > { %950 = vrot.lane.b32.xlu0 %v6593_v4, %s6485_s18  ;;  %v908_v21 = vrot.slane %v906_v10, 4  ;;  %v915_v23 = vrot.slane %v753_v17, 7  ;;  %v754_v24 = vld [vmem:[%s6535_s17 + $0x9c] sm:$0xf]  ;;  %v6699_v26 = vsel %vm6528_vm2, %v896_v1, %v897_v60  ;;  %v6703_v27 = vsel %vm6528_vm2, %v899_v8, %v900_v2  ;;  %v755_v29 = vld [vmem:[%s6535_s17 + $0xa0] sm:$0xf] }
  0x2e   : > { %v911_v28 = vrot.slane %v909_v16, 4  ;;  %v918_v4 = vrot.slane %v754_v24, 7  ;;  %v756_v31 = vld [vmem:[%s6535_s17 + $0xa4] sm:$0x1]  ;;  %v6711_v32 = vsel %vm6528_vm2, %v902_v3, %v903_v5  ;;  %v914_v33 = vrot.slane %v912_v22, 4 }
  0x2f   : > { %952 = vrot.lane.b32.xlu1 %v6599_v9, %s6485_s18  ;;  %v917_v34 = vrot.slane %v915_v23, 4  ;;  %v921_v37 = vrot.slane %v755_v29, 7  ;;  %v1092_v38 = vld [vmem:[%s6535_s17] sm:$0x8]  ;;  %v6716_v39 = vsel %vm6528_vm2, %v905_v15, %v906_v10  ;;  %v6720_v40 = vsel %vm6528_vm2, %v908_v21, %v909_v16  ;;  %v1093_v42 = vld [vmem:[%s6535_s17 + $0x4] sm:$0xf] }
  0x30   : > { %v920_v9 = vrot.slane %v918_v4, 4  ;;  %v1138_v43 = vshrl.u32 %v1092_v38, 16  ;;  %v6727_v44 = vsel %vm6528_vm2, %v911_v28, %v912_v22  ;;  %v6731_v45 = vsel %vm6528_vm2, %v914_v33, %v915_v23  ;;  %v1094_v49 = vld [vmem:[%s6535_s17 + $0x8] sm:$0xf]  ;;  %v1095_v50 = vld [vmem:[%s6535_s17 + $0xc] sm:$0xf] }
  0x31   : > { %954 = vrot.lane.b32.xlu0 %v6605_v14, %s6485_s18  ;;  %v924_v47 = vrot.slane %v756_v31, 7  ;;  %v1143_v48 = vshrl.u32 %v1093_v42, 16  ;;  %v6737_v53 = vsel %vm6528_vm2, %v917_v34, %v918_v4  ;;  %v923_v54 = vrot.slane %v921_v37, 4  ;;  %v1096_v56 = vld [vmem:[%s6535_s17 + $0x10] sm:$0xf] }
  0x32   : > { %v1146_v55 = vshll.u32 %v1093_v42, 16  ;;  %v1152_v14 = vshrl.u32 %v1094_v49, 16  ;;  %v6742_v58 = vrot.slane %v1138_v43, 11  ;;  %v1155_v60 = vshll.u32 %v1094_v49, 16  ;;  %v1097_v1 = vld [vmem:[%s6535_s17 + $0x14] sm:$0xf] }
  0x33   : > { %956 = vrot.lane.b32.xlu1 %v6610_v19, %s6485_s18  ;;  %v1145_v59 = vrot.slane %v1143_v48, 7  ;;  %v1161_v62 = vshrl.u32 %v1095_v50, 16  ;;  %v1164_v5 = vshll.u32 %v1095_v50, 16  ;;  %v1170_v6 = vshrl.u32 %v1096_v56, 16  ;;  %v1098_v15 = vld [vmem:[%s6535_s17 + $0x18] sm:$0xf] }
  0x34   : > { %v1154_v2 = vrot.slane %v1152_v14, 7  ;;  %v1173_v8 = vshll.u32 %v1096_v56, 16  ;;  %v1179_v3 = vshrl.u32 %v1097_v1, 16  ;;  %v1182_v22 = vshll.u32 %v1097_v1, 16  ;;  %v1099_v4 = vld [vmem:[%s6535_s17 + $0x1c] sm:$0xf] }
  0x35   : > { %958 = vrot.lane.b32.xlu0 %v6614_v20, %s6485_s18  ;;  %v6753_v19 = vor.u32 %v1146_v55, %v1145_v59  ;;  %v1150_v11 = vrot.slane %v1145_v59, 4  ;;  %v1163_v12 = vrot.slane %v1161_v62, 7  ;;  %v1172_v21 = vrot.slane %v1170_v6, 7  ;;  %v1100_v34 = vld [vmem:[%s6535_s17 + $0x20] sm:$0xf] }
  0x36   : > { %v1157_v16 = vor.u32 %v1155_v60, %v1154_v2  ;;  %v1159_v17 = vrot.slane %v1154_v2, 4  ;;  %v6760_v20 = vsel %vm6528_vm2, %v920_v9, %v921_v37  ;;  %v6764_v23 = vsel %vm6528_vm2, %v923_v54, %v924_v47  ;;  %v1101_v38 = vld [vmem:[%s6535_s17 + $0x24] sm:$0xf]  ;;  %v1102_v50 = vld [vmem:[%s6535_s17 + $0x28] sm:$0xf]  ;;  %vm7760_vm2 = vmor %vm2546_vm0, %vm2547_vm1 }
  0x37   : > { %960 = vrot.lane.b32.xlu1 %v6621_v25, %s6485_s18  ;;  %v1166_v24 = vor.u32 %v1164_v5, %v1163_v12  ;;  %v1181_v28 = vrot.slane %v1179_v3, 7  ;;  %v1149_v29 = vsel %vm6749_vm5, %v6742_v58, %v6753_v19  ;;  %v1168_v31 = vrot.slane %v1163_v12, 4  ;;  %v1103_v56 = vld [vmem:[%s6535_s17 + $0x2c] sm:$0xf] }
  0x38   : > { %v1175_v33 = vor.u32 %v1173_v8, %v1172_v21  ;;  %v1188_v25 = vshrl.u32 %v1098_v15, 16  ;;  %v6777_v0 = vsel %vm6749_vm5, %v1150_v11, %v1157_v16  ;;  %v1177_v9 = vrot.slane %v1172_v21, 4 }
  0x39   : > { %962 = vrot.lane.b32.xlu0 %v6626_v30, %s6485_s18  ;;  %v6781_v37 = vsel %vm6749_vm5, %v1159_v17, %v1166_v24  ;;  %v1191_v42 = vshll.u32 %v1098_v15, 16  ;;  %v1184_v43 = vor.u32 %v1182_v22, %v1181_v28  ;;  %v1197_v48 = vshrl.u32 %v1099_v4, 16  ;;  %v1104_v15 = vld [vmem:[%s6535_s17 + $0x30] sm:$0xf]  ;;  %v1105_v22 = vld [vmem:[%s6535_s17 + $0x34] sm:$0xf] }
  0x3a   : > { %v1190_v47 = vrot.slane %v1188_v25, 7  ;;  %v1200_v49 = vshll.u32 %v1099_v4, 16  ;;  %v1186_v54 = vrot.slane %v1181_v28, 4  ;;  %v1206_v30 = vshrl.u32 %v1100_v34, 16 }
  0x3b   : > { %964 = vrot.lane.b32.xlu1 %v6632_v35, %s6485_s18  ;;  %v1209_v55 = vshll.u32 %v1100_v34, 16  ;;  %v1215_v14 = vshrl.u32 %v1101_v38, 16  ;;  %v6789_v59 = vsel %vm6749_vm5, %v1168_v31, %v1175_v33  ;;  %v1199_v62 = vrot.slane %v1197_v48, 7  ;;  %v1106_v33 = vld [vmem:[%s6535_s17 + $0x38] sm:$0xf] }
  0x3c   : > { %v1193_v60 = vor.u32 %v1191_v42, %v1190_v47  ;;  %v1218_v1 = vshll.u32 %v1101_v38, 16  ;;  %v1195_v2 = vrot.slane %v1190_v47, 4  ;;  %v1208_v5 = vrot.slane %v1206_v30, 7  ;;  %v1108_v30 = vld [vmem:[%s6535_s17 + $0x40] sm:$0xf] }
  0x3d   : > { %966 = vrot.lane.b32.xlu0 %v6636_v36, %s6485_s18  ;;  %v1217_v35 = vrot.slane %v1215_v14, 7  ;;  %v1224_v6 = vshrl.u32 %v1102_v50, 16  ;;  %v1202_v8 = vor.u32 %v1200_v49, %v1199_v62  ;;  %v1204_v11 = vrot.slane %v1199_v62, 4 }
  0x3e   : > { %v1227_v12 = vshll.u32 %v1102_v50, 16  ;;  %v1233_v3 = vshrl.u32 %v1103_v56, 16  ;;  %v6798_v16 = vsel %vm6749_vm5, %v1177_v9, %v1184_v43  ;;  %v6802_v36 = vsel %vm6749_vm5, %v1186_v54, %v1193_v60  ;;  %v1107_v9 = vld [vmem:[%s6535_s17 + $0x3c] sm:$0xf] }
  0x3f   : > { %968 = vrot.lane.b32.xlu1 %v6642_v41, %s6485_s18  ;;  %v1211_v17 = vor.u32 %v1209_v55, %v1208_v5  ;;  %v1213_v21 = vrot.slane %v1208_v5, 4  ;;  %v1220_v24 = vor.u32 %v1218_v1, %v1217_v35  ;;  %v1226_v28 = vrot.slane %v1224_v6, 7 }
  0x40   : > { %v1235_v4 = vrot.slane %v1233_v3, 7  ;;  %v1236_v31 = vshll.u32 %v1103_v56, 16  ;;  %v6810_v41 = vsel %vm6749_vm5, %v1195_v2, %v1202_v8  ;;  %v1222_v25 = vrot.slane %v1217_v35, 4 }
  0x41   : > { %970 = vrot.lane.b32.xlu0 %v6648_v46, %s6485_s18  ;;  %v1242_v34 = vshrl.u32 %v1104_v15, 16  ;;  %v1245_v38 = vshll.u32 %v1104_v15, 16  ;;  %v6815_v42 = vsel %vm6749_vm5, %v1204_v11, %v1211_v17  ;;  %v1229_v43 = vor.u32 %v1227_v12, %v1226_v28  ;;  %v1109_v11 = vld [vmem:[%s6535_s17 + $0x44] sm:$0xf]  ;;  %v172_v17 = vld [vmem:[%s6535_s17] sm:$0xc] }
  0x42   : > { %v1231_v47 = vrot.slane %v1226_v28, 4  ;;  %v1238_v48 = vor.u32 %v1236_v31, %v1235_v4  ;;  %v1251_v46 = vshrl.u32 %v1105_v22, 16  ;;  %v1254_v50 = vshll.u32 %v1105_v22, 16 }
  0x43   : > { %972 = vrot.lane.b32.xlu1 %v6653_v51, %s6485_s18  ;;  %v1244_v49 = vrot.slane %v1242_v34, 7  ;;  %v1260_v54 = vshrl.u32 %v1106_v33, 16  ;;  %v6822_v55 = vsel %vm6749_vm5, %v1213_v21, %v1220_v24  ;;  %v1240_v14 = vrot.slane %v1235_v4, 4  ;;  %v173_v4 = vld [vmem:[%s6535_s17 + $0x4] sm:$0xf] }
  0x44   : > { %v1263_v56 = vshll.u32 %v1106_v33, 16  ;;  %v1269_v60 = vshrl.u32 %v1107_v9, 16  ;;  %v1253_v51 = vrot.slane %v1251_v46, 7  ;;  %v6828_v5 = vsel %vm6749_vm5, %v1222_v25, %v1229_v43  ;;  %v174_v34 = vld [vmem:[%s6535_s17 + $0x8] sm:$0xf] }
  0x45   : > { %974 = vrot.lane.b32.xlu0 %v6657_v52, %s6485_s18  ;;  %v1247_v62 = vor.u32 %v1245_v38, %v1244_v49  ;;  %v1249_v1 = vrot.slane %v1244_v49, 4  ;;  %v1262_v2 = vrot.slane %v1260_v54, 7  ;;  %v1272_v6 = vshll.u32 %v1107_v9, 16 }
  0x46   : > { %v6830_v35 = vrot.slane %v1269_v60, 7  ;;  %v1278_v8 = vshrl.u32 %v1108_v30, 16  ;;  %v6837_v52 = vsel %vm6749_vm5, %v1231_v47, %v1238_v48  ;;  %v1256_v12 = vor.u32 %v1254_v50, %v1253_v51  ;;  %v175_v50 = vld [vmem:[%s6535_s17 + $0xc] sm:$0xf] }
  0x47   : > { %976 = vrot.lane.b32.xlu1 %v6665_v57, %s6485_s18  ;;  %v1258_v3 = vrot.slane %v1253_v51, 4  ;;  %v1265_v15 = vor.u32 %v1263_v56, %v1262_v2  ;;  %v1267_v21 = vrot.slane %v1262_v2, 4  ;;  %v1281_v28 = vshll.u32 %v1108_v30, 16  ;;  %v1110_v51 = vld [vmem:[%s6535_s17 + $0x48] sm:$0xf] }
  0x48   : > { %v1274_v22 = vor.u32 %v1272_v6, %v6830_v35  ;;  %v6841_v24 = vrot.slane %v1278_v8, 7  ;;  %v6848_v57 = vsel %vm6749_vm5, %v1240_v14, %v1247_v62  ;;  %v6852_v31 = vsel %vm6749_vm5, %v1249_v1, %v1256_v12 }
  0x49   : > { %978 = vrot.lane.b32.xlu0 %v6670_v63, %s6485_s18  ;;  %v1276_v33 = vrot.slane %v6830_v35, 4  ;;  %v1287_v25 = vshrl.u32 %v1109_v11, 16  ;;  %v6858_v38 = vsel %vm6749_vm5, %v1258_v3, %v1265_v15  ;;  %v1290_v9 = vshll.u32 %v1109_v11, 16  ;;  %v1111_v11 = vld [vmem:[%s6535_s17 + $0x4c] sm:$0xf] }
  0x4a   : > { %v6862_v63 = vsel %vm6749_vm5, %v1267_v21, %v1274_v22  ;;  %v218_v43 = vshrl.u32 %v172_v17, 16  ;;  %v221_v48 = vshll.u32 %v172_v17, 16  ;;  %v227_v49 = vshrl.u32 %v173_v4, 16 }
  0x4b   : > { %980 = vrot.lane.b32.xlu1 %v6677_v61, %s6485_s18  ;;  %v6866_v47 = vrot.slane %v1287_v25, 7  ;;  %v230_v46 = vshll.u32 %v173_v4, 16  ;;  %v1283_v54 = vor.u32 %v1281_v28, %v6841_v24  ;;  %v237_v14 = vshrl.u32 %v174_v34, 16  ;;  %v176_v4 = vld [vmem:[%s6535_s17 + $0x10] sm:$0xf] }
  0x4c   : > { %v220_v30 = vrot.slane %v218_v43, 6  ;;  %v240_v56 = vshll.u32 %v174_v34, 16  ;;  %v1285_v60 = vrot.slane %v6841_v24, 4  ;;  %v223_v62 = vrot.slane %v221_v48, 7 }
  0x4d   : > { %982 = vrot.lane.b32.xlu0 %v6681_v7, %s6485_s18  ;;  %v229_v1 = vrot.slane %v227_v49, 6  ;;  %v232_v61 = vrot.slane %v230_v46, 7  ;;  %v239_v2 = vrot.slane %v237_v14, 6  ;;  %v247_v6 = vshrl.u32 %v175_v50, 16  ;;  %v1112_v14 = vld [vmem:[%s6535_s17 + $0x50] sm:$0xf] }
  0x4e   : > { %v242_v35 = vrot.slane %v240_v56, 7  ;;  %v250_v8 = vshll.u32 %v175_v50, 16  ;;  %v1292_v12 = vor.u32 %v1290_v9, %v6866_v47  ;;  %v224_v3 = vor.u32 %v223_v62, %v220_v30 }
  0x4f   : > { %984 = vrot.lane.b32.xlu1 %v6687_v13, %s6485_s18  ;;  %v233_v15 = vor.u32 %v232_v61, %v229_v1  ;;  %v1294_v7 = vrot.slane %v6866_v47, 4  ;;  %v249_v22 = vrot.slane %v247_v6, 6  ;;  %v1296_v28 = vshrl.u32 %v1110_v51, 16  ;;  %v1113_v61 = vld [vmem:[%s6535_s17 + $0x54] sm:$0xf] }
  0x50   : > { %v243_v21 = vor.u32 %v242_v35, %v239_v2  ;;  %v252_v24 = vrot.slane %v250_v8, 7  ;;  %v225_v13 = vrot.slane %v224_v3, 4  ;;  %v1299_v25 = vshll.u32 %v1110_v51, 16  ;;  %v177_v51 = vld [vmem:[%s6535_s17 + $0x14] sm:$0xf] }
  0x51   : > { %986 = vrot.lane.b32.xlu0 %v6694_v18, %s6485_s18  ;;  %v1305_v34 = vshrl.u32 %v1111_v11, 16  ;;  %v1308_v9 = vshll.u32 %v1111_v11, 16  ;;  %v1298_v48 = vrot.slane %v1296_v28, 7  ;;  %v235_v49 = vrot.slane %v233_v15, 4  ;;  %v178_v6 = vld [vmem:[%s6535_s17 + $0x18] sm:$0xf] }
  0x52   : > { %v245_v43 = vrot.slane %v243_v21, 4  ;;  %v253_v47 = vor.u32 %v252_v24, %v249_v22  ;;  %v234_v46 = vsel %vm6881_vm9, %v225_v13, %v233_v15  ;;  %v257_v30 = vshrl.u32 %v176_v4, 16 }
  0x53   : > { %988 = vrot.lane.b32.xlu1 %v6699_v26, %s6485_s18  ;;  %v6892_v50 = vrot.slane %v1305_v34, 7  ;;  %v260_v18 = vshll.u32 %v176_v4, 16  ;;  %v6897_v56 = vsel %vm6749_vm5, %v1276_v33, %v1283_v54  ;;  %673 = vst.msk [vmem:[#allocation2] sm:$0xf] %vm672_vm8, %v234_v46  ;;  %v1301_v1 = vor.u32 %v1299_v25, %v1298_v48  ;;  %v1114_v34 = vld [vmem:[%s6535_s17 + $0x58] sm:$0xf] }
  0x54   : > { %v254_v62 = vsel %vm6881_vm9, %v245_v43, %v253_v47  ;;  %v244_v26 = vsel %vm6881_vm9, %v235_v49, %v243_v21  ;;  %v6910_v2 = vsel %vm6749_vm5, %v1285_v60, %v1292_v12  ;;  %v255_v33 = vrot.slane %v253_v47, 4 }
  0x55   : > { %990 = vrot.lane.b32.xlu0 %v6703_v27, %s6485_s18  ;;  %675 = vst.msk [vmem:[#allocation2 + $0x8] sm:$0xf] %vm672_vm8, %v254_v62  ;;  %674 = vst.msk [vmem:[#allocation2 + $0x4] sm:$0xf] %vm672_vm8, %v244_v26  ;;  %v259_v54 = vrot.slane %v257_v30, 6  ;;  %v262_v35 = vrot.slane %v260_v18, 7  ;;  %v6917_v8 = vsel %vm6749_vm5, %v1294_v7, %v1301_v1  ;;  %v1310_v3 = vor.u32 %v1308_v9, %v6892_v50 }
  0x56   : > { %v1303_v11 = vrot.slane %v1298_v48, 4  ;;  %v1314_v27 = vshrl.u32 %v1112_v14, 16  ;;  %v1317_v12 = vshll.u32 %v1112_v14, 16  ;;  %v1323_v15 = vshrl.u32 %v1113_v61, 16  ;;  %v179_v18 = vld [vmem:[%s6535_s17 + $0x1c] sm:$0xf] }
  0x57   : > { %992 = vrot.lane.b32.xlu1 %v6711_v32, %s6485_s18  ;;  %v263_v60 = vor.u32 %v262_v35, %v259_v54  ;;  %v1326_v21 = vshll.u32 %v1113_v61, 16  ;;  %v267_v24 = vshrl.u32 %v177_v51, 16  ;;  %v270_v28 = vshll.u32 %v177_v51, 16  ;;  %v180_v61 = vld [vmem:[%s6535_s17 + $0x20] sm:$0xf] }
  0x58   : > { %v1316_v22 = vrot.slane %v1314_v27, 7  ;;  %v277_v4 = vshrl.u32 %v178_v6, 16  ;;  %v1312_v13 = vrot.slane %v6892_v50, 4  ;;  %v1325_v25 = vrot.slane %v1323_v15, 7  ;;  %v1116_v15 = vld [vmem:[%s6535_s17 + $0x60] sm:$0xf] }
  0x59   : > { %994 = vrot.lane.b32.xlu0 %v6716_v39, %s6485_s18  ;;  %v264_v7 = vsel %vm6881_vm9, %v255_v33, %v263_v60  ;;  %v280_v32 = vshll.u32 %v178_v6, 16  ;;  %v6930_v9 = vsel %vm6749_vm5, %v1303_v11, %v1310_v3  ;;  %v265_v43 = vrot.slane %v263_v60, 4  ;;  %v1115_v39 = vld [vmem:[%s6535_s17 + $0x5c] sm:$0xf] }
  0x5a   : > { %676 = vst.msk [vmem:[#allocation2 + $0xc] sm:$0xf] %vm672_vm8, %v264_v7  ;;  %v269_v47 = vrot.slane %v267_v24, 6  ;;  %v272_v48 = vrot.slane %v270_v28, 7  ;;  %v1319_v49 = vor.u32 %v1317_v12, %v1316_v22  ;;  %v1321_v46 = vrot.slane %v1316_v22, 4 }
  0x5b   : > { %996 = vrot.lane.b32.xlu1 %v6720_v40, %s6485_s18  ;;  %v279_v50 = vrot.slane %v277_v4, 6  ;;  %v282_v30 = vrot.slane %v280_v32, 7  ;;  %v1328_v14 = vor.u32 %v1326_v21, %v1325_v25  ;;  %v1332_v1 = vshrl.u32 %v1114_v34, 16  ;;  %v1117_v28 = vld [vmem:[%s6535_s17 + $0x64] sm:$0xf] }
  0x5c   : > { %v273_v62 = vor.u32 %v272_v48, %v269_v47  ;;  %v1335_v26 = vshll.u32 %v1114_v34, 16  ;;  %v1330_v33 = vrot.slane %v1325_v25, 4  ;;  %v1341_v54 = vshrl.u32 %v1115_v39, 16  ;;  %v181_v32 = vld [vmem:[%s6535_s17 + $0x24] sm:$0xf] }
  0x5d   : > { %998 = vrot.lane.b32.xlu0 %v6727_v44, %s6485_s18  ;;  %v283_v51 = vor.u32 %v282_v30, %v279_v50  ;;  %v1344_v35 = vshll.u32 %v1115_v39, 16  ;;  %v1334_v11 = vrot.slane %v1332_v1, 7  ;;  %v287_v3 = vshrl.u32 %v179_v18, 16 }
  0x5e   : > { %v274_v40 = vsel %vm6881_vm9, %v265_v43, %v273_v62  ;;  %v275_v6 = vrot.slane %v273_v62, 4  ;;  %v6946_v27 = vsel %vm6749_vm5, %v1312_v13, %v1319_v49  ;;  %v6949_v44 = vrot.slane %v1341_v54, 7  ;;  %v182_v62 = vld [vmem:[%s6535_s17 + $0x28] sm:$0xf] }
  0x5f   : > { %1000 = vrot.lane.b32.xlu1 %v6731_v45, %s6485_s18  ;;  %677 = vst.msk [vmem:[#allocation2 + $0x10] sm:$0xf] %vm672_vm8, %v274_v40  ;;  %v290_v60 = vshll.u32 %v179_v18, 16  ;;  %v297_v12 = vshrl.u32 %v180_v61, 16  ;;  %v6954_v21 = vsel %vm6749_vm5, %v1321_v46, %v1328_v14  ;;  %v1337_v45 = vor.u32 %v1335_v26, %v1334_v11  ;;  %v1118_v40 = vld [vmem:[%s6535_s17 + $0x68] sm:$0xf] }
  0x60   : > { %v284_v22 = vsel %vm6881_vm9, %v275_v6, %v283_v51  ;;  %v289_v24 = vrot.slane %v287_v3, 6  ;;  %v285_v4 = vrot.slane %v283_v51, 4  ;;  %v300_v25 = vshll.u32 %v180_v61, 16 }
  0x61   : > { %1002 = vrot.lane.b32.xlu0 %v6737_v53, %s6485_s18  ;;  %678 = vst.msk [vmem:[#allocation2 + $0x14] sm:$0xf] %vm672_vm8, %v284_v22  ;;  %v292_v7 = vrot.slane %v290_v60, 7  ;;  %v299_v13 = vrot.slane %v297_v12, 6  ;;  %v6965_v34 = vsel %vm6749_vm5, %v1330_v33, %v1337_v45  ;;  %v1339_v43 = vrot.slane %v1334_v11, 4 }
  0x62   : > { %v1346_v47 = vor.u32 %v1344_v35, %v6949_v44  ;;  %v1350_v48 = vshrl.u32 %v1116_v15, 16  ;;  %v302_v39 = vrot.slane %v300_v25, 7  ;;  %v1353_v49 = vshll.u32 %v1116_v15, 16  ;;  %v183_v45 = vld [vmem:[%s6535_s17 + $0x2c] sm:$0xf] }
  0x63   : > { %1004 = vrot.lane.b32.xlu1 %v6760_v20, %s6485_s18  ;;  %v293_v53 = vor.u32 %v292_v7, %v289_v24  ;;  %v1359_v46 = vshrl.u32 %v1117_v28, 16  ;;  %v1362_v30 = vshll.u32 %v1117_v28, 16  ;;  %v307_v18 = vshrl.u32 %v181_v32, 16  ;;  %v184_v28 = vld [vmem:[%s6535_s17 + $0x30] sm:$0xf] }
  0x64   : > { %v1352_v50 = vrot.slane %v1350_v48, 7  ;;  %v310_v14 = vshll.u32 %v181_v32, 16  ;;  %v303_v61 = vor.u32 %v302_v39, %v299_v13  ;;  %v6977_v51 = vsel %vm6749_vm5, %v1339_v43, %v1346_v47 }
  0x65   : > { %1006 = vrot.lane.b32.xlu0 %v6764_v23, %s6485_s18  ;;  %v294_v1 = vsel %vm6881_vm9, %v285_v4, %v293_v53  ;;  %v295_v26 = vrot.slane %v293_v53, 4  ;;  %v1361_v20 = vrot.slane %v1359_v46, 7  ;;  %v1348_v33 = vrot.slane %v6949_v44, 4  ;;  %v1119_v44 = vld [vmem:[%s6535_s17 + $0x6c] sm:$0xf] }
  0x66   : > { %679 = vst.msk [vmem:[#allocation2 + $0x18] sm:$0xf] %vm672_vm8, %v294_v1  ;;  %v309_v54 = vrot.slane %v307_v18, 6  ;;  %v312_v35 = vrot.slane %v310_v14, 7  ;;  %v1355_v6 = vor.u32 %v1353_v49, %v1352_v50  ;;  %v305_v11 = vrot.slane %v303_v61, 4 }
  0x67   : > { %1510 = vrot.lane.b32.xlu1 %v1149_v29, %s6486_s19  ;;  %v304_v23 = vsel %vm6881_vm9, %v295_v26, %v303_v61  ;;  %v317_v3 = vshrl.u32 %v182_v62, 16  ;;  %v1357_v60 = vrot.slane %v1352_v50, 4  ;;  %v1364_v12 = vor.u32 %v1362_v30, %v1361_v20  ;;  %v1120_v18 = vld [vmem:[%s6535_s17 + $0x70] sm:$0xf]  ;;  %v1121_v14 = vld [vmem:[%s6535_s17 + $0x74] sm:$0xf] }
  0x68   : > { %680 = vst.msk [vmem:[#allocation2 + $0x1c] sm:$0xf] %vm672_vm8, %v304_v23  ;;  %v313_v15 = vor.u32 %v312_v35, %v309_v54  ;;  %v320_v22 = vshll.u32 %v182_v62, 16  ;;  %v1366_v19 = vrot.slane %v1361_v20, 4  ;;  %v1368_v29 = vshrl.u32 %v1118_v40, 16 }
  0x69   : > { %1512 = vrot.lane.b32.xlu0 %v6777_v0, %s6486_s19  ;;  %v319_v58 = vrot.slane %v317_v3, 6  ;;  %v1371_v24 = vshll.u32 %v1118_v40, 16  ;;  %v1377_v25 = vshrl.u32 %v1119_v44, 16  ;;  %v1380_v0 = vshll.u32 %v1119_v44, 16  ;;  %v185_v35 = vld [vmem:[%s6535_s17 + $0x34] sm:$0xf] }
  0x6a   : > { %v314_v4 = vsel %vm6881_vm9, %v305_v11, %v313_v15  ;;  %v315_v7 = vrot.slane %v313_v15, 4  ;;  %v322_v13 = vrot.slane %v320_v22, 7  ;;  %v1370_v32 = vrot.slane %v1368_v29, 7  ;;  %v186_v3 = vld [vmem:[%s6535_s17 + $0x38] sm:$0xf] }
  0x6b   : > { %1514 = vrot.lane.b32.xlu1 %v6781_v37, %s6486_s19  ;;  %681 = vst.msk [vmem:[#allocation2 + $0x20] sm:$0xf] %vm672_vm8, %v314_v4  ;;  %v327_v43 = vshrl.u32 %v183_v45, 16  ;;  %v330_v47 = vshll.u32 %v183_v45, 16  ;;  %v7001_v53 = vrot.slane %v1377_v25, 7  ;;  %v337_v39 = vshrl.u32 %v184_v28, 16 }
  0x6c   : > { %v323_v48 = vor.u32 %v322_v13, %v319_v58  ;;  %v340_v49 = vshll.u32 %v184_v28, 16  ;;  %v7007_v46 = vsel %vm6749_vm5, %v1348_v33, %v1355_v6  ;;  %v1373_v37 = vor.u32 %v1371_v24, %v1370_v32  ;;  %v1122_v28 = vld [vmem:[%s6535_s17 + $0x78] sm:$0xf] }
  0x6d   : > { %1516 = vrot.lane.b32.xlu0 %v6789_v59, %s6486_s19  ;;  %v329_v50 = vrot.slane %v327_v43, 6  ;;  %v332_v30 = vrot.slane %v330_v47, 7  ;;  %v7013_v62 = vsel %vm6749_vm5, %v1357_v60, %v1364_v12  ;;  %v339_v59 = vrot.slane %v337_v39, 6 }
  0x6e   : > { %v324_v1 = vsel %vm6881_vm9, %v315_v7, %v323_v48  ;;  %v325_v26 = vrot.slane %v323_v48, 4  ;;  %v1375_v61 = vrot.slane %v1370_v32, 4  ;;  %v1382_v20 = vor.u32 %v1380_v0, %v7001_v53  ;;  %v1123_v32 = vld [vmem:[%s6535_s17 + $0x7c] sm:$0xf] }
  0x6f   : > { %1518 = vrot.lane.b32.xlu1 %v6798_v16, %s6486_s19  ;;  %682 = vst.msk [vmem:[#allocation2 + $0x24] sm:$0xf] %vm672_vm8, %v324_v1  ;;  %v333_v33 = vor.u32 %v332_v30, %v329_v50  ;;  %v342_v54 = vrot.slane %v340_v49, 7  ;;  %v7024_v40 = vsel %vm6749_vm5, %v1366_v19, %v1373_v37  ;;  %v1386_v23 = vshrl.u32 %v1120_v18, 16 }
  0x70   : > { %v1389_v6 = vshll.u32 %v1120_v18, 16  ;;  %v1395_v11 = vshrl.u32 %v1121_v14, 16  ;;  %v1398_v12 = vshll.u32 %v1121_v14, 16  ;;  %v347_v45 = vshrl.u32 %v185_v35, 16 }
  0x71   : > { %1520 = vrot.lane.b32.xlu0 %v6802_v36, %s6486_s19  ;;  %v334_v16 = vsel %vm6881_vm9, %v325_v26, %v333_v33  ;;  %v335_v44 = vrot.slane %v333_v33, 4  ;;  %v343_v60 = vor.u32 %v342_v54, %v339_v59  ;;  %v1388_v15 = vrot.slane %v1386_v23, 7 }
  0x72   : > { %683 = vst.msk [vmem:[#allocation2 + $0x28] sm:$0xf] %vm672_vm8, %v334_v16  ;;  %v7032_v22 = vrot.slane %v1395_v11, 7  ;;  %v350_v58 = vshll.u32 %v185_v35, 16  ;;  %v1384_v19 = vrot.slane %v7001_v53, 4  ;;  %v357_v29 = vshrl.u32 %v186_v3, 16 }
  0x73   : > { %1522 = vrot.lane.b32.xlu1 %v6810_v41, %s6486_s19  ;;  %v344_v36 = vsel %vm6881_vm9, %v335_v44, %v343_v60  ;;  %v360_v24 = vshll.u32 %v186_v3, 16  ;;  %v7042_v4 = vsel %vm6749_vm5, %v1375_v61, %v1382_v20  ;;  %v1391_v7 = vor.u32 %v1389_v6, %v1388_v15  ;;  %v187_v41 = vld [vmem:[%s6535_s17 + $0x3c] sm:$0xf]  ;;  %v188_v53 = vld [vmem:[%s6535_s17 + $0x40] sm:$0xf] }
  0x74   : > { %684 = vst.msk [vmem:[#allocation2 + $0x2c] sm:$0xf] %vm672_vm8, %v344_v36  ;;  %v345_v13 = vrot.slane %v343_v60, 4  ;;  %v349_v25 = vrot.slane %v347_v45, 6  ;;  %v1393_v0 = vrot.slane %v1388_v15, 4  ;;  %v352_v43 = vrot.slane %v350_v58, 7 }
  0x75   : > { %1524 = vrot.lane.b32.xlu0 %v6815_v42, %s6486_s19  ;;  %v359_v47 = vrot.slane %v357_v29, 6  ;;  %v362_v48 = vrot.slane %v360_v24, 7  ;;  %v1400_v39 = vor.u32 %v1398_v12, %v7032_v22  ;;  %v1402_v49 = vrot.slane %v7032_v22, 4  ;;  %v1124_v35 = vld [vmem:[%s6535_s17 + $0x80] sm:$0xf] }
  0x76   : > { %v1404_v37 = vshrl.u32 %v1122_v28, 16  ;;  %v1407_v50 = vshll.u32 %v1122_v28, 16  ;;  %v353_v30 = vor.u32 %v352_v43, %v349_v25  ;;  %v1413_v14 = vshrl.u32 %v1123_v32, 16  ;;  %v1125_v3 = vld [vmem:[%s6535_s17 + $0x84] sm:$0xf] }
  0x77   : > { %1526 = vrot.lane.b32.xlu1 %v6822_v55, %s6486_s19  ;;  %v363_v18 = vor.u32 %v362_v48, %v359_v47  ;;  %v1416_v1 = vshll.u32 %v1123_v32, 16  ;;  %v367_v26 = vshrl.u32 %v187_v41, 16  ;;  %v370_v59 = vshll.u32 %v187_v41, 16  ;;  %v189_v36 = vld [vmem:[%s6535_s17 + $0x44] sm:$0xf] }
  0x78   : > { %v7054_v42 = vrot.slane %v1404_v37, 7  ;;  %v377_v61 = vshrl.u32 %v188_v53, 16  ;;  %v7060_v20 = vsel %vm6749_vm5, %v1384_v19, %v1391_v7  ;;  %v354_v55 = vsel %vm6881_vm9, %v345_v13, %v353_v30  ;;  %v190_v28 = vld [vmem:[%s6535_s17 + $0x48] sm:$0xf] }
  0x79   : > { %1528 = vrot.lane.b32.xlu0 %v6828_v5, %s6486_s19  ;;  %v355_v33 = vrot.slane %v353_v30, 4  ;;  %v1415_v54 = vrot.slane %v1413_v14, 7  ;;  %v7067_v23 = vsel %vm6749_vm5, %v1393_v0, %v1400_v39  ;;  %685 = vst.msk [vmem:[#allocation2 + $0x30] sm:$0xf] %vm672_vm8, %v354_v55  ;;  %v365_v6 = vrot.slane %v363_v18, 4 }
  0x7a   : > { %v369_v11 = vrot.slane %v367_v26, 6  ;;  %v372_v5 = vrot.slane %v370_v59, 7  ;;  %v1409_v44 = vor.u32 %v1407_v50, %v7054_v42  ;;  %v379_v60 = vrot.slane %v377_v61, 6  ;;  %v1126_v37 = vld [vmem:[%s6535_s17 + $0x88] sm:$0xf] }
  0x7b   : > { %1530 = vrot.lane.b32.xlu1 %v6837_v52, %s6486_s19  ;;  %v364_v16 = vsel %vm6881_vm9, %v355_v33, %v363_v18  ;;  %v380_v12 = vshll.u32 %v188_v53, 16  ;;  %v1411_v15 = vrot.slane %v7054_v42, 4  ;;  %v1418_v22 = vor.u32 %v1416_v1, %v1415_v54  ;;  %v1127_v14 = vld [vmem:[%s6535_s17 + $0x8c] sm:$0xf]  ;;  %v192_v61 = vld [vmem:[%s6535_s17 + $0x50] sm:$0xf] }
  0x7c   : > { %686 = vst.msk [vmem:[#allocation2 + $0x34] sm:$0xf] %vm672_vm8, %v364_v16  ;;  %v373_v45 = vor.u32 %v372_v5, %v369_v11  ;;  %v1422_v58 = vshrl.u32 %v1124_v35, 16  ;;  %v1420_v19 = vrot.slane %v1415_v54, 4  ;;  %v1425_v29 = vshll.u32 %v1124_v35, 16 }
  0x7d   : > { %1532 = vrot.lane.b32.xlu0 %v6848_v57, %s6486_s19  ;;  %v382_v52 = vrot.slane %v380_v12, 7  ;;  %v1431_v24 = vshrl.u32 %v1125_v3, 16  ;;  %v1434_v32 = vshll.u32 %v1125_v3, 16  ;;  %v387_v0 = vshrl.u32 %v189_v36, 16  ;;  %v191_v1 = vld [vmem:[%s6535_s17 + $0x4c] sm:$0xf] }
  0x7e   : > { %v374_v7 = vsel %vm6881_vm9, %v365_v6, %v373_v45  ;;  %v375_v13 = vrot.slane %v373_v45, 4  ;;  %v1424_v25 = vrot.slane %v1422_v58, 7  ;;  %v390_v43 = vshll.u32 %v189_v36, 16  ;;  %v1128_v45 = vld [vmem:[%s6535_s17 + $0x90] sm:$0xf] }
  0x7f   : > { %1534 = vrot.lane.b32.xlu1 %v6852_v31, %s6486_s19  ;;  %687 = vst.msk [vmem:[#allocation2 + $0x38] sm:$0xf] %vm672_vm8, %v374_v7  ;;  %v383_v57 = vor.u32 %v382_v52, %v379_v60  ;;  %v7087_v41 = vrot.slane %v1431_v24, 7  ;;  %v7091_v47 = vsel %vm6749_vm5, %v1402_v49, %v1409_v44  ;;  %v397_v53 = vshrl.u32 %v190_v28, 16 }
  0x80   : > { %v1427_v48 = vor.u32 %v1425_v29, %v1424_v25  ;;  %v400_v39 = vshll.u32 %v190_v28, 16  ;;  %v1429_v50 = vrot.slane %v1424_v25, 4  ;;  %v389_v18 = vrot.slane %v387_v0, 6  ;;  %v1129_v29 = vld [vmem:[%s6535_s17 + $0x94] sm:$0xf] }
  0x81   : > { %1536 = vrot.lane.b32.xlu0 %v6858_v38, %s6486_s19  ;;  %v384_v31 = vsel %vm6881_vm9, %v375_v13, %v383_v57  ;;  %v1436_v30 = vor.u32 %v1434_v32, %v7087_v41  ;;  %v385_v49 = vrot.slane %v383_v57, 4  ;;  %v392_v42 = vrot.slane %v390_v43, 7  ;;  %v193_v0 = vld [vmem:[%s6535_s17 + $0x54] sm:$0xf] }
  0x82   : > { %688 = vst.msk [vmem:[#allocation2 + $0x3c] sm:$0xf] %vm672_vm8, %v384_v31  ;;  %v399_v26 = vrot.slane %v397_v53, 6  ;;  %v402_v59 = vrot.slane %v400_v39, 7  ;;  %v7107_v38 = vsel %vm6749_vm5, %v1411_v15, %v1418_v22  ;;  %v7111_v55 = vsel %vm6749_vm5, %v1420_v19, %v1427_v48 }
  0x83   : > { %1538 = vrot.lane.b32.xlu1 %v6862_v63, %s6486_s19  ;;  %v1440_v33 = vshrl.u32 %v1126_v37, 16  ;;  %v1443_v54 = vshll.u32 %v1126_v37, 16  ;;  %v393_v35 = vor.u32 %v392_v42, %v389_v18  ;;  %v1449_v11 = vshrl.u32 %v1127_v14, 16  ;;  %v194_v37 = vld [vmem:[%s6535_s17 + $0x58] sm:$0xf] }
  0x84   : > { %v403_v6 = vor.u32 %v402_v59, %v399_v26  ;;  %v1452_v5 = vshll.u32 %v1127_v14, 16  ;;  %v407_v63 = vshrl.u32 %v191_v1, 16  ;;  %v410_v16 = vshll.u32 %v191_v1, 16 }
  0x85   : > { %1540 = vrot.lane.b32.xlu0 %v6897_v56, %s6486_s19  ;;  %v1442_v3 = vrot.slane %v1440_v33, 7  ;;  %v417_v44 = vshrl.u32 %v192_v61, 16  ;;  %v7117_v60 = vsel %vm6749_vm5, %v1429_v50, %v1436_v30  ;;  %v394_v12 = vsel %vm6881_vm9, %v385_v49, %v393_v35 }
  0x86   : > { %v395_v15 = vrot.slane %v393_v35, 4  ;;  %v7121_v22 = vrot.slane %v1449_v11, 7  ;;  %689 = vst.msk [vmem:[#allocation2 + $0x40] sm:$0xf] %vm672_vm8, %v394_v12  ;;  %v1438_v58 = vrot.slane %v7087_v41, 4  ;;  %v405_v36 = vrot.slane %v403_v6, 4 }
  0x87   : > { %1542 = vrot.lane.b32.xlu1 %v6910_v2, %s6486_s19  ;;  %v927_v56 = vpop.permute.xlu0 %926  ;;  %v409_v52 = vrot.slane %v407_v63, 6  ;;  %v412_v19 = vrot.slane %v410_v16, 7  ;;  %v1445_v28 = vor.u32 %v1443_v54, %v1442_v3  ;;  %v419_v7 = vrot.slane %v417_v44, 6  ;;  %v1130_v54 = vld [vmem:[%s6535_s17 + $0x98] sm:$0xf] }
  0x88   : > { %1050 = vst.msk [vmem:[#allocation2] sm:$0xf] %vm1049_vm10, %v927_v56  ;;  %v404_v24 = vsel %vm6881_vm9, %v395_v15, %v403_v6  ;;  %v420_v13 = vshll.u32 %v192_v61, 16  ;;  %v1447_v25 = vrot.slane %v1442_v3, 4  ;;  %v1454_v32 = vor.u32 %v1452_v5, %v7121_v22  ;;  %v1131_v5 = vld [vmem:[%s6535_s17 + $0x9c] sm:$0xf] }
  0x89   : > { %v931_v2 = vpop.permute.xlu1 %930  ;;  %1544 = vrot.lane.b32.xlu0 %v6917_v8, %s6486_s19  ;;  %690 = vst.msk [vmem:[#allocation2 + $0x44] sm:$0xf] %vm672_vm8, %v404_v24  ;;  %v413_v57 = vor.u32 %v412_v19, %v409_v52  ;;  %v1458_v41 = vshrl.u32 %v1128_v45, 16  ;;  %v1456_v48 = vrot.slane %v7121_v22, 4  ;;  %v1461_v53 = vshll.u32 %v1128_v45, 16 }
  0x8a   : > { %1052 = vst.msk [vmem:[#allocation2 + $0x8] sm:$0xf] %vm1049_vm10, %v931_v2  ;;  %v422_v43 = vrot.slane %v420_v13, 7  ;;  %v1467_v39 = vshrl.u32 %v1129_v29, 16  ;;  %v1470_v18 = vshll.u32 %v1129_v29, 16  ;;  %v427_v49 = vshrl.u32 %v193_v0, 16 }
  0x8b   : > { %1546 = vrot.lane.b32.xlu1 %v6930_v9, %s6486_s19  ;;  %v929_v8 = vpop.permute.xlu0 %928  ;;  %v414_v31 = vsel %vm6881_vm9, %v405_v36, %v413_v57  ;;  %v415_v50 = vrot.slane %v413_v57, 4  ;;  %v7144_v30 = vrot.slane %v1458_v41, 7  ;;  %v430_v9 = vshll.u32 %v193_v0, 16  ;;  %v195_v3 = vld [vmem:[%s6535_s17 + $0x5c] sm:$0xf] }
  0x8c   : > { %1051 = vst.msk [vmem:[#allocation2 + $0x4] sm:$0xf] %vm1049_vm10, %v929_v8  ;;  %v423_v14 = vor.u32 %v422_v43, %v419_v7  ;;  %v7148_v1 = vrot.slane %v1467_v39, 7  ;;  %v7154_v26 = vsel %vm6749_vm5, %v1438_v58, %v1445_v28  ;;  %v437_v61 = vshrl.u32 %v194_v37, 16  ;;  %v196_v22 = vld [vmem:[%s6535_s17 + $0x60] sm:$0xf] }
  0x8d   : > { %691 = vst.msk [vmem:[#allocation2 + $0x48] sm:$0xf] %vm672_vm8, %v414_v31  ;;  %v933_v42 = vpop.permute.xlu1 %932  ;;  %1548 = vrot.lane.b32.xlu0 %v6946_v27, %s6486_s19  ;;  %v1463_v59 = vor.u32 %v1461_v53, %v7144_v30  ;;  %v440_v33 = vshll.u32 %v194_v37, 16  ;;  %v7161_v35 = vsel %vm6749_vm5, %v1447_v25, %v1454_v32  ;;  %v1465_v27 = vrot.slane %v7144_v30, 4  ;;  %v1132_v0 = vld [vmem:[%s6535_s17 + $0xa0] sm:$0xf] }
  0x8e   : > { %1053 = vst.msk [vmem:[#allocation2 + $0xc] sm:$0xf] %vm1049_vm10, %v933_v42  ;;  %v424_v6 = vsel %vm6881_vm9, %v415_v50, %v423_v14  ;;  %v429_v11 = vrot.slane %v427_v49, 6  ;;  %v425_v16 = vrot.slane %v423_v14, 4  ;;  %v432_v44 = vrot.slane %v430_v9, 7 }
  0x8f   : > { %1550 = vrot.lane.b32.xlu1 %v6954_v21, %s6486_s19  ;;  %v935_v63 = vpop.permute.xlu0 %934  ;;  %692 = vst.msk [vmem:[#allocation2 + $0x4c] sm:$0xf] %vm672_vm8, %v424_v6  ;;  %v439_v12 = vrot.slane %v437_v61, 6  ;;  %v442_v15 = vrot.slane %v440_v33, 7  ;;  %v7175_v45 = vsel %vm6749_vm5, %v1456_v48, %v1463_v59  ;;  %v1472_v56 = vor.u32 %v1470_v18, %v7148_v1 }
  0x90   : > { %1054 = vst.msk [vmem:[#allocation2 + $0x10] sm:$0xf] %vm1049_vm10, %v935_v63  ;;  %v1476_v58 = vshrl.u32 %v1130_v54, 16  ;;  %v1479_v36 = vshll.u32 %v1130_v54, 16  ;;  %v433_v21 = vor.u32 %v432_v44, %v429_v11  ;;  %v1485_v29 = vshrl.u32 %v1131_v5, 16 }
  0x91   : > { %v937_v52 = vpop.permute.xlu1 %936  ;;  %1552 = vrot.lane.b32.xlu0 %v6965_v34, %s6486_s19  ;;  %v443_v19 = vor.u32 %v442_v15, %v439_v12  ;;  %v1488_v24 = vshll.u32 %v1131_v5, 16  ;;  %v447_v7 = vshrl.u32 %v195_v3, 16  ;;  %v450_v13 = vshll.u32 %v195_v3, 16  ;;  %v198_v54 = vld [vmem:[%s6535_s17 + $0x68] sm:$0xf] }
  0x92   : > { %1055 = vst.msk [vmem:[#allocation2 + $0x14] sm:$0xf] %vm1049_vm10, %v937_v52  ;;  %v1478_v28 = vrot.slane %v1476_v58, 7  ;;  %v457_v2 = vshrl.u32 %v196_v22, 16  ;;  %v434_v32 = vsel %vm6881_vm9, %v425_v16, %v433_v21  ;;  %v435_v34 = vrot.slane %v433_v21, 4 }
  0x93   : > { %1554 = vrot.lane.b32.xlu1 %v6977_v51, %s6486_s19  ;;  %v939_v25 = vpop.permute.xlu0 %938  ;;  %v1474_v57 = vrot.slane %v7148_v1, 4  ;;  %v7186_v41 = vrot.slane %v1485_v29, 7  ;;  %693 = vst.msk [vmem:[#allocation2 + $0x50] sm:$0xf] %vm672_vm8, %v434_v32  ;;  %v445_v48 = vrot.slane %v443_v19, 4  ;;  %v449_v53 = vrot.slane %v447_v7, 6 }
  0x94   : > { %1056 = vst.msk [vmem:[#allocation2 + $0x18] sm:$0xf] %vm1049_vm10, %v939_v25  ;;  %v1481_v43 = vor.u32 %v1479_v36, %v1478_v28  ;;  %v452_v39 = vrot.slane %v450_v13, 7  ;;  %v1133_v51 = vld [vmem:[%s6535_s17 + $0xa4] sm:$0x3]  ;;  %v7196_v8 = vsel %vm6749_vm5, %v1465_v27, %v1472_v56  ;;  %v444_v31 = vsel %vm6881_vm9, %v435_v34, %v443_v19 }
  0x95   : > { %v941_v37 = vpop.permute.xlu1 %940  ;;  %1556 = vrot.lane.b32.xlu0 %v7007_v46, %s6486_s19  ;;  %v459_v50 = vrot.slane %v457_v2, 6  ;;  %v460_v30 = vshll.u32 %v196_v22, 16  ;;  %694 = vst.msk [vmem:[#allocation2 + $0x54] sm:$0xf] %vm672_vm8, %v444_v31  ;;  %v1483_v18 = vrot.slane %v1478_v28, 4  ;;  %v1490_v14 = vor.u32 %v1488_v24, %v7186_v41 }
  0x96   : > { %1057 = vst.msk [vmem:[#allocation2 + $0x1c] sm:$0xf] %vm1049_vm10, %v941_v37  ;;  %v453_v1 = vor.u32 %v452_v39, %v449_v53  ;;  %v1494_v49 = vshrl.u32 %v1132_v0, 16  ;;  %v197_v46 = vld [vmem:[%s6535_s17 + $0x64] sm:$0xf]  ;;  %v7208_v42 = vsel %vm6749_vm5, %v1474_v57, %v1481_v43  ;;  %v1497_v61 = vshll.u32 %v1132_v0, 16 }
  0x97   : > { %1558 = vrot.lane.b32.xlu1 %v7013_v62, %s6486_s19  ;;  %v943_v9 = vpop.permute.xlu0 %942  ;;  %v462_v59 = vrot.slane %v460_v30, 7  ;;  %v1503_v33 = vshrl.u32 %v1133_v51, 16  ;;  %v1506_v62 = vshll.u32 %v1133_v51, 16  ;;  %v467_v16 = vshrl.u32 %v197_v46, 16  ;;  %v1676_v12 = vld [vmem:[%s6535_s17 + $0x8] sm:$0x8] }
  0x98   : > { %1058 = vst.msk [vmem:[#allocation2 + $0x20] sm:$0xf] %vm1049_vm10, %v943_v9  ;;  %v454_v6 = vsel %vm6881_vm9, %v445_v48, %v453_v1  ;;  %v455_v27 = vrot.slane %v453_v1, 4  ;;  %v7214_v11 = vrot.slane %v1494_v49, 7  ;;  %v470_v44 = vshll.u32 %v197_v46, 16 }
  0x99   : > { %v945_v5 = vpop.permute.xlu1 %944  ;;  %1560 = vrot.lane.b32.xlu0 %v7024_v40, %s6486_s19  ;;  %695 = vst.msk [vmem:[#allocation2 + $0x58] sm:$0xf] %vm672_vm8, %v454_v6  ;;  %v463_v3 = vor.u32 %v462_v59, %v459_v50  ;;  %v1505_v63 = vrot.slane %v1503_v33, 7  ;;  %v1492_v15 = vrot.slane %v7186_v41, 4  ;;  %v477_v56 = vshrl.u32 %v198_v54, 16 }
  0x9a   : > { %1059 = vst.msk [vmem:[#allocation2 + $0x24] sm:$0xf] %vm1049_vm10, %v945_v5  ;;  %v1499_v22 = vor.u32 %v1497_v61, %v7214_v11  ;;  %v480_v58 = vshll.u32 %v198_v54, 16  ;;  %v1677_v36 = vld [vmem:[%s6535_s17 + $0xc] sm:$0xf]  ;;  %v7228_v52 = vsel %vm6749_vm5, %v1483_v18, %v1490_v14  ;;  %v1501_v19 = vrot.slane %v7214_v11, 4 }
  0x9b   : > { %1562 = vrot.lane.b32.xlu1 %v7042_v4, %s6486_s19  ;;  %v947_v40 = vpop.permute.xlu0 %946  ;;  %v464_v21 = vsel %vm6881_vm9, %v455_v27, %v463_v3  ;;  %v469_v29 = vrot.slane %v467_v16, 6  ;;  %v1678_v24 = vld [vmem:[%s6535_s17 + $0x10] sm:$0xf]  ;;  %v465_v28 = vrot.slane %v463_v3, 4  ;;  %v472_v7 = vrot.slane %v470_v44, 7 }
  0x9c   : > { %1060 = vst.msk [vmem:[#allocation2 + $0x28] sm:$0xf] %vm1049_vm10, %v947_v40  ;;  %v479_v13 = vrot.slane %v477_v56, 6  ;;  %v482_v4 = vrot.slane %v480_v58, 7  ;;  %v199_v2 = vld [vmem:[%s6535_s17 + $0x6c] sm:$0xf]  ;;  %v1508_v32 = vor.u32 %v1506_v62, %v1505_v63  ;;  %v7242_v0 = vsel %vm6749_vm5, %v1492_v15, %v1499_v22 }
  0x9d   : > { %696 = vst.msk [vmem:[#allocation2 + $0x5c] sm:$0xf] %vm672_vm8, %v464_v21  ;;  %v949_v25 = vpop.permute.xlu1 %948  ;;  %1564 = vrot.lane.b32.xlu0 %v7060_v20, %s6486_s19  ;;  %v1719_v34 = vshrl.u32 %v1676_v12, 16  ;;  %v1724_v57 = vshrl.u32 %v1677_v36, 16  ;;  %v1727_v41 = vshll.u32 %v1677_v36, 16  ;;  %v473_v43 = vor.u32 %v472_v7, %v469_v29 }
  0x9e   : > { %1061 = vst.msk [vmem:[#allocation2 + $0x2c] sm:$0xf] %vm1049_vm10, %v949_v25  ;;  %v483_v48 = vor.u32 %v482_v4, %v479_v13  ;;  %v1733_v53 = vshrl.u32 %v1678_v24, 16  ;;  %v1736_v51 = vshll.u32 %v1678_v24, 16  ;;  %v487_v37 = vshrl.u32 %v199_v2, 16 }
  0x9f   : > { %1566 = vrot.lane.b32.xlu1 %v7067_v23, %s6486_s19  ;;  %v951_v39 = vpop.permute.xlu0 %950  ;;  %v1726_v20 = vrot.slane %v1724_v57, 7  ;;  %v490_v31 = vshll.u32 %v199_v2, 16  ;;  %v200_v50 = vld [vmem:[%s6535_s17 + $0x70] sm:$0xf]  ;;  %v474_v30 = vsel %vm6881_vm9, %v465_v28, %v473_v43  ;;  %v475_v18 = vrot.slane %v473_v43, 4 }
  0xa0   : > { %1062 = vst.msk [vmem:[#allocation2 + $0x30] sm:$0xf] %vm1049_vm10, %v951_v39  ;;  %v7250_v14 = vrot.slane %v1719_v34, 11  ;;  %v7252_v1 = vrot.slane %v1733_v53, 7  ;;  %v1679_v49 = vld [vmem:[%s6535_s17 + $0x14] sm:$0xf]  ;;  %v7263_v33 = vsel %vm6749_vm5, %v1501_v19, %v1508_v32 }
  0xa1   : > { %v953_v46 = vpop.permute.xlu1 %952  ;;  %1568 = vrot.lane.b32.xlu0 %v7091_v47, %s6486_s19  ;;  %697 = vst.msk [vmem:[#allocation2 + $0x60] sm:$0xf] %vm672_vm8, %v474_v30  ;;  %v7258_v23 = vor.u32 %v1727_v41, %v1726_v20  ;;  %v485_v9 = vrot.slane %v483_v48, 4  ;;  %v489_v59 = vrot.slane %v487_v37, 6  ;;  %v492_v61 = vrot.slane %v490_v31, 7 }
  0xa2   : > { %1063 = vst.msk [vmem:[#allocation2 + $0x34] sm:$0xf] %vm1049_vm10, %v953_v46  ;;  %v484_v54 = vsel %vm6881_vm9, %v475_v18, %v483_v48  ;;  %v497_v6 = vshrl.u32 %v200_v50, 16  ;;  %v500_v47 = vshll.u32 %v200_v50, 16  ;;  %v1680_v27 = vld [vmem:[%s6535_s17 + $0x18] sm:$0xf]  ;;  %v1738_v5 = vor.u32 %v1736_v51, %v7252_v1 }
  0xa3   : > { %1570 = vrot.lane.b32.xlu1 %v7107_v38, %s6486_s19  ;;  %v955_v11 = vpop.permute.xlu0 %954  ;;  %698 = vst.msk [vmem:[#allocation2 + $0x64] sm:$0xf] %vm672_vm8, %v484_v54  ;;  %v1731_v62 = vrot.slane %v1726_v20, 4  ;;  %v493_v3 = vor.u32 %v492_v61, %v489_v59  ;;  %v1742_v63 = vshrl.u32 %v1679_v49, 16  ;;  %v201_v16 = vld [vmem:[%s6535_s17 + $0x74] sm:$0xf]  ;;  %v1730_v44 = vsel %vm6749_vm5, %v7250_v14, %v7258_v23 }
  0xa4   : > { %1064 = vst.msk [vmem:[#allocation2 + $0x38] sm:$0xf] %vm1049_vm10, %v955_v11  ;;  %v499_v12 = vrot.slane %v497_v6, 6  ;;  %v502_v15 = vrot.slane %v500_v47, 7  ;;  %v1745_v22 = vshll.u32 %v1679_v49, 16  ;;  %v1751_v21 = vshrl.u32 %v1680_v27, 16 }
  0xa5   : > { %v202_v38 = vld [vmem:[%s6535_s17 + $0x78] sm:$0xf]  ;;  %v957_v56 = vpop.permute.xlu1 %956  ;;  %1572 = vrot.lane.b32.xlu0 %v7111_v55, %s6486_s19  ;;  %v494_v58 = vsel %vm6881_vm9, %v485_v9, %v493_v3  ;;  %v495_v36 = vrot.slane %v493_v3, 4  ;;  %v7283_v40 = vrot.slane %v1742_v63, 7  ;;  %v1754_v29 = vshll.u32 %v1680_v27, 16 }
  0xa6   : > { %1065 = vst.msk [vmem:[#allocation2 + $0x3c] sm:$0xf] %vm1049_vm10, %v957_v56  ;;  %v503_v19 = vor.u32 %v502_v15, %v499_v12  ;;  %v507_v24 = vshrl.u32 %v201_v16, 16  ;;  %v510_v28 = vshll.u32 %v201_v16, 16  ;;  %v7291_v7 = vsel %vm6749_vm5, %v1731_v62, %v1738_v5  ;;  %v1681_v25 = vld [vmem:[%s6535_s17 + $0x1c] sm:$0xf] }
  0xa7   : > { %699 = vst.msk [vmem:[#allocation2 + $0x68] sm:$0xf] %vm672_vm8, %v494_v58  ;;  %1574 = vrot.lane.b32.xlu1 %v7117_v60, %s6486_s19  ;;  %v959_v55 = vpop.permute.xlu0 %958  ;;  %v1740_v13 = vrot.slane %v7252_v1, 4  ;;  %v7294_v4 = vrot.slane %v1751_v21, 7  ;;  %v517_v2 = vshrl.u32 %v202_v38, 16  ;;  %v1747_v48 = vor.u32 %v1745_v22, %v7283_v40 }
  0xa8   : > { %1066 = vst.msk [vmem:[#allocation2 + $0x40] sm:$0xf] %vm1049_vm10, %v959_v55  ;;  %v504_v32 = vsel %vm6881_vm9, %v495_v36, %v503_v19  ;;  %v505_v34 = vrot.slane %v503_v19, 4  ;;  %v509_v57 = vrot.slane %v507_v24, 6  ;;  %v512_v60 = vrot.slane %v510_v28, 7 }
  0xa9   : > { %v1682_v41 = vld [vmem:[%s6535_s17 + $0x20] sm:$0xf]  ;;  %v961_v43 = vpop.permute.xlu1 %960  ;;  %1576 = vrot.lane.b32.xlu0 %v7154_v26, %s6486_s19  ;;  %700 = vst.msk [vmem:[#allocation2 + $0x6c] sm:$0xf] %vm672_vm8, %v504_v32  ;;  %v1749_v53 = vrot.slane %v7283_v40, 4  ;;  %v519_v39 = vrot.slane %v517_v2, 6  ;;  %v1756_v37 = vor.u32 %v1754_v29, %v7294_v4  ;;  %v7324_v5 = vsel %vm6749_vm5, %v1740_v13, %v1747_v48 }
  0xaa   : > { %v520_v20 = vshll.u32 %v202_v38, 16  ;;  %v203_v51 = vld [vmem:[%s6535_s17 + $0x7c] sm:$0xf]  ;;  %1067 = vst.msk [vmem:[#allocation2 + $0x44] sm:$0xf] %vm1049_vm10, %v961_v43  ;;  %v513_v31 = vor.u32 %v512_v60, %v509_v57  ;;  %v1760_v50 = vshrl.u32 %v1681_v25, 16 }
  0xab   : > { %v1763_v30 = vshll.u32 %v1681_v25, 16  ;;  %v204_v18 = vld [vmem:[%s6535_s17 + $0x80] sm:$0xf]  ;;  %1578 = vrot.lane.b32.xlu1 %v7161_v35, %s6486_s19  ;;  %v963_v26 = vpop.permute.xlu0 %962  ;;  %v1758_v49 = vrot.slane %v7294_v4, 4  ;;  %v1769_v46 = vshrl.u32 %v1682_v41, 16  ;;  %v1772_v9 = vshll.u32 %v1682_v41, 16 }
  0xac   : > { %v522_v1 = vrot.slane %v520_v20, 7  ;;  %1068 = vst.msk [vmem:[#allocation2 + $0x48] sm:$0xf] %vm1049_vm10, %v963_v26  ;;  %v514_v59 = vsel %vm6881_vm9, %v505_v34, %v513_v31  ;;  %v515_v61 = vrot.slane %v513_v31, 4  ;;  %v1762_v54 = vrot.slane %v1760_v50, 7 }
  0xad   : > { %v527_v6 = vshrl.u32 %v203_v51, 16  ;;  %v965_v47 = vpop.permute.xlu1 %964  ;;  %1580 = vrot.lane.b32.xlu0 %v7175_v45, %s6486_s19  ;;  %701 = vst.msk [vmem:[#allocation2 + $0x70] sm:$0xf] %vm672_vm8, %v514_v59  ;;  %v7319_v27 = vrot.slane %v1769_v46, 7  ;;  %v530_v11 = vshll.u32 %v203_v51, 16  ;;  %v537_v62 = vshrl.u32 %v204_v18, 16 }
  0xae   : > { %v523_v35 = vor.u32 %v522_v1, %v519_v39  ;;  %1069 = vst.msk [vmem:[#allocation2 + $0x4c] sm:$0xf] %vm1049_vm10, %v965_v47  ;;  %v1765_v3 = vor.u32 %v1763_v30, %v1762_v54  ;;  %v540_v16 = vshll.u32 %v204_v18, 16  ;;  %v1683_v12 = vld [vmem:[%s6535_s17 + $0x24] sm:$0xf]  ;;  %v7331_v15 = vsel %vm6749_vm5, %v1749_v53, %v1756_v37 }
  0xaf   : > { %v529_v63 = vrot.slane %v527_v6, 6  ;;  %1582 = vrot.lane.b32.xlu1 %v7196_v8, %s6486_s19  ;;  %v967_v45 = vpop.permute.xlu0 %966  ;;  %v532_v56 = vrot.slane %v530_v11, 7  ;;  %v1684_v58 = vld [vmem:[%s6535_s17 + $0x28] sm:$0xf]  ;;  %v205_v36 = vld [vmem:[%s6535_s17 + $0x84] sm:$0xf]  ;;  %v1774_v8 = vor.u32 %v1772_v9, %v7319_v27 }
  0xb0   : > { %v524_v22 = vsel %vm6881_vm9, %v515_v61, %v523_v35  ;;  %v525_v38 = vrot.slane %v523_v35, 4  ;;  %1070 = vst.msk [vmem:[#allocation2 + $0x50] sm:$0xf] %vm1049_vm10, %v967_v45  ;;  %v1767_v40 = vrot.slane %v1762_v54, 4  ;;  %v539_v21 = vrot.slane %v537_v62, 6 }
  0xb1   : > { %702 = vst.msk [vmem:[#allocation2 + $0x74] sm:$0xf] %vm672_vm8, %v524_v22  ;;  %v542_v19 = vrot.slane %v540_v16, 7  ;;  %v969_v29 = vpop.permute.xlu1 %968  ;;  %1584 = vrot.lane.b32.xlu0 %v7208_v42, %s6486_s19  ;;  %v7344_v24 = vsel %vm6749_vm5, %v1758_v49, %v1765_v3  ;;  %v533_v28 = vor.u32 %v532_v56, %v529_v63  ;;  %v1778_v55 = vshrl.u32 %v1683_v12, 16  ;;  %v206_v4 = vld [vmem:[%s6535_s17 + $0x88] sm:$0xf] }
  0xb2   : > { %v1781_v13 = vshll.u32 %v1683_v12, 16  ;;  %1071 = vst.msk [vmem:[#allocation2 + $0x54] sm:$0xf] %vm1049_vm10, %v969_v29  ;;  %v1787_v25 = vshrl.u32 %v1684_v58, 16  ;;  %v1790_v32 = vshll.u32 %v1684_v58, 16  ;;  %v547_v34 = vshrl.u32 %v205_v36, 16 }
  0xb3   : > { %v543_v2 = vor.u32 %v542_v19, %v539_v21  ;;  %1586 = vrot.lane.b32.xlu1 %v7228_v52, %s6486_s19  ;;  %v971_v57 = vpop.permute.xlu0 %970  ;;  %v534_v42 = vsel %vm6881_vm9, %v525_v38, %v533_v28  ;;  %v535_v60 = vrot.slane %v533_v28, 4  ;;  %v1780_v41 = vrot.slane %v1778_v55, 7  ;;  %v1685_v52 = vld [vmem:[%s6535_s17 + $0x2c] sm:$0xf]  ;;  %v1686_v18 = vld [vmem:[%s6535_s17 + $0x30] sm:$0xf] }
  0xb4   : > { %v550_v43 = vshll.u32 %v205_v36, 16  ;;  %1072 = vst.msk [vmem:[#allocation2 + $0x58] sm:$0xf] %vm1049_vm10, %v971_v57  ;;  %v1776_v48 = vrot.slane %v7319_v27, 4  ;;  %v7355_v53 = vrot.slane %v1787_v25, 7  ;;  %v549_v39 = vrot.slane %v547_v34, 6 }
  0xb5   : > { %703 = vst.msk [vmem:[#allocation2 + $0x78] sm:$0xf] %vm672_vm8, %v534_v42  ;;  %v557_v20 = vshrl.u32 %v206_v4, 16  ;;  %v973_v51 = vpop.permute.xlu1 %972  ;;  %1588 = vrot.lane.b32.xlu0 %v7242_v0, %s6486_s19  ;;  %v7362_v37 = vsel %vm6749_vm5, %v1767_v40, %v1774_v8  ;;  %v544_v31 = vsel %vm6881_vm9, %v535_v60, %v543_v2  ;;  %v545_v50 = vrot.slane %v543_v2, 4  ;;  %v207_v0 = vld [vmem:[%s6535_s17 + $0x8c] sm:$0xf] }
  0xb6   : > { %v552_v30 = vrot.slane %v550_v43, 7  ;;  %1073 = vst.msk [vmem:[#allocation2 + $0x5c] sm:$0xf] %vm1049_vm10, %v973_v51  ;;  %v1783_v26 = vor.u32 %v1781_v13, %v1780_v41  ;;  %v1785_v1 = vrot.slane %v1780_v41, 4  ;;  %v560_v46 = vshll.u32 %v206_v4, 16 }
  0xb7   : > { %704 = vst.msk [vmem:[#allocation2 + $0x7c] sm:$0xf] %vm672_vm8, %v544_v31  ;;  %v559_v49 = vrot.slane %v557_v20, 6  ;;  %1590 = vrot.lane.b32.xlu1 %v7263_v33, %s6486_s19  ;;  %v975_v9 = vpop.permute.xlu0 %974  ;;  %v1792_v59 = vor.u32 %v1790_v32, %v7355_v53  ;;  %v1796_v54 = vshrl.u32 %v1685_v52, 16  ;;  %v1799_v6 = vshll.u32 %v1685_v52, 16  ;;  %s6496_s19 = smov 80  }
  0xb8   : > { %v553_v61 = vor.u32 %v552_v30, %v549_v39  ;;  %v208_v47 = vld [vmem:[%s6535_s17 + $0x90] sm:$0xf]  ;;  %1074 = vst.msk [vmem:[#allocation2 + $0x60] sm:$0xf] %vm1049_vm10, %v975_v9  ;;  %v562_v35 = vrot.slane %v560_v46, 7  ;;  %v1794_v27 = vrot.slane %v7355_v53, 4  ;;  %v7392_v23 = vsel %vm6749_vm5, %v1776_v48, %v1783_v26 }
  0xb9   : > { %v1805_v11 = vshrl.u32 %v1686_v18, 16  ;;  %v1808_v62 = vshll.u32 %v1686_v18, 16  ;;  %v977_v3 = vpop.permute.xlu1 %976  ;;  %2091 = vrot.lane.b32.xlu0 %v1730_v44, %s6487_s20  ;;  %v1798_v16 = vrot.slane %v1796_v54, 7  ;;  %v567_v12 = vshrl.u32 %v207_v0, 16  ;;  %v1687_v40 = vld [vmem:[%s6535_s17 + $0x34] sm:$0xf] }
  0xba   : > { %v554_v33 = vsel %vm6881_vm9, %v545_v50, %v553_v61  ;;  %v555_v63 = vrot.slane %v553_v61, 4  ;;  %1075 = vst.msk [vmem:[#allocation2 + $0x64] sm:$0xf] %vm1049_vm10, %v977_v3  ;;  %v563_v45 = vor.u32 %v562_v35, %v559_v49  ;;  %v570_v38 = vshll.u32 %v207_v0, 16  ;;  %v1688_v29 = vld [vmem:[%s6535_s17 + $0x38] sm:$0xf] }
  0xbb   : > { %705 = vst.msk [vmem:[#allocation2 + $0x80] sm:$0xf] %vm672_vm8, %v554_v33  ;;  %v7386_v22 = vrot.slane %v1805_v11, 7  ;;  %v577_v56 = vshrl.u32 %v208_v47, 16  ;;  %2093 = vrot.lane.b32.xlu1 %v7291_v7, %s6487_s20  ;;  %v979_v14 = vpop.permute.xlu0 %978  ;;  %v1801_v44 = vor.u32 %v1799_v6, %v1798_v16  ;;  %v569_v58 = vrot.slane %v567_v12, 6 }
  0xbc   : > { %v580_v36 = vshll.u32 %v208_v47, 16  ;;  %1076 = vst.msk [vmem:[#allocation2 + $0x68] sm:$0xf] %vm1049_vm10, %v979_v14  ;;  %v7398_v8 = vsel %vm6749_vm5, %v1785_v1, %v1792_v59  ;;  %v564_v21 = vsel %vm6881_vm9, %v555_v63, %v563_v45  ;;  %v565_v19 = vrot.slane %v563_v45, 4  ;;  %v209_v28 = vld [vmem:[%s6535_s17 + $0x94] sm:$0xf] }
  0xbd   : > { %v572_v7 = vrot.slane %v570_v38, 7  ;;  %v981_v55 = vpop.permute.xlu1 %980  ;;  %2095 = vrot.lane.b32.xlu0 %v7324_v5, %s6487_s20  ;;  %706 = vst.msk [vmem:[#allocation2 + $0x84] sm:$0xf] %vm672_vm8, %v564_v21  ;;  %v1803_v13 = vrot.slane %v1798_v16, 4  ;;  %v1810_v4 = vor.u32 %v1808_v62, %v7386_v22  ;;  %v579_v2 = vrot.slane %v577_v56, 6 }
  0xbe   : > { %v582_v25 = vrot.slane %v580_v36, 7  ;;  %1077 = vst.msk [vmem:[#allocation2 + $0x6c] sm:$0xf] %vm1049_vm10, %v981_v55  ;;  %v7411_v32 = vsel %vm6749_vm5, %v1794_v27, %v1801_v44  ;;  %v1814_v57 = vshrl.u32 %v1687_v40, 16  ;;  %v1817_v42 = vshll.u32 %v1687_v40, 16 }
  0xbf   : > { %v573_v34 = vor.u32 %v572_v7, %v569_v58  ;;  %v210_v60 = vld [vmem:[%s6535_s17 + $0x98] sm:$0xf]  ;;  %2097 = vrot.lane.b32.xlu1 %v7331_v15, %s6487_s20  ;;  %v983_v5 = vpop.permute.xlu0 %982  ;;  %v1823_v43 = vshrl.u32 %v1688_v29, 16  ;;  %v1826_v48 = vshll.u32 %v1688_v29, 16  ;;  %v587_v53 = vshrl.u32 %v209_v28, 16 }
  0xc0   : > { %v583_v41 = vor.u32 %v582_v25, %v579_v2  ;;  %1078 = vst.msk [vmem:[#allocation2 + $0x70] sm:$0xf] %vm1049_vm10, %v983_v5  ;;  %v7419_v52 = vrot.slane %v1814_v57, 7  ;;  %v590_v51 = vshll.u32 %v209_v28, 16  ;;  %v1812_v15 = vrot.slane %v7386_v22, 4 }
  0xc1   : > { %v574_v39 = vsel %vm6881_vm9, %v565_v19, %v573_v34  ;;  %v575_v20 = vrot.slane %v573_v34, 4  ;;  %v985_v31 = vpop.permute.xlu1 %984  ;;  %2099 = vrot.lane.b32.xlu0 %v7344_v24, %s6487_s20  ;;  %v7425_v50 = vrot.slane %v1823_v43, 7  ;;  %v589_v30 = vrot.slane %v587_v53, 6  ;;  %v1689_v26 = vld [vmem:[%s6535_s17 + $0x3c] sm:$0xf] }
  0xc2   : > { %707 = vst.msk [vmem:[#allocation2 + $0x88] sm:$0xf] %vm672_vm8, %v574_v39  ;;  %v597_v18 = vshrl.u32 %v210_v60, 16  ;;  %v1811_v1 = vsel %vm6749_vm5, %v1803_v13, %v1810_v4  ;;  %v585_v46 = vrot.slane %v583_v41, 4  ;;  %v592_v24 = vrot.slane %v590_v51, 7 }
  0xc3   : > { %1079 = vst.msk [vmem:[#allocation2 + $0x74] sm:$0xf] %vm1049_vm10, %v985_v31  ;;  %v584_v49 = vsel %vm6881_vm9, %v575_v20, %v583_v41  ;;  %v1690_v0 = vld [vmem:[%s6535_s17 + $0x40] sm:$0xf]  ;;  %2101 = vrot.lane.b32.xlu1 %v7362_v37, %s6487_s20  ;;  %v987_v9 = vpop.permute.xlu0 %986  ;;  %v1819_v59 = vor.u32 %v1817_v42, %v7419_v52  ;;  %v1821_v61 = vrot.slane %v7419_v52, 4  ;;  %v600_v6 = vshll.u32 %v210_v60, 16 }
  0xc4   : > { %708 = vst.msk [vmem:[#allocation2 + $0x8c] sm:$0xf] %vm672_vm8, %v584_v49  ;;  %v599_v54 = vrot.slane %v597_v18, 6  ;;  %v211_v47 = vld [vmem:[%s6535_s17 + $0x9c] sm:$0xf]  ;;  %v1828_v35 = vor.u32 %v1826_v48, %v7425_v50  ;;  %v593_v27 = vor.u32 %v592_v24, %v589_v30  ;;  %v1832_v11 = vshrl.u32 %v1689_v26, 16 }
  0xc5   : > { %1080 = vst.msk [vmem:[#allocation2 + $0x78] sm:$0xf] %vm1049_vm10, %v987_v9  ;;  %v1835_v62 = vshll.u32 %v1689_v26, 16  ;;  %v212_v3 = vld [vmem:[%s6535_s17 + $0xa0] sm:$0xf]  ;;  %v989_v33 = vpop.permute.xlu1 %988  ;;  %2103 = vrot.lane.b32.xlu0 %v7392_v23, %s6487_s20  ;;  %v602_v37 = vrot.slane %v600_v6, 7  ;;  %v1820_v25 = vsel %vm6749_vm5, %v1812_v15, %v1819_v59 }
  0xc6   : > { %v1830_v63 = vrot.slane %v7425_v50, 4  ;;  %v1841_v16 = vshrl.u32 %v1690_v0, 16  ;;  %v1844_v12 = vshll.u32 %v1690_v0, 16  ;;  %1081 = vst.msk [vmem:[#allocation2 + $0x7c] sm:$0xf] %vm1049_vm10, %v989_v33  ;;  %v594_v45 = vsel %vm6881_vm9, %v585_v46, %v593_v27 }
  0xc7   : > { %v595_v22 = vrot.slane %v593_v27, 4  ;;  %v1834_v38 = vrot.slane %v1832_v11, 7  ;;  %v607_v56 = vshrl.u32 %v211_v47, 16  ;;  %2105 = vrot.lane.b32.xlu1 %v7398_v8, %s6487_s20  ;;  %v991_v14 = vpop.permute.xlu0 %990  ;;  %709 = vst.msk [vmem:[#allocation2 + $0x90] sm:$0xf] %vm672_vm8, %v594_v45  ;;  %v603_v23 = vor.u32 %v602_v37, %v599_v54 }
  0xc8   : > { %v7452_v44 = vrot.slane %v1841_v16, 7  ;;  %v610_v58 = vshll.u32 %v211_v47, 16  ;;  %v617_v36 = vshrl.u32 %v212_v3, 16  ;;  %1082 = vst.msk [vmem:[#allocation2 + $0x80] sm:$0xf] %vm1049_vm10, %v991_v14  ;;  %v620_v7 = vshll.u32 %v212_v3, 16 }
  0xc9   : > { %v1837_v40 = vor.u32 %v1835_v62, %v1834_v38  ;;  %v1839_v21 = vrot.slane %v1834_v38, 4  ;;  %v609_v19 = vrot.slane %v607_v56, 6  ;;  %v1691_v29 = vld [vmem:[%s6535_s17 + $0x44] sm:$0xf]  ;;  %v993_v28 = vpop.permute.xlu1 %992  ;;  %2107 = vrot.lane.b32.xlu0 %v7411_v32, %s6487_s20  ;;  %v604_v8 = vsel %vm6881_vm9, %v595_v22, %v603_v23  ;;  %v1692_v2 = vld [vmem:[%s6535_s17 + $0x48] sm:$0xf] }
  0xca   : > { %v1846_v55 = vor.u32 %v1844_v12, %v7452_v44  ;;  %v605_v13 = vrot.slane %v603_v23, 4  ;;  %v612_v4 = vrot.slane %v610_v58, 7  ;;  %1083 = vst.msk [vmem:[#allocation2 + $0x84] sm:$0xf] %vm1049_vm10, %v993_v28  ;;  %v1829_v34 = vsel %vm6749_vm5, %v1821_v61, %v1828_v35  ;;  %v213_v48 = vld [vmem:[%s6535_s17 + $0xa4] sm:$0x1] }
  0xcb   : > { %710 = vst.msk [vmem:[#allocation2 + $0x94] sm:$0xf] %vm672_vm8, %v604_v8  ;;  %v619_v32 = vrot.slane %v617_v36, 6  ;;  %v622_v57 = vrot.slane %v620_v7, 7  ;;  %2109 = vrot.lane.b32.xlu1 %v1811_v1, %s6487_s20  ;;  %v995_v42 = vpop.permute.xlu0 %994  ;;  %v1838_v60 = vsel %vm6749_vm5, %v1830_v63, %v1837_v40  ;;  %v1850_v41 = vshrl.u32 %v1691_v29, 16 }
  0xcc   : > { %v613_v5 = vor.u32 %v612_v4, %v609_v19  ;;  %v1853_v43 = vshll.u32 %v1691_v29, 16  ;;  %1084 = vst.msk [vmem:[#allocation2 + $0x88] sm:$0xf] %vm1049_vm10, %v995_v42  ;;  %v1848_v39 = vrot.slane %v7452_v44, 4  ;;  %v1859_v20 = vshrl.u32 %v1692_v2, 16 }
  0xcd   : > { %v623_v53 = vor.u32 %v622_v57, %v619_v32  ;;  %v1862_v52 = vshll.u32 %v1692_v2, 16  ;;  %v1693_v51 = vld [vmem:[%s6535_s17 + $0x4c] sm:$0xf]  ;;  %v997_v31 = vpop.permute.xlu1 %996  ;;  %2111 = vrot.lane.b32.xlu0 %v1820_v25, %s6487_s20  ;;  %v1847_v15 = vsel %vm6749_vm5, %v1839_v21, %v1846_v55  ;;  %v1852_v18 = vrot.slane %v1850_v41, 7  ;;  %v1694_v46 = vld [vmem:[%s6535_s17 + $0x50] sm:$0xf] }
  0xce   : > { %v614_v50 = vsel %vm6881_vm9, %v605_v13, %v613_v5  ;;  %v615_v30 = vrot.slane %v613_v5, 4  ;;  %1085 = vst.msk [vmem:[#allocation2 + $0x8c] sm:$0xf] %vm1049_vm10, %v997_v31  ;;  %v1861_v26 = vrot.slane %v1859_v20, 7  ;;  %v627_v49 = vshll.u32 %v213_v48, 16 }
  0xcf   : > { %711 = vst.msk [vmem:[#allocation2 + $0x98] sm:$0xf] %vm672_vm8, %v614_v50  ;;  %v625_v1 = vrot.slane %v623_v53, 4  ;;  %2113 = vrot.lane.b32.xlu1 %v1829_v34, %s6487_s20  ;;  %v999_v24 = vpop.permute.xlu0 %998  ;;  %v1855_v9 = vor.u32 %v1853_v43, %v1852_v18  ;;  %v1857_v59 = vrot.slane %v1852_v18, 4  ;;  %v1868_v61 = vshrl.u32 %v1693_v51, 16 }
  0xd0   : > { %v624_v0 = vsel %vm6881_vm9, %v615_v30, %v623_v53  ;;  %v1695_v54 = vld [vmem:[%s6535_s17 + $0x54] sm:$0xf]  ;;  %1086 = vst.msk [vmem:[#allocation2 + $0x90] sm:$0xf] %vm1049_vm10, %v999_v24  ;;  %v1864_v6 = vor.u32 %v1862_v52, %v1861_v26  ;;  %v629_v47 = vrot.slane %v627_v49, 7  ;;  %v1871_v35 = vshll.u32 %v1693_v51, 16 }
  0xd1   : > { %712 = vst.msk [vmem:[#allocation2 + $0x9c] sm:$0xf] %vm672_vm8, %v624_v0  ;;  %v1696_v27 = vld [vmem:[%s6535_s17 + $0x58] sm:$0xf]  ;;  %v1001_v11 = vpop.permute.xlu1 %1000  ;;  %2115 = vrot.lane.b32.xlu0 %v1838_v60, %s6487_s20  ;;  %v1866_v62 = vrot.slane %v1861_v26, 4  ;;  %v1870_v3 = vrot.slane %v1868_v61, 7  ;;  %v1856_v16 = vsel %vm6749_vm5, %v1848_v39, %v1855_v9 }
  0xd2   : > { %v1877_v33 = vshrl.u32 %v1694_v46, 16  ;;  %v1880_v37 = vshll.u32 %v1694_v46, 16  ;;  %v1697_v63 = vld [vmem:[%s6535_s17 + $0x5c] sm:$0xf]  ;;  %1087 = vst.msk [vmem:[#allocation2 + $0x94] sm:$0xf] %vm1049_vm10, %v1001_v11  ;;  %v630_v12 = vsel %vm6881_vm9, %v625_v1, %v629_v47  ;;  %v1865_v56 = vsel %vm6749_vm5, %v1857_v59, %v1864_v6 }
  0xd3   : > { %v1886_v45 = vshrl.u32 %v1695_v54, 16  ;;  %v1889_v22 = vshll.u32 %v1695_v54, 16  ;;  %2117 = vrot.lane.b32.xlu1 %v1847_v15, %s6487_s20  ;;  %v1003_v38 = vpop.permute.xlu0 %1002  ;;  %714 = vst.msk [vmem:[#allocation2 + $0xa0] sm:$0x3] %vm713_vm11, %v630_v12  ;;  %v1873_v14 = vor.u32 %v1871_v35, %v1870_v3  ;;  %v1895_v44 = vshrl.u32 %v1696_v27, 16 }
  0xd4   : > { %v1879_v23 = vrot.slane %v1877_v33, 7  ;;  %v1698_v58 = vld [vmem:[%s6535_s17 + $0x60] sm:$0xf]  ;;  %1088 = vst.msk [vmem:[#allocation2 + $0x98] sm:$0xf] %vm1049_vm10, %v1003_v38  ;;  %v1875_v36 = vrot.slane %v1870_v3, 4 }
  0xd5   : > { %v1888_v17 = vrot.slane %v1886_v45, 7  ;;  %v1898_v40 = vshll.u32 %v1696_v27, 16  ;;  %v1904_v21 = vshrl.u32 %v1697_v63, 16  ;;  %v1005_v19 = vpop.permute.xlu1 %1004  ;;  %2119 = vrot.lane.b32.xlu0 %v1856_v16, %s6487_s20  ;;  %v1874_v7 = vsel %vm6749_vm5, %v1866_v62, %v1873_v14  ;;  %v1699_v55 = vld [vmem:[%s6535_s17 + $0x64] sm:$0xf] }
  0xd6   : > { %v1882_v29 = vor.u32 %v1880_v37, %v1879_v23  ;;  %v1897_v28 = vrot.slane %v1895_v44, 7  ;;  %v1907_v8 = vshll.u32 %v1697_v63, 16  ;;  %1089 = vst.msk [vmem:[#allocation2 + $0x9c] sm:$0xf] %vm1049_vm10, %v1005_v19  ;;  %v1884_v13 = vrot.slane %v1879_v23, 4 }
  0xd7   : > { %v1891_v4 = vor.u32 %v1889_v22, %v1888_v17  ;;  %v1906_v2 = vrot.slane %v1904_v21, 7  ;;  %v1913_v25 = vshrl.u32 %v1698_v58, 16  ;;  %v1700_v34 = vld [vmem:[%s6535_s17 + $0x68] sm:$0xf]  ;;  %2121 = vrot.lane.b32.xlu1 %v1865_v56, %s6487_s20  ;;  %v1007_v32 = vpop.permute.xlu0 %1006  ;;  %v1893_v57 = vrot.slane %v1888_v17, 4 }
  0xd8   : > { %1091 = vst.msk [vmem:[#allocation2 + $0xa0] sm:$0x3] %vm1090_vm12, %v1007_v32  ;;  %v1883_v42 = vsel %vm6749_vm5, %v1875_v36, %v1882_v29  ;;  %v1900_v60 = vor.u32 %v1898_v40, %v1897_v28  ;;  %v1916_v41 = vshll.u32 %v1698_v58, 16  ;;  %v1701_v43 = vld [vmem:[%s6535_s17 + $0x6c] sm:$0xf]  ;;  %v1902_v53 = vrot.slane %v1897_v28, 4 }
  0xd9   : > { %v1915_v5 = vrot.slane %v1913_v25, 7  ;;  %v1511_v48 = vpop.permute.xlu1 %1510  ;;  %2123 = vrot.lane.b32.xlu0 %v1874_v7, %s6487_s20  ;;  %v1909_v39 = vor.u32 %v1907_v8, %v1906_v2  ;;  %v1922_v20 = vshrl.u32 %v1699_v55, 16  ;;  %v1931_v52 = vshrl.u32 %v1700_v34, 16  ;;  %v1702_v51 = vld [vmem:[%s6535_s17 + $0x70] sm:$0xf] }
  0xda   : > { %1634 = vst.msk [vmem:[#allocation2] sm:$0xf] %vm1633_vm13, %v1511_v48  ;;  %v1892_v31 = vsel %vm6749_vm5, %v1884_v13, %v1891_v4  ;;  %v1925_v15 = vshll.u32 %v1699_v55, 16  ;;  %v1703_v50 = vld [vmem:[%s6535_s17 + $0x74] sm:$0xf]  ;;  %v1934_v1 = vshll.u32 %v1700_v34, 16  ;;  %v1901_v46 = vsel %vm6749_vm5, %v1893_v57, %v1900_v60 }
  0xdb   : > { %2125 = vrot.lane.b32.xlu1 %v1883_v42, %s6487_s20  ;;  %v1513_v30 = vpop.permute.xlu0 %1512  ;;  %v1924_v18 = vrot.slane %v1922_v20, 7  ;;  %v1933_v26 = vrot.slane %v1931_v52, 7  ;;  %v1940_v49 = vshrl.u32 %v1701_v43, 16  ;;  %v1911_v24 = vrot.slane %v1906_v2, 4  ;;  %v1704_v6 = vld [vmem:[%s6535_s17 + $0x78] sm:$0xf] }
  0xdc   : > { %1635 = vst.msk [vmem:[#allocation2 + $0x4] sm:$0xf] %vm1633_vm13, %v1513_v30  ;;  %v1918_v0 = vor.u32 %v1916_v41, %v1915_v5  ;;  %v1949_v9 = vshrl.u32 %v1702_v51, 16  ;;  %v1910_v61 = vsel %vm6749_vm5, %v1902_v53, %v1909_v39  ;;  %v1958_v54 = vshrl.u32 %v1703_v50, 16  ;;  %v1705_v37 = vld [vmem:[%s6535_s17 + $0x7c] sm:$0xf] }
  0xdd   : > { %v1515_v59 = vpop.permute.xlu1 %1514  ;;  %2127 = vrot.lane.b32.xlu0 %v1892_v31, %s6487_s20  ;;  %v1920_v47 = vrot.slane %v1915_v5, 4  ;;  %v1927_v35 = vor.u32 %v1925_v15, %v1924_v18  ;;  %v1942_v27 = vrot.slane %v1940_v49, 7  ;;  %v1943_v11 = vshll.u32 %v1701_v43, 16  ;;  %v1706_v22 = vld [vmem:[%s6535_s17 + $0x80] sm:$0xf] }
  0xde   : > { %1636 = vst.msk [vmem:[#allocation2 + $0x8] sm:$0xf] %vm1633_vm13, %v1515_v59  ;;  %v1929_v3 = vrot.slane %v1924_v18, 4  ;;  %v1936_v33 = vor.u32 %v1934_v1, %v1933_v26  ;;  %v1919_v63 = vsel %vm6749_vm5, %v1911_v24, %v1918_v0  ;;  %v1951_v16 = vrot.slane %v1949_v9, 7  ;;  %v1707_v19 = vld [vmem:[%s6535_s17 + $0x84] sm:$0xf] }
  0xdf   : > { %2129 = vrot.lane.b32.xlu1 %v1901_v46, %s6487_s20  ;;  %v1517_v62 = vpop.permute.xlu0 %1516  ;;  %v1952_v12 = vshll.u32 %v1702_v51, 16  ;;  %v1967_v45 = vshrl.u32 %v1704_v6, 16  ;;  %v1960_v56 = vrot.slane %v1958_v54, 7  ;;  %v1961_v14 = vshll.u32 %v1703_v50, 16  ;;  %v1708_v2 = vld [vmem:[%s6535_s17 + $0x88] sm:$0xf] }
  0xe0   : > { %1637 = vst.msk [vmem:[#allocation2 + $0xc] sm:$0xf] %vm1633_vm13, %v1517_v62  ;;  %v1928_v23 = vsel %vm6749_vm5, %v1920_v47, %v1927_v35  ;;  %v1938_v44 = vrot.slane %v1933_v26, 4  ;;  %v1945_v58 = vor.u32 %v1943_v11, %v1942_v27  ;;  %v1976_v36 = vshrl.u32 %v1705_v37, 16  ;;  %v1709_v41 = vld [vmem:[%s6535_s17 + $0x8c] sm:$0xf] }
  0xe1   : > { %v1519_v38 = vpop.permute.xlu1 %1518  ;;  %2131 = vrot.lane.b32.xlu0 %v1910_v61, %s6487_s20  ;;  %v1937_v40 = vsel %vm6749_vm5, %v1929_v3, %v1936_v33  ;;  %v1985_v21 = vshrl.u32 %v1706_v22, 16  ;;  %v1947_v7 = vrot.slane %v1942_v27, 4  ;;  %v1954_v29 = vor.u32 %v1952_v12, %v1951_v16  ;;  %v1710_v31 = vld [vmem:[%s6535_s17 + $0x90] sm:$0xf]  ;;  %v1711_v26 = vld [vmem:[%s6535_s17 + $0x94] sm:$0xf] }
  0xe2   : > { %1638 = vst.msk [vmem:[#allocation2 + $0x10] sm:$0xf] %vm1633_vm13, %v1519_v38  ;;  %v1969_v28 = vrot.slane %v1967_v45, 7  ;;  %v1970_v8 = vshll.u32 %v1704_v6, 16  ;;  %v1956_v13 = vrot.slane %v1951_v16, 4  ;;  %v1963_v4 = vor.u32 %v1961_v14, %v1960_v56 }
  0xe3   : > { %2133 = vrot.lane.b32.xlu1 %v1919_v63, %s6487_s20  ;;  %v1521_v17 = vpop.permute.xlu0 %1520  ;;  %v1946_v25 = vsel %vm6749_vm5, %v1938_v44, %v1945_v58  ;;  %v1978_v34 = vrot.slane %v1976_v36, 7  ;;  %v1979_v32 = vshll.u32 %v1705_v37, 16  ;;  %v1994_v57 = vshrl.u32 %v1707_v19, 16  ;;  %v1712_v61 = vld [vmem:[%s6535_s17 + $0x98] sm:$0xf] }
  0xe4   : > { %1639 = vst.msk [vmem:[#allocation2 + $0x14] sm:$0xf] %vm1633_vm13, %v1521_v17  ;;  %v1987_v60 = vrot.slane %v1985_v21, 7  ;;  %v1988_v5 = vshll.u32 %v1706_v22, 16  ;;  %v1955_v43 = vsel %vm6749_vm5, %v1947_v7, %v1954_v29  ;;  %v1965_v48 = vrot.slane %v1960_v56, 4 }
  0xe5   : > { %v1523_v55 = vpop.permute.xlu1 %1522  ;;  %2135 = vrot.lane.b32.xlu0 %v1928_v23, %s6487_s20  ;;  %v1972_v53 = vor.u32 %v1970_v8, %v1969_v28  ;;  %v2003_v39 = vshrl.u32 %v1708_v2, 16  ;;  %v1964_v52 = vsel %vm6749_vm5, %v1956_v13, %v1963_v4  ;;  %v1974_v51 = vrot.slane %v1969_v28, 4  ;;  %v1713_v63 = vld [vmem:[%s6535_s17 + $0x9c] sm:$0xf]  ;;  %v1714_v23 = vld [vmem:[%s6535_s17 + $0xa0] sm:$0xf] }
  0xe6   : > { %1640 = vst.msk [vmem:[#allocation2 + $0x18] sm:$0xf] %vm1633_vm13, %v1523_v55  ;;  %v1981_v15 = vor.u32 %v1979_v32, %v1978_v34  ;;  %v1996_v50 = vrot.slane %v1994_v57, 7  ;;  %v1997_v30 = vshll.u32 %v1707_v19, 16  ;;  %v2012_v18 = vshrl.u32 %v1709_v41, 16 }
  0xe7   : > { %2137 = vrot.lane.b32.xlu1 %v1937_v40, %s6487_s20  ;;  %v1525_v42 = vpop.permute.xlu0 %1524  ;;  %v1983_v49 = vrot.slane %v1978_v34, 4  ;;  %v1990_v46 = vor.u32 %v1988_v5, %v1987_v60  ;;  %v1973_v24 = vsel %vm6749_vm5, %v1965_v48, %v1972_v53  ;;  %v2005_v0 = vrot.slane %v2003_v39, 7  ;;  %v1715_v7 = vld [vmem:[%s6535_s17 + $0xa4] sm:$0xf] }
  0xe8   : > { %1641 = vst.msk [vmem:[#allocation2 + $0x1c] sm:$0xf] %vm1633_vm13, %v1525_v42  ;;  %v2006_v9 = vshll.u32 %v1708_v2, 16  ;;  %v2021_v59 = vshrl.u32 %v1710_v31, 16  ;;  %v1992_v6 = vrot.slane %v1987_v60, 4  ;;  %v2030_v47 = vshrl.u32 %v1711_v26, 16 }
  0xe9   : > { %v1527_v20 = vpop.permute.xlu1 %1526  ;;  %2139 = vrot.lane.b32.xlu0 %v1946_v25, %s6487_s20  ;;  %v1982_v35 = vsel %vm6749_vm5, %v1974_v51, %v1981_v15  ;;  %v1999_v27 = vor.u32 %v1997_v30, %v1996_v50  ;;  %v2014_v11 = vrot.slane %v2012_v18, 7  ;;  %v2015_v62 = vshll.u32 %v1709_v41, 16  ;;  %v1716_v25 = vld [vmem:[%s6535_s17 + $0xa8] sm:$0xf] }
  0xea   : > { %1642 = vst.msk [vmem:[#allocation2 + $0x20] sm:$0xf] %vm1633_vm13, %v1527_v20  ;;  %v1991_v33 = vsel %vm6749_vm5, %v1983_v49, %v1990_v46  ;;  %v2039_v37 = vshrl.u32 %v1712_v61, 16  ;;  %v2001_v16 = vrot.slane %v1996_v50, 4  ;;  %v2008_v12 = vor.u32 %v2006_v9, %v2005_v0 }
  0xeb   : > { %2141 = vrot.lane.b32.xlu1 %v1955_v43, %s6487_s20  ;;  %v1529_v1 = vpop.permute.xlu0 %1528  ;;  %v2023_v45 = vrot.slane %v2021_v59, 7  ;;  %v2024_v22 = vshll.u32 %v1710_v31, 16  ;;  %v2032_v56 = vrot.slane %v2030_v47, 7  ;;  %v2033_v14 = vshll.u32 %v1711_v26, 16  ;;  %v1717_v43 = vld [vmem:[%s6535_s17 + $0xac] sm:$0x3] }
  0xec   : > { %1643 = vst.msk [vmem:[#allocation2 + $0x24] sm:$0xf] %vm1633_vm13, %v1529_v1  ;;  %v2000_v44 = vsel %vm6749_vm5, %v1992_v6, %v1999_v27  ;;  %v2010_v58 = vrot.slane %v2005_v0, 4  ;;  %v2017_v36 = vor.u32 %v2015_v62, %v2014_v11  ;;  %v2048_v17 = vshrl.u32 %v1713_v63, 16 }
  0xed   : > { %v1531_v54 = vpop.permute.xlu1 %1530  ;;  %2143 = vrot.lane.b32.xlu0 %v1964_v52, %s6487_s20  ;;  %v2041_v21 = vrot.slane %v2039_v37, 7  ;;  %v2042_v19 = vshll.u32 %v1712_v61, 16  ;;  %v2009_v29 = vsel %vm6749_vm5, %v2001_v16, %v2008_v12  ;;  %v2019_v28 = vrot.slane %v2014_v11, 4 }
  0xee   : > { %1644 = vst.msk [vmem:[#allocation2 + $0x28] sm:$0xf] %vm1633_vm13, %v1531_v54  ;;  %v2026_v8 = vor.u32 %v2024_v22, %v2023_v45  ;;  %v2057_v55 = vshrl.u32 %v1714_v23, 16  ;;  %v2028_v4 = vrot.slane %v2023_v45, 4  ;;  %v2035_v2 = vor.u32 %v2033_v14, %v2032_v56 }
  0xef   : > { %2145 = vrot.lane.b32.xlu1 %v1973_v24, %s6487_s20  ;;  %v1533_v3 = vpop.permute.xlu0 %1532  ;;  %v2018_v34 = vsel %vm6749_vm5, %v2010_v58, %v2017_v36  ;;  %v2050_v32 = vrot.slane %v2048_v17, 7  ;;  %v2051_v57 = vshll.u32 %v1713_v63, 16  ;;  %v2066_v42 = vshrl.u32 %v1715_v7, 16  ;;  %v2260_v36 = vld [vmem:[%s6535_s17 + $0x18] sm:$0xf] }
  0xf0   : > { %1645 = vst.msk [vmem:[#allocation2 + $0x2c] sm:$0xf] %vm1633_vm13, %v1533_v3  ;;  %v2037_v5 = vrot.slane %v2032_v56, 4  ;;  %v2044_v41 = vor.u32 %v2042_v19, %v2041_v21  ;;  %v2027_v48 = vsel %vm6749_vm5, %v2019_v28, %v2026_v8  ;;  %v2059_v53 = vrot.slane %v2057_v55, 7  ;;  %v2257_v56 = vld [vmem:[%s6535_s17 + $0xc] sm:$0xf] }
  0xf1   : > { %v1535_v38 = vpop.permute.xlu1 %1534  ;;  %2147 = vrot.lane.b32.xlu0 %v1982_v35, %s6487_s20  ;;  %v2060_v39 = vshll.u32 %v1714_v23, 16  ;;  %v2075_v20 = vshrl.u32 %v1716_v25, 16  ;;  %v2036_v51 = vsel %vm6749_vm5, %v2028_v4, %v2035_v2  ;;  %v2046_v31 = vrot.slane %v2041_v21, 4  ;;  %v2258_v23 = vld [vmem:[%s6535_s17 + $0x10] sm:$0xf] }
  0xf2   : > { %1646 = vst.msk [vmem:[#allocation2 + $0x30] sm:$0xf] %vm1633_vm13, %v1535_v38  ;;  %v2053_v15 = vor.u32 %v2051_v57, %v2050_v32  ;;  %v2068_v50 = vrot.slane %v2066_v42, 7  ;;  %v2069_v30 = vshll.u32 %v1715_v7, 16  ;;  %v2084_v18 = vshrl.u32 %v1717_v43, 16 }
  0xf3   : > { %2149 = vrot.lane.b32.xlu1 %v1991_v33, %s6487_s20  ;;  %v1537_v40 = vpop.permute.xlu0 %1536  ;;  %v2045_v1 = vsel %vm6749_vm5, %v2037_v5, %v2044_v41  ;;  %v2055_v49 = vrot.slane %v2050_v32, 4  ;;  %v2062_v46 = vor.u32 %v2060_v39, %v2059_v53  ;;  %v2077_v24 = vrot.slane %v2075_v20, 7  ;;  %v2262_v19 = vld [vmem:[%s6535_s17 + $0x20] sm:$0xf]  ;;  %v2264_v8 = vld [vmem:[%s6535_s17 + $0x28] sm:$0xf] }
  0xf4   : > { %1647 = vst.msk [vmem:[#allocation2 + $0x34] sm:$0xf] %vm1633_vm13, %v1537_v40  ;;  %v2078_v0 = vshll.u32 %v1716_v25, 16  ;;  %v2064_v59 = vrot.slane %v2059_v53, 4  ;;  %v2054_v61 = vsel %vm6749_vm5, %v2046_v31, %v2053_v15  ;;  %v2071_v54 = vor.u32 %v2069_v30, %v2068_v50  ;;  %v2261_v40 = vld [vmem:[%s6535_s17 + $0x1c] sm:$0xf] }
  0xf5   : > { %v1539_v13 = vpop.permute.xlu1 %1538  ;;  %2151 = vrot.lane.b32.xlu0 %v2000_v44, %s6487_s20  ;;  %v2086_v6 = vrot.slane %v2084_v18, 7  ;;  %v2087_v47 = vshll.u32 %v1717_v43, 16  ;;  %v2063_v27 = vsel %vm6749_vm5, %v2055_v49, %v2062_v46  ;;  %v2073_v11 = vrot.slane %v2068_v50, 4  ;;  %v2259_v44 = vld [vmem:[%s6535_s17 + $0x14] sm:$0xf] }
  0xf6   : > { %1648 = vst.msk [vmem:[#allocation2 + $0x38] sm:$0xf] %vm1633_vm13, %v1539_v13  ;;  %v2080_v62 = vor.u32 %v2078_v0, %v2077_v24  ;;  %v2072_v33 = vsel %vm6749_vm5, %v2064_v59, %v2071_v54  ;;  %v2082_v37 = vrot.slane %v2077_v24, 4  ;;  %v2265_v13 = vld [vmem:[%s6535_s17 + $0x2c] sm:$0xf]  ;;  %vm3081_vm11 = vcmask 388416  }
  0xf7   : > { %2153 = vrot.lane.b32.xlu1 %v2009_v29, %s6487_s20  ;;  %v1541_v60 = vpop.permute.xlu0 %1540  ;;  %v2089_v63 = vor.u32 %v2087_v47, %v2086_v6  ;;  %v2263_v29 = vld [vmem:[%s6535_s17 + $0x24] sm:$0xf]  ;;  %v2266_v2 = vld [vmem:[%s6535_s17 + $0x30] sm:$0xf]  ;;  %v2268_v57 = vld [vmem:[%s6535_s17 + $0x38] sm:$0xf] }
  0xf8   : > { %1649 = vst.msk [vmem:[#allocation2 + $0x3c] sm:$0xf] %vm1633_vm13, %v1541_v60  ;;  %v2081_v12 = vsel %vm6749_vm5, %v2073_v11, %v2080_v62  ;;  %v2269_v60 = vld [vmem:[%s6535_s17 + $0x3c] sm:$0xf]  ;;  %v2270_v41 = vld [vmem:[%s6535_s17 + $0x40] sm:$0xf] }
  0xf9   : > { %v1543_v52 = vpop.permute.xlu1 %1542  ;;  %2155 = vrot.lane.b32.xlu0 %v2018_v34, %s6487_s20  ;;  %v2090_v22 = vsel %vm6749_vm5, %v2082_v37, %v2089_v63  ;;  %v2267_v34 = vld [vmem:[%s6535_s17 + $0x34] sm:$0xf]  ;;  %v2272_v39 = vld [vmem:[%s6535_s17 + $0x48] sm:$0xf]  ;;  %v2274_v31 = vld [vmem:[%s6535_s17 + $0x50] sm:$0xf] }
  0xfa   : > { %1650 = vst.msk [vmem:[#allocation2 + $0x40] sm:$0xf] %vm1633_vm13, %v1543_v52  ;;  %v2273_v52 = vld [vmem:[%s6535_s17 + $0x4c] sm:$0xf]  ;;  %v2275_v50 = vld [vmem:[%s6535_s17 + $0x54] sm:$0xf] }
  0xfb   : > { %2157 = vrot.lane.b32.xlu1 %v2027_v48, %s6487_s20  ;;  %v1545_v26 = vpop.permute.xlu0 %1544  ;;  %v2271_v48 = vld [vmem:[%s6535_s17 + $0x44] sm:$0xf]  ;;  %v2276_v18 = vld [vmem:[%s6535_s17 + $0x58] sm:$0xf]  ;;  %v2278_v46 = vld [vmem:[%s6535_s17 + $0x60] sm:$0xf] }
  0xfc   : > { %1651 = vst.msk [vmem:[#allocation2 + $0x44] sm:$0xf] %vm1633_vm13, %v1545_v26  ;;  %v2279_v0 = vld [vmem:[%s6535_s17 + $0x64] sm:$0xf]  ;;  %v2280_v59 = vld [vmem:[%s6535_s17 + $0x68] sm:$0xf] }
  0xfd   : > { %v1547_v9 = vpop.permute.xlu1 %1546  ;;  %2159 = vrot.lane.b32.xlu0 %v2036_v51, %s6487_s20  ;;  %v2281_v54 = vld [vmem:[%s6535_s17 + $0x6c] sm:$0xf]  ;;  %v2282_v47 = vld [vmem:[%s6535_s17 + $0x70] sm:$0xf]  ;;  %v2284_v62 = vld [vmem:[%s6535_s17 + $0x78] sm:$0xf] }
  0xfe   : > { %1652 = vst.msk [vmem:[#allocation2 + $0x48] sm:$0xf] %vm1633_vm13, %v1547_v9  ;;  %v2286_v63 = vld [vmem:[%s6535_s17 + $0x80] sm:$0xf]  ;;  %vm3822_vm5 = vcmask 1042432   ;;  %vm3697_vm0 = vcmask 454016  }
  0xff   : > { %2161 = vrot.lane.b32.xlu1 %v2045_v1, %s6487_s20  ;;  %v1549_v35 = vpop.permute.xlu0 %1548  ;;  %v2277_v1 = vld [vmem:[%s6535_s17 + $0x5c] sm:$0xf]  ;;  %vm8289_vm8 = vmor %vm3822_vm5, %vm3823_vm6  ;;  %vm4154_vm9 = vsmask.f32 2304  ;;  %vm4155_vm10 = vsmask.f32 6416 }
 0x100   : > { %1653 = vst.msk [vmem:[#allocation2 + $0x4c] sm:$0xf] %vm1633_vm13, %v1549_v35  ;;  %vm8310_vm12 = vmor %vm4154_vm9, %vm4155_vm10  ;;  %vm4070_vm1 = vcmask 519616   ;;  %vm5185_vm5 = vcmask 732800   ;;  %vm5419_vm6 = vcmask 736256   ;;  %vm4978_vm9 = vcmask 648768  }
 0x101   : > { %v1551_v3 = vpop.permute.xlu1 %1550  ;;  %2163 = vrot.lane.b32.xlu0 %v2054_v61, %s6487_s20  ;;  %vm5226_vm10 = vcmask 730752  }
 0x102   : > { %1654 = vst.msk [vmem:[#allocation2 + $0x50] sm:$0xf] %vm1633_vm13, %v1551_v3 }
 0x103   : > { %2165 = vrot.lane.b32.xlu1 %v2063_v27, %s6487_s20  ;;  %v1553_v16 = vpop.permute.xlu0 %1552  ;;  %v2283_v27 = vld [vmem:[%s6535_s17 + $0x74] sm:$0xf] }
 0x104   : > { %1655 = vst.msk [vmem:[#allocation2 + $0x54] sm:$0xf] %vm1633_vm13, %v1553_v16 }
 0x105   : > { %v1555_v45 = vpop.permute.xlu1 %1554  ;;  %2167 = vrot.lane.b32.xlu0 %v2072_v33, %s6487_s20  ;;  %v2285_v33 = vld [vmem:[%s6535_s17 + $0x7c] sm:$0xf] }
 0x106   : > { %1656 = vst.msk [vmem:[#allocation2 + $0x58] sm:$0xf] %vm1633_vm13, %v1555_v45 }
 0x107   : > { %2169 = vrot.lane.b32.xlu1 %v2081_v12, %s6487_s20  ;;  %v1557_v38 = vpop.permute.xlu0 %1556  ;;  %v2287_v12 = vld [vmem:[%s6535_s17 + $0x84] sm:$0xf] }
 0x108   : > { %1657 = vst.msk [vmem:[#allocation2 + $0x5c] sm:$0xf] %vm1633_vm13, %v1557_v38  ;;  %v2288_v38 = vld [vmem:[%s6535_s17 + $0x88] sm:$0xf] }
 0x109   : > { %v1559_v14 = vpop.permute.xlu1 %1558  ;;  %2171 = vrot.lane.b32.xlu0 %v2090_v22, %s6487_s20  ;;  %v2505_v22 = vld [vmem:[%s6535_s17 + $0xc] sm:$0xf] }
 0x10a   : > { %1658 = vst.msk [vmem:[#allocation2 + $0x60] sm:$0xf] %vm1633_vm13, %v1559_v14  ;;  %v2289_v14 = vld [vmem:[%s6535_s17 + $0x8c] sm:$0xf] }
 0x10b   : > { %2339 = vrot.lane.b32.xlu1 %v2257_v56, %s6488_s21  ;;  %v1561_v10 = vpop.permute.xlu0 %1560 }
 0x10c   : > { %1659 = vst.msk [vmem:[#allocation2 + $0x64] sm:$0xf] %vm1633_vm13, %v1561_v10  ;;  %v2550_v10 = vshrl.u32 %v2505_v22, 16 }
 0x10d   : > { %v1563_v58 = vpop.permute.xlu1 %1562  ;;  %2341 = vrot.lane.b32.xlu0 %v2258_v23, %s6488_s21  ;;  %v2506_v23 = vld [vmem:[%s6535_s17 + $0x10] sm:$0xf] }
 0x10e   : > { %1660 = vst.msk [vmem:[#allocation2 + $0x68] sm:$0xf] %vm1633_vm13, %v1563_v58  ;;  %v2507_v58 = vld [vmem:[%s6535_s17 + $0x14] sm:$0xf] }
 0x10f   : > { %2343 = vrot.lane.b32.xlu1 %v2259_v44, %s6488_s21  ;;  %v1565_v17 = vpop.permute.xlu0 %1564  ;;  %v2553_v44 = vshll.u32 %v2505_v22, 16 }
 0x110   : > { %1661 = vst.msk [vmem:[#allocation2 + $0x6c] sm:$0xf] %vm1633_vm13, %v1565_v17  ;;  %v2290_v17 = vld [vmem:[%s6535_s17 + $0x90] sm:$0xf] }
 0x111   : > { %v1567_v21 = vpop.permute.xlu1 %1566  ;;  %2345 = vrot.lane.b32.xlu0 %v2260_v36, %s6488_s21 }
 0x112   : > { %1662 = vst.msk [vmem:[#allocation2 + $0x70] sm:$0xf] %vm1633_vm13, %v1567_v21 }
 0x113   : > { %2347 = vrot.lane.b32.xlu1 %v2261_v40, %s6488_s21  ;;  %v1569_v7 = vpop.permute.xlu0 %1568  ;;  %v2508_v40 = vld [vmem:[%s6535_s17 + $0x18] sm:$0xf] }
 0x114   : > { %1663 = vst.msk [vmem:[#allocation2 + $0x74] sm:$0xf] %vm1633_vm13, %v1569_v7  ;;  %v2563_v7 = vshrl.u32 %v2506_v23, 16 }
 0x115   : > { %v1571_v28 = vpop.permute.xlu1 %1570  ;;  %2349 = vrot.lane.b32.xlu0 %v2262_v19, %s6488_s21  ;;  %v2559_v19 = vshll.u32 %v2506_v23, 16 }
 0x116   : > { %1664 = vst.msk [vmem:[#allocation2 + $0x78] sm:$0xf] %vm1633_vm13, %v1571_v28  ;;  %v2291_v28 = vld [vmem:[%s6535_s17 + $0x94] sm:$0xf] }
 0x117   : > { %2351 = vrot.lane.b32.xlu1 %v2263_v29, %s6488_s21  ;;  %v1573_v55 = vpop.permute.xlu0 %1572  ;;  %v2569_v29 = vshll.u32 %v2507_v58, 16 }
 0x118   : > { %1665 = vst.msk [vmem:[#allocation2 + $0x7c] sm:$0xf] %vm1633_vm13, %v1573_v55  ;;  %v2555_v55 = vrot.slane %v2553_v44, 5  ;;  %v2515_v44 = vld [vmem:[%s6535_s17 + $0x34] sm:$0xf] }
 0x119   : > { %v1575_v4 = vpop.permute.xlu1 %1574  ;;  %2353 = vrot.lane.b32.xlu0 %v2264_v8, %s6488_s21  ;;  %v2552_v8 = vrot.slane %v2550_v10, 4 }
 0x11a   : > { %1666 = vst.msk [vmem:[#allocation2 + $0x80] sm:$0xf] %vm1633_vm13, %v1575_v4 }
 0x11b   : > { %2355 = vrot.lane.b32.xlu1 %v2265_v13, %s6488_s21  ;;  %v1577_v25 = vpop.permute.xlu0 %1576  ;;  %v2573_v13 = vshrl.u32 %v2507_v58, 16 }
 0x11c   : > { %1667 = vst.msk [vmem:[#allocation2 + $0x84] sm:$0xf] %vm1633_vm13, %v1577_v25  ;;  %v2583_v25 = vshrl.u32 %v2508_v40, 16 }
 0x11d   : > { %v1579_v32 = vpop.permute.xlu1 %1578  ;;  %2357 = vrot.lane.b32.xlu0 %v2266_v2, %s6488_s21  ;;  %v2579_v2 = vshll.u32 %v2508_v40, 16 }
 0x11e   : > { %1668 = vst.msk [vmem:[#allocation2 + $0x88] sm:$0xf] %vm1633_vm13, %v1579_v32  ;;  %v2292_v32 = vld [vmem:[%s6535_s17 + $0x98] sm:$0xf] }
 0x11f   : > { %2359 = vrot.lane.b32.xlu1 %v2267_v34, %s6488_s21  ;;  %v1581_v42 = vpop.permute.xlu0 %1580  ;;  %v2509_v34 = vld [vmem:[%s6535_s17 + $0x1c] sm:$0xf] }
 0x120   : > { %1669 = vst.msk [vmem:[#allocation2 + $0x8c] sm:$0xf] %vm1633_vm13, %v1581_v42  ;;  %v2510_v42 = vld [vmem:[%s6535_s17 + $0x20] sm:$0xf] }
 0x121   : > { %v1583_v5 = vpop.permute.xlu1 %1582  ;;  %2361 = vrot.lane.b32.xlu0 %v2268_v57, %s6488_s21  ;;  %v2293_v57 = vld [vmem:[%s6535_s17 + $0x9c] sm:$0xf] }
 0x122   : > { %1670 = vst.msk [vmem:[#allocation2 + $0x90] sm:$0xf] %vm1633_vm13, %v1583_v5  ;;  %v7737_v5 = vrot.slane %v2559_v19, 5  ;;  %v2516_v19 = vld [vmem:[%s6535_s17 + $0x38] sm:$0xf] }
 0x123   : > { %2363 = vrot.lane.b32.xlu1 %v2269_v60, %s6488_s21  ;;  %v1585_v43 = vpop.permute.xlu0 %1584 }
 0x124   : > { %1671 = vst.msk [vmem:[#allocation2 + $0x94] sm:$0xf] %vm1633_vm13, %v1585_v43  ;;  %v7739_v43 = vrot.slane %v2569_v29, 5 }
 0x125   : > { %v1587_v53 = vpop.permute.xlu1 %1586  ;;  %2365 = vrot.lane.b32.xlu0 %v2270_v41, %s6488_s21  ;;  %v2565_v41 = vrot.slane %v2563_v7, 4 }
 0x126   : > { %1672 = vst.msk [vmem:[#allocation2 + $0x98] sm:$0xf] %vm1633_vm13, %v1587_v53  ;;  %v2294_v53 = vld [vmem:[%s6535_s17 + $0xa0] sm:$0xf] }
 0x127   : > { %2367 = vrot.lane.b32.xlu1 %v2271_v48, %s6488_s21  ;;  %v1589_v20 = vpop.permute.xlu0 %1588  ;;  %v2511_v48 = vld [vmem:[%s6535_s17 + $0x24] sm:$0xf] }
 0x128   : > { %1673 = vst.msk [vmem:[#allocation2 + $0x9c] sm:$0xf] %vm1633_vm13, %v1589_v20  ;;  %v2575_v20 = vrot.slane %v2573_v13, 4  ;;  %vm5483_vm13 = vcmask 1044480  }
 0x129   : > { %v1591_v51 = vpop.permute.xlu1 %1590  ;;  %2369 = vrot.lane.b32.xlu0 %v2272_v39, %s6488_s21  ;;  %v2556_v39 = vor.u32 %v2555_v55, %v2552_v8 }
 0x12a   : > { %1675 = vst.msk [vmem:[#allocation2 + $0xa0] sm:$0x3] %vm1674_vm14, %v1591_v51  ;;  %v2593_v51 = vshrl.u32 %v2509_v34, 16  ;;  %vm6495_vm14 = vmmov 0  }
 0x12b   : > { %2371 = vrot.lane.b32.xlu1 %v2273_v52, %s6488_s21  ;;  %v2092_v15 = vpop.permute.xlu0 %2091  ;;  %v2589_v52 = vshll.u32 %v2509_v34, 16 }
 0x12c   : > { %2215 = vst.msk [vmem:[#allocation2] sm:$0xf] %vm2214_vm15, %v2092_v15  ;;  %v7745_v15 = vrot.slane %v2579_v2, 5  ;;  %v2649_v2 = vshll.u32 %v2515_v44, 16 }
 0x12d   : > { %v2094_v30 = vpop.permute.xlu1 %2093  ;;  %2373 = vrot.lane.b32.xlu0 %v2274_v31, %s6488_s21 }
 0x12e   : > { %2216 = vst.msk [vmem:[#allocation2 + $0x4] sm:$0xf] %vm2214_vm15, %v2094_v30  ;;  %v2599_v30 = vshll.u32 %v2510_v42, 16 }
 0x12f   : > { %2375 = vrot.lane.b32.xlu1 %v2275_v50, %s6488_s21  ;;  %v2096_v26 = vpop.permute.xlu0 %2095  ;;  %v2585_v50 = vrot.slane %v2583_v25, 4  ;;  %v2653_v25 = vshrl.u32 %v2515_v44, 16 }
 0x130   : > { %2217 = vst.msk [vmem:[#allocation2 + $0x8] sm:$0xf] %vm2214_vm15, %v2096_v26  ;;  %v2512_v26 = vld [vmem:[%s6535_s17 + $0x28] sm:$0xf] }
 0x131   : > { %v2098_v49 = vpop.permute.xlu1 %2097  ;;  %2377 = vrot.lane.b32.xlu0 %v2276_v18, %s6488_s21  ;;  %v2603_v18 = vshrl.u32 %v2510_v42, 16 }
 0x132   : > { %2218 = vst.msk [vmem:[#allocation2 + $0xc] sm:$0xf] %vm2214_vm15, %v2098_v49  ;;  %v2613_v49 = vshrl.u32 %v2511_v48, 16 }
 0x133   : > { %2379 = vrot.lane.b32.xlu1 %v2277_v1, %s6488_s21  ;;  %v2100_v24 = vpop.permute.xlu0 %2099  ;;  %v2609_v1 = vshll.u32 %v2511_v48, 16  ;;  %v2517_v48 = vld [vmem:[%s6535_s17 + $0x3c] sm:$0xf] }
 0x134   : > { %2219 = vst.msk [vmem:[#allocation2 + $0x10] sm:$0xf] %vm2214_vm15, %v2100_v24  ;;  %v2566_v24 = vor.u32 %v2565_v41, %v7737_v5 }
 0x135   : > { %v2102_v9 = vpop.permute.xlu1 %2101  ;;  %2381 = vrot.lane.b32.xlu0 %v2278_v46, %s6488_s21 }
 0x136   : > { %2220 = vst.msk [vmem:[#allocation2 + $0x14] sm:$0xf] %vm2214_vm15, %v2102_v9  ;;  %v2295_v9 = vld [vmem:[%s6535_s17 + $0xa4] sm:$0xf]  ;;  %v2567_v23 = vrot.slane %v2566_v24, 4 }
 0x137   : > { %2383 = vrot.lane.b32.xlu1 %v2279_v0, %s6488_s21  ;;  %v2104_v61 = vpop.permute.xlu0 %2103  ;;  %v2513_v0 = vld [vmem:[%s6535_s17 + $0x2c] sm:$0xf] }
 0x138   : > { %2221 = vst.msk [vmem:[#allocation2 + $0x18] sm:$0xf] %vm2214_vm15, %v2104_v61  ;;  %v2576_v61 = vor.u32 %v2575_v20, %v7739_v43  ;;  %v2633_v22 = vshrl.u32 %v2513_v0, 16  ;;  %v2572_v34 = vsel %vm7760_vm2, %v2567_v23, %v7739_v43 }
 0x139   : > { %v2106_v6 = vpop.permute.xlu1 %2105  ;;  %2385 = vrot.lane.b32.xlu0 %v2280_v59, %s6488_s21  ;;  %v2557_v59 = vrot.slane %v2556_v39, 4 }
 0x13a   : > { %2222 = vst.msk [vmem:[#allocation2 + $0x1c] sm:$0xf] %vm2214_vm15, %v2106_v6  ;;  %v2595_v6 = vrot.slane %v2593_v51, 4  ;;  %v2577_v10 = vrot.slane %v2576_v61, 4  ;;  %v2635_v13 = vrot.slane %v2633_v22, 4 }
 0x13b   : > { %2387 = vrot.lane.b32.xlu1 %v2281_v54, %s6488_s21  ;;  %v2108_v35 = vpop.permute.xlu0 %2107  ;;  %v7755_v54 = vrot.slane %v2589_v52, 5  ;;  %v2519_v51 = vld [vmem:[%s6535_s17 + $0x44] sm:$0xf] }
 0x13c   : > { %2223 = vst.msk [vmem:[#allocation2 + $0x20] sm:$0xf] %vm2214_vm15, %v2108_v35  ;;  %v2693_v61 = vshrl.u32 %v2519_v51, 16 }
 0x13d   : > { %v2110_v11 = vpop.permute.xlu1 %2109  ;;  %2389 = vrot.lane.b32.xlu0 %v2282_v47, %s6488_s21 }
 0x13e   : > { %2224 = vst.msk [vmem:[#allocation2 + $0x24] sm:$0xf] %vm2214_vm15, %v2110_v11  ;;  %v7765_v11 = vrot.slane %v2599_v30, 5  ;;  %v7810_v30 = vrot.slane %v2649_v2, 5  ;;  %v2695_v23 = vrot.slane %v2693_v61, 4 }
 0x13f   : > { %2391 = vrot.lane.b32.xlu1 %v2283_v27, %s6488_s21  ;;  %v2112_v3 = vpop.permute.xlu0 %2111  ;;  %v2586_v27 = vor.u32 %v2585_v50, %v7745_v15 }
 0x140   : > { %2225 = vst.msk [vmem:[#allocation2 + $0x28] sm:$0xf] %vm2214_vm15, %v2112_v3  ;;  %v2619_v3 = vshll.u32 %v2512_v26, 16 }
 0x141   : > { %v2114_v37 = vpop.permute.xlu1 %2113  ;;  %2393 = vrot.lane.b32.xlu0 %v2284_v62, %s6488_s21  ;;  %v2605_v62 = vrot.slane %v2603_v18, 4  ;;  %v2655_v18 = vrot.slane %v2653_v25, 4 }
 0x142   : > { %2226 = vst.msk [vmem:[#allocation2 + $0x2c] sm:$0xf] %vm2214_vm15, %v2114_v37  ;;  %v7769_v37 = vrot.slane %v2609_v1, 5 }
 0x143   : > { %2395 = vrot.lane.b32.xlu1 %v2285_v33, %s6488_s21  ;;  %v2116_v16 = vpop.permute.xlu0 %2115  ;;  %v2296_v33 = vld [vmem:[%s6535_s17 + $0xa8] sm:$0xf]  ;;  %v2606_v40 = vor.u32 %v2605_v62, %v7765_v11 }
 0x144   : > { %2227 = vst.msk [vmem:[#allocation2 + $0x30] sm:$0xf] %vm2214_vm15, %v2116_v16  ;;  %v2623_v16 = vshrl.u32 %v2512_v26, 16 }
 0x145   : > { %v2118_v45 = vpop.permute.xlu1 %2117  ;;  %2397 = vrot.lane.b32.xlu0 %v2286_v63, %s6488_s21  ;;  %v2615_v63 = vrot.slane %v2613_v49, 4  ;;  %v2607_v43 = vrot.slane %v2606_v40, 4  ;;  %v2669_v49 = vshll.u32 %v2517_v48, 16 }
 0x146   : > { %2228 = vst.msk [vmem:[#allocation2 + $0x34] sm:$0xf] %vm2214_vm15, %v2118_v45  ;;  %v2625_v29 = vrot.slane %v2623_v16, 4  ;;  %v2521_v16 = vld [vmem:[%s6535_s17 + $0x4c] sm:$0xf] }
 0x147   : > { %2399 = vrot.lane.b32.xlu1 %v2287_v12, %s6488_s21  ;;  %v2120_v56 = vpop.permute.xlu0 %2119  ;;  %v2629_v12 = vshll.u32 %v2513_v0, 16  ;;  %v2616_v7 = vor.u32 %v2615_v63, %v7769_v37  ;;  %v2520_v63 = vld [vmem:[%s6535_s17 + $0x48] sm:$0xf] }
 0x148   : > { %2229 = vst.msk [vmem:[#allocation2 + $0x38] sm:$0xf] %vm2214_vm15, %v2120_v56  ;;  %v2297_v56 = vld [vmem:[%s6535_s17 + $0xac] sm:$0x3]  ;;  %v2703_v44 = vshrl.u32 %v2520_v63, 16 }
 0x149   : > { %v2122_v36 = vpop.permute.xlu1 %2121  ;;  %2401 = vrot.lane.b32.xlu0 %v2288_v38, %s6488_s21  ;;  %v2514_v38 = vld [vmem:[%s6535_s17 + $0x30] sm:$0xf]  ;;  %v2617_v39 = vrot.slane %v2616_v7, 4 }
 0x14a   : > { %2230 = vst.msk [vmem:[#allocation2 + $0x3c] sm:$0xf] %vm2214_vm15, %v2122_v36  ;;  %v2587_v36 = vrot.slane %v2586_v27, 4  ;;  %v2639_v8 = vshll.u32 %v2514_v38, 16 }
 0x14b   : > { %2403 = vrot.lane.b32.xlu1 %v2289_v14, %s6488_s21  ;;  %v2124_v21 = vpop.permute.xlu0 %2123  ;;  %v2562_v14 = vsel %vm7760_vm2, %v2557_v59, %v7737_v5  ;;  %v2689_v59 = vshll.u32 %v2519_v51, 16 }
 0x14c   : > { %2231 = vst.msk [vmem:[#allocation2 + $0x40] sm:$0xf] %vm2214_vm15, %v2124_v21  ;;  %v7782_v21 = vrot.slane %v2619_v3, 5  ;;  %v2592_v5 = vsel %vm7760_vm2, %v2587_v36, %v7755_v54  ;;  %v7805_v52 = vrot.slane %v2639_v8, 5  ;;  %v2713_v36 = vshrl.u32 %v2521_v16, 16 }
 0x14d   : > { %v2126_v4 = vpop.permute.xlu1 %2125  ;;  %2405 = vrot.lane.b32.xlu0 %v2290_v17, %s6488_s21  ;;  %v2596_v17 = vor.u32 %v2595_v6, %v7755_v54  ;;  %v2612_v6 = vsel %vm7760_vm2, %v2607_v43, %v7769_v37  ;;  %v7833_v37 = vrot.slane %v2669_v49, 5  ;;  %v2523_v8 = vld [vmem:[%s6535_s17 + $0x54] sm:$0xf] }
 0x14e   : > { %2232 = vst.msk [vmem:[#allocation2 + $0x44] sm:$0xf] %vm2214_vm15, %v2126_v4  ;;  %v2643_v4 = vshrl.u32 %v2514_v38, 16  ;;  %v2626_v20 = vor.u32 %v2625_v29, %v7782_v21  ;;  %v2622_v27 = vsel %vm7760_vm2, %v2617_v39, %v7782_v21  ;;  %v2522_v29 = vld [vmem:[%s6535_s17 + $0x50] sm:$0xf] }
 0x14f   : > { %2407 = vrot.lane.b32.xlu1 %v2291_v28, %s6488_s21  ;;  %v2128_v60 = vpop.permute.xlu0 %2127  ;;  %v7787_v28 = vrot.slane %v2629_v12, 5  ;;  %v2597_v41 = vrot.slane %v2596_v17, 4 }
 0x150   : > { %2233 = vst.msk [vmem:[#allocation2 + $0x48] sm:$0xf] %vm2214_vm15, %v2128_v60  ;;  %v2582_v60 = vsel %vm7760_vm2, %v2577_v10, %v7745_v15  ;;  %v2645_v50 = vrot.slane %v2643_v4, 4  ;;  %v2627_v62 = vrot.slane %v2626_v20, 4  ;;  %v2699_v10 = vshll.u32 %v2520_v63, 16 }
 0x151   : > { %v2130_v31 = vpop.permute.xlu1 %2129  ;;  %2409 = vrot.lane.b32.xlu0 %v2292_v32, %s6488_s21  ;;  %v2659_v32 = vshll.u32 %v2516_v19, 16  ;;  %v2636_v15 = vor.u32 %v2635_v13, %v7787_v28  ;;  %v2602_v54 = vsel %vm7760_vm2, %v2597_v41, %v7765_v11  ;;  %v2656_v11 = vor.u32 %v2655_v18, %v7810_v30 }
 0x152   : > { %2234 = vst.msk [vmem:[#allocation2 + $0x4c] sm:$0xf] %vm2214_vm15, %v2130_v31  ;;  %v2632_v40 = vsel %vm7760_vm2, %v2627_v62, %v7787_v28  ;;  %v7857_v28 = vrot.slane %v2699_v10, 5  ;;  %v2723_v41 = vshrl.u32 %v2522_v29, 16 }
 0x153   : > { %2411 = vrot.lane.b32.xlu1 %v2293_v57, %s6488_s21  ;;  %v2132_v46 = vpop.permute.xlu0 %2131  ;;  %v2663_v57 = vshrl.u32 %v2516_v19, 16  ;;  %v7813_v26 = vrot.slane %v2659_v32, 5  ;;  %v2637_v3 = vrot.slane %v2636_v15, 4  ;;  %v2657_v7 = vrot.slane %v2656_v11, 4 }
 0x154   : > { %2235 = vst.msk [vmem:[#allocation2 + $0x50] sm:$0xf] %vm2214_vm15, %v2132_v46  ;;  %v2673_v46 = vshrl.u32 %v2517_v48, 16  ;;  %v2705_v32 = vrot.slane %v2703_v44, 4  ;;  %v2729_v48 = vshll.u32 %v2523_v8, 16 }
 0x155   : > { %v2134_v47 = vpop.permute.xlu1 %2133  ;;  %2413 = vrot.lane.b32.xlu0 %v2294_v53, %s6488_s21  ;;  %v2518_v53 = vld [vmem:[%s6535_s17 + $0x40] sm:$0xf]  ;;  %v2665_v1 = vrot.slane %v2663_v57, 4  ;;  %v2642_v21 = vsel %vm7760_vm2, %v2637_v3, %v7805_v52  ;;  %v2662_v51 = vsel %vm7760_vm2, %v2657_v7, %v7813_v26  ;;  %v2529_v44 = vld [vmem:[%s6535_s17 + $0x6c] sm:$0xf] }
 0x156   : > { %2236 = vst.msk [vmem:[#allocation2 + $0x54] sm:$0xf] %vm2214_vm15, %v2134_v47  ;;  %v2679_v0 = vshll.u32 %v2518_v53, 16 }
 0x157   : > { %2415 = vrot.lane.b32.xlu1 %v2295_v9, %s6488_s21  ;;  %v2136_v45 = vpop.permute.xlu0 %2135  ;;  %v2683_v9 = vshrl.u32 %v2518_v53, 16  ;;  %v2666_v12 = vor.u32 %v2665_v1, %v7813_v26  ;;  %v2733_v53 = vshrl.u32 %v2523_v8, 16 }
 0x158   : > { %2237 = vst.msk [vmem:[#allocation2 + $0x58] sm:$0xf] %vm2214_vm15, %v2136_v45  ;;  %v2675_v45 = vrot.slane %v2673_v46, 4  ;;  %v7836_v38 = vrot.slane %v2679_v0, 5  ;;  %v2526_v46 = vld [vmem:[%s6535_s17 + $0x60] sm:$0xf] }
 0x159   : > { %v2138_v58 = vpop.permute.xlu1 %2137  ;;  %2417 = vrot.lane.b32.xlu0 %v2296_v33, %s6488_s21  ;;  %v2646_v33 = vor.u32 %v2645_v50, %v7805_v52  ;;  %v2667_v13 = vrot.slane %v2666_v12, 4  ;;  %v2525_v50 = vld [vmem:[%s6535_s17 + $0x5c] sm:$0xf]  ;;  %v2735_v61 = vrot.slane %v2733_v53, 4  ;;  %v2759_v3 = vshll.u32 %v2526_v46, 16 }
 0x15a   : > { %2238 = vst.msk [vmem:[#allocation2 + $0x5c] sm:$0xf] %vm2214_vm15, %v2138_v58  ;;  %v2709_v58 = vshll.u32 %v2521_v16, 16  ;;  %v2676_v4 = vor.u32 %v2675_v45, %v7833_v37 }
 0x15b   : > { %2419 = vrot.lane.b32.xlu1 %v2297_v56, %s6488_s21  ;;  %v2140_v55 = vpop.permute.xlu0 %2139  ;;  %v2685_v56 = vrot.slane %v2683_v9, 4  ;;  %v2647_v19 = vrot.slane %v2646_v33, 4  ;;  %v2725_v9 = vrot.slane %v2723_v41, 4  ;;  %v2763_v33 = vshrl.u32 %v2526_v46, 16 }
 0x15c   : > { %2239 = vst.msk [vmem:[#allocation2 + $0x60] sm:$0xf] %vm2214_vm15, %v2140_v55  ;;  %v7859_v57 = vrot.slane %v2709_v58, 5  ;;  %v2677_v15 = vrot.slane %v2676_v4, 4 }
 0x15d   : > { %v2142_v42 = vpop.permute.xlu1 %2141  ;;  %2958 = vrot.lane.b32.xlu0 %v2562_v14, %s6489_s22  ;;  %v7838_v14 = vrot.slane %v2689_v59, 5  ;;  %v2686_v2 = vor.u32 %v2685_v56, %v7836_v38  ;;  %v2652_v43 = vsel %vm7760_vm2, %v2647_v19, %v7810_v30  ;;  %v2706_v30 = vor.u32 %v2705_v32, %v7857_v28  ;;  %v2530_v32 = vld [vmem:[%s6535_s17 + $0x70] sm:$0xf] }
 0x15e   : > { %2240 = vst.msk [vmem:[#allocation2 + $0x64] sm:$0xf] %vm2214_vm15, %v2142_v42  ;;  %v2715_v42 = vrot.slane %v2713_v36, 4  ;;  %v7882_v59 = vrot.slane %v2729_v48, 5  ;;  %v2682_v16 = vsel %vm7760_vm2, %v2677_v15, %v7836_v38  ;;  %v2803_v15 = vshrl.u32 %v2530_v32, 16 }
 0x15f   : > { %2960 = vrot.lane.b32.xlu1 %v2572_v34, %s6489_s22  ;;  %v2144_v31 = vpop.permute.xlu0 %2143  ;;  %v2696_v25 = vor.u32 %v2695_v23, %v7838_v14  ;;  %v2524_v34 = vld [vmem:[%s6535_s17 + $0x58] sm:$0xf]  ;;  %v2687_v18 = vrot.slane %v2686_v2, 4  ;;  %v2707_v56 = vrot.slane %v2706_v30, 4 }
 0x160   : > { %2241 = vst.msk [vmem:[#allocation2 + $0x68] sm:$0xf] %vm2214_vm15, %v2144_v31  ;;  %v2739_v39 = vshll.u32 %v2524_v34, 16  ;;  %v2743_v20 = vshrl.u32 %v2524_v34, 16  ;;  %v2672_v31 = vsel %vm7760_vm2, %v2667_v13, %v7833_v37  ;;  %v2716_v49 = vor.u32 %v2715_v42, %v7859_v57  ;;  %v2528_v37 = vld [vmem:[%s6535_s17 + $0x68] sm:$0xf] }
 0x161   : > { %v2146_v24 = vpop.permute.xlu1 %2145  ;;  %2962 = vrot.lane.b32.xlu0 %v2582_v60, %s6489_s22  ;;  %v2697_v1 = vrot.slane %v2696_v25, 4  ;;  %v2692_v11 = vsel %vm7760_vm2, %v2687_v18, %v7838_v14  ;;  %v2736_v38 = vor.u32 %v2735_v61, %v7882_v59  ;;  %v2779_v7 = vshll.u32 %v2528_v37, 16  ;;  %v2531_v42 = vld [vmem:[%s6535_s17 + $0x74] sm:$0xf] }
 0x162   : > { %2242 = vst.msk [vmem:[#allocation2 + $0x6c] sm:$0xf] %vm2214_vm15, %v2146_v24  ;;  %v2527_v24 = vld [vmem:[%s6535_s17 + $0x64] sm:$0xf]  ;;  %v2717_v23 = vrot.slane %v2716_v49, 4  ;;  %v2783_v8 = vshrl.u32 %v2528_v37, 16  ;;  %v2712_v2 = vsel %vm7760_vm2, %v2707_v56, %v7859_v57 }
 0x163   : > { %2964 = vrot.lane.b32.xlu1 %v2592_v5, %s6489_s22  ;;  %v2148_v47 = vpop.permute.xlu0 %2147  ;;  %v2719_v5 = vshll.u32 %v2522_v29, 16  ;;  %v2769_v63 = vshll.u32 %v2527_v24, 16  ;;  %v2773_v12 = vshrl.u32 %v2527_v24, 16  ;;  %v2793_v13 = vshrl.u32 %v2529_v44, 16 }
 0x164   : > { %2243 = vst.msk [vmem:[#allocation2 + $0x70] sm:$0xf] %vm2214_vm15, %v2148_v47  ;;  %v2749_v47 = vshll.u32 %v2525_v50, 16  ;;  %v7926_v53 = vrot.slane %v2779_v7, 5  ;;  %v2813_v18 = vshrl.u32 %v2531_v42, 16 }
 0x165   : > { %v2150_v22 = vpop.permute.xlu1 %2149  ;;  %2966 = vrot.lane.b32.xlu0 %v2602_v54, %s6489_s22  ;;  %v7880_v26 = vrot.slane %v2719_v5, 5  ;;  %v7885_v54 = vrot.slane %v2739_v39, 5  ;;  %v7910_v19 = vrot.slane %v2769_v63, 5  ;;  %v2775_v29 = vrot.slane %v2773_v12, 4  ;;  %v2537_v7 = vld [vmem:[%s6535_s17 + $0x8c] sm:$0xf] }
 0x166   : > { %2244 = vst.msk [vmem:[#allocation2 + $0x74] sm:$0xf] %vm2214_vm15, %v2150_v22  ;;  %v2702_v22 = vsel %vm7760_vm2, %v2697_v1, %v7857_v28  ;;  %v7905_v58 = vrot.slane %v2749_v47, 5  ;;  %v2737_v28 = vrot.slane %v2736_v38, 4  ;;  %v2785_v39 = vrot.slane %v2783_v8, 4 }
 0x167   : > { %2968 = vrot.lane.b32.xlu1 %v2612_v6, %s6489_s22  ;;  %v2152_v17 = vpop.permute.xlu0 %2151  ;;  %v2745_v6 = vrot.slane %v2743_v20, 4  ;;  %v2726_v10 = vor.u32 %v2725_v9, %v7880_v26  ;;  %v2722_v25 = vsel %vm7760_vm2, %v2717_v23, %v7880_v26  ;;  %v2776_v57 = vor.u32 %v2775_v29, %v7910_v19  ;;  %v2533_v9 = vld [vmem:[%s6535_s17 + $0x7c] sm:$0xf] }
 0x168   : > { %2245 = vst.msk [vmem:[#allocation2 + $0x78] sm:$0xf] %vm2214_vm15, %v2152_v17  ;;  %v2742_v24 = vsel %vm7760_vm2, %v2737_v28, %v7885_v54  ;;  %v2815_v63 = vrot.slane %v2813_v18, 4  ;;  %v2829_v12 = vshll.u32 %v2533_v9, 16  ;;  %v2833_v37 = vshrl.u32 %v2533_v9, 16 }
 0x169   : > { %v2154_v55 = vpop.permute.xlu1 %2153  ;;  %2970 = vrot.lane.b32.xlu0 %v2622_v27, %s6489_s22  ;;  %v2753_v27 = vshrl.u32 %v2525_v50, 16  ;;  %v2746_v14 = vor.u32 %v2745_v6, %v7885_v54  ;;  %v2727_v34 = vrot.slane %v2726_v10, 4  ;;  %v2809_v50 = vshll.u32 %v2531_v42, 16 }
 0x16a   : > { %2246 = vst.msk [vmem:[#allocation2 + $0x7c] sm:$0xf] %vm2214_vm15, %v2154_v55  ;;  %v2789_v55 = vshll.u32 %v2529_v44, 16  ;;  %v2777_v6 = vrot.slane %v2776_v57, 4  ;;  %v2805_v54 = vrot.slane %v2803_v15, 4  ;;  %v7977_v29 = vrot.slane %v2829_v12, 5 }
 0x16b   : > { %2972 = vrot.lane.b32.xlu1 %v2632_v40, %s6489_s22  ;;  %v2156_v60 = vpop.permute.xlu0 %2155  ;;  %v2755_v36 = vrot.slane %v2753_v27, 4  ;;  %v7908_v40 = vrot.slane %v2759_v3, 5  ;;  %v2747_v5 = vrot.slane %v2746_v14, 4  ;;  %v2732_v1 = vsel %vm7760_vm2, %v2727_v34, %v7882_v59  ;;  %v2534_v27 = vld [vmem:[%s6535_s17 + $0x80] sm:$0xf] }
 0x16c   : > { %2247 = vst.msk [vmem:[#allocation2 + $0x80] sm:$0xf] %vm2214_vm15, %v2156_v60  ;;  %v7931_v20 = vrot.slane %v2789_v55, 5  ;;  %v2786_v59 = vor.u32 %v2785_v39, %v7926_v53  ;;  %v2843_v56 = vshrl.u32 %v2534_v27, 16  ;;  %v2535_v44 = vld [vmem:[%s6535_s17 + $0x84] sm:$0xf]  ;;  %v2782_v14 = vsel %vm7760_vm2, %v2777_v6, %v7926_v53 }
 0x16d   : > { %v2158_v52 = vpop.permute.xlu1 %2157  ;;  %2974 = vrot.lane.b32.xlu0 %v2642_v21, %s6489_s22  ;;  %v2765_v21 = vrot.slane %v2763_v33, 4  ;;  %v2756_v41 = vor.u32 %v2755_v36, %v7905_v58  ;;  %v7953_v33 = vrot.slane %v2809_v50, 5  ;;  %v2835_v8 = vrot.slane %v2833_v37, 4  ;;  %v2538_v57 = vld [vmem:[%s6535_s17 + $0x90] sm:$0xf] }
 0x16e   : > { %2248 = vst.msk [vmem:[#allocation2 + $0x84] sm:$0xf] %vm2214_vm15, %v2158_v52  ;;  %v2795_v52 = vrot.slane %v2793_v13, 4  ;;  %v2873_v42 = vshrl.u32 %v2537_v7, 16  ;;  %v2539_v39 = vld [vmem:[%s6535_s17 + $0x94] sm:$0xf] }
 0x16f   : > { %2976 = vrot.lane.b32.xlu1 %v2652_v43, %s6489_s22  ;;  %v2160_v0 = vpop.permute.xlu0 %2159  ;;  %v2766_v48 = vor.u32 %v2765_v21, %v7908_v40  ;;  %v2532_v43 = vld [vmem:[%s6535_s17 + $0x78] sm:$0xf]  ;;  %v2757_v26 = vrot.slane %v2756_v41, 4  ;;  %v2536_v21 = vld [vmem:[%s6535_s17 + $0x88] sm:$0xf]  ;;  %v2893_v9 = vshrl.u32 %v2539_v39, 16 }
 0x170   : > { %2249 = vst.msk [vmem:[#allocation2 + $0x88] sm:$0xf] %vm2214_vm15, %v2160_v0  ;;  %v2819_v30 = vshll.u32 %v2532_v43, 16  ;;  %v2823_v49 = vshrl.u32 %v2532_v43, 16  ;;  %v2752_v0 = vsel %vm7760_vm2, %v2747_v5, %v7905_v58  ;;  %v2796_v47 = vor.u32 %v2795_v52, %v7931_v20  ;;  %v2540_v50 = vld [vmem:[%s6535_s17 + $0x98] sm:$0xf] }
 0x171   : > { %v2162_v62 = vpop.permute.xlu1 %2161  ;;  %2978 = vrot.lane.b32.xlu0 %v2662_v51, %s6489_s22  ;;  %v2767_v61 = vrot.slane %v2766_v48, 4  ;;  %v2762_v23 = vsel %vm7760_vm2, %v2757_v26, %v7908_v40  ;;  %v2787_v58 = vrot.slane %v2786_v59, 4  ;;  %v2816_v40 = vor.u32 %v2815_v63, %v7953_v33  ;;  %v2542_v37 = vld [vmem:[%s6535_s17 + $0xa0] sm:$0xf] }
 0x172   : > { %2250 = vst.msk [vmem:[#allocation2 + $0x8c] sm:$0xf] %vm2214_vm15, %v2162_v62  ;;  %v2797_v36 = vrot.slane %v2796_v47, 4  ;;  %v2859_v34 = vshll.u32 %v2536_v21, 16  ;;  %v2863_v28 = vshrl.u32 %v2536_v21, 16  ;;  %v2836_v43 = vor.u32 %v2835_v8, %v7977_v29 }
 0x173   : > { %2980 = vrot.lane.b32.xlu1 %v2672_v31, %s6489_s22  ;;  %v2164_v45 = vpop.permute.xlu0 %2163  ;;  %v2799_v31 = vshll.u32 %v2530_v32, 16  ;;  %v2772_v10 = vsel %vm7760_vm2, %v2767_v61, %v7910_v19  ;;  %v2869_v32 = vshll.u32 %v2537_v7, 16  ;;  %v2792_v5 = vsel %vm7760_vm2, %v2787_v58, %v7931_v20 }
 0x174   : > { %2251 = vst.msk [vmem:[#allocation2 + $0x90] sm:$0xf] %vm2214_vm15, %v2164_v45  ;;  %v2817_v53 = vrot.slane %v2816_v40, 4  ;;  %v8000_v18 = vrot.slane %v2859_v34, 5  ;;  %v2889_v26 = vshll.u32 %v2539_v39, 16  ;;  %v2899_v6 = vshll.u32 %v2540_v50, 16 }
 0x175   : > { %v2166_v17 = vpop.permute.xlu1 %2165  ;;  %2982 = vrot.lane.b32.xlu0 %v2682_v16, %s6489_s22  ;;  %v7951_v3 = vrot.slane %v2799_v31, 5  ;;  %v7956_v16 = vrot.slane %v2819_v30, 5  ;;  %v8002_v30 = vrot.slane %v2869_v32, 5  ;;  %v2903_v59 = vshrl.u32 %v2540_v50, 16  ;;  %v2543_v40 = vld [vmem:[%s6535_s17 + $0xa4] sm:$0xf] }
 0x176   : > { %2252 = vst.msk [vmem:[#allocation2 + $0x94] sm:$0xf] %vm2214_vm15, %v2166_v17  ;;  %v3124_v50 = vld [vmem:[%s6535_s17 + $0x14] sm:$0xf] }
 0x177   : > { %2984 = vrot.lane.b32.xlu1 %v2692_v11, %s6489_s22  ;;  %v2168_v4 = vpop.permute.xlu0 %2167  ;;  %v2825_v11 = vrot.slane %v2823_v49, 4  ;;  %v2806_v17 = vor.u32 %v2805_v54, %v7951_v3  ;;  %v2802_v41 = vsel %vm7760_vm2, %v2797_v36, %v7951_v3  ;;  %v2875_v49 = vrot.slane %v2873_v42, 4  ;;  %v2541_v54 = vld [vmem:[%s6535_s17 + $0x9c] sm:$0xf] }
 0x178   : > { %2253 = vst.msk [vmem:[#allocation2 + $0x98] sm:$0xf] %vm2214_vm15, %v2168_v4  ;;  %v2845_v4 = vrot.slane %v2843_v56, 4  ;;  %v2837_v3 = vrot.slane %v2836_v43, 4  ;;  %v8025_v56 = vrot.slane %v2889_v26, 5  ;;  %v2919_v36 = vshll.u32 %v2542_v37, 16 }
 0x179   : > { %v2170_v60 = vpop.permute.xlu1 %2169  ;;  %2986 = vrot.lane.b32.xlu0 %v2702_v22, %s6489_s22  ;;  %v2839_v22 = vshll.u32 %v2534_v27, 16  ;;  %v2826_v19 = vor.u32 %v2825_v11, %v7956_v16  ;;  %v2807_v48 = vrot.slane %v2806_v17, 4  ;;  %v2822_v27 = vsel %vm7760_vm2, %v2817_v53, %v7956_v16 }
 0x17a   : > { %2254 = vst.msk [vmem:[#allocation2 + $0x9c] sm:$0xf] %vm2214_vm15, %v2170_v60  ;;  %v2876_v12 = vor.u32 %v2875_v49, %v8002_v30  ;;  %v2923_v17 = vshrl.u32 %v2542_v37, 16  ;;  %v8048_v42 = vrot.slane %v2919_v36, 5  ;;  %vm3122_vm15 = vcmask 386368  }
 0x17b   : > { %2988 = vrot.lane.b32.xlu1 %v2712_v2, %s6489_s22  ;;  %v2172_v51 = vpop.permute.xlu0 %2171  ;;  %v7980_v13 = vrot.slane %v2839_v22, 5  ;;  %v2849_v2 = vshll.u32 %v2535_v44, 16  ;;  %v2812_v61 = vsel %vm7760_vm2, %v2807_v48, %v7953_v33 }
 0x17c   : > { %2256 = vst.msk [vmem:[#allocation2 + $0xa0] sm:$0x3] %vm2255_vm3, %v2172_v51  ;;  %v2827_v51 = vrot.slane %v2826_v19, 4  ;;  %vm4689_vm3 = vcmask 585216  }
 0x17d   : > { %v2340_v46 = vpop.permute.xlu1 %2339  ;;  %2990 = vrot.lane.b32.xlu0 %v2722_v25, %s6489_s22  ;;  %v2853_v25 = vshrl.u32 %v2535_v44, 16  ;;  %v2846_v31 = vor.u32 %v2845_v4, %v7980_v13  ;;  %v7996_v15 = vrot.slane %v2849_v2, 5  ;;  %v2905_v44 = vrot.slane %v2903_v59, 4  ;;  %v2544_v2 = vld [vmem:[%s6535_s17 + $0xa8] sm:$0xf] }
 0x17e   : > { %2463 = vst.msk [vmem:[#allocation2] sm:$0xf] %vm2462_vm4, %v2340_v46  ;;  %v2842_v21 = vsel %vm7760_vm2, %v2837_v3, %v7980_v13  ;;  %v2939_v53 = vshll.u32 %v2544_v2, 16  ;;  %v2943_v43 = vshrl.u32 %v2544_v2, 16  ;;  %v3166_v59 = vshrl.u32 %v3124_v50, 16 }
 0x17f   : > { %2992 = vrot.lane.b32.xlu1 %v2732_v1, %s6489_s22  ;;  %v2342_v62 = vpop.permute.xlu0 %2341  ;;  %v2855_v20 = vrot.slane %v2853_v25, 4  ;;  %v2865_v1 = vrot.slane %v2863_v28, 4  ;;  %v2847_v63 = vrot.slane %v2846_v31, 4 }
 0x180   : > { %2464 = vst.msk [vmem:[#allocation2 + $0x4] sm:$0xf] %vm2462_vm4, %v2342_v62  ;;  %v2832_v62 = vsel %vm7760_vm2, %v2827_v51, %v7977_v29  ;;  %v2945_v26 = vrot.slane %v2943_v43, 4 }
 0x181   : > { %v2344_v45 = vpop.permute.xlu1 %2343  ;;  %2994 = vrot.lane.b32.xlu0 %v2742_v24, %s6489_s22  ;;  %v2879_v24 = vshll.u32 %v2538_v57, 16  ;;  %v2856_v33 = vor.u32 %v2855_v20, %v7996_v15  ;;  %v2866_v11 = vor.u32 %v2865_v1, %v8000_v18  ;;  %v2852_v29 = vsel %vm7760_vm2, %v2847_v63, %v7996_v15 }
 0x182   : > { %2465 = vst.msk [vmem:[#allocation2 + $0x8] sm:$0xf] %vm2462_vm4, %v2344_v45 }
 0x183   : > { %2996 = vrot.lane.b32.xlu1 %v2752_v0, %s6489_s22  ;;  %v2346_v38 = vpop.permute.xlu0 %2345  ;;  %v2883_v0 = vshrl.u32 %v2538_v57, 16  ;;  %v8023_v16 = vrot.slane %v2879_v24, 5  ;;  %v2857_v7 = vrot.slane %v2856_v33, 4  ;;  %v2867_v8 = vrot.slane %v2866_v11, 4 }
 0x184   : > { %2466 = vst.msk [vmem:[#allocation2 + $0xc] sm:$0xf] %vm2462_vm4, %v2346_v38  ;;  %v2909_v38 = vshll.u32 %v2541_v54, 16 }
 0x185   : > { %v2348_v55 = vpop.permute.xlu1 %2347  ;;  %2998 = vrot.lane.b32.xlu0 %v2762_v23, %s6489_s22  ;;  %v2885_v22 = vrot.slane %v2883_v0, 4  ;;  %v2895_v23 = vrot.slane %v2893_v9, 4  ;;  %v2862_v48 = vsel %vm7760_vm2, %v2857_v7, %v8000_v18  ;;  %v2872_v39 = vsel %vm7760_vm2, %v2867_v8, %v8002_v30  ;;  %v3125_v18 = vld [vmem:[%s6535_s17 + $0x18] sm:$0xf] }
 0x186   : > { %2467 = vst.msk [vmem:[#allocation2 + $0x10] sm:$0xf] %vm2462_vm4, %v2348_v55  ;;  %v2877_v55 = vrot.slane %v2876_v12, 4  ;;  %v8045_v34 = vrot.slane %v2909_v38, 5  ;;  %v8071_v0 = vrot.slane %v2939_v53, 5  ;;  %v3179_v3 = vshrl.u32 %v3125_v18, 16 }
 0x187   : > { %3000 = vrot.lane.b32.xlu1 %v2772_v10, %s6489_s22  ;;  %v2350_v60 = vpop.permute.xlu0 %2349  ;;  %v8028_v10 = vrot.slane %v2899_v6, 5  ;;  %v2886_v4 = vor.u32 %v2885_v22, %v8023_v16  ;;  %v2896_v25 = vor.u32 %v2895_v23, %v8025_v56  ;;  %v3168_v38 = vrot.slane %v3166_v59, 4 }
 0x188   : > { %2468 = vst.msk [vmem:[#allocation2 + $0x14] sm:$0xf] %vm2462_vm4, %v2350_v60  ;;  %v2925_v60 = vrot.slane %v2923_v17, 4  ;;  %v2882_v51 = vsel %vm7760_vm2, %v2877_v55, %v8023_v16  ;;  %v2946_v22 = vor.u32 %v2945_v26, %v8071_v0  ;;  %v3181_v17 = vrot.slane %v3179_v3, 4 }
 0x189   : > { %v2352_v52 = vpop.permute.xlu1 %2351  ;;  %3002 = vrot.lane.b32.xlu0 %v2782_v14, %s6489_s22  ;;  %v2913_v14 = vshrl.u32 %v2541_v54, 16  ;;  %v2906_v13 = vor.u32 %v2905_v44, %v8028_v10  ;;  %v2887_v31 = vrot.slane %v2886_v4, 4  ;;  %v2897_v15 = vrot.slane %v2896_v25, 4  ;;  %v3126_v54 = vld [vmem:[%s6535_s17 + $0x1c] sm:$0xf] }
 0x18a   : > { %2469 = vst.msk [vmem:[#allocation2 + $0x18] sm:$0xf] %vm2462_vm4, %v2352_v52  ;;  %v2545_v52 = vld [vmem:[%s6535_s17 + $0xac] sm:$0x7]  ;;  %v3128_v44 = vld [vmem:[%s6535_s17 + $0x24] sm:$0xf] }
 0x18b   : > { %3004 = vrot.lane.b32.xlu1 %v2792_v5, %s6489_s22  ;;  %v2354_v46 = vpop.permute.xlu0 %2353  ;;  %v2915_v28 = vrot.slane %v2913_v14, 4  ;;  %v2929_v5 = vshll.u32 %v2543_v40, 16  ;;  %v2907_v49 = vrot.slane %v2906_v13, 4  ;;  %v2949_v9 = vshll.u32 %v2545_v52, 16  ;;  %v3129_v25 = vld [vmem:[%s6535_s17 + $0x28] sm:$0xf] }
 0x18c   : > { %2470 = vst.msk [vmem:[#allocation2 + $0x1c] sm:$0xf] %vm2462_vm4, %v2354_v46  ;;  %v2926_v46 = vor.u32 %v2925_v60, %v8048_v42  ;;  %v2902_v33 = vsel %vm7760_vm2, %v2897_v15, %v8028_v10  ;;  %v3185_v36 = vshll.u32 %v3126_v54, 16  ;;  %v3209_v8 = vshrl.u32 %v3128_v44, 16 }
 0x18d   : > { %v2356_v47 = vpop.permute.xlu1 %2355  ;;  %3006 = vrot.lane.b32.xlu0 %v2802_v41, %s6489_s22  ;;  %v2933_v41 = vshrl.u32 %v2543_v40, 16  ;;  %v2916_v20 = vor.u32 %v2915_v28, %v8045_v34  ;;  %v8068_v30 = vrot.slane %v2929_v5, 5  ;;  %v2912_v11 = vsel %vm7760_vm2, %v2907_v49, %v8045_v34  ;;  %v3130_v5 = vld [vmem:[%s6535_s17 + $0x2c] sm:$0xf] }
 0x18e   : > { %2471 = vst.msk [vmem:[#allocation2 + $0x20] sm:$0xf] %vm2462_vm4, %v2356_v47  ;;  %v3169_v47 = vshll.u32 %v3124_v50, 16  ;;  %v2927_v37 = vrot.slane %v2926_v46, 4  ;;  %v2947_v34 = vrot.slane %v2946_v22, 4  ;;  %v8108_v60 = vrot.slane %v3185_v36, 5 }
 0x18f   : > { %3008 = vrot.lane.b32.xlu1 %v2812_v61, %s6489_s22  ;;  %v2358_v45 = vpop.permute.xlu0 %2357  ;;  %v2935_v24 = vrot.slane %v2933_v41, 4  ;;  %v2953_v61 = vshrl.u32 %v2545_v52, 16  ;;  %v2917_v12 = vrot.slane %v2916_v20, 4  ;;  %v3215_v52 = vshll.u32 %v3129_v25, 16  ;;  %v3131_v50 = vld [vmem:[%s6535_s17 + $0x30] sm:$0xf] }
 0x190   : > { %2472 = vst.msk [vmem:[#allocation2 + $0x24] sm:$0xf] %vm2462_vm4, %v2358_v45  ;;  %v3127_v45 = vld [vmem:[%s6535_s17 + $0x20] sm:$0xf]  ;;  %v3171_v14 = vrot.slane %v3169_v47, 5  ;;  %v2932_v4 = vsel %vm7760_vm2, %v2927_v37, %v8068_v30  ;;  %v3225_v15 = vshll.u32 %v3130_v5, 16 }
 0x191   : > { %v2360_v58 = vpop.permute.xlu1 %2359  ;;  %3010 = vrot.lane.b32.xlu0 %v2822_v27, %s6489_s22  ;;  %v3175_v27 = vshll.u32 %v3125_v18, 16  ;;  %v2936_v16 = vor.u32 %v2935_v24, %v8068_v30  ;;  %v2955_v23 = vrot.slane %v2953_v61, 4  ;;  %v3195_v7 = vshll.u32 %v3127_v45, 16 }
 0x192   : > { %2473 = vst.msk [vmem:[#allocation2 + $0x28] sm:$0xf] %vm2462_vm4, %v2360_v58  ;;  %v3199_v40 = vshrl.u32 %v3127_v45, 16  ;;  %v2922_v55 = vsel %vm7760_vm2, %v2917_v12, %v8048_v42  ;;  %v3229_v20 = vshrl.u32 %v3130_v5, 16  ;;  %v3235_v47 = vshll.u32 %v3131_v50, 16 }
 0x193   : > { %3012 = vrot.lane.b32.xlu1 %v2832_v62, %s6489_s22  ;;  %v2362_v19 = vpop.permute.xlu0 %2361  ;;  %v2892_v62 = vsel %vm7760_vm2, %v2887_v31, %v8025_v56  ;;  %v8090_v56 = vrot.slane %v2949_v9, 5  ;;  %v8094_v58 = vrot.slane %v3175_v27, 5  ;;  %v2937_v2 = vrot.slane %v2936_v16, 4  ;;  %v3134_v16 = vld [vmem:[%s6535_s17 + $0x3c] sm:$0xf] }
 0x194   : > { %2474 = vst.msk [vmem:[#allocation2 + $0x2c] sm:$0xf] %vm2462_vm4, %v2362_v19  ;;  %v3201_v53 = vrot.slane %v3199_v40, 4  ;;  %v8136_v27 = vrot.slane %v3225_v15, 5  ;;  %v3239_v3 = vshrl.u32 %v3131_v50, 16 }
 0x195   : > { %v2364_v32 = vpop.permute.xlu1 %2363  ;;  %3014 = vrot.lane.b32.xlu0 %v2842_v21, %s6489_s22  ;;  %v3189_v21 = vshrl.u32 %v3126_v54, 16  ;;  %v2956_v28 = vor.u32 %v2955_v23, %v8090_v56  ;;  %v3182_v42 = vor.u32 %v3181_v17, %v8094_v58  ;;  %v2942_v31 = vsel %vm7760_vm2, %v2937_v2, %v8071_v0  ;;  %v3132_v0 = vld [vmem:[%s6535_s17 + $0x34] sm:$0xf] }
 0x196   : > { %2475 = vst.msk [vmem:[#allocation2 + $0x30] sm:$0xf] %vm2462_vm4, %v2364_v32  ;;  %v3172_v32 = vor.u32 %v3171_v14, %v3168_v38  ;;  %v3135_v38 = vld [vmem:[%s6535_s17 + $0x40] sm:$0xf] }
 0x197   : > { %3016 = vrot.lane.b32.xlu1 %v2852_v29, %s6489_s22  ;;  %v2366_v57 = vpop.permute.xlu0 %2365  ;;  %v3205_v29 = vshll.u32 %v3128_v44, 16  ;;  %v3191_v41 = vrot.slane %v3189_v21, 4  ;;  %v2957_v49 = vrot.slane %v2956_v28, 4  ;;  %v3183_v30 = vrot.slane %v3182_v42, 4  ;;  %v3137_v28 = vld [vmem:[%s6535_s17 + $0x48] sm:$0xf] }
 0x198   : > { %2476 = vst.msk [vmem:[#allocation2 + $0x34] sm:$0xf] %vm2462_vm4, %v2366_v57  ;;  %v3173_v46 = vrot.slane %v3172_v32, 4  ;;  %v3295_v50 = vshll.u32 %v3137_v28, 16 }
 0x199   : > { %v2368_v1 = vpop.permute.xlu1 %2367  ;;  %3018 = vrot.lane.b32.xlu0 %v2862_v48, %s6489_s22  ;;  %v8113_v48 = vrot.slane %v3195_v7, 5  ;;  %v8116_v57 = vrot.slane %v3205_v29, 5  ;;  %v3192_v24 = vor.u32 %v3191_v41, %v8108_v60  ;;  %v3188_v37 = vsel %vm7760_vm2, %v3183_v30, %v8108_v60  ;;  %v3138_v41 = vld [vmem:[%s6535_s17 + $0x4c] sm:$0xf] }
 0x19a   : > { %2477 = vst.msk [vmem:[#allocation2 + $0x38] sm:$0xf] %vm2462_vm4, %v2368_v1  ;;  %v2952_v1 = vsel %vm7760_vm2, %v2947_v34, %v8090_v56  ;;  %v3178_v12 = vsel %vm7760_vm2, %v3173_v46, %v8094_v58  ;;  %v3241_v58 = vrot.slane %v3239_v3, 4  ;;  %v3269_v29 = vshrl.u32 %v3134_v16, 16  ;;  %v3136_v34 = vld [vmem:[%s6535_s17 + $0x44] sm:$0xf] }
 0x19b   : > { %3020 = vrot.lane.b32.xlu1 %v2872_v39, %s6489_s22  ;;  %v2370_v6 = vpop.permute.xlu0 %2369  ;;  %v3211_v39 = vrot.slane %v3209_v8, 4  ;;  %v3202_v26 = vor.u32 %v3201_v53, %v8113_v48  ;;  %v3193_v45 = vrot.slane %v3192_v24, 4  ;;  %v3289_v15 = vshrl.u32 %v3136_v34, 16 }
 0x19c   : > { %2478 = vst.msk [vmem:[#allocation2 + $0x3c] sm:$0xf] %vm2462_vm4, %v2370_v6  ;;  %v8133_v6 = vrot.slane %v3215_v52, 5 }
 0x19d   : > { %v2372_v63 = vpop.permute.xlu1 %2371  ;;  %3022 = vrot.lane.b32.xlu0 %v2882_v51, %s6489_s22  ;;  %v3219_v51 = vshrl.u32 %v3129_v25, 16  ;;  %v3212_v61 = vor.u32 %v3211_v39, %v8116_v57  ;;  %v3203_v56 = vrot.slane %v3202_v26, 4  ;;  %v3198_v8 = vsel %vm7760_vm2, %v3193_v45, %v8113_v48 }
 0x19e   : > { %2479 = vst.msk [vmem:[#allocation2 + $0x40] sm:$0xf] %vm2462_vm4, %v2372_v63  ;;  %v3245_v63 = vshll.u32 %v3132_v0, 16  ;;  %v3271_v39 = vrot.slane %v3269_v29, 4 }
 0x19f   : > { %3024 = vrot.lane.b32.xlu1 %v2892_v62, %s6489_s22  ;;  %v2374_v10 = vpop.permute.xlu0 %2373  ;;  %v3221_v59 = vrot.slane %v3219_v51, 4  ;;  %v3231_v62 = vrot.slane %v3229_v20, 4  ;;  %v3213_v23 = vrot.slane %v3212_v61, 4  ;;  %v3208_v25 = vsel %vm7760_vm2, %v3203_v56, %v8116_v57  ;;  %v3139_v61 = vld [vmem:[%s6535_s17 + $0x50] sm:$0xf] }
 0x1a0   : > { %2480 = vst.msk [vmem:[#allocation2 + $0x44] sm:$0xf] %vm2462_vm4, %v2374_v10  ;;  %v8150_v10 = vrot.slane %v3235_v47, 5  ;;  %v8156_v7 = vrot.slane %v3245_v63, 5  ;;  %v3315_v45 = vshll.u32 %v3139_v61, 16 }
 0x1a1   : > { %v2376_v19 = vpop.permute.xlu1 %2375  ;;  %3026 = vrot.lane.b32.xlu0 %v2902_v33, %s6489_s22  ;;  %v3249_v33 = vshrl.u32 %v3132_v0, 16  ;;  %v3222_v44 = vor.u32 %v3221_v59, %v8133_v6  ;;  %v3232_v14 = vor.u32 %v3231_v62, %v8136_v27  ;;  %v3140_v62 = vld [vmem:[%s6535_s17 + $0x54] sm:$0xf] }
 0x1a2   : > { %2481 = vst.msk [vmem:[#allocation2 + $0x48] sm:$0xf] %vm2462_vm4, %v2376_v19  ;;  %v3265_v19 = vshll.u32 %v3134_v16, 16  ;;  %v3242_v60 = vor.u32 %v3241_v58, %v8150_v10  ;;  %v3319_v16 = vshrl.u32 %v3139_v61, 16  ;;  %v3325_v56 = vshll.u32 %v3140_v62, 16 }
 0x1a3   : > { %3028 = vrot.lane.b32.xlu1 %v2912_v11, %s6489_s22  ;;  %v2378_v13 = vpop.permute.xlu0 %2377  ;;  %v3133_v11 = vld [vmem:[%s6535_s17 + $0x38] sm:$0xf]  ;;  %v3251_v40 = vrot.slane %v3249_v33, 4  ;;  %v3223_v32 = vrot.slane %v3222_v44, 4  ;;  %v3233_v53 = vrot.slane %v3232_v14, 4 }
 0x1a4   : > { %2482 = vst.msk [vmem:[#allocation2 + $0x4c] sm:$0xf] %vm2462_vm4, %v2378_v13  ;;  %v3255_v36 = vshll.u32 %v3133_v11, 16  ;;  %v3259_v17 = vshrl.u32 %v3133_v11, 16  ;;  %v3218_v13 = vsel %vm7760_vm2, %v3213_v23, %v8133_v6  ;;  %v8178_v57 = vrot.slane %v3265_v19, 5 }
 0x1a5   : > { %v2380_v43 = vpop.permute.xlu1 %2379  ;;  %3030 = vrot.lane.b32.xlu0 %v2922_v55, %s6489_s22  ;;  %v3275_v55 = vshll.u32 %v3135_v38, 16  ;;  %v3228_v46 = vsel %vm7760_vm2, %v3223_v32, %v8136_v27  ;;  %v3243_v30 = vrot.slane %v3242_v60, 4  ;;  %v3238_v0 = vsel %vm7760_vm2, %v3233_v53, %v8150_v10  ;;  %v3141_v19 = vld [vmem:[%s6535_s17 + $0x58] sm:$0xf]  ;;  %v6449_v53 = vld [vmem:[%s9616_s1] sm:$0xff]  }
 0x1a6   : > { %2483 = vst.msk [vmem:[#allocation2 + $0x50] sm:$0xf] %vm2462_vm4, %v2380_v43  ;;  %v8173_v5 = vrot.slane %v3255_v36, 5  ;;  %v3261_v42 = vrot.slane %v3259_v17, 4  ;;  %v3252_v43 = vor.u32 %v3251_v40, %v8156_v7  ;;  %v3272_v6 = vor.u32 %v3271_v39, %v8178_v57  ;;  %v3740_v61 = vld [vmem:[%s6535_s17 + $0x14] sm:$0xe] }
 0x1a7   : > { %3032 = vrot.lane.b32.xlu1 %v2932_v4, %s6489_s22  ;;  %v2382_v18 = vpop.permute.xlu0 %2381  ;;  %v3279_v4 = vshrl.u32 %v3135_v38, 16  ;;  %v8181_v52 = vrot.slane %v3275_v55, 5  ;;  %v3291_v27 = vrot.slane %v3289_v15, 4  ;;  %v3329_v23 = vshrl.u32 %v3140_v62, 16 }
 0x1a8   : > { %2484 = vst.msk [vmem:[#allocation2 + $0x54] sm:$0xf] %vm2462_vm4, %v2382_v18  ;;  %v3299_v18 = vshrl.u32 %v3137_v28, 16  ;;  %v3262_v24 = vor.u32 %v3261_v42, %v8173_v5  ;;  %v3273_v10 = vrot.slane %v3272_v6, 4  ;;  %v3321_v40 = vrot.slane %v3319_v16, 4 }
 0x1a9   : > { %v2384_v9 = vpop.permute.xlu1 %2383  ;;  %3034 = vrot.lane.b32.xlu0 %v2942_v31, %s6489_s22  ;;  %v3281_v51 = vrot.slane %v3279_v4, 4  ;;  %v3285_v31 = vshll.u32 %v3136_v34, 16  ;;  %v3331_v55 = vrot.slane %v3329_v23, 4  ;;  %v4113_v4 = vld [vmem:[%s6535_s17 + $0x14] sm:$0xe]  ;;  %v3335_v60 = vshll.u32 %v3141_v19, 16 }
 0x1aa   : > { %2485 = vst.msk [vmem:[#allocation2 + $0x58] sm:$0xf] %vm2462_vm4, %v2384_v9  ;;  %v3253_v9 = vrot.slane %v3252_v43, 4  ;;  %v3301_v63 = vrot.slane %v3299_v18, 4  ;;  %v6491_v39 = vmov 0.0  }
 0x1ab   : > { %3036 = vrot.lane.b32.xlu1 %v2952_v1, %s6489_s22  ;;  %v2386_v54 = vpop.permute.xlu0 %2385  ;;  %v3305_v1 = vshll.u32 %v3138_v41, 16  ;;  %v3282_v59 = vor.u32 %v3281_v51, %v8181_v52  ;;  %v8197_v47 = vrot.slane %v3285_v31, 5  ;;  %6320 = vmatprep.subr.bf16.mxu0 %v6491_v39  ;;  %v8251_v51 = vld [vmem:[%s6535_s17 + $0x18] sm:$0xf]  ;;  %v8258_v18 = vrot.slane %v3335_v60, 5 }
 0x1ac   : > { %2486 = vst.msk [vmem:[#allocation2 + $0x5c] sm:$0xf] %vm2462_vm4, %v2386_v54  ;;  %v8201_v54 = vrot.slane %v3295_v50, 5  ;;  %v3258_v44 = vsel %vm7760_vm2, %v3253_v9, %v8173_v5  ;;  %v4114_v5 = vld [vmem:[%s6535_s17 + $0x18] sm:$0xf]  ;;  %6321 = vmatpush3.bf16.msra.mxu0 %v6449_v53  ;;  %6416 = vmatprep.subr.bf16.mxu1 %v6491_v39  ;;  %v3827_v6 = vrot.slane %v8251_v51, 5 }
 0x1ad   : > { %v2388_v22 = vpop.permute.xlu1 %2387  ;;  %3038 = vrot.lane.b32.xlu0 %v2957_v49, %s6489_s22  ;;  %v3309_v49 = vshrl.u32 %v3138_v41, 16  ;;  %v8203_v33 = vrot.slane %v3305_v1, 5  ;;  %v3292_v38 = vor.u32 %v3291_v27, %v8197_v47  ;;  %v3283_v58 = vrot.slane %v3282_v59, 4  ;;  %v4115_v1 = vld [vmem:[%s6535_s17 + $0x1c] sm:$0xf]  ;;  %6322 = vmatprep.subr.bf16.mxu0 %v6491_v39 }
 0x1ae   : > { %2487 = vst.msk [vmem:[#allocation2 + $0x60] sm:$0xf] %vm2462_vm4, %v2388_v22  ;;  %v3302_v36 = vor.u32 %v3301_v63, %v8201_v54  ;;  %v4158_v41 = vshrl.u32 %v4113_v4, 16  ;;  %v4167_v31 = vshrl.u32 %v4114_v5, 16  ;;  %v4170_v15 = vshll.u32 %v4114_v5, 16  ;;  %6422 = vmatpush3.bf16.msra.mxu1 %v6449_v53  ;;  %6332 = vmatprep.mubr.msk.bf16.mxu0 %vm6495_vm14, %v6491_v39 }
 0x1af   : > { %3574 = vrot.lane.b32.xlu1 %v3178_v12, %s6490_s23  ;;  %v2390_v21 = vpop.permute.xlu0 %2389  ;;  %v3311_v11 = vrot.slane %v3309_v49, 4  ;;  %v3248_v12 = vsel %vm7760_vm2, %v3243_v30, %v8156_v7  ;;  %v8222_v7 = vrot.slane %v3315_v45, 5  ;;  %v3288_v34 = vsel %vm7760_vm2, %v3283_v58, %v8197_v47  ;;  %6417 = vmatprep.subr.bf16.mxu1 %v6491_v39  ;;  %v8275_v59 = vld [vmem:[%s6535_s17 + $0x1c] sm:$0xf]  ;;  %v4117_v60 = vld [vmem:[%s6535_s17 + $0x24] sm:$0xf] }
 0x1b0   : > { %2488 = vst.msk [vmem:[#allocation2 + $0x64] sm:$0xf] %vm2462_vm4, %v2390_v21  ;;  %v3303_v28 = vrot.slane %v3302_v36, 4  ;;  %v4160_v30 = vrot.slane %v4158_v41, 5  ;;  %v4169_v47 = vrot.slane %v4167_v31, 5  ;;  %v4172_v27 = vrot.slane %v4170_v15, 6  ;;  %6376 = vmatprep.mubr.msk.bf16.mxu1 %vm6495_vm14, %v6491_v39 }
 0x1b1   : > { %v2392_v2 = vpop.permute.xlu1 %2391  ;;  %3576 = vrot.lane.b32.xlu0 %v3188_v37, %s6490_s23  ;;  %v3263_v37 = vrot.slane %v3262_v24, 4  ;;  %v3312_v17 = vor.u32 %v3311_v11, %v8203_v33  ;;  %v3322_v42 = vor.u32 %v3321_v40, %v8222_v7  ;;  %v4177_v62 = vshrl.u32 %v4115_v1, 16  ;;  %v6452_v36 = vld [vmem:[%s9616_s1 + $0x18] sm:$0xff]   ;;  %v6454_v5 = vld [vmem:[%s9616_s1 + $0x28] sm:$0x1f]  }
 0x1b2   : > { %2489 = vst.msk [vmem:[#allocation2 + $0x68] sm:$0xf] %vm2462_vm4, %v2392_v2  ;;  %v3278_v2 = vsel %vm7760_vm2, %v3273_v10, %v8181_v52  ;;  %v3308_v50 = vsel %vm7760_vm2, %v3303_v28, %v8203_v33  ;;  %v6050_v33 = vrot.slane %v3740_v61, 9  ;;  %v3829_v16 = vrot.slane %v3827_v6, 4 }
 0x1b3   : > { %3578 = vrot.lane.b32.xlu1 %v3198_v8, %s6490_s23  ;;  %v2394_v48 = vpop.permute.xlu0 %2393  ;;  %v3268_v21 = vsel %vm7760_vm2, %v3263_v37, %v8178_v57  ;;  %v8226_v8 = vrot.slane %v3325_v56, 5  ;;  %v3313_v32 = vrot.slane %v3312_v17, 4  ;;  %v4173_v23 = vor.u32 %v4172_v27, %v4169_v47  ;;  %v3146_v47 = vld [vmem:[%s6535_s17 + $0x6c] sm:$0xf] }
 0x1b4   : > { %2490 = vst.msk [vmem:[#allocation2 + $0x6c] sm:$0xf] %vm2462_vm4, %v2394_v48  ;;  %v4161_v48 = vshll.u32 %v4113_v4, 16  ;;  %v6453_v4 = vld [vmem:[%s9616_s1 + $0x20] sm:$0xff]   ;;  %v4197_v31 = vshrl.u32 %v4117_v60, 16  ;;  %v4200_v15 = vshll.u32 %v4117_v60, 16 }
 0x1b5   : > { %v2396_v20 = vpop.permute.xlu1 %2395  ;;  %3580 = vrot.lane.b32.xlu0 %v3208_v25, %s6490_s23  ;;  %v3293_v25 = vrot.slane %v3292_v38, 4  ;;  %v3332_v57 = vor.u32 %v3331_v55, %v8226_v8  ;;  %v3318_v49 = vsel %vm7760_vm2, %v3313_v32, %v8222_v7  ;;  %v4175_v40 = vrot.slane %v4173_v23, 4 }
 0x1b6   : > { %2491 = vst.msk [vmem:[#allocation2 + $0x70] sm:$0xf] %vm2462_vm4, %v2396_v20  ;;  %v4163_v24 = vrot.slane %v4161_v48, 6  ;;  %v4733_v48 = vld [vmem:[%s6535_s17 + $0x10] sm:$0xf] }
 0x1b7   : > { %3582 = vrot.lane.b32.xlu1 %v3218_v13, %s6490_s23  ;;  %v2398_v26 = vpop.permute.xlu0 %2397  ;;  %v3298_v52 = vsel %vm7760_vm2, %v3293_v25, %v8201_v54  ;;  %v3333_v9 = vrot.slane %v3332_v57, 4  ;;  %v8351_v57 = vld [vmem:[%s6535_s17 + $0x24] sm:$0xf] }
 0x1b8   : > { %2492 = vst.msk [vmem:[#allocation2 + $0x74] sm:$0xf] %vm2462_vm4, %v2398_v26  ;;  %v6450_v26 = vld [vmem:[%s9616_s1 + $0x8] sm:$0xff]   ;;  %v4164_v11 = vor.u32 %v4163_v24, %v4160_v30  ;;  %v4981_v30 = vld [vmem:[%s9617_s2 + $0x4] sm:$0xf] }
 0x1b9   : > { %v2400_v3 = vpop.permute.xlu1 %2399  ;;  %3584 = vrot.lane.b32.xlu0 %v3228_v46, %s6490_s23  ;;  %v3323_v46 = vrot.slane %v3322_v42, 4  ;;  %6323 = vmatpush3.bf16.msra.mxu0 %v6450_v26  ;;  %v3338_v56 = vsel %vm7760_vm2, %v3333_v9, %v8258_v18  ;;  %v4732_v42 = vld [vmem:[%s6535_s17 + $0xc] sm:$0xf]  ;;  %v4202_v9 = vrot.slane %v4200_v15, 6 }
 0x1ba   : > { %2493 = vst.msk [vmem:[#allocation2 + $0x78] sm:$0xf] %vm2462_vm4, %v2400_v3  ;;  %v4180_v3 = vshll.u32 %v4115_v1, 16  ;;  %6324 = vmatprep.subr.bf16.mxu0 %v6491_v39  ;;  %6423 = vmatpush3.bf16.msra.mxu1 %v6450_v26  ;;  %v4165_v58 = vrot.slane %v4164_v11, 4  ;;  %v3385_v11 = vshll.u32 %v3146_v47, 16 }
 0x1bb   : > { %3586 = vrot.lane.b32.xlu1 %v3238_v0, %s6490_s23  ;;  %v2402_v22 = vpop.permute.xlu0 %2401  ;;  %v3328_v63 = vsel %vm7760_vm2, %v3323_v46, %v8226_v8  ;;  %6418 = vmatprep.subr.bf16.mxu1 %v6491_v39  ;;  %v4116_v8 = vld [vmem:[%s6535_s17 + $0x20] sm:$0xf]  ;;  %v3836_v46 = vrot.slane %v8351_v57, 5 }
 0x1bc   : > { %2494 = vst.msk [vmem:[#allocation2 + $0x7c] sm:$0xf] %vm2462_vm4, %v2402_v22  ;;  %v3830_v22 = vrot.slane %v8275_v59, 5  ;;  %v4182_v10 = vrot.slane %v4180_v3, 6  ;;  %v4174_v55 = vsel %vm8310_vm12, %v4165_v58, %v4173_v23  ;;  %v4190_v28 = vshll.u32 %v4116_v8, 16 }
 0x1bd   : > { %v2404_v14 = vpop.permute.xlu1 %2403  ;;  %3588 = vrot.lane.b32.xlu0 %v3248_v12, %s6490_s23  ;;  %v6451_v12 = vld [vmem:[%s9616_s1 + $0x10] sm:$0xff]  }
 0x1be   : > { %2495 = vst.msk [vmem:[#allocation2 + $0x80] sm:$0xf] %vm2462_vm4, %v2404_v14  ;;  %6325 = vmatpush3.bf16.msra.mxu0 %v6451_v12  ;;  %v3828_v14 = vsel %vm8289_vm8, %v6050_v33, %v3827_v6  ;;  %6424 = vmatpush3.bf16.msra.mxu1 %v6451_v12  ;;  %v3831_v7 = vsel %vm8289_vm8, %v3829_v16, %v3830_v22  ;;  %v4192_v51 = vrot.slane %v4190_v28, 6  ;;  %v3832_v1 = vrot.slane %v3830_v22, 4  ;;  %v3147_v33 = vld [vmem:[%s6535_s17 + $0x70] sm:$0xf] }
 0x1bf   : > { %3590 = vrot.lane.b32.xlu1 %v3258_v44, %s6490_s23  ;;  %v2406_v29 = vpop.permute.xlu0 %2405  ;;  %v4179_v44 = vrot.slane %v4177_v62, 5  ;;  %6326 = vmatprep.subr.bf16.mxu0 %v6491_v39  ;;  %v3389_v12 = vshrl.u32 %v3146_v47, 16  ;;  %v3399_v23 = vshrl.u32 %v3147_v33, 16  ;;  %v4982_v28 = vld [vmem:[%s9617_s2 + $0x8] sm:$0xf] }
 0x1c0   : > { %2496 = vst.msk [vmem:[#allocation2 + $0x84] sm:$0xf] %vm2462_vm4, %v2406_v29  ;;  %6419 = vmatprep.subr.bf16.mxu1 %v6491_v39  ;;  %v4136_v47 = vld [vmem:[%s6535_s17 + $0x70] sm:$0xf] }
 0x1c1   : > { %v2408_v13 = vpop.permute.xlu1 %2407  ;;  %3592 = vrot.lane.b32.xlu0 %v3268_v21, %s6490_s23  ;;  %v8320_v19 = vor.u32 %v4182_v10, %v4179_v44  ;;  %v4118_v44 = vld [vmem:[%s6535_s17 + $0x28] sm:$0xf]  ;;  %v3391_v58 = vrot.slane %v3389_v12, 4 }
 0x1c2   : > { %2497 = vst.msk [vmem:[#allocation2 + $0x88] sm:$0xf] %vm2462_vm4, %v2408_v13  ;;  %6327 = vmatpush3.bf16.msra.mxu0 %v6452_v36  ;;  %6425 = vmatpush3.bf16.msra.mxu1 %v6452_v36  ;;  %v3743_v13 = vld [vmem:[%s6535_s17 + $0x20] sm:$0xf]  ;;  %v4734_v36 = vld [vmem:[%s6535_s17 + $0x14] sm:$0xf] }
 0x1c3   : > { %3594 = vrot.lane.b32.xlu1 %v3278_v2, %s6490_s23  ;;  %v2410_v43 = vpop.permute.xlu0 %2409  ;;  %6328 = vmatprep.subr.bf16.mxu0 %v6491_v39  ;;  %v4184_v25 = vsel %vm8310_vm12, %v4175_v40, %v8320_v19  ;;  %v3833_v53 = vrot.slane %v3743_v13, 5  ;;  %v4185_v59 = vrot.slane %v8320_v19, 4  ;;  %v4207_v40 = vshrl.u32 %v4118_v44, 16 }
 0x1c4   : > { %2498 = vst.msk [vmem:[#allocation2 + $0x8c] sm:$0xf] %vm2462_vm4, %v2410_v43  ;;  %6420 = vmatprep.subr.bf16.mxu1 %v6491_v39  ;;  %v5485_v43 = vsel %vm5483_vm13, %v6454_v5, 0  ;;  %v4210_v19 = vshll.u32 %v4118_v44, 16  ;;  %v4137_v44 = vld [vmem:[%s6535_s17 + $0x74] sm:$0xf] }
 0x1c5   : > { %v2412_v20 = vpop.permute.xlu1 %2411  ;;  %3596 = vrot.lane.b32.xlu0 %v3288_v34, %s6490_s23  ;;  %v4187_v34 = vshrl.u32 %v4116_v8, 16  ;;  %v3835_v24 = vrot.slane %v3833_v53, 4  ;;  %v3834_v6 = vsel %vm8289_vm8, %v3832_v1, %v3833_v53  ;;  %v4209_v5 = vrot.slane %v4207_v40, 5  ;;  %v4983_v53 = vld [vmem:[%s9617_s2 + $0xc] sm:$0xf] }
 0x1c6   : > { %2499 = vst.msk [vmem:[#allocation2 + $0x90] sm:$0xf] %vm2462_vm4, %v2412_v20  ;;  %6329 = vmatpush3.bf16.msra.mxu0 %v6453_v4  ;;  %6426 = vmatpush3.bf16.msra.mxu1 %v6453_v4  ;;  %v4119_v4 = vld [vmem:[%s6535_s17 + $0x2c] sm:$0xf] }
 0x1c7   : > { %3598 = vrot.lane.b32.xlu1 %v3298_v52, %s6490_s23  ;;  %v2414_v0 = vpop.permute.xlu0 %2413  ;;  %6330 = vmatprep.subr.bf16.mxu0 %v6491_v39  ;;  %v4189_v52 = vrot.slane %v4187_v34, 5  ;;  %v3837_v62 = vsel %vm8289_vm8, %v3835_v24, %v3836_v46  ;;  %v8409_v34 = vld [vmem:[%s6535_s17 + $0x74] sm:$0xf]  ;;  %v4135_v24 = vld [vmem:[%s6535_s17 + $0x6c] sm:$0xf] }
 0x1c8   : > { %2500 = vst.msk [vmem:[#allocation2 + $0x94] sm:$0xf] %vm2462_vm4, %v2414_v0  ;;  %6421 = vmatprep.subr.bf16.mxu1 %v6491_v39  ;;  %v4199_v0 = vrot.slane %v4197_v31, 5 }
 0x1c9   : > { %v2416_v54 = vpop.permute.xlu1 %2415  ;;  %3600 = vrot.lane.b32.xlu0 %v3308_v50, %s6490_s23  ;;  %v4980_v50 = vld [vmem:[%s9617_s2] sm:$0xf]  ;;  %v4193_v26 = vor.u32 %v4192_v51, %v4189_v52  ;;  %v3405_v51 = vshll.u32 %v8409_v34, 16 }
 0x1ca   : > { %2501 = vst.msk [vmem:[#allocation2 + $0x98] sm:$0xf] %vm2462_vm4, %v2416_v54  ;;  %6331 = vmatpush3.bf16.msra.mxu0 %v5485_v43  ;;  %6427 = vmatpush3.bf16.msra.mxu1 %v5485_v43  ;;  %v8380_v54 = vor.u32 %v4202_v9, %v4199_v0 }
 0x1cb   : > { %3602 = vrot.lane.b32.xlu1 %v3318_v49, %s6490_s23  ;;  %v2418_v37 = vpop.permute.xlu0 %2417  ;;  %v4195_v3 = vrot.slane %v4193_v26, 4  ;;  %v8436_v9 = vrot.slane %v3405_v51, 5  ;;  %v4737_v51 = vld [vmem:[%s6535_s17 + $0x20] sm:$0xf] }
 0x1cc   : > { %2502 = vst.msk [vmem:[#allocation2 + $0x9c] sm:$0xf] %vm2462_vm4, %v2418_v37  ;;  %v4194_v37 = vsel %vm8310_vm12, %v4185_v59, %v4193_v26  ;;  %vm4937_vm4 = vcmask 650816  }
 0x1cd   : > { %v2420_v38 = vpop.permute.xlu1 %2419  ;;  %3604 = vrot.lane.b32.xlu0 %v3328_v63, %s6490_s23  ;;  %v4204_v22 = vsel %vm8310_vm12, %v4195_v3, %v8380_v54  ;;  %v4377_v3 = vshrl.u32 %v4135_v24, 16 }
 0x1ce   : > { %2504 = vst.msk [vmem:[#allocation2 + $0xa0] sm:$0x3] %vm2503_vm7, %v2420_v38  ;;  %v3745_v38 = vld [vmem:[%s6535_s17 + $0x28] sm:$0xf]  ;;  %vm4111_vm7 = vcmask 517568  }
 0x1cf   : > { %3606 = vrot.lane.b32.xlu1 %v3338_v56, %s6490_s23  ;;  %v2959_v17 = vpop.permute.xlu0 %2958  ;;  %v3395_v56 = vshll.u32 %v3147_v33, 16 }
 0x1d0   : > { %3082 = vst.msk [vmem:[#allocation2] sm:$0xf] %vm3081_vm11, %v2959_v17 }
 0x1d1   : > { %v2961_v29 = vpop.permute.xlu1 %2960  ;;  %3947 = vrot.lane.b32.xlu0 %v3828_v14, %s6492_s5  ;;  %v8395_v14 = vrot.slane %v3385_v11, 5  ;;  %v3397_v8 = vrot.slane %v3395_v56, 5  ;;  %v4390_v56 = vshll.u32 %v4136_v47, 16 }
 0x1d2   : > { %3083 = vst.msk [vmem:[#allocation2 + $0x4] sm:$0xf] %vm3081_vm11, %v2961_v29  ;;  %v3839_v29 = vrot.slane %v3745_v38, 5 }
 0x1d3   : > { %3949 = vrot.lane.b32.xlu1 %v3831_v7, %s6492_s5  ;;  %v2963_v2 = vpop.permute.xlu0 %2962  ;;  %v4735_v7 = vld [vmem:[%s6535_s17 + $0x18] sm:$0xf]  ;;  %v3392_v13 = vor.u32 %v3391_v58, %v8395_v14  ;;  %v4379_v58 = vrot.slane %v4377_v3, 5  ;;  %v3747_v3 = vld [vmem:[%s6535_s17 + $0x30] sm:$0xf] }
 0x1d4   : > { %3084 = vst.msk [vmem:[#allocation2 + $0x8] sm:$0xf] %vm3081_vm11, %v2963_v2  ;;  %v3841_v43 = vrot.slane %v3839_v29, 4 }
 0x1d5   : > { %v2965_v32 = vpop.permute.xlu1 %2964  ;;  %4566 = vrot.lane.b32.xlu0 %v4174_v55, %s6493_s8  ;;  %v3401_v55 = vrot.slane %v3399_v23, 4  ;;  %v3393_v15 = vrot.slane %v3392_v13, 4 }
 0x1d6   : > { %3085 = vst.msk [vmem:[#allocation2 + $0xc] sm:$0xf] %vm3081_vm11, %v2965_v32  ;;  %v3838_v32 = vrot.slane %v3836_v46, 4 }
 0x1d7   : > { %4568 = vrot.lane.b32.xlu1 %v4184_v25, %s6493_s8  ;;  %v2967_v41 = vpop.permute.xlu0 %2966  ;;  %v8405_v25 = vld [vmem:[%s6535_s17 + $0x2c] sm:$0xf]  ;;  %v3402_v52 = vor.u32 %v3401_v55, %v3397_v8  ;;  %v3398_v59 = vsel %vm7760_vm2, %v3393_v15, %v3397_v8  ;;  %v4392_v8 = vrot.slane %v4390_v56, 6  ;;  %v4397_v55 = vshrl.u32 %v4137_v44, 16 }
 0x1d8   : > { %3086 = vst.msk [vmem:[#allocation2 + $0x10] sm:$0xf] %vm3081_vm11, %v2967_v41  ;;  %v4217_v41 = vshrl.u32 %v4119_v4, 16  ;;  %v3842_v57 = vrot.slane %v8405_v25, 5  ;;  %v3845_v56 = vrot.slane %v3747_v3, 5 }
 0x1d9   : > { %v2969_v20 = vpop.permute.xlu1 %2968  ;;  %4814 = vrot.lane.b32.xlu0 %v4732_v42, %s6494_s11  ;;  %v4212_v42 = vrot.slane %v4210_v19, 6  ;;  %v3403_v0 = vrot.slane %v3402_v52, 4 }
 0x1da   : > { %3087 = vst.msk [vmem:[#allocation2 + $0x14] sm:$0xf] %vm3081_vm11, %v2969_v20  ;;  %v3840_v20 = vsel %vm8289_vm8, %v3838_v32, %v3839_v29  ;;  %v3843_v26 = vsel %vm8289_vm8, %v3841_v43, %v3842_v57 }
 0x1db   : > { %4816 = vrot.lane.b32.xlu1 %v4733_v48, %s6494_s11  ;;  %v2971_v49 = vpop.permute.xlu0 %2970  ;;  %v4220_v48 = vshll.u32 %v4119_v4, 16  ;;  %v4213_v1 = vor.u32 %v4212_v42, %v4209_v5  ;;  %v4400_v4 = vshll.u32 %v4137_v44, 16  ;;  %v4399_v42 = vrot.slane %v4397_v55, 5 }
 0x1dc   : > { %3088 = vst.msk [vmem:[#allocation2 + $0x18] sm:$0xf] %vm3081_vm11, %v2971_v49  ;;  %v4219_v49 = vrot.slane %v4217_v41, 5 }
 0x1dd   : > { %v2973_v61 = vpop.permute.xlu1 %2972  ;;  %5062 = vrot.lane.b32.xlu0 %v4980_v50, %s6496_s19  ;;  %v4222_v46 = vrot.slane %v4220_v48, 6  ;;  %v4215_v11 = vrot.slane %v4213_v1, 4  ;;  %v4402_v41 = vrot.slane %v4400_v4, 6 }
 0x1de   : > { %3089 = vst.msk [vmem:[#allocation2 + $0x1c] sm:$0xf] %vm3081_vm11, %v2973_v61  ;;  %v3763_v61 = vld [vmem:[%s6535_s17 + $0x70] sm:$0xf] }
 0x1df   : > { %5064 = vrot.lane.b32.xlu1 %v4981_v30, %s6496_s19  ;;  %v2975_v27 = vpop.permute.xlu0 %2974  ;;  %v8428_v30 = vld [vmem:[%s6535_s17 + $0x6c] sm:$0xf]  ;;  %v8447_v12 = vor.u32 %v4222_v46, %v4219_v49  ;;  %v8488_v15 = vor.u32 %v4402_v41, %v4399_v42 }
 0x1e0   : > { %3090 = vst.msk [vmem:[#allocation2 + $0x20] sm:$0xf] %vm3081_vm11, %v2975_v27  ;;  %v4205_v27 = vrot.slane %v8380_v54, 4  ;;  %v4387_v54 = vshrl.u32 %v4136_v47, 16 }
 0x1e1   : > { %v2977_v63 = vpop.permute.xlu1 %2976  ;;  %3951 = vrot.lane.b32.xlu0 %v3834_v6, %s6492_s5 }
 0x1e2   : > { %3091 = vst.msk [vmem:[#allocation2 + $0x24] sm:$0xf] %vm3081_vm11, %v2977_v63  ;;  %v4380_v63 = vshll.u32 %v4135_v24, 16  ;;  %v4389_v29 = vrot.slane %v4387_v54, 5  ;;  %v3149_v24 = vld [vmem:[%s6535_s17 + $0x78] sm:$0xf] }
 0x1e3   : > { %3953 = vrot.lane.b32.xlu1 %v3837_v62, %s6492_s5  ;;  %v2979_v16 = vpop.permute.xlu0 %2978  ;;  %v3890_v62 = vrot.slane %v8428_v30, 5  ;;  %v3419_v47 = vshrl.u32 %v3149_v24, 16 }
 0x1e4   : > { %3092 = vst.msk [vmem:[#allocation2 + $0x28] sm:$0xf] %vm3081_vm11, %v2979_v16  ;;  %v3408_v16 = vsel %vm7760_vm2, %v3403_v0, %v8436_v9  ;;  %v4393_v5 = vor.u32 %v4392_v8, %v4389_v29  ;;  %v4984_v0 = vld [vmem:[%s9617_s2 + $0x10] sm:$0xf] }
 0x1e5   : > { %v2981_v10 = vpop.permute.xlu1 %2980  ;;  %4570 = vrot.lane.b32.xlu0 %v4194_v37, %s6493_s8  ;;  %v3893_v37 = vrot.slane %v3763_v61, 5  ;;  %v3892_v38 = vrot.slane %v3890_v62, 4  ;;  %v3421_v44 = vrot.slane %v3419_v47, 4 }
 0x1e6   : > { %3093 = vst.msk [vmem:[#allocation2 + $0x2c] sm:$0xf] %vm3081_vm11, %v2981_v10  ;;  %v4214_v10 = vsel %vm8310_vm12, %v4205_v27, %v4213_v1  ;;  %v4120_v27 = vld [vmem:[%s6535_s17 + $0x30] sm:$0xf] }
 0x1e7   : > { %4572 = vrot.lane.b32.xlu1 %v4204_v22, %s6493_s8  ;;  %v2983_v17 = vpop.permute.xlu0 %2982  ;;  %v8454_v22 = vld [vmem:[%s6535_s17 + $0x74] sm:$0xf]  ;;  %v3895_v40 = vrot.slane %v3893_v37, 4  ;;  %v3894_v13 = vsel %vm8289_vm8, %v3892_v38, %v3893_v37  ;;  %v4755_v37 = vld [vmem:[%s6535_s17 + $0x68] sm:$0xf]  ;;  %v4230_v54 = vshll.u32 %v4120_v27, 16 }
 0x1e8   : > { %3094 = vst.msk [vmem:[#allocation2 + $0x30] sm:$0xf] %vm3081_vm11, %v2983_v17  ;;  %v3896_v19 = vrot.slane %v8454_v22, 5 }
 0x1e9   : > { %v2985_v2 = vpop.permute.xlu1 %2984  ;;  %4818 = vrot.lane.b32.xlu0 %v4734_v36, %s6494_s11  ;;  %v4382_v36 = vrot.slane %v4380_v63, 6  ;;  %v4754_v63 = vld [vmem:[%s6535_s17 + $0x64] sm:$0xf]  ;;  %v4232_v55 = vrot.slane %v4230_v54, 6 }
 0x1ea   : > { %3095 = vst.msk [vmem:[#allocation2 + $0x34] sm:$0xf] %vm3081_vm11, %v2985_v2 }
 0x1eb   : > { %4820 = vrot.lane.b32.xlu1 %v4735_v7, %s6494_s11  ;;  %v2987_v60 = vpop.permute.xlu0 %2986  ;;  %v4224_v7 = vsel %vm8310_vm12, %v4215_v11, %v8447_v12 }
 0x1ec   : > { %3096 = vst.msk [vmem:[#allocation2 + $0x38] sm:$0xf] %vm3081_vm11, %v2987_v60  ;;  %v3897_v60 = vsel %vm8289_vm8, %v3895_v40, %v3896_v19 }
 0x1ed   : > { %v2989_v31 = vpop.permute.xlu1 %2988  ;;  %5066 = vrot.lane.b32.xlu0 %v4982_v28, %s6496_s19  ;;  %v8473_v28 = vor.u32 %v4382_v36, %v4379_v58  ;;  %v8522_v58 = vld [vmem:[%s6535_s17 + $0x34] sm:$0xf]  ;;  %v8525_v36 = vld [vmem:[%s6535_s17 + $0x7c] sm:$0xf] }
 0x1ee   : > { %3097 = vst.msk [vmem:[#allocation2 + $0x3c] sm:$0xf] %vm3081_vm11, %v2989_v31  ;;  %v4395_v31 = vrot.slane %v4393_v5, 4 }
 0x1ef   : > { %5068 = vrot.lane.b32.xlu1 %v4983_v53, %s6496_s19  ;;  %v2991_v50 = vpop.permute.xlu0 %2990  ;;  %v4736_v53 = vld [vmem:[%s6535_s17 + $0x1c] sm:$0xf]  ;;  %v4385_v43 = vrot.slane %v8473_v28, 4 }
 0x1f0   : > { %3098 = vst.msk [vmem:[#allocation2 + $0x40] sm:$0xf] %vm3081_vm11, %v2991_v50  ;;  %v4404_v49 = vsel %vm8310_vm12, %v4395_v31, %v8488_v15 }
 0x1f1   : > { %v2993_v6 = vpop.permute.xlu1 %2992  ;;  %3955 = vrot.lane.b32.xlu0 %v3840_v20, %s6492_s5  ;;  %v4394_v50 = vsel %vm8310_vm12, %v4385_v43, %v4393_v5 }
 0x1f2   : > { %3099 = vst.msk [vmem:[#allocation2 + $0x44] sm:$0xf] %vm3081_vm11, %v2993_v6  ;;  %v4985_v6 = vld [vmem:[%s9617_s2 + $0x14] sm:$0xf] }
 0x1f3   : > { %3957 = vrot.lane.b32.xlu1 %v3843_v26, %s6492_s5  ;;  %v2995_v33 = vpop.permute.xlu0 %2994  ;;  %v3409_v26 = vshrl.u32 %v8409_v34, 16 }
 0x1f4   : > { %3100 = vst.msk [vmem:[#allocation2 + $0x48] sm:$0xf] %vm3081_vm11, %v2995_v33 }
 0x1f5   : > { %v2997_v23 = vpop.permute.xlu1 %2996  ;;  %3618 = vrot.lane.b32.xlu0 %v3398_v59, %s6490_s23  ;;  %v3415_v59 = vshll.u32 %v3149_v24, 16  ;;  %v3411_v33 = vrot.slane %v3409_v26, 4 }
 0x1f6   : > { %3101 = vst.msk [vmem:[#allocation2 + $0x4c] sm:$0xf] %vm3081_vm11, %v2997_v23 }
 0x1f7   : > { %3620 = vrot.lane.b32.xlu1 %v3408_v16, %s6490_s23  ;;  %v2999_v17 = vpop.permute.xlu0 %2998  ;;  %v4227_v16 = vshrl.u32 %v4120_v27, 16  ;;  %v3417_v23 = vrot.slane %v3415_v59, 5  ;;  %v3412_v40 = vor.u32 %v3411_v33, %v8436_v9  ;;  %v8568_v59 = vld [vmem:[%s6535_s17 + $0x7c] sm:$0xf] }
 0x1f8   : > { %3102 = vst.msk [vmem:[#allocation2 + $0x50] sm:$0xf] %vm3081_vm11, %v2999_v17  ;;  %v5002_v17 = vld [vmem:[%s9617_s2 + $0x58] sm:$0xf] }
 0x1f9   : > { %v3001_v2 = vpop.permute.xlu1 %3000  ;;  %4574 = vrot.lane.b32.xlu0 %v4214_v10, %s6493_s8  ;;  %v4121_v10 = vld [vmem:[%s6535_s17 + $0x34] sm:$0xf]  ;;  %v4229_v8 = vrot.slane %v4227_v16, 5  ;;  %v3422_v25 = vor.u32 %v3421_v44, %v3417_v23  ;;  %v3413_v42 = vrot.slane %v3412_v40, 4  ;;  %v3902_v16 = vrot.slane %v8568_v59, 5 }
 0x1fa   : > { %3103 = vst.msk [vmem:[#allocation2 + $0x54] sm:$0xf] %vm3081_vm11, %v3001_v2  ;;  %v4237_v4 = vshrl.u32 %v4121_v10, 16  ;;  %v4240_v2 = vshll.u32 %v4121_v10, 16 }
 0x1fb   : > { %4576 = vrot.lane.b32.xlu1 %v4224_v7, %s6493_s8  ;;  %v3003_v32 = vpop.permute.xlu0 %3002  ;;  %v3844_v7 = vrot.slane %v3842_v57, 4  ;;  %v3425_v57 = vshll.u32 %v8525_v36, 16 }
 0x1fc   : > { %3104 = vst.msk [vmem:[#allocation2 + $0x58] sm:$0xf] %vm3081_vm11, %v3003_v32  ;;  %v3847_v32 = vrot.slane %v3845_v56, 4  ;;  %v4242_v43 = vrot.slane %v4240_v2, 6  ;;  %v4739_v2 = vld [vmem:[%s6535_s17 + $0x28] sm:$0xf] }
 0x1fd   : > { %v3005_v48 = vpop.permute.xlu1 %3004  ;;  %3991 = vrot.lane.b32.xlu0 %v3894_v13, %s6492_s5  ;;  %v5003_v13 = vld [vmem:[%s9617_s2 + $0x5c] sm:$0xf]  ;;  %v3846_v5 = vsel %vm8289_vm8, %v3844_v7, %v3845_v56  ;;  %v8551_v31 = vrot.slane %v3425_v57, 5 }
 0x1fe   : > { %3105 = vst.msk [vmem:[#allocation2 + $0x5c] sm:$0xf] %vm3081_vm11, %v3005_v48  ;;  %v4233_v48 = vor.u32 %v4232_v55, %v4229_v8  ;;  %v4738_v8 = vld [vmem:[%s6535_s17 + $0x24] sm:$0xf]  ;;  %v4405_v55 = vrot.slane %v8488_v15, 4 }
 0x1ff   : > { %3993 = vrot.lane.b32.xlu1 %v3897_v60, %s6492_s5  ;;  %v3007_v52 = vpop.permute.xlu0 %3006  ;;  %v3848_v60 = vrot.slane %v8522_v58, 5 }
 0x200   : > { %3106 = vst.msk [vmem:[#allocation2 + $0x60] sm:$0xf] %vm3081_vm11, %v3007_v52  ;;  %v4235_v26 = vrot.slane %v4233_v48, 4 }
 0x201   : > { %v3009_v20 = vpop.permute.xlu1 %3008  ;;  %4822 = vrot.lane.b32.xlu0 %v4736_v53, %s6494_s11  ;;  %v4239_v53 = vrot.slane %v4237_v4, 5  ;;  %v3849_v52 = vsel %vm8289_vm8, %v3847_v32, %v3848_v60 }
 0x202   : > { %3107 = vst.msk [vmem:[#allocation2 + $0x64] sm:$0xf] %vm3081_vm11, %v3009_v20  ;;  %v3765_v20 = vld [vmem:[%s6535_s17 + $0x78] sm:$0xf] }
 0x203   : > { %4824 = vrot.lane.b32.xlu1 %v4737_v51, %s6494_s11  ;;  %v3011_v1 = vpop.permute.xlu0 %3010  ;;  %v3423_v51 = vrot.slane %v3422_v25, 4 }
 0x204   : > { %3108 = vst.msk [vmem:[#allocation2 + $0x68] sm:$0xf] %vm3081_vm11, %v3011_v1  ;;  %v4138_v1 = vld [vmem:[%s6535_s17 + $0x78] sm:$0xf] }
 0x205   : > { %v3013_v46 = vpop.permute.xlu1 %3012  ;;  %4610 = vrot.lane.b32.xlu0 %v4394_v50, %s6493_s8  ;;  %v4407_v47 = vshrl.u32 %v4138_v1, 16  ;;  %v4410_v27 = vshll.u32 %v4138_v1, 16  ;;  %v4756_v1 = vld [vmem:[%s6535_s17 + $0x6c] sm:$0xf] }
 0x206   : > { %3109 = vst.msk [vmem:[#allocation2 + $0x6c] sm:$0xf] %vm3081_vm11, %v3013_v46  ;;  %v4225_v46 = vrot.slane %v8447_v12, 4  ;;  %v4139_v12 = vld [vmem:[%s6535_s17 + $0x7c] sm:$0xf] }
 0x207   : > { %4612 = vrot.lane.b32.xlu1 %v4404_v49, %s6493_s8  ;;  %v3015_v61 = vpop.permute.xlu0 %3014  ;;  %v3418_v49 = vsel %vm7760_vm2, %v3413_v42, %v3417_v23  ;;  %v4409_v54 = vrot.slane %v4407_v47, 5  ;;  %v4412_v56 = vrot.slane %v4410_v27, 6  ;;  %v4417_v23 = vshrl.u32 %v4139_v12, 16  ;;  %v3151_v42 = vld [vmem:[%s6535_s17 + $0x80] sm:$0xf] }
 0x208   : > { %3110 = vst.msk [vmem:[#allocation2 + $0x70] sm:$0xf] %vm3081_vm11, %v3015_v61  ;;  %v3899_v61 = vrot.slane %v3765_v20, 5  ;;  %v4234_v3 = vsel %vm8310_vm12, %v4225_v46, %v4233_v48  ;;  %v4420_v44 = vshll.u32 %v4139_v12, 16  ;;  %v4986_v48 = vld [vmem:[%s9617_s2 + $0x18] sm:$0xf] }
 0x209   : > { %v3017_v34 = vpop.permute.xlu1 %3016  ;;  %5070 = vrot.lane.b32.xlu0 %v4984_v0, %s6496_s19  ;;  %v8561_v0 = vor.u32 %v4242_v43, %v4239_v53  ;;  %v4419_v7 = vrot.slane %v4417_v23, 5  ;;  %v4987_v43 = vld [vmem:[%s9617_s2 + $0x1c] sm:$0xf]  ;;  %v4122_v20 = vld [vmem:[%s6535_s17 + $0x38] sm:$0xf] }
 0x20a   : > { %3111 = vst.msk [vmem:[#allocation2 + $0x74] sm:$0xf] %vm3081_vm11, %v3017_v34  ;;  %v4422_v40 = vrot.slane %v4420_v44, 6 }
 0x20b   : > { %5072 = vrot.lane.b32.xlu1 %v4985_v6, %s6496_s19  ;;  %v3019_v11 = vpop.permute.xlu0 %3018  ;;  %v3428_v6 = vsel %vm7760_vm2, %v3423_v51, %v8551_v31  ;;  %v3439_v51 = vshrl.u32 %v3151_v42, 16 }
 0x20c   : > { %3112 = vst.msk [vmem:[#allocation2 + $0x78] sm:$0xf] %vm3081_vm11, %v3019_v11  ;;  %v4244_v11 = vsel %vm8310_vm12, %v4235_v26, %v8561_v0  ;;  %v8599_v32 = vor.u32 %v4422_v40, %v4419_v7  ;;  %v4247_v26 = vshrl.u32 %v4122_v20, 16 }
 0x20d   : > { %v3021_v38 = vpop.permute.xlu1 %3020  ;;  %4858 = vrot.lane.b32.xlu0 %v4754_v63, %s6494_s11  ;;  %v3898_v63 = vrot.slane %v3896_v19, 4  ;;  %v3441_v27 = vrot.slane %v3439_v51, 4 }
 0x20e   : > { %3113 = vst.msk [vmem:[#allocation2 + $0x7c] sm:$0xf] %vm3081_vm11, %v3021_v38 }
 0x20f   : > { %4860 = vrot.lane.b32.xlu1 %v4755_v37, %s6494_s11  ;;  %v3023_v29 = vpop.permute.xlu0 %3022  ;;  %v3901_v37 = vrot.slane %v3899_v61, 4  ;;  %v3900_v22 = vsel %vm8289_vm8, %v3898_v63, %v3899_v61  ;;  %v4250_v61 = vshll.u32 %v4122_v20, 16  ;;  %v8636_v63 = vld [vmem:[%s6535_s17 + $0x84] sm:$0xf] }
 0x210   : > { %3114 = vst.msk [vmem:[#allocation2 + $0x80] sm:$0xf] %vm3081_vm11, %v3023_v29 }
 0x211   : > { %v3025_v9 = vpop.permute.xlu1 %3024  ;;  %5106 = vrot.lane.b32.xlu0 %v5002_v17, %s6496_s19  ;;  %v3903_v38 = vsel %vm8289_vm8, %v3901_v37, %v3902_v16  ;;  %v4413_v17 = vor.u32 %v4412_v56, %v4409_v54  ;;  %v4249_v56 = vrot.slane %v4247_v26, 5  ;;  %v4252_v23 = vrot.slane %v4250_v61, 6 }
 0x212   : > { %3115 = vst.msk [vmem:[#allocation2 + $0x84] sm:$0xf] %vm3081_vm11, %v3025_v9 }
 0x213   : > { %5108 = vrot.lane.b32.xlu1 %v5003_v13, %s6496_s19  ;;  %v3027_v41 = vpop.permute.xlu0 %3026  ;;  %v4415_v13 = vrot.slane %v4413_v17, 4  ;;  %v4414_v57 = vsel %vm8310_vm12, %v4405_v55, %v4413_v17 }
 0x214   : > { %3116 = vst.msk [vmem:[#allocation2 + $0x88] sm:$0xf] %vm3081_vm11, %v3027_v41  ;;  %v3429_v41 = vshrl.u32 %v8525_v36, 16 }
 0x215   : > { %v3029_v50 = vpop.permute.xlu1 %3028  ;;  %3959 = vrot.lane.b32.xlu0 %v3846_v5, %s6492_s5  ;;  %v4424_v9 = vsel %vm8310_vm12, %v4415_v13, %v8599_v32 }
 0x216   : > { %3117 = vst.msk [vmem:[#allocation2 + $0x8c] sm:$0xf] %vm3081_vm11, %v3029_v50  ;;  %v3749_v50 = vld [vmem:[%s6535_s17 + $0x38] sm:$0xf] }
 0x217   : > { %3961 = vrot.lane.b32.xlu1 %v3849_v52, %s6492_s5  ;;  %v3031_v24 = vpop.permute.xlu0 %3030  ;;  %v3435_v52 = vshll.u32 %v3151_v42, 16 }
 0x218   : > { %3118 = vst.msk [vmem:[#allocation2 + $0x90] sm:$0xf] %vm3081_vm11, %v3031_v24  ;;  %v4757_v24 = vld [vmem:[%s6535_s17 + $0x70] sm:$0xf] }
 0x219   : > { %v3033_v34 = vpop.permute.xlu1 %3032  ;;  %3622 = vrot.lane.b32.xlu0 %v3418_v49, %s6490_s23  ;;  %v3431_v49 = vrot.slane %v3429_v41, 4  ;;  %v3437_v47 = vrot.slane %v3435_v52, 5  ;;  %v8679_v52 = vld [vmem:[%s6535_s17 + $0x84] sm:$0xf] }
 0x21a   : > { %3119 = vst.msk [vmem:[#allocation2 + $0x94] sm:$0xf] %vm3081_vm11, %v3033_v34  ;;  %v4123_v34 = vld [vmem:[%s6535_s17 + $0x3c] sm:$0xf]  ;;  %v3908_v26 = vrot.slane %v8679_v52, 5 }
 0x21b   : > { %3624 = vrot.lane.b32.xlu1 %v3428_v6, %s6490_s23  ;;  %v3035_v33 = vpop.permute.xlu0 %3034  ;;  %v3851_v6 = vrot.slane %v3749_v50, 5  ;;  %v3432_v37 = vor.u32 %v3431_v49, %v8551_v31  ;;  %v4257_v44 = vshrl.u32 %v4123_v34, 16  ;;  %v3442_v58 = vor.u32 %v3441_v27, %v3437_v47 }
 0x21c   : > { %3120 = vst.msk [vmem:[#allocation2 + $0x98] sm:$0xf] %vm3081_vm11, %v3035_v33  ;;  %v5004_v33 = vld [vmem:[%s9617_s2 + $0x60] sm:$0xf] }
 0x21d   : > { %v3037_v10 = vpop.permute.xlu1 %3036  ;;  %4578 = vrot.lane.b32.xlu0 %v4234_v3, %s6493_s8  ;;  %v8633_v3 = vld [vmem:[%s6535_s17 + $0x3c] sm:$0xf]  ;;  %v3433_v7 = vrot.slane %v3432_v37, 4 }
 0x21e   : > { %3121 = vst.msk [vmem:[#allocation2 + $0x9c] sm:$0xf] %vm3081_vm11, %v3037_v10  ;;  %v4260_v10 = vshll.u32 %v4123_v34, 16 }
 0x21f   : > { %4580 = vrot.lane.b32.xlu1 %v4244_v11, %s6493_s8  ;;  %v3039_v19 = vpop.permute.xlu0 %3038  ;;  %v3850_v11 = vrot.slane %v3848_v60, 4  ;;  %v3445_v60 = vshll.u32 %v8636_v63, 16 }
 0x220   : > { %3123 = vst.msk [vmem:[#allocation2 + $0xa0] sm:$0x3] %vm3122_vm15, %v3039_v19  ;;  %v3853_v19 = vrot.slane %v3851_v6, 4  ;;  %v4262_v55 = vrot.slane %v4260_v10, 6  ;;  %v4741_v10 = vld [vmem:[%s6535_s17 + $0x30] sm:$0xf] }
 0x221   : > { %v3575_v29 = vpop.permute.xlu1 %3574  ;;  %3995 = vrot.lane.b32.xlu0 %v3900_v22, %s6492_s5  ;;  %v5005_v22 = vld [vmem:[%s9617_s2 + $0x64] sm:$0xf]  ;;  %v3852_v17 = vsel %vm8289_vm8, %v3850_v11, %v3851_v6  ;;  %v8662_v13 = vrot.slane %v3445_v60, 5 }
 0x222   : > { %3698 = vst.msk [vmem:[#allocation2] sm:$0xf] %vm3697_vm0, %v3575_v29  ;;  %v4253_v29 = vor.u32 %v4252_v23, %v4249_v56  ;;  %v4740_v56 = vld [vmem:[%s6535_s17 + $0x2c] sm:$0xf]  ;;  %v4425_v23 = vrot.slane %v8599_v32, 4 }
 0x223   : > { %3997 = vrot.lane.b32.xlu1 %v3903_v38, %s6492_s5  ;;  %v3577_v4 = vpop.permute.xlu0 %3576  ;;  %v3854_v38 = vrot.slane %v8633_v3, 5 }
 0x224   : > { %3699 = vst.msk [vmem:[#allocation2 + $0x4] sm:$0xf] %vm3697_vm0, %v3577_v4  ;;  %v4255_v41 = vrot.slane %v4253_v29, 4 }
 0x225   : > { %v3579_v25 = vpop.permute.xlu1 %3578  ;;  %4826 = vrot.lane.b32.xlu0 %v4738_v8, %s6494_s11  ;;  %v4259_v8 = vrot.slane %v4257_v44, 5  ;;  %v3855_v4 = vsel %vm8289_vm8, %v3853_v19, %v3854_v38 }
 0x226   : > { %3700 = vst.msk [vmem:[#allocation2 + $0x8] sm:$0xf] %vm3697_vm0, %v3579_v25  ;;  %v3767_v25 = vld [vmem:[%s6535_s17 + $0x80] sm:$0xf] }
 0x227   : > { %4828 = vrot.lane.b32.xlu1 %v4739_v2, %s6494_s11  ;;  %v3581_v15 = vpop.permute.xlu0 %3580  ;;  %v3443_v2 = vrot.slane %v3442_v58, 4 }
 0x228   : > { %3701 = vst.msk [vmem:[#allocation2 + $0xc] sm:$0xf] %vm3697_vm0, %v3581_v15  ;;  %v4140_v15 = vld [vmem:[%s6535_s17 + $0x80] sm:$0xf] }
 0x229   : > { %v3583_v5 = vpop.permute.xlu1 %3582  ;;  %4614 = vrot.lane.b32.xlu0 %v4414_v57, %s6493_s8  ;;  %v4427_v51 = vshrl.u32 %v4140_v15, 16  ;;  %v4430_v20 = vshll.u32 %v4140_v15, 16  ;;  %v4758_v15 = vld [vmem:[%s6535_s17 + $0x74] sm:$0xf] }
 0x22a   : > { %3702 = vst.msk [vmem:[#allocation2 + $0x10] sm:$0xf] %vm3697_vm0, %v3583_v5  ;;  %v4245_v5 = vrot.slane %v8561_v0, 4  ;;  %v4141_v0 = vld [vmem:[%s6535_s17 + $0x84] sm:$0xf] }
 0x22b   : > { %4616 = vrot.lane.b32.xlu1 %v4424_v9, %s6493_s8  ;;  %v3585_v53 = vpop.permute.xlu0 %3584  ;;  %v3438_v9 = vsel %vm7760_vm2, %v3433_v7, %v3437_v47  ;;  %v4429_v61 = vrot.slane %v4427_v51, 5  ;;  %v4432_v6 = vrot.slane %v4430_v20, 6  ;;  %v4437_v47 = vshrl.u32 %v4141_v0, 16  ;;  %v3153_v7 = vld [vmem:[%s6535_s17 + $0x88] sm:$0xf] }
 0x22c   : > { %3703 = vst.msk [vmem:[#allocation2 + $0x14] sm:$0xf] %vm3697_vm0, %v3585_v53  ;;  %v3905_v53 = vrot.slane %v3767_v25, 5  ;;  %v4254_v50 = vsel %vm8310_vm12, %v4245_v5, %v4253_v29  ;;  %v4440_v27 = vshll.u32 %v4141_v0, 16  ;;  %v4988_v29 = vld [vmem:[%s9617_s2 + $0x20] sm:$0xf] }
 0x22d   : > { %v3587_v36 = vpop.permute.xlu1 %3586  ;;  %5074 = vrot.lane.b32.xlu0 %v4986_v48, %s6496_s19  ;;  %v8672_v48 = vor.u32 %v4262_v55, %v4259_v8  ;;  %v4439_v11 = vrot.slane %v4437_v47, 5  ;;  %v4989_v55 = vld [vmem:[%s9617_s2 + $0x24] sm:$0xf]  ;;  %v4124_v25 = vld [vmem:[%s6535_s17 + $0x40] sm:$0xf] }
 0x22e   : > { %3704 = vst.msk [vmem:[#allocation2 + $0x18] sm:$0xf] %vm3697_vm0, %v3587_v36  ;;  %v4442_v37 = vrot.slane %v4440_v27, 6 }
 0x22f   : > { %5076 = vrot.lane.b32.xlu1 %v4987_v43, %s6496_s19  ;;  %v3589_v46 = vpop.permute.xlu0 %3588  ;;  %v3448_v43 = vsel %vm7760_vm2, %v3443_v2, %v8662_v13  ;;  %v3459_v2 = vshrl.u32 %v3153_v7, 16 }
 0x230   : > { %3705 = vst.msk [vmem:[#allocation2 + $0x1c] sm:$0xf] %vm3697_vm0, %v3589_v46  ;;  %v4264_v46 = vsel %vm8310_vm12, %v4255_v41, %v8672_v48  ;;  %v8711_v19 = vor.u32 %v4442_v37, %v4439_v11  ;;  %v4267_v41 = vshrl.u32 %v4124_v25, 16 }
 0x231   : > { %v3591_v12 = vpop.permute.xlu1 %3590  ;;  %4862 = vrot.lane.b32.xlu0 %v4756_v1, %s6494_s11  ;;  %v3904_v1 = vrot.slane %v3902_v16, 4  ;;  %v3461_v20 = vrot.slane %v3459_v2, 4  ;;  %v8794_v2 = vld [vmem:[%s6535_s17 + $0x8c] sm:$0xf] }
 0x232   : > { %3706 = vst.msk [vmem:[#allocation2 + $0x20] sm:$0xf] %vm3697_vm0, %v3591_v12 }
 0x233   : > { %4864 = vrot.lane.b32.xlu1 %v4757_v24, %s6494_s11  ;;  %v3593_v54 = vpop.permute.xlu0 %3592  ;;  %v3907_v24 = vrot.slane %v3905_v53, 4  ;;  %v3906_v59 = vsel %vm8289_vm8, %v3904_v1, %v3905_v53  ;;  %v4270_v53 = vshll.u32 %v4124_v25, 16  ;;  %v8748_v1 = vld [vmem:[%s6535_s17 + $0x8c] sm:$0xf] }
 0x234   : > { %3707 = vst.msk [vmem:[#allocation2 + $0x24] sm:$0xf] %vm3697_vm0, %v3593_v54 }
 0x235   : > { %v3595_v31 = vpop.permute.xlu1 %3594  ;;  %5110 = vrot.lane.b32.xlu0 %v5004_v33, %s6496_s19  ;;  %v3909_v12 = vsel %vm8289_vm8, %v3907_v24, %v3908_v26  ;;  %v4433_v33 = vor.u32 %v4432_v6, %v4429_v61  ;;  %v4269_v6 = vrot.slane %v4267_v41, 5  ;;  %v4272_v47 = vrot.slane %v4270_v53, 6 }
 0x236   : > { %3708 = vst.msk [vmem:[#allocation2 + $0x28] sm:$0xf] %vm3697_vm0, %v3595_v31  ;;  %v3914_v53 = vrot.slane %v8794_v2, 5 }
 0x237   : > { %5112 = vrot.lane.b32.xlu1 %v5005_v22, %s6496_s19  ;;  %v3597_v40 = vpop.permute.xlu0 %3596  ;;  %v4435_v22 = vrot.slane %v4433_v33, 4  ;;  %v4434_v60 = vsel %vm8310_vm12, %v4425_v23, %v4433_v33 }
 0x238   : > { %3709 = vst.msk [vmem:[#allocation2 + $0x2c] sm:$0xf] %vm3697_vm0, %v3597_v40  ;;  %v3449_v40 = vshrl.u32 %v8636_v63, 16 }
 0x239   : > { %v3599_v57 = vpop.permute.xlu1 %3598  ;;  %3963 = vrot.lane.b32.xlu0 %v3852_v17, %s6492_s5  ;;  %v4444_v31 = vsel %vm8310_vm12, %v4435_v22, %v8711_v19 }
 0x23a   : > { %3710 = vst.msk [vmem:[#allocation2 + $0x30] sm:$0xf] %vm3697_vm0, %v3599_v57  ;;  %v3751_v57 = vld [vmem:[%s6535_s17 + $0x40] sm:$0xf] }
 0x23b   : > { %3965 = vrot.lane.b32.xlu1 %v3855_v4, %s6492_s5  ;;  %v3601_v42 = vpop.permute.xlu0 %3600  ;;  %v3455_v4 = vshll.u32 %v3153_v7, 16  ;;  %v4265_v7 = vrot.slane %v8672_v48, 4  ;;  %v4143_v48 = vld [vmem:[%s6535_s17 + $0x8c] sm:$0xf] }
 0x23c   : > { %3711 = vst.msk [vmem:[#allocation2 + $0x34] sm:$0xf] %vm3697_vm0, %v3601_v42  ;;  %v4759_v42 = vld [vmem:[%s6535_s17 + $0x78] sm:$0xf] }
 0x23d   : > { %v3603_v36 = vpop.permute.xlu1 %3602  ;;  %3626 = vrot.lane.b32.xlu0 %v3438_v9, %s6490_s23  ;;  %v3451_v9 = vrot.slane %v3449_v40, 4  ;;  %v3457_v51 = vrot.slane %v3455_v4, 5 }
 0x23e   : > { %3712 = vst.msk [vmem:[#allocation2 + $0x38] sm:$0xf] %vm3697_vm0, %v3603_v36  ;;  %v4125_v36 = vld [vmem:[%s6535_s17 + $0x44] sm:$0xf] }
 0x23f   : > { %3628 = vrot.lane.b32.xlu1 %v3448_v43, %s6490_s23  ;;  %v3605_v49 = vpop.permute.xlu0 %3604  ;;  %v3857_v43 = vrot.slane %v3751_v57, 5  ;;  %v3452_v24 = vor.u32 %v3451_v9, %v8662_v13  ;;  %v4277_v27 = vshrl.u32 %v4125_v36, 16  ;;  %v3462_v3 = vor.u32 %v3461_v20, %v3457_v51 }
 0x240   : > { %3713 = vst.msk [vmem:[#allocation2 + $0x3c] sm:$0xf] %vm3697_vm0, %v3605_v49  ;;  %v5006_v49 = vld [vmem:[%s9617_s2 + $0x68] sm:$0xf]  ;;  %v3910_v9 = vrot.slane %v3908_v26, 4  ;;  %v4457_v20 = vshrl.u32 %v4143_v48, 16 }
 0x241   : > { %v3607_v34 = vpop.permute.xlu1 %3606  ;;  %4582 = vrot.lane.b32.xlu0 %v4254_v50, %s6493_s8  ;;  %v8745_v50 = vld [vmem:[%s6535_s17 + $0x44] sm:$0xf]  ;;  %v3453_v37 = vrot.slane %v3452_v24, 4  ;;  %v4279_v23 = vrot.slane %v4277_v27, 5  ;;  %v3463_v22 = vrot.slane %v3462_v3, 4 }
 0x242   : > { %3714 = vst.msk [vmem:[#allocation2 + $0x40] sm:$0xf] %vm3697_vm0, %v3607_v34  ;;  %v4280_v34 = vshll.u32 %v4125_v36, 16  ;;  %v4460_v36 = vshll.u32 %v4143_v48, 16  ;;  %v4459_v24 = vrot.slane %v4457_v20, 5 }
 0x243   : > { %4584 = vrot.lane.b32.xlu1 %v4264_v46, %s6493_s8  ;;  %v3948_v16 = vpop.permute.xlu0 %3947  ;;  %v3856_v46 = vrot.slane %v3854_v38, 4  ;;  %v3465_v38 = vshll.u32 %v8748_v1, 16  ;;  %v4742_v27 = vld [vmem:[%s6535_s17 + $0x34] sm:$0xf]  ;;  %v4127_v48 = vld [vmem:[%s6535_s17 + $0x4c] sm:$0xf] }
 0x244   : > { %4071 = vst.msk [vmem:[#allocation2] sm:$0xf] %vm4070_vm1, %v3948_v16  ;;  %v3859_v16 = vrot.slane %v3857_v43, 4 }
 0x245   : > { %v3950_v54 = vpop.permute.xlu1 %3949  ;;  %3999 = vrot.lane.b32.xlu0 %v3906_v59, %s6492_s5  ;;  %v5007_v59 = vld [vmem:[%s9617_s2 + $0x6c] sm:$0xf]  ;;  %v3858_v11 = vsel %vm8289_vm8, %v3856_v46, %v3857_v43 }
 0x246   : > { %4072 = vst.msk [vmem:[#allocation2 + $0x4] sm:$0xf] %vm4070_vm1, %v3950_v54 }
 0x247   : > { %4001 = vrot.lane.b32.xlu1 %v3909_v12, %s6492_s5  ;;  %v4567_v44 = vpop.permute.xlu0 %4566  ;;  %v3860_v12 = vrot.slane %v8745_v50, 5 }
 0x248   : > { %4690 = vst.msk [vmem:[#allocation2] sm:$0xf] %vm4689_vm3, %v4567_v44  ;;  %v4282_v44 = vrot.slane %v4280_v34, 6  ;;  %v4445_v34 = vrot.slane %v8711_v19, 4 }
 0x249   : > { %v4569_v58 = vpop.permute.xlu1 %4568  ;;  %4830 = vrot.lane.b32.xlu0 %v4740_v56, %s6494_s11  ;;  %v4273_v56 = vor.u32 %v4272_v47, %v4269_v6 }
 0x24a   : > { %4691 = vst.msk [vmem:[#allocation2 + $0x4] sm:$0xf] %vm4689_vm3, %v4569_v58  ;;  %v8775_v58 = vrot.slane %v3465_v38, 5 }
 0x24b   : > { %4832 = vrot.lane.b32.xlu1 %v4741_v10, %s6494_s11  ;;  %v4815_v32 = vpop.permute.xlu0 %4814  ;;  %v3861_v10 = vsel %vm8289_vm8, %v3859_v16, %v3860_v12  ;;  %v4743_v16 = vld [vmem:[%s6535_s17 + $0x38] sm:$0xf] }
 0x24c   : > { %4938 = vst.msk [vmem:[#allocation2] sm:$0xf] %vm4937_vm4, %v4815_v32  ;;  %v3468_v4 = vsel %vm7760_vm2, %v3463_v22, %v8775_v58 }
 0x24d   : > { %v4817_v17 = vpop.permute.xlu1 %4816  ;;  %4618 = vrot.lane.b32.xlu0 %v4434_v60, %s6493_s8  ;;  %v3769_v60 = vld [vmem:[%s6535_s17 + $0x88] sm:$0xf] }
 0x24e   : > { %4939 = vst.msk [vmem:[#allocation2 + $0x4] sm:$0xf] %vm4937_vm4, %v4817_v17  ;;  %v3458_v17 = vsel %vm7760_vm2, %v3453_v37, %v3457_v51 }
 0x24f   : > { %4620 = vrot.lane.b32.xlu1 %v4444_v31, %s6493_s8  ;;  %v5063_v8 = vpop.permute.xlu0 %5062  ;;  %v4142_v31 = vld [vmem:[%s6535_s17 + $0x88] sm:$0xf] }
 0x250   : > { %5186 = vst.msk [vmem:[#allocation2] sm:$0xf] %vm5185_vm5, %v5063_v8  ;;  %v8787_v8 = vor.u32 %v4282_v44, %v4279_v23  ;;  %v4447_v25 = vshrl.u32 %v4142_v31, 16  ;;  %v4990_v23 = vld [vmem:[%s9617_s2 + $0x28] sm:$0xf] }
 0x251   : > { %v5065_v63 = vpop.permute.xlu1 %5064  ;;  %5078 = vrot.lane.b32.xlu0 %v4988_v29, %s6496_s19  ;;  %v4275_v29 = vrot.slane %v4273_v56, 4 }
 0x252   : > { %5187 = vst.msk [vmem:[#allocation2 + $0x4] sm:$0xf] %vm5185_vm5, %v5065_v63  ;;  %v4450_v63 = vshll.u32 %v4142_v31, 16  ;;  %v4449_v43 = vrot.slane %v4447_v25, 5  ;;  %v3753_v31 = vld [vmem:[%s6535_s17 + $0x48] sm:$0xf] }
 0x253   : > { %5080 = vrot.lane.b32.xlu1 %v4989_v55, %s6496_s19  ;;  %v3952_v5 = vpop.permute.xlu0 %3951  ;;  %v3911_v55 = vrot.slane %v3769_v60, 5  ;;  %v3863_v25 = vrot.slane %v3753_v31, 5  ;;  %v4145_v31 = vld [vmem:[%s6535_s17 + $0x94] sm:$0xf] }
 0x254   : > { %4073 = vst.msk [vmem:[#allocation2 + $0x8] sm:$0xf] %vm4070_vm1, %v3952_v5  ;;  %v4452_v51 = vrot.slane %v4450_v63, 6 }
 0x255   : > { %v3954_v0 = vpop.permute.xlu1 %3953  ;;  %4866 = vrot.lane.b32.xlu0 %v4758_v15, %s6494_s11  ;;  %v4274_v15 = vsel %vm8310_vm12, %v4265_v7, %v4273_v56  ;;  %v3913_v41 = vrot.slane %v3911_v55, 4  ;;  %v3912_v52 = vsel %vm8289_vm8, %v3910_v9, %v3911_v55  ;;  %v3469_v56 = vshrl.u32 %v8748_v1, 16  ;;  %v8863_v9 = vld [vmem:[%s6535_s17 + $0x4c] sm:$0xf] }
 0x256   : > { %4074 = vst.msk [vmem:[#allocation2 + $0xc] sm:$0xf] %vm4070_vm1, %v3954_v0  ;;  %v4453_v46 = vor.u32 %v4452_v51, %v4449_v43 }
 0x257   : > { %4868 = vrot.lane.b32.xlu1 %v4759_v42, %s6494_s11  ;;  %v4571_v61 = vpop.permute.xlu0 %4570  ;;  %v4284_v42 = vsel %vm8310_vm12, %v4275_v29, %v8787_v8  ;;  %v3471_v7 = vrot.slane %v3469_v56, 4  ;;  %v4761_v29 = vld [vmem:[%s6535_s17 + $0x80] sm:$0xf] }
 0x258   : > { %4692 = vst.msk [vmem:[#allocation2 + $0x8] sm:$0xf] %vm4689_vm3, %v4571_v61  ;;  %v4462_v61 = vrot.slane %v4460_v36, 6  ;;  %v4455_v3 = vrot.slane %v4453_v46, 4  ;;  %v4454_v19 = vsel %vm8310_vm12, %v4445_v34, %v4453_v46  ;;  %v3866_v46 = vrot.slane %v8863_v9, 5 }
 0x259   : > { %v4573_v13 = vpop.permute.xlu1 %4572  ;;  %5114 = vrot.lane.b32.xlu0 %v5006_v49, %s6496_s19  ;;  %v6455_v33 = vld [vmem:[#allocation2] sm:$0xff]   ;;  %v3915_v49 = vsel %vm8289_vm8, %v3913_v41, %v3914_v53  ;;  %v3862_v41 = vrot.slane %v3860_v12, 4  ;;  %v3472_v43 = vor.u32 %v3471_v7, %v8775_v58  ;;  %v3916_v7 = vrot.slane %v3914_v53, 4 }
 0x25a   : > { %4693 = vst.msk [vmem:[#allocation2 + $0xc] sm:$0xf] %vm4689_vm3, %v4573_v13  ;;  %6333 = vmatmul.mubr.msk.bf16.vlgmr.msra.gmra.mrb[0].mxu0 %vm5419_vm6, %v6455_v33  ;;  %v8827_v38 = vor.u32 %v4462_v61, %v4459_v24 }
 0x25b   : > { %5116 = vrot.lane.b32.xlu1 %v5007_v59, %s6496_s19  ;;  %v4819_v54 = vpop.permute.xlu0 %4818  ;;  %6336 = vmatprep.mubr.msk.bf16.mxu0 %vm6495_vm14, %v6491_v39  ;;  %v3864_v24 = vsel %vm8289_vm8, %v3862_v41, %v3863_v25  ;;  %v3473_v61 = vrot.slane %v3472_v43, 4 }
 0x25c   : > { %4940 = vst.msk [vmem:[#allocation2 + $0x8] sm:$0xf] %vm4937_vm4, %v4819_v54  ;;  %v3155_v54 = vld [vmem:[%s6535_s17 + $0x90] sm:$0xf] }
 0x25d   : > { %v4821_v32 = vpop.permute.xlu1 %4820  ;;  %3967 = vrot.lane.b32.xlu0 %v3858_v11, %s6492_s5  ;;  %v4464_v11 = vsel %vm8310_vm12, %v4455_v3, %v8827_v38  ;;  %v3475_v22 = vshll.u32 %v3155_v54, 16  ;;  %v3479_v60 = vshrl.u32 %v3155_v54, 16 }
 0x25e   : > { %4941 = vst.msk [vmem:[#allocation2 + $0xc] sm:$0xf] %vm4937_vm4, %v4821_v32  ;;  %v4126_v32 = vld [vmem:[%s6535_s17 + $0x48] sm:$0xf] }
 0x25f   : > { %3969 = vrot.lane.b32.xlu1 %v3861_v10, %s6492_s5  ;;  %v5067_v40 = vpop.permute.xlu0 %5066  ;;  %v4991_v10 = vld [vmem:[%s9617_s2 + $0x2c] sm:$0xf]  ;;  %v4287_v55 = vshrl.u32 %v4126_v32, 16  ;;  %v3477_v63 = vrot.slane %v3475_v22, 5  ;;  %v8909_v22 = vld [vmem:[%s6535_s17 + $0x94] sm:$0xf] }
 0x260   : > { %5188 = vst.msk [vmem:[#allocation2 + $0x8] sm:$0xf] %vm5185_vm5, %v5067_v40 }
 0x261   : > { %v5069_v57 = vpop.permute.xlu1 %5068  ;;  %3630 = vrot.lane.b32.xlu0 %v3458_v17, %s6490_s23  ;;  %v4760_v17 = vld [vmem:[%s6535_s17 + $0x7c] sm:$0xf]  ;;  %v4289_v20 = vrot.slane %v4287_v55, 5 }
 0x262   : > { %5189 = vst.msk [vmem:[#allocation2 + $0xc] sm:$0xf] %vm5185_vm5, %v5069_v57  ;;  %v3481_v57 = vrot.slane %v3479_v60, 4 }
 0x263   : > { %3632 = vrot.lane.b32.xlu1 %v3468_v4, %s6490_s23  ;;  %v3956_v5 = vpop.permute.xlu0 %3955  ;;  %v4290_v4 = vshll.u32 %v4126_v32, 16 }
 0x264   : > { %4075 = vst.msk [vmem:[#allocation2 + $0x10] sm:$0xf] %vm4070_vm1, %v3956_v5  ;;  %v8866_v5 = vld [vmem:[%s6535_s17 + $0x94] sm:$0xf]  ;;  %v3482_v50 = vor.u32 %v3481_v57, %v3477_v63  ;;  %v4477_v57 = vshrl.u32 %v4145_v31, 16 }
 0x265   : > { %v3958_v0 = vpop.permute.xlu1 %3957  ;;  %4586 = vrot.lane.b32.xlu0 %v4274_v15, %s6493_s8  ;;  %v4292_v36 = vrot.slane %v4290_v4, 6  ;;  %v3485_v12 = vshll.u32 %v8866_v5, 16  ;;  %v3920_v4 = vrot.slane %v8909_v22, 5 }
 0x266   : > { %4076 = vst.msk [vmem:[#allocation2 + $0x14] sm:$0xf] %vm4070_vm1, %v3958_v0  ;;  %v4297_v0 = vshrl.u32 %v4127_v48, 16  ;;  %v4479_v43 = vrot.slane %v4477_v57, 5 }
 0x267   : > { %4588 = vrot.lane.b32.xlu1 %v4284_v42, %s6493_s8  ;;  %v3619_v26 = vpop.permute.xlu0 %3618  ;;  %v5008_v42 = vld [vmem:[%s9617_s2 + $0x70] sm:$0xf]  ;;  %v8892_v3 = vrot.slane %v3485_v12, 5 }
 0x268   : > { %3720 = vst.msk [vmem:[#allocation2 + $0x58] sm:$0xf] %vm3697_vm0, %v3619_v26  ;;  %v5009_v26 = vld [vmem:[%s9617_s2 + $0x74] sm:$0xf] }
 0x269   : > { %v3621_v6 = vpop.permute.xlu1 %3620  ;;  %4003 = vrot.lane.b32.xlu0 %v3912_v52, %s6492_s5  ;;  %v6456_v47 = vld [vmem:[#allocation2 + $0x8] sm:$0xff]   ;;  %v4300_v52 = vshll.u32 %v4127_v48, 16  ;;  %v4480_v48 = vshll.u32 %v4145_v31, 16  ;;  %v4129_v31 = vld [vmem:[%s6535_s17 + $0x54] sm:$0xf] }
 0x26a   : > { %3721 = vst.msk [vmem:[#allocation2 + $0x5c] sm:$0xf] %vm3697_vm0, %v3621_v6  ;;  %6337 = vmatmul.mubr.msk.bf16.gmra.mrb[4].mxu0 %vm5419_vm6, %v6456_v47  ;;  %v4293_v47 = vor.u32 %v4292_v36, %v4289_v20 }
 0x26b   : > { %4005 = vrot.lane.b32.xlu1 %v3915_v49, %s6492_s5  ;;  %v4575_v59 = vpop.permute.xlu0 %4574  ;;  %6340 = vmatprep.mubr.msk.bf16.mxu0 %vm6495_vm14, %v6491_v39  ;;  %v3865_v49 = vrot.slane %v3863_v25, 4  ;;  %v4302_v34 = vrot.slane %v4300_v52, 6  ;;  %v4465_v52 = vrot.slane %v8827_v38, 4 }
 0x26c   : > { %4694 = vst.msk [vmem:[#allocation2 + $0x10] sm:$0xf] %vm4689_vm3, %v4575_v59  ;;  %v4295_v56 = vrot.slane %v4293_v47, 4 }
 0x26d   : > { %v4577_v13 = vpop.permute.xlu1 %4576  ;;  %4834 = vrot.lane.b32.xlu0 %v4742_v27, %s6494_s11  ;;  %v4299_v27 = vrot.slane %v4297_v0, 5  ;;  %v3867_v59 = vsel %vm8289_vm8, %v3865_v49, %v3866_v46  ;;  %v4744_v0 = vld [vmem:[%s6535_s17 + $0x3c] sm:$0xf]  ;;  %v4745_v49 = vld [vmem:[%s6535_s17 + $0x40] sm:$0xf] }
 0x26e   : > { %4695 = vst.msk [vmem:[#allocation2 + $0x14] sm:$0xf] %vm4689_vm3, %v4577_v13  ;;  %v3771_v13 = vld [vmem:[%s6535_s17 + $0x90] sm:$0xf] }
 0x26f   : > { %4836 = vrot.lane.b32.xlu1 %v4743_v16, %s6494_s11  ;;  %v3992_v33 = vpop.permute.xlu0 %3991  ;;  %v3483_v16 = vrot.slane %v3482_v50, 4 }
 0x270   : > { %4093 = vst.msk [vmem:[#allocation2 + $0x58] sm:$0xf] %vm4070_vm1, %v3992_v33  ;;  %v4144_v33 = vld [vmem:[%s6535_s17 + $0x90] sm:$0xf] }
 0x271   : > { %v3994_v37 = vpop.permute.xlu1 %3993  ;;  %4622 = vrot.lane.b32.xlu0 %v4454_v19, %s6493_s8  ;;  %v4467_v60 = vshrl.u32 %v4144_v33, 16  ;;  %v4470_v32 = vshll.u32 %v4144_v33, 16  ;;  %v4128_v33 = vld [vmem:[%s6535_s17 + $0x50] sm:$0xf] }
 0x272   : > { %4094 = vst.msk [vmem:[#allocation2 + $0x5c] sm:$0xf] %vm4070_vm1, %v3994_v37  ;;  %v4285_v37 = vrot.slane %v8787_v8, 4 }
 0x273   : > { %4624 = vrot.lane.b32.xlu1 %v4464_v11, %s6493_s8  ;;  %v4823_v44 = vpop.permute.xlu0 %4822  ;;  %v3478_v11 = vsel %vm7760_vm2, %v3473_v61, %v3477_v63  ;;  %v4469_v25 = vrot.slane %v4467_v60, 5  ;;  %v4472_v63 = vrot.slane %v4470_v32, 6  ;;  %v4310_v60 = vshll.u32 %v4128_v33, 16 }
 0x274   : > { %4942 = vst.msk [vmem:[#allocation2 + $0x10] sm:$0xf] %vm4937_vm4, %v4823_v44  ;;  %v3917_v44 = vrot.slane %v3771_v13, 5 }
 0x275   : > { %v4825_v1 = vpop.permute.xlu1 %4824  ;;  %5082 = vrot.lane.b32.xlu0 %v4990_v23, %s6496_s19  ;;  %v8902_v23 = vor.u32 %v4302_v34, %v4299_v27  ;;  %v4473_v41 = vor.u32 %v4472_v63, %v4469_v25  ;;  %v3489_v27 = vshrl.u32 %v8866_v5, 16  ;;  %v4992_v34 = vld [vmem:[%s9617_s2 + $0x30] sm:$0xf] }
 0x276   : > { %4943 = vst.msk [vmem:[#allocation2 + $0x14] sm:$0xf] %vm4937_vm4, %v4825_v1  ;;  %v3919_v55 = vrot.slane %v3917_v44, 4  ;;  %v3918_v53 = vsel %vm8289_vm8, %v3916_v7, %v3917_v44  ;;  %v4763_v44 = vld [vmem:[%s6535_s17 + $0x88] sm:$0xf] }
 0x277   : > { %5084 = vrot.lane.b32.xlu1 %v4991_v10, %s6496_s19  ;;  %v4611_v40 = vpop.permute.xlu0 %4610  ;;  %v3488_v10 = vsel %vm7760_vm2, %v3483_v16, %v8892_v3  ;;  %v4475_v50 = vrot.slane %v4473_v41, 4  ;;  %v4474_v38 = vsel %vm8310_vm12, %v4465_v52, %v4473_v41  ;;  %v4993_v16 = vld [vmem:[%s9617_s2 + $0x34] sm:$0xf] }
 0x278   : > { %4712 = vst.msk [vmem:[#allocation2 + $0x58] sm:$0xf] %vm4689_vm3, %v4611_v40  ;;  %v8981_v7 = vld [vmem:[%s6535_s17 + $0x54] sm:$0xf] }
 0x279   : > { %v4613_v15 = vpop.permute.xlu1 %4612  ;;  %4870 = vrot.lane.b32.xlu0 %v4760_v17, %s6494_s11  ;;  %v4294_v17 = vsel %vm8310_vm12, %v4285_v37, %v4293_v47  ;;  %v3157_v47 = vld [vmem:[%s6535_s17 + $0x98] sm:$0xf]  ;;  %v4762_v37 = vld [vmem:[%s6535_s17 + $0x84] sm:$0xf]  ;;  %v3872_v41 = vrot.slane %v8981_v7, 5 }
 0x27a   : > { %4713 = vst.msk [vmem:[#allocation2 + $0x5c] sm:$0xf] %vm4689_vm3, %v4613_v15  ;;  %v3495_v13 = vshll.u32 %v3157_v47, 16 }
 0x27b   : > { %4872 = vrot.lane.b32.xlu1 %v4761_v29, %s6494_s11  ;;  %v5071_v51 = vpop.permute.xlu0 %5070  ;;  %v4304_v29 = vsel %vm8310_vm12, %v4295_v56, %v8902_v23 }
 0x27c   : > { %5190 = vst.msk [vmem:[#allocation2 + $0x10] sm:$0xf] %vm5185_vm5, %v5071_v51  ;;  %v4482_v51 = vrot.slane %v4480_v48, 6  ;;  %v4312_v48 = vrot.slane %v4310_v60, 6 }
 0x27d   : > { %v5073_v58 = vpop.permute.xlu1 %5072  ;;  %5118 = vrot.lane.b32.xlu0 %v5008_v42, %s6496_s19  ;;  %v3921_v42 = vsel %vm8289_vm8, %v3919_v55, %v3920_v4  ;;  %v3868_v55 = vrot.slane %v3866_v46, 4 }
 0x27e   : > { %5191 = vst.msk [vmem:[#allocation2 + $0x14] sm:$0xf] %vm5185_vm5, %v5073_v58  ;;  %v8945_v12 = vor.u32 %v4482_v51, %v4479_v43 }
 0x27f   : > { %5120 = vrot.lane.b32.xlu1 %v5009_v26, %s6496_s19  ;;  %v4859_v6 = vpop.permute.xlu0 %4858 }
 0x280   : > { %4960 = vst.msk [vmem:[#allocation2 + $0x58] sm:$0xf] %vm4937_vm4, %v4859_v6  ;;  %v4484_v61 = vsel %vm8310_vm12, %v4475_v50, %v8945_v12 }
 0x281   : > { %v4861_v19 = vpop.permute.xlu1 %4860  ;;  %3971 = vrot.lane.b32.xlu0 %v3864_v24, %s6492_s5 }
 0x282   : > { %4961 = vst.msk [vmem:[#allocation2 + $0x5c] sm:$0xf] %vm4937_vm4, %v4861_v19  ;;  %v3499_v19 = vshrl.u32 %v3157_v47, 16 }
 0x283   : > { %3973 = vrot.lane.b32.xlu1 %v3867_v59, %s6492_s5  ;;  %v5107_v54 = vpop.permute.xlu0 %5106 }
 0x284   : > { %5208 = vst.msk [vmem:[#allocation2 + $0x58] sm:$0xf] %vm5185_vm5, %v5107_v54  ;;  %v3491_v54 = vrot.slane %v3489_v27, 4 }
 0x285   : > { %v5109_v1 = vpop.permute.xlu1 %5108  ;;  %3634 = vrot.lane.b32.xlu0 %v3478_v11, %s6490_s23  ;;  %v6457_v8 = vld [vmem:[#allocation2 + $0x10] sm:$0xff]  }
 0x286   : > { %5209 = vst.msk [vmem:[#allocation2 + $0x5c] sm:$0xf] %vm5185_vm5, %v5109_v1  ;;  %6341 = vmatmul.mubr.msk.bf16.gmra.mrb[8].mxu0 %vm5419_vm6, %v6457_v8  ;;  %v3755_v11 = vld [vmem:[%s6535_s17 + $0x50] sm:$0xf]  ;;  %v3497_v1 = vrot.slane %v3495_v13, 5  ;;  %v3501_v8 = vrot.slane %v3499_v19, 4  ;;  %v3492_v25 = vor.u32 %v3491_v54, %v8892_v3 }
 0x287   : > { %3636 = vrot.lane.b32.xlu1 %v3488_v10, %s6490_s23  ;;  %v3960_v40 = vpop.permute.xlu0 %3959  ;;  %6344 = vmatprep.mubr.msk.bf16.mxu0 %vm6495_vm14, %v6491_v39  ;;  %v4307_v10 = vshrl.u32 %v4128_v33, 16  ;;  %v3869_v32 = vrot.slane %v3755_v11, 5  ;;  %v9027_v13 = vld [vmem:[%s6535_s17 + $0x9c] sm:$0xf]  ;;  %v3922_v54 = vrot.slane %v3920_v4, 4 }
 0x288   : > { %4077 = vst.msk [vmem:[#allocation2 + $0x18] sm:$0xf] %vm4070_vm1, %v3960_v40  ;;  %v8984_v40 = vld [vmem:[%s6535_s17 + $0x9c] sm:$0xf]  ;;  %v3502_v9 = vor.u32 %v3501_v8, %v3497_v1  ;;  %v3493_v51 = vrot.slane %v3492_v25, 4  ;;  %v3926_v60 = vrot.slane %v9027_v13, 5 }
 0x289   : > { %v3962_v2 = vpop.permute.xlu1 %3961  ;;  %4590 = vrot.lane.b32.xlu0 %v4294_v17, %s6493_s8  ;;  %v4309_v57 = vrot.slane %v4307_v10, 5  ;;  %v3505_v46 = vshll.u32 %v8984_v40, 16  ;;  %v3870_v43 = vsel %vm8289_vm8, %v3868_v55, %v3869_v32  ;;  %v4147_v11 = vld [vmem:[%s6535_s17 + $0x9c] sm:$0xf] }
 0x28a   : > { %4078 = vst.msk [vmem:[#allocation2 + $0x1c] sm:$0xf] %vm4070_vm1, %v3962_v2  ;;  %v4317_v2 = vshrl.u32 %v4129_v31, 16  ;;  %v4497_v8 = vshrl.u32 %v4147_v11, 16 }
 0x28b   : > { %4592 = vrot.lane.b32.xlu1 %v4304_v29, %s6493_s8  ;;  %v3623_v15 = vpop.permute.xlu0 %3622  ;;  %v5010_v29 = vld [vmem:[%s9617_s2 + $0x78] sm:$0xf]  ;;  %v9010_v50 = vrot.slane %v3505_v46, 5  ;;  %v4747_v46 = vld [vmem:[%s6535_s17 + $0x48] sm:$0xf] }
 0x28c   : > { %3722 = vst.msk [vmem:[#allocation2 + $0x60] sm:$0xf] %vm3697_vm0, %v3623_v15  ;;  %v5011_v15 = vld [vmem:[%s9617_s2 + $0x7c] sm:$0xf]  ;;  %v4499_v25 = vrot.slane %v4497_v8, 5 }
 0x28d   : > { %v3625_v20 = vpop.permute.xlu1 %3624  ;;  %4007 = vrot.lane.b32.xlu0 %v3918_v53, %s6492_s5  ;;  %v6458_v36 = vld [vmem:[#allocation2 + $0x58] sm:$0xff]   ;;  %v4320_v53 = vshll.u32 %v4129_v31, 16  ;;  %v4500_v31 = vshll.u32 %v4147_v11, 16 }
 0x28e   : > { %3723 = vst.msk [vmem:[#allocation2 + $0x64] sm:$0xf] %vm3697_vm0, %v3625_v20  ;;  %6377 = vmatmul.mubr.msk.bf16.vlgmr.msra.gmra.mrb[0].mxu1 %vm5419_vm6, %v6458_v36  ;;  %v4313_v36 = vor.u32 %v4312_v48, %v4309_v57 }
 0x28f   : > { %4009 = vrot.lane.b32.xlu1 %v3921_v42, %s6492_s5  ;;  %v4579_v26 = vpop.permute.xlu0 %4578  ;;  %6380 = vmatprep.mubr.msk.bf16.mxu1 %vm6495_vm14, %v6491_v39  ;;  %v3871_v42 = vrot.slane %v3869_v32, 4  ;;  %v4322_v52 = vrot.slane %v4320_v53, 6  ;;  %v4485_v53 = vrot.slane %v8945_v12, 4 }
 0x290   : > { %4696 = vst.msk [vmem:[#allocation2 + $0x18] sm:$0xf] %vm4689_vm3, %v4579_v26  ;;  %v4315_v27 = vrot.slane %v4313_v36, 4 }
 0x291   : > { %v4581_v58 = vpop.permute.xlu1 %4580  ;;  %4838 = vrot.lane.b32.xlu0 %v4744_v0, %s6494_s11  ;;  %v4319_v0 = vrot.slane %v4317_v2, 5  ;;  %v3873_v26 = vsel %vm8289_vm8, %v3871_v42, %v3872_v41  ;;  %v4746_v2 = vld [vmem:[%s6535_s17 + $0x44] sm:$0xf]  ;;  %v6476_v42 = vld [vmem:[%s6535_s17 + $0x58] sm:$0xf] }
 0x292   : > { %4697 = vst.msk [vmem:[#allocation2 + $0x1c] sm:$0xf] %vm4689_vm3, %v4581_v58  ;;  %v3773_v58 = vld [vmem:[%s6535_s17 + $0x98] sm:$0xf] }
 0x293   : > { %4840 = vrot.lane.b32.xlu1 %v4745_v49, %s6494_s11  ;;  %v3996_v24 = vpop.permute.xlu0 %3995  ;;  %v3503_v49 = vrot.slane %v3502_v9, 4  ;;  %v3339_v9 = vshrl.u32 %v6476_v42, 16 }
 0x294   : > { %4095 = vst.msk [vmem:[#allocation2 + $0x60] sm:$0xf] %vm4070_vm1, %v3996_v24  ;;  %v4146_v24 = vld [vmem:[%s6535_s17 + $0x98] sm:$0xf] }
 0x295   : > { %v3998_v6 = vpop.permute.xlu1 %3997  ;;  %4626 = vrot.lane.b32.xlu0 %v4474_v38, %s6493_s8  ;;  %v4487_v19 = vshrl.u32 %v4146_v24, 16  ;;  %v4490_v33 = vshll.u32 %v4146_v24, 16  ;;  %v3509_v24 = vshrl.u32 %v8984_v40, 16  ;;  %v4130_v40 = vld [vmem:[%s6535_s17 + $0x58] sm:$0xf] }
 0x296   : > { %4096 = vst.msk [vmem:[#allocation2 + $0x64] sm:$0xf] %vm4070_vm1, %v3998_v6  ;;  %v4305_v6 = vrot.slane %v8902_v23, 4 }
 0x297   : > { %4628 = vrot.lane.b32.xlu1 %v4484_v61, %s6493_s8  ;;  %v4827_v59 = vpop.permute.xlu0 %4826  ;;  %v3498_v61 = vsel %vm7760_vm2, %v3493_v51, %v3497_v1  ;;  %v4489_v32 = vrot.slane %v4487_v19, 5  ;;  %v4492_v1 = vrot.slane %v4490_v33, 6 }
 0x298   : > { %4944 = vst.msk [vmem:[#allocation2 + $0x18] sm:$0xf] %vm4937_vm4, %v4827_v59  ;;  %v3923_v59 = vrot.slane %v3773_v58, 5 }
 0x299   : > { %v4829_v5 = vpop.permute.xlu1 %4828  ;;  %5086 = vrot.lane.b32.xlu0 %v4992_v34, %s6496_s19  ;;  %v9020_v34 = vor.u32 %v4322_v52, %v4319_v0  ;;  %v4493_v55 = vor.u32 %v4492_v1, %v4489_v32  ;;  %v3341_v0 = vrot.slane %v3339_v9, 4 }
 0x29a   : > { %4945 = vst.msk [vmem:[#allocation2 + $0x1c] sm:$0xf] %vm4937_vm4, %v4829_v5  ;;  %v3925_v10 = vrot.slane %v3923_v59, 4  ;;  %v3924_v4 = vsel %vm8289_vm8, %v3922_v54, %v3923_v59  ;;  %v4764_v59 = vld [vmem:[%s6535_s17 + $0x8c] sm:$0xf] }
 0x29b   : > { %5088 = vrot.lane.b32.xlu1 %v4993_v16, %s6496_s19  ;;  %v4615_v56 = vpop.permute.xlu0 %4614  ;;  %v3508_v16 = vsel %vm7760_vm2, %v3503_v49, %v9010_v50  ;;  %v4494_v12 = vsel %vm8310_vm12, %v4485_v53, %v4493_v55  ;;  %v4994_v49 = vld [vmem:[%s9617_s2 + $0x38] sm:$0xf] }
 0x29c   : > { %4714 = vst.msk [vmem:[#allocation2 + $0x60] sm:$0xf] %vm4689_vm3, %v4615_v56 }
 0x29d   : > { %v4617_v17 = vpop.permute.xlu1 %4616  ;;  %4874 = vrot.lane.b32.xlu0 %v4762_v37, %s6494_s11  ;;  %v4314_v37 = vsel %vm8310_vm12, %v4305_v6, %v4313_v36  ;;  %v3342_v6 = vor.u32 %v3341_v0, %v8258_v18 }
 0x29e   : > { %4715 = vst.msk [vmem:[#allocation2 + $0x64] sm:$0xf] %vm4689_vm3, %v4617_v17 }
 0x29f   : > { %4876 = vrot.lane.b32.xlu1 %v4763_v44, %s6494_s11  ;;  %v5075_v63 = vpop.permute.xlu0 %5074  ;;  %v4324_v44 = vsel %vm8310_vm12, %v4315_v27, %v9020_v34  ;;  %v3343_v18 = vrot.slane %v3342_v6, 4  ;;  %v4325_v6 = vrot.slane %v9020_v34, 4 }
 0x2a0   : > { %5192 = vst.msk [vmem:[#allocation2 + $0x18] sm:$0xf] %vm5185_vm5, %v5075_v63  ;;  %v4502_v63 = vrot.slane %v4500_v31, 6  ;;  %v4131_v31 = vld [vmem:[%s6535_s17 + $0x5c] sm:$0xf] }
 0x2a1   : > { %v5077_v3 = vpop.permute.xlu1 %5076  ;;  %5122 = vrot.lane.b32.xlu0 %v5010_v29, %s6496_s19  ;;  %v3927_v29 = vsel %vm8289_vm8, %v3925_v10, %v3926_v60  ;;  %v4330_v10 = vshll.u32 %v4130_v40, 16  ;;  %v4337_v53 = vshrl.u32 %v4131_v31, 16 }
 0x2a2   : > { %5193 = vst.msk [vmem:[#allocation2 + $0x1c] sm:$0xf] %vm5185_vm5, %v5077_v3  ;;  %v4495_v3 = vrot.slane %v4493_v55, 4 }
 0x2a3   : > { %5124 = vrot.lane.b32.xlu1 %v5011_v15, %s6496_s19  ;;  %v4863_v20 = vpop.permute.xlu0 %4862 }
 0x2a4   : > { %4962 = vst.msk [vmem:[#allocation2 + $0x60] sm:$0xf] %vm4937_vm4, %v4863_v20 }
 0x2a5   : > { %v4865_v38 = vpop.permute.xlu1 %4864  ;;  %3975 = vrot.lane.b32.xlu0 %v3870_v43, %s6492_s5  ;;  %v9064_v43 = vor.u32 %v4502_v63, %v4499_v25  ;;  %v3874_v25 = vrot.slane %v3872_v41, 4 }
 0x2a6   : > { %4963 = vst.msk [vmem:[#allocation2 + $0x64] sm:$0xf] %vm4937_vm4, %v4865_v38  ;;  %v3159_v38 = vld [vmem:[%s6535_s17 + $0xa0] sm:$0xf] }
 0x2a7   : > { %3977 = vrot.lane.b32.xlu1 %v3873_v26, %s6492_s5  ;;  %v5111_v47 = vpop.permute.xlu0 %5110  ;;  %v4504_v36 = vsel %vm8310_vm12, %v4495_v3, %v9064_v43  ;;  %v9079_v26 = vld [vmem:[%s6535_s17 + $0x5c] sm:$0xf]  ;;  %v3519_v19 = vshrl.u32 %v3159_v38, 16 }
 0x2a8   : > { %5210 = vst.msk [vmem:[#allocation2 + $0x60] sm:$0xf] %vm5185_vm5, %v5111_v47  ;;  %v3345_v47 = vshll.u32 %v9079_v26, 16 }
 0x2a9   : > { %v5113_v5 = vpop.permute.xlu1 %5112  ;;  %3638 = vrot.lane.b32.xlu0 %v3498_v61, %s6490_s23  ;;  %v6459_v23 = vld [vmem:[#allocation2 + $0x18] sm:$0xff]   ;;  %v3521_v8 = vrot.slane %v3519_v19, 4 }
 0x2aa   : > { %5211 = vst.msk [vmem:[#allocation2 + $0x64] sm:$0xf] %vm5185_vm5, %v5113_v5  ;;  %6345 = vmatmul.mubr.msk.bf16.gmra.mrb[12].mxu0 %vm5419_vm6, %v6459_v23  ;;  %v4995_v61 = vld [vmem:[%s9617_s2 + $0x3c] sm:$0xf]  ;;  %v3757_v5 = vld [vmem:[%s6535_s17 + $0x58] sm:$0xf] }
 0x2ab   : > { %3640 = vrot.lane.b32.xlu1 %v3508_v16, %s6490_s23  ;;  %v3964_v56 = vpop.permute.xlu0 %3963  ;;  %6348 = vmatprep.mubr.msk.bf16.mxu0 %vm6495_vm14, %v6491_v39  ;;  %v3515_v16 = vshll.u32 %v3159_v38, 16  ;;  %v4765_v23 = vld [vmem:[%s6535_s17 + $0x90] sm:$0xf]  ;;  %v9102_v11 = vrot.slane %v3345_v47, 5  ;;  %v3875_v32 = vrot.slane %v3757_v5, 5 }
 0x2ac   : > { %4079 = vst.msk [vmem:[#allocation2 + $0x20] sm:$0xf] %vm4070_vm1, %v3964_v56  ;;  %v5012_v56 = vld [vmem:[%s9617_s2 + $0x80] sm:$0xf] }
 0x2ad   : > { %v3966_v22 = vpop.permute.xlu1 %3965  ;;  %4594 = vrot.lane.b32.xlu0 %v4314_v37, %s6493_s8  ;;  %v3511_v37 = vrot.slane %v3509_v24, 4  ;;  %v3517_v1 = vrot.slane %v3515_v16, 5  ;;  %v3348_v55 = vsel %vm7760_vm2, %v3343_v18, %v9102_v11  ;;  %v3877_v42 = vrot.slane %v3875_v32, 4  ;;  %v4148_v24 = vld [vmem:[%s6535_s17 + $0xa0] sm:$0xf] }
 0x2ae   : > { %4080 = vst.msk [vmem:[#allocation2 + $0x24] sm:$0xf] %vm4070_vm1, %v3966_v22  ;;  %v3876_v41 = vsel %vm8289_vm8, %v3874_v25, %v3875_v32  ;;  %v4507_v5 = vshrl.u32 %v4148_v24, 16  ;;  %v4149_v18 = vld [vmem:[%s6535_s17 + $0xa4] sm:$0xf] }
 0x2af   : > { %4596 = vrot.lane.b32.xlu1 %v4324_v44, %s6493_s8  ;;  %v3627_v17 = vpop.permute.xlu0 %3626  ;;  %v4327_v44 = vshrl.u32 %v4130_v40, 16  ;;  %v3512_v63 = vor.u32 %v3511_v37, %v9010_v50  ;;  %v4520_v13 = vshll.u32 %v4149_v18, 16 }
 0x2b0   : > { %3724 = vst.msk [vmem:[#allocation2 + $0x68] sm:$0xf] %vm3697_vm0, %v3627_v17  ;;  %v9115_v17 = vld [vmem:[%s6535_s17 + $0xa4] sm:$0xf] }
 0x2b1   : > { %v3629_v57 = vpop.permute.xlu1 %3628  ;;  %4011 = vrot.lane.b32.xlu0 %v3924_v4, %s6492_s5  ;;  %v6460_v48 = vld [vmem:[#allocation2 + $0x60] sm:$0xff]   ;;  %v9112_v4 = vld [vmem:[%s6535_s17 + $0x5c] sm:$0xf]  ;;  %v3525_v3 = vshll.u32 %v9115_v17, 16  ;;  %v3513_v50 = vrot.slane %v3512_v63, 4 }
 0x2b2   : > { %3725 = vst.msk [vmem:[#allocation2 + $0x6c] sm:$0xf] %vm3697_vm0, %v3629_v57  ;;  %6381 = vmatmul.mubr.msk.bf16.gmra.mrb[4].mxu1 %vm5419_vm6, %v6460_v48  ;;  %v4329_v48 = vrot.slane %v4327_v44, 5  ;;  %v3878_v9 = vrot.slane %v9112_v4, 5 }
 0x2b3   : > { %4013 = vrot.lane.b32.xlu1 %v3927_v29, %s6492_s5  ;;  %v4583_v15 = vpop.permute.xlu0 %4582  ;;  %6384 = vmatprep.mubr.msk.bf16.mxu1 %vm6495_vm14, %v6491_v39  ;;  %v5013_v29 = vld [vmem:[%s9617_s2 + $0x84] sm:$0xf] }
 0x2b4   : > { %4698 = vst.msk [vmem:[#allocation2 + $0x20] sm:$0xf] %vm4689_vm3, %v4583_v15  ;;  %v4340_v15 = vshll.u32 %v4131_v31, 16  ;;  %v3879_v0 = vsel %vm8289_vm8, %v3877_v42, %v3878_v9  ;;  %v4517_v31 = vshrl.u32 %v4149_v18, 16 }
 0x2b5   : > { %v4585_v51 = vpop.permute.xlu1 %4584  ;;  %4842 = vrot.lane.b32.xlu0 %v4746_v2, %s6494_s11  ;;  %v4332_v2 = vrot.slane %v4330_v10, 6 }
 0x2b6   : > { %4699 = vst.msk [vmem:[#allocation2 + $0x24] sm:$0xf] %vm4689_vm3, %v4585_v51 }
 0x2b7   : > { %4844 = vrot.lane.b32.xlu1 %v4747_v46, %s6494_s11  ;;  %v4000_v20 = vpop.permute.xlu0 %3999  ;;  %v3522_v46 = vor.u32 %v3521_v8, %v3517_v1 }
 0x2b8   : > { %4097 = vst.msk [vmem:[#allocation2 + $0x68] sm:$0xf] %vm4070_vm1, %v4000_v20  ;;  %v4339_v20 = vrot.slane %v4337_v53, 5  ;;  %v4748_v53 = vld [vmem:[%s6535_s17 + $0x4c] sm:$0xf] }
 0x2b9   : > { %v4002_v52 = vpop.permute.xlu1 %4001  ;;  %4630 = vrot.lane.b32.xlu0 %v4494_v12, %s6493_s8  ;;  %v4333_v12 = vor.u32 %v4332_v2, %v4329_v48  ;;  %v4522_v48 = vrot.slane %v4520_v13, 6 }
 0x2ba   : > { %4098 = vst.msk [vmem:[#allocation2 + $0x6c] sm:$0xf] %vm4070_vm1, %v4002_v52  ;;  %v3523_v52 = vrot.slane %v3522_v46, 4  ;;  %v3143_v46 = vld [vmem:[%s6535_s17 + $0x60] sm:$0xf] }
 0x2bb   : > { %4632 = vrot.lane.b32.xlu1 %v4504_v36, %s6493_s8  ;;  %v4831_v58 = vpop.permute.xlu0 %4830  ;;  %v4342_v36 = vrot.slane %v4340_v15, 6  ;;  %v4334_v37 = vsel %vm8310_vm12, %v4325_v6, %v4333_v12  ;;  %v4505_v15 = vrot.slane %v9064_v43, 4  ;;  %v9216_v6 = vld [vmem:[%s6535_s17 + $0x64] sm:$0xf] }
 0x2bc   : > { %4946 = vst.msk [vmem:[#allocation2 + $0x20] sm:$0xf] %vm4937_vm4, %v4831_v58  ;;  %v3775_v58 = vld [vmem:[%s6535_s17 + $0xa0] sm:$0xf] }
 0x2bd   : > { %v4833_v27 = vpop.permute.xlu1 %4832  ;;  %5090 = vrot.lane.b32.xlu0 %v4994_v49, %s6496_s19  ;;  %v9141_v49 = vrot.slane %v3525_v3, 5  ;;  %v9151_v16 = vor.u32 %v4342_v36, %v4339_v20  ;;  %v3929_v19 = vrot.slane %v3775_v58, 5  ;;  %v4749_v3 = vld [vmem:[%s6535_s17 + $0x50] sm:$0xf]  ;;  %v3359_v20 = vshrl.u32 %v3143_v46, 16 }
 0x2be   : > { %4947 = vst.msk [vmem:[#allocation2 + $0x24] sm:$0xf] %vm4937_vm4, %v4833_v27 }
 0x2bf   : > { %5092 = vrot.lane.b32.xlu1 %v4995_v61, %s6496_s19  ;;  %v4619_v33 = vpop.permute.xlu0 %4618  ;;  %v3518_v61 = vsel %vm7760_vm2, %v3513_v50, %v3517_v1  ;;  %v3528_v40 = vsel %vm7760_vm2, %v3523_v52, %v9141_v49  ;;  %v3931_v10 = vrot.slane %v3929_v19, 4  ;;  %v4509_v1 = vrot.slane %v4507_v5, 5  ;;  %v4996_v52 = vld [vmem:[%s9617_s2 + $0x40] sm:$0xf] }
 0x2c0   : > { %4716 = vst.msk [vmem:[#allocation2 + $0x68] sm:$0xf] %vm4689_vm3, %v4619_v33  ;;  %v9158_v33 = vld [vmem:[%s6535_s17 + $0xa4] sm:$0xf] }
 0x2c1   : > { %v4621_v54 = vpop.permute.xlu1 %4620  ;;  %4878 = vrot.lane.b32.xlu0 %v4764_v59, %s6494_s11  ;;  %v4335_v59 = vrot.slane %v4333_v12, 4  ;;  %v3932_v32 = vrot.slane %v9158_v33, 5  ;;  %v3355_v12 = vshll.u32 %v3143_v46, 16 }
 0x2c2   : > { %4717 = vst.msk [vmem:[#allocation2 + $0x6c] sm:$0xf] %vm4689_vm3, %v4621_v54  ;;  %v3928_v54 = vrot.slane %v3926_v60, 4 }
 0x2c3   : > { %4880 = vrot.lane.b32.xlu1 %v4765_v23, %s6494_s11  ;;  %v5079_v22 = vpop.permute.xlu0 %5078  ;;  %v4510_v23 = vshll.u32 %v4148_v24, 16  ;;  %v4344_v44 = vsel %vm8310_vm12, %v4335_v59, %v9151_v16  ;;  %v3933_v25 = vsel %vm8289_vm8, %v3931_v10, %v3932_v32  ;;  %v3361_v24 = vrot.slane %v3359_v20, 4  ;;  %v3161_v59 = vld [vmem:[%s6535_s17 + $0xa8] sm:$0xf]  ;;  %v3759_v10 = vld [vmem:[%s6535_s17 + $0x60] sm:$0xf] }
 0x2c4   : > { %5194 = vst.msk [vmem:[#allocation2 + $0x20] sm:$0xf] %vm5185_vm5, %v5079_v22  ;;  %v3930_v22 = vsel %vm8289_vm8, %v3928_v54, %v3929_v19  ;;  %v3529_v19 = vshrl.u32 %v9115_v17, 16  ;;  %v3535_v54 = vshll.u32 %v3161_v59, 16 }
 0x2c5   : > { %v5081_v57 = vpop.permute.xlu1 %5080  ;;  %5126 = vrot.lane.b32.xlu0 %v5012_v56, %s6496_s19  ;;  %v4512_v8 = vrot.slane %v4510_v23, 6 }
 0x2c6   : > { %5195 = vst.msk [vmem:[#allocation2 + $0x24] sm:$0xf] %vm5185_vm5, %v5081_v57  ;;  %v4519_v57 = vrot.slane %v4517_v31, 5  ;;  %v3531_v13 = vrot.slane %v3529_v19, 4 }
 0x2c7   : > { %5128 = vrot.lane.b32.xlu1 %v5013_v29, %s6496_s19  ;;  %v4867_v7 = vpop.permute.xlu0 %4866  ;;  %v4513_v63 = vor.u32 %v4512_v8, %v4509_v1 }
 0x2c8   : > { %4964 = vst.msk [vmem:[#allocation2 + $0x68] sm:$0xf] %vm4937_vm4, %v4867_v7 }
 0x2c9   : > { %v4869_v51 = vpop.permute.xlu1 %4868  ;;  %3608 = vrot.lane.b32.xlu0 %v3348_v55, %s6490_s23  ;;  %v4515_v7 = vrot.slane %v4513_v63, 4  ;;  %v4514_v43 = vsel %vm8310_vm12, %v4505_v15, %v4513_v63  ;;  %v3537_v63 = vrot.slane %v3535_v54, 5  ;;  %v9252_v15 = vld [vmem:[%s6535_s17 + $0xac] sm:$0xf] }
 0x2ca   : > { %4965 = vst.msk [vmem:[#allocation2 + $0x6c] sm:$0xf] %vm4937_vm4, %v4869_v51  ;;  %v3349_v51 = vshrl.u32 %v9079_v26, 16 }
 0x2cb   : > { %3979 = vrot.lane.b32.xlu1 %v3876_v41, %s6492_s5  ;;  %v5115_v38 = vpop.permute.xlu0 %5114  ;;  %v9197_v41 = vor.u32 %v4522_v48, %v4519_v57  ;;  %v4133_v48 = vld [vmem:[%s6535_s17 + $0x64] sm:$0xf] }
 0x2cc   : > { %5212 = vst.msk [vmem:[#allocation2 + $0x68] sm:$0xf] %vm5185_vm5, %v5115_v38  ;;  %v3351_v58 = vrot.slane %v3349_v51, 4  ;;  %v3357_v38 = vrot.slane %v3355_v12, 5  ;;  %v4357_v12 = vshrl.u32 %v4133_v48, 16  ;;  %v4360_v20 = vshll.u32 %v4133_v48, 16 }
 0x2cd   : > { %v5117_v47 = vpop.permute.xlu1 %5116  ;;  %3981 = vrot.lane.b32.xlu0 %v3879_v0, %s6492_s5  ;;  %v6461_v27 = vld [vmem:[#allocation2 + $0x20] sm:$0xff]   ;;  %v4524_v0 = vsel %vm8310_vm12, %v4515_v7, %v9197_v41  ;;  %v3532_v7 = vor.u32 %v3531_v13, %v9141_v49 }
 0x2ce   : > { %5213 = vst.msk [vmem:[#allocation2 + $0x6c] sm:$0xf] %vm5185_vm5, %v5117_v47  ;;  %6349 = vmatmul.mubr.msk.bf16.gmra.mrb[16].mxu0 %vm5419_vm6, %v6461_v27  ;;  %v4997_v47 = vld [vmem:[%s9617_s2 + $0x44] sm:$0xf]  ;;  %v3352_v5 = vor.u32 %v3351_v58, %v9102_v11  ;;  %v3362_v23 = vor.u32 %v3361_v24, %v3357_v38  ;;  %v5014_v11 = vld [vmem:[%s9617_s2 + $0x88] sm:$0xf] }
 0x2cf   : > { %3642 = vrot.lane.b32.xlu1 %v3518_v61, %s6490_s23  ;;  %v3968_v34 = vpop.permute.xlu0 %3967  ;;  %6352 = vmatprep.mubr.msk.bf16.mxu0 %vm6495_vm14, %v6491_v39  ;;  %v3533_v49 = vrot.slane %v3532_v7, 4 }
 0x2d0   : > { %4081 = vst.msk [vmem:[#allocation2 + $0x28] sm:$0xf] %vm4070_vm1, %v3968_v34  ;;  %v3365_v34 = vshll.u32 %v9216_v6, 16  ;;  %v3353_v1 = vrot.slane %v3352_v5, 4  ;;  %v3363_v8 = vrot.slane %v3362_v23, 4 }
 0x2d1   : > { %v3970_v56 = vpop.permute.xlu1 %3969  ;;  %3644 = vrot.lane.b32.xlu0 %v3528_v40, %s6490_s23  ;;  %v4766_v40 = vld [vmem:[%s6535_s17 + $0x94] sm:$0xf]  ;;  %v4150_v23 = vld [vmem:[%s6535_s17 + $0xa8] sm:$0xf] }
 0x2d2   : > { %4082 = vst.msk [vmem:[#allocation2 + $0x2c] sm:$0xf] %vm4070_vm1, %v3970_v56  ;;  %v3539_v56 = vshrl.u32 %v3161_v59, 16  ;;  %v9239_v31 = vrot.slane %v3365_v34, 5  ;;  %v3538_v34 = vsel %vm7760_vm2, %v3533_v49, %v3537_v63  ;;  %v3145_v49 = vld [vmem:[%s6535_s17 + $0x68] sm:$0xf] }
 0x2d3   : > { %4598 = vrot.lane.b32.xlu1 %v4334_v37, %s6493_s8  ;;  %v3631_v60 = vpop.permute.xlu0 %3630  ;;  %v4767_v37 = vld [vmem:[%s6535_s17 + $0x98] sm:$0xf] }
 0x2d4   : > { %3726 = vst.msk [vmem:[#allocation2 + $0x70] sm:$0xf] %vm3697_vm0, %v3631_v60  ;;  %v3541_v57 = vrot.slane %v3539_v56, 4  ;;  %v3368_v46 = vsel %vm7760_vm2, %v3363_v8, %v9239_v31  ;;  %v4151_v8 = vld [vmem:[%s6535_s17 + $0xac] sm:$0xf] }
 0x2d5   : > { %v3633_v29 = vpop.permute.xlu1 %3632  ;;  %4600 = vrot.lane.b32.xlu0 %v4344_v44, %s6493_s8  ;;  %v6462_v55 = vld [vmem:[#allocation2 + $0x68] sm:$0xff]   ;;  %v4132_v44 = vld [vmem:[%s6535_s17 + $0x60] sm:$0xf] }
 0x2d6   : > { %3727 = vst.msk [vmem:[#allocation2 + $0x74] sm:$0xf] %vm3697_vm0, %v3633_v29  ;;  %6385 = vmatmul.mubr.msk.bf16.gmra.mrb[8].mxu1 %vm5419_vm6, %v6462_v55  ;;  %v4347_v29 = vshrl.u32 %v4132_v44, 16  ;;  %v4350_v55 = vshll.u32 %v4132_v44, 16 }
 0x2d7   : > { %4015 = vrot.lane.b32.xlu1 %v3930_v22, %s6492_s5  ;;  %v4587_v2 = vpop.permute.xlu0 %4586  ;;  %6388 = vmatprep.mubr.msk.bf16.mxu1 %vm6495_vm14, %v6491_v39  ;;  %v5015_v22 = vld [vmem:[%s9617_s2 + $0x8c] sm:$0xf] }
 0x2d8   : > { %4700 = vst.msk [vmem:[#allocation2 + $0x28] sm:$0xf] %vm4689_vm3, %v4587_v2  ;;  %v4349_v51 = vrot.slane %v4347_v29, 5 }
 0x2d9   : > { %v4589_v42 = vpop.permute.xlu1 %4588  ;;  %4017 = vrot.lane.b32.xlu0 %v3933_v25, %s6492_s5  ;;  %v3881_v25 = vrot.slane %v3759_v10, 5  ;;  %v9297_v10 = vld [vmem:[%s6535_s17 + $0xac] sm:$0xf] }
 0x2da   : > { %4701 = vst.msk [vmem:[#allocation2 + $0x2c] sm:$0xf] %vm4689_vm3, %v4589_v42  ;;  %v3358_v42 = vsel %vm7760_vm2, %v3353_v1, %v3357_v38 }
 0x2db   : > { %4846 = vrot.lane.b32.xlu1 %v4748_v53, %s6494_s11  ;;  %v4004_v50 = vpop.permute.xlu0 %4003  ;;  %v9249_v53 = vld [vmem:[%s6535_s17 + $0x64] sm:$0xf] }
 0x2dc   : > { %4099 = vst.msk [vmem:[#allocation2 + $0x70] sm:$0xf] %vm4070_vm1, %v4004_v50 }
 0x2dd   : > { %v4006_v36 = vpop.permute.xlu1 %4005  ;;  %4848 = vrot.lane.b32.xlu0 %v4749_v3, %s6494_s11  ;;  %v3880_v3 = vrot.slane %v3878_v9, 4 }
 0x2de   : > { %4100 = vst.msk [vmem:[#allocation2 + $0x74] sm:$0xf] %vm4070_vm1, %v4006_v36  ;;  %v3883_v36 = vrot.slane %v3881_v25, 4 }
 0x2df   : > { %4634 = vrot.lane.b32.xlu1 %v4514_v43, %s6493_s8  ;;  %v4835_v26 = vpop.permute.xlu0 %4834  ;;  %v4352_v43 = vrot.slane %v4350_v55, 6  ;;  %v3882_v9 = vsel %vm8289_vm8, %v3880_v3, %v3881_v25 }
 0x2e0   : > { %4948 = vst.msk [vmem:[#allocation2 + $0x28] sm:$0xf] %vm4937_vm4, %v4835_v26  ;;  %v3542_v26 = vor.u32 %v3541_v57, %v3537_v63  ;;  %v3938_v63 = vrot.slane %v9297_v10, 5 }
 0x2e1   : > { %v4837_v61 = vpop.permute.xlu1 %4836  ;;  %4636 = vrot.lane.b32.xlu0 %v4524_v0, %s6493_s8  ;;  %v3884_v0 = vrot.slane %v9249_v53, 5  ;;  %v4353_v24 = vor.u32 %v4352_v43, %v4349_v51 }
 0x2e2   : > { %4949 = vst.msk [vmem:[#allocation2 + $0x2c] sm:$0xf] %vm4937_vm4, %v4837_v61  ;;  %v4359_v61 = vrot.slane %v4357_v12, 5  ;;  %v3543_v59 = vrot.slane %v3542_v26, 4  ;;  %v4750_v12 = vld [vmem:[%s6535_s17 + $0x54] sm:$0xf] }
 0x2e3   : > { %5094 = vrot.lane.b32.xlu1 %v4996_v52, %s6496_s19  ;;  %v4623_v27 = vpop.permute.xlu0 %4622  ;;  %v3545_v52 = vshll.u32 %v9252_v15, 16  ;;  %v4355_v54 = vrot.slane %v4353_v24, 4  ;;  %v4751_v26 = vld [vmem:[%s6535_s17 + $0x58] sm:$0xf] }
 0x2e4   : > { %4718 = vst.msk [vmem:[#allocation2 + $0x70] sm:$0xf] %vm4689_vm3, %v4623_v27  ;;  %v3885_v27 = vsel %vm8289_vm8, %v3883_v36, %v3884_v0 }
 0x2e5   : > { %v4625_v18 = vpop.permute.xlu1 %4624  ;;  %5096 = vrot.lane.b32.xlu0 %v4997_v47, %s6496_s19  ;;  %v4362_v47 = vrot.slane %v4360_v20, 6  ;;  %v9277_v19 = vrot.slane %v3545_v52, 5  ;;  %v4525_v20 = vrot.slane %v9197_v41, 4 }
 0x2e6   : > { %4719 = vst.msk [vmem:[#allocation2 + $0x74] sm:$0xf] %vm4689_vm3, %v4625_v18  ;;  %v4345_v18 = vrot.slane %v9151_v16, 4  ;;  %v4530_v16 = vshll.u32 %v4150_v23, 16 }
 0x2e7   : > { %4882 = vrot.lane.b32.xlu1 %v4766_v40, %s6494_s11  ;;  %v5083_v17 = vpop.permute.xlu0 %5082  ;;  %v3777_v40 = vld [vmem:[%s6535_s17 + $0xa8] sm:$0xf]  ;;  %v9290_v56 = vor.u32 %v4362_v47, %v4359_v61  ;;  %v3375_v61 = vshll.u32 %v3145_v49, 16  ;;  %v3379_v47 = vshrl.u32 %v3145_v49, 16 }
 0x2e8   : > { %5196 = vst.msk [vmem:[#allocation2 + $0x28] sm:$0xf] %vm5185_vm5, %v5083_v17  ;;  %v3935_v44 = vrot.slane %v3777_v40, 5  ;;  %v3548_v17 = vsel %vm7760_vm2, %v3543_v59, %v9277_v19  ;;  %v4354_v13 = vsel %vm8310_vm12, %v4345_v18, %v4353_v24  ;;  %v4532_v48 = vrot.slane %v4530_v16, 6  ;;  %v4769_v16 = vld [vmem:[%s6535_s17 + $0xa0] sm:$0xf] }
 0x2e9   : > { %v5085_v60 = vpop.permute.xlu1 %5084  ;;  %4884 = vrot.lane.b32.xlu0 %v4767_v37, %s6494_s11  ;;  %v4364_v55 = vsel %vm8310_vm12, %v4355_v54, %v9290_v56  ;;  %v3549_v54 = vshrl.u32 %v9252_v15, 16  ;;  %v4365_v30 = vrot.slane %v9290_v56, 4  ;;  %v4153_v56 = vld [vmem:[%s6535_s17 + $0xb4] sm:$0xf] }
 0x2ea   : > { %5197 = vst.msk [vmem:[#allocation2 + $0x2c] sm:$0xf] %vm5185_vm5, %v5085_v60  ;;  %v3934_v60 = vrot.slane %v3932_v32, 4  ;;  %v3937_v25 = vrot.slane %v3935_v44, 4  ;;  %v4560_v10 = vshll.u32 %v4153_v56, 16 }
 0x2eb   : > { %5130 = vrot.lane.b32.xlu1 %v5014_v11, %s6496_s19  ;;  %v4871_v2 = vpop.permute.xlu0 %4870  ;;  %v4527_v11 = vshrl.u32 %v4150_v23, 16  ;;  %v3377_v23 = vrot.slane %v3375_v61, 5 }
 0x2ec   : > { %4966 = vst.msk [vmem:[#allocation2 + $0x70] sm:$0xf] %vm4937_vm4, %v4871_v2  ;;  %v4537_v2 = vshrl.u32 %v4151_v8, 16  ;;  %v3936_v32 = vsel %vm8289_vm8, %v3934_v60, %v3935_v44  ;;  %v3939_v3 = vsel %vm8289_vm8, %v3937_v25, %v3938_v63  ;;  %v4768_v44 = vld [vmem:[%s6535_s17 + $0x9c] sm:$0xf] }
 0x2ed   : > { %v4873_v50 = vpop.permute.xlu1 %4872  ;;  %5132 = vrot.lane.b32.xlu0 %v5015_v22, %s6496_s19  ;;  %v4529_v57 = vrot.slane %v4527_v11, 5  ;;  %v4134_v60 = vld [vmem:[%s6535_s17 + $0x68] sm:$0xf] }
 0x2ee   : > { %4967 = vst.msk [vmem:[#allocation2 + $0x74] sm:$0xf] %vm4937_vm4, %v4873_v50  ;;  %v4539_v50 = vrot.slane %v4537_v2, 5  ;;  %v5017_v2 = vld [vmem:[%s9617_s2 + $0x94] sm:$0xf] }
 0x2ef   : > { %3610 = vrot.lane.b32.xlu1 %v3358_v42, %s6490_s23  ;;  %v5119_v4 = vpop.permute.xlu0 %5118  ;;  %v4540_v42 = vshll.u32 %v4151_v8, 16  ;;  %v4533_v7 = vor.u32 %v4532_v48, %v4529_v57  ;;  %v4367_v57 = vshrl.u32 %v4134_v60, 16  ;;  %v4370_v48 = vshll.u32 %v4134_v60, 16 }
 0x2f0   : > { %5214 = vst.msk [vmem:[#allocation2 + $0x70] sm:$0xf] %vm5185_vm5, %v5119_v4 }
 0x2f1   : > { %v5121_v58 = vpop.permute.xlu1 %5120  ;;  %3612 = vrot.lane.b32.xlu0 %v3368_v46, %s6490_s23  ;;  %v6463_v38 = vld [vmem:[#allocation2 + $0x28] sm:$0xff]   ;;  %v4542_v51 = vrot.slane %v4540_v42, 6  ;;  %v4535_v52 = vrot.slane %v4533_v7, 4  ;;  %v4534_v41 = vsel %vm8310_vm12, %v4525_v20, %v4533_v7  ;;  %v9378_v7 = vld [vmem:[%s6535_s17 + $0xb4] sm:$0x7] }
 0x2f2   : > { %5215 = vst.msk [vmem:[#allocation2 + $0x74] sm:$0xf] %vm5185_vm5, %v5121_v58  ;;  %6353 = vmatmul.mubr.msk.bf16.gmra.mrb[20].mxu0 %vm5419_vm6, %v6463_v38  ;;  %v3369_v58 = vshrl.u32 %v9216_v6, 16  ;;  %v3565_v53 = vshll.u32 %v9378_v7, 16 }
 0x2f3   : > { %3983 = vrot.lane.b32.xlu1 %v3882_v9, %s6492_s5  ;;  %v3972_v5 = vpop.permute.xlu0 %3971  ;;  %6356 = vmatprep.mubr.msk.bf16.mxu0 %vm6495_vm14, %v6491_v39  ;;  %v9332_v4 = vor.u32 %v4542_v51, %v4539_v50  ;;  %v3886_v51 = vrot.slane %v3884_v0, 4 }
 0x2f4   : > { %4083 = vst.msk [vmem:[#allocation2 + $0x30] sm:$0xf] %vm4070_vm1, %v3972_v5  ;;  %v3371_v59 = vrot.slane %v3369_v58, 4  ;;  %v4999_v5 = vld [vmem:[%s9617_s2 + $0x4c] sm:$0xf]  ;;  %v9405_v61 = vrot.slane %v3565_v53, 5 }
 0x2f5   : > { %v3974_v37 = vpop.permute.xlu1 %3973  ;;  %3985 = vrot.lane.b32.xlu0 %v3885_v27, %s6492_s5  ;;  %v4544_v24 = vsel %vm8310_vm12, %v4535_v52, %v9332_v4  ;;  %v4998_v27 = vld [vmem:[%s9617_s2 + $0x48] sm:$0xf]  ;;  %v4770_v53 = vld [vmem:[%s6535_s17 + $0xa4] sm:$0xf] }
 0x2f6   : > { %4084 = vst.msk [vmem:[#allocation2 + $0x34] sm:$0xf] %vm4070_vm1, %v3974_v37  ;;  %v3163_v37 = vld [vmem:[%s6535_s17 + $0xb0] sm:$0xf] }
 0x2f7   : > { %3646 = vrot.lane.b32.xlu1 %v3538_v34, %s6490_s23  ;;  %v3635_v1 = vpop.permute.xlu0 %3634  ;;  %v3381_v34 = vrot.slane %v3379_v47, 4  ;;  %v3555_v8 = vshll.u32 %v3163_v37, 16  ;;  %v3779_v47 = vld [vmem:[%s6535_s17 + $0xb0] sm:$0xf] }
 0x2f8   : > { %3728 = vst.msk [vmem:[#allocation2 + $0x78] sm:$0xf] %vm3697_vm0, %v3635_v1 }
 0x2f9   : > { %v3637_v22 = vpop.permute.xlu1 %3636  ;;  %3648 = vrot.lane.b32.xlu0 %v3548_v17, %s6490_s23  ;;  %v6464_v29 = vld [vmem:[#allocation2 + $0x70] sm:$0xff]   ;;  %v3372_v17 = vor.u32 %v3371_v59, %v9239_v31  ;;  %v3382_v1 = vor.u32 %v3381_v34, %v3377_v23 }
 0x2fa   : > { %3729 = vst.msk [vmem:[#allocation2 + $0x7c] sm:$0xf] %vm3697_vm0, %v3637_v22  ;;  %6389 = vmatmul.mubr.msk.bf16.gmra.mrb[12].mxu1 %vm5419_vm6, %v6464_v29  ;;  %v3761_v29 = vld [vmem:[%s6535_s17 + $0x68] sm:$0xf]  ;;  %v5016_v31 = vld [vmem:[%s9617_s2 + $0x90] sm:$0xf] }
 0x2fb   : > { %4602 = vrot.lane.b32.xlu1 %v4354_v13, %s6493_s8  ;;  %v4591_v33 = vpop.permute.xlu0 %4590  ;;  %6392 = vmatprep.mubr.msk.bf16.mxu1 %vm6495_vm14, %v6491_v39  ;;  %v3559_v13 = vshrl.u32 %v3163_v37, 16  ;;  %v3373_v15 = vrot.slane %v3372_v17, 4  ;;  %v3383_v42 = vrot.slane %v3382_v1, 4 }
 0x2fc   : > { %4702 = vst.msk [vmem:[#allocation2 + $0x30] sm:$0xf] %vm4689_vm3, %v4591_v33  ;;  %v3887_v33 = vrot.slane %v3761_v29, 5 }
 0x2fd   : > { %v4593_v46 = vpop.permute.xlu1 %4592  ;;  %4604 = vrot.lane.b32.xlu0 %v4364_v55, %s6493_s8  ;;  %v3551_v55 = vrot.slane %v3549_v54, 4  ;;  %v3378_v50 = vsel %vm7760_vm2, %v3373_v15, %v3377_v23  ;;  %v3388_v52 = vsel %vm7760_vm2, %v3383_v42, %v8395_v14  ;;  %v3941_v23 = vrot.slane %v3779_v47, 5  ;;  %v5019_v47 = vld [vmem:[%s9617_s2 + $0x9c] sm:$0xf] }
 0x2fe   : > { %4703 = vst.msk [vmem:[#allocation2 + $0x34] sm:$0xf] %vm4689_vm3, %v4593_v46  ;;  %v3561_v46 = vrot.slane %v3559_v13, 4 }
 0x2ff   : > { %4019 = vrot.lane.b32.xlu1 %v3936_v32, %s6492_s5  ;;  %v4008_v43 = vpop.permute.xlu0 %4007  ;;  %v3557_v32 = vrot.slane %v3555_v8, 5  ;;  %v3943_v1 = vrot.slane %v3941_v23, 4 }
 0x300   : > { %4101 = vst.msk [vmem:[#allocation2 + $0x78] sm:$0xf] %vm4070_vm1, %v4008_v43  ;;  %v3552_v43 = vor.u32 %v3551_v55, %v9277_v19  ;;  %v3888_v19 = vsel %vm8289_vm8, %v3886_v51, %v3887_v33 }
 0x301   : > { %v4010_v36 = vpop.permute.xlu1 %4009  ;;  %4021 = vrot.lane.b32.xlu0 %v3939_v3, %s6492_s5  ;;  %v3562_v49 = vor.u32 %v3561_v46, %v3557_v32 }
 0x302   : > { %4102 = vst.msk [vmem:[#allocation2 + $0x7c] sm:$0xf] %vm4070_vm1, %v4010_v36  ;;  %v4369_v36 = vrot.slane %v4367_v57, 5  ;;  %v3553_v58 = vrot.slane %v3552_v43, 4 }
 0x303   : > { %4850 = vrot.lane.b32.xlu1 %v4750_v12, %s6494_s11  ;;  %v4839_v9 = vpop.permute.xlu0 %4838 }
 0x304   : > { %4950 = vst.msk [vmem:[#allocation2 + $0x30] sm:$0xf] %vm4937_vm4, %v4839_v9  ;;  %v3889_v9 = vrot.slane %v3887_v33, 4  ;;  %v3558_v59 = vsel %vm7760_vm2, %v3553_v58, %v3557_v32  ;;  %v4753_v33 = vld [vmem:[%s6535_s17 + $0x60] sm:$0xf] }
 0x305   : > { %v4841_v38 = vpop.permute.xlu1 %4840  ;;  %4852 = vrot.lane.b32.xlu0 %v4751_v26, %s6494_s11  ;;  %v4372_v26 = vrot.slane %v4370_v48, 6  ;;  %v4752_v48 = vld [vmem:[%s6535_s17 + $0x5c] sm:$0xf] }
 0x306   : > { %4951 = vst.msk [vmem:[#allocation2 + $0x34] sm:$0xf] %vm4937_vm4, %v4841_v38  ;;  %v3891_v38 = vsel %vm8289_vm8, %v3889_v9, %v3890_v62  ;;  %v5001_v9 = vld [vmem:[%s9617_s2 + $0x54] sm:$0xf] }
 0x307   : > { %4638 = vrot.lane.b32.xlu1 %v4534_v41, %s6493_s8  ;;  %v4627_v6 = vpop.permute.xlu0 %4626  ;;  %v4373_v41 = vor.u32 %v4372_v26, %v4369_v36  ;;  %v5000_v26 = vld [vmem:[%s9617_s2 + $0x50] sm:$0xf] }
 0x308   : > { %4720 = vst.msk [vmem:[#allocation2 + $0x78] sm:$0xf] %vm4689_vm3, %v4627_v6 }
 0x309   : > { %v4629_v40 = vpop.permute.xlu1 %4628  ;;  %4640 = vrot.lane.b32.xlu0 %v4544_v24, %s6493_s8  ;;  %v3563_v24 = vrot.slane %v3562_v49, 4  ;;  %v4374_v17 = vsel %vm8310_vm12, %v4365_v30, %v4373_v41 }
 0x30a   : > { %4721 = vst.msk [vmem:[#allocation2 + $0x7c] sm:$0xf] %vm4689_vm3, %v4629_v40 }
 0x30b   : > { %5098 = vrot.lane.b32.xlu1 %v4998_v27, %s6496_s19  ;;  %v5087_v18 = vpop.permute.xlu0 %5086  ;;  %v4152_v27 = vld [vmem:[%s6535_s17 + $0xb0] sm:$0xf]  ;;  %v3568_v34 = vsel %vm7760_vm2, %v3563_v24, %v9405_v61  ;;  %vm3738_vm2 = vcmask 451968  }
 0x30c   : > { %5198 = vst.msk [vmem:[#allocation2 + $0x30] sm:$0xf] %vm5185_vm5, %v5087_v18  ;;  %v9420_v18 = vld [vmem:[%s6535_s17 + $0xb4] sm:$0x7]  ;;  %v4547_v37 = vshrl.u32 %v4152_v27, 16  ;;  %v4550_v54 = vshll.u32 %v4152_v27, 16 }
 0x30d   : > { %v5089_v11 = vpop.permute.xlu1 %5088  ;;  %5100 = vrot.lane.b32.xlu0 %v4999_v5, %s6496_s19  ;;  %v4375_v5 = vrot.slane %v4373_v41, 4  ;;  %v3944_v8 = vrot.slane %v9420_v18, 5  ;;  %v5018_v41 = vld [vmem:[%s9617_s2 + $0x98] sm:$0xf] }
 0x30e   : > { %5199 = vst.msk [vmem:[#allocation2 + $0x34] sm:$0xf] %vm5185_vm5, %v5089_v11  ;;  %v3940_v11 = vrot.slane %v3938_v63, 4  ;;  %v4549_v13 = vrot.slane %v4547_v37, 5  ;;  %v4552_v60 = vrot.slane %v4550_v54, 6 }
 0x30f   : > { %4886 = vrot.lane.b32.xlu1 %v4768_v44, %s6494_s11  ;;  %v4875_v22 = vpop.permute.xlu0 %4874  ;;  %v4772_v54 = vld [vmem:[%s6535_s17 + $0xac] sm:$0x3] }
 0x310   : > { %4968 = vst.msk [vmem:[#allocation2 + $0x78] sm:$0xf] %vm4937_vm4, %v4875_v22  ;;  %v4557_v22 = vshrl.u32 %v4153_v56, 16  ;;  %v3942_v29 = vsel %vm8289_vm8, %v3940_v11, %v3941_v23  ;;  %v4553_v15 = vor.u32 %v4552_v60, %v4549_v13  ;;  %v5020_v56 = vld [vmem:[%s9617_s2 + $0xa0] sm:$0x3] }
 0x311   : > { %v4877_v25 = vpop.permute.xlu1 %4876  ;;  %4888 = vrot.lane.b32.xlu0 %v4769_v16, %s6494_s11  ;;  %v4384_v16 = vsel %vm8310_vm12, %v4375_v5, %v8473_v28 }
 0x312   : > { %4969 = vst.msk [vmem:[#allocation2 + $0x7c] sm:$0xf] %vm4937_vm4, %v4877_v25  ;;  %v4559_v55 = vrot.slane %v4557_v22, 5  ;;  %v4562_v25 = vrot.slane %v4560_v10, 6  ;;  %v4555_v32 = vrot.slane %v4553_v15, 4 }
 0x313   : > { %5134 = vrot.lane.b32.xlu1 %v5016_v31, %s6496_s19  ;;  %v5123_v3 = vpop.permute.xlu0 %5122  ;;  %v3945_v31 = vsel %vm8289_vm8, %v3943_v1, %v3944_v8  ;;  %vm4730_vm8 = vcmask 583168  }
 0x314   : > { %5216 = vst.msk [vmem:[#allocation2 + $0x78] sm:$0xf] %vm5185_vm5, %v5123_v3  ;;  %v9455_v45 = vor.u32 %v4562_v25, %v4559_v55 }
 0x315   : > { %v5125_v12 = vpop.permute.xlu1 %5124  ;;  %5136 = vrot.lane.b32.xlu0 %v5017_v2, %s6496_s19  ;;  %v6465_v20 = vld [vmem:[#allocation2 + $0x30] sm:$0xff]   ;;  %v4545_v2 = vrot.slane %v9332_v4, 4 }
 0x316   : > { %5217 = vst.msk [vmem:[#allocation2 + $0x7c] sm:$0xf] %vm5185_vm5, %v5125_v12  ;;  %6357 = vmatmul.mubr.msk.bf16.gmra.mrb[24].mxu0 %vm5419_vm6, %v6465_v20  ;;  %v4564_v51 = vsel %vm8310_vm12, %v4555_v32, %v9455_v45  ;;  %v3569_v20 = vshrl.u32 %v9378_v7, 16  ;;  %v4565_v5 = vrot.slane %v9455_v45, 4 }
 0x317   : > { %3614 = vrot.lane.b32.xlu1 %v3378_v50, %s6490_s23  ;;  %v3976_v0 = vpop.permute.xlu0 %3975  ;;  %6360 = vmatprep.mubr.msk.bf16.mxu0 %vm6495_vm14, %v6491_v39  ;;  %v4554_v3 = vsel %vm8310_vm12, %v4545_v2, %v4553_v15 }
 0x318   : > { %4085 = vst.msk [vmem:[#allocation2 + $0x38] sm:$0xf] %vm4070_vm1, %v3976_v0  ;;  %v3571_v49 = vrot.slane %v3569_v20, 4 }
 0x319   : > { %v3978_v14 = vpop.permute.xlu1 %3977  ;;  %3616 = vrot.lane.b32.xlu0 %v3388_v52, %s6490_s23 }
 0x31a   : > { %4086 = vst.msk [vmem:[#allocation2 + $0x3c] sm:$0xf] %vm4070_vm1, %v3978_v14  ;;  %v3572_v14 = vor.u32 %v3571_v49, %v9405_v61 }
 0x31b   : > { %3987 = vrot.lane.b32.xlu1 %v3888_v19, %s6492_s5  ;;  %v3639_v6 = vpop.permute.xlu0 %3638  ;;  %v4771_v19 = vld [vmem:[%s6535_s17 + $0xa8] sm:$0xf]  ;;  %s6165_s17 = sshll.u32 %s9632_s13, 7 }
 0x31c   : > { %3730 = vst.msk [vmem:[#allocation2 + $0x80] sm:$0xf] %vm3697_vm0, %v3639_v6  ;;  %v3573_v61 = vrot.slane %v3572_v14, 4 }
 0x31d   : > { %v3641_v40 = vpop.permute.xlu1 %3640  ;;  %3989 = vrot.lane.b32.xlu0 %v3891_v38, %s6492_s5  ;;  %v6466_v62 = vld [vmem:[#allocation2 + $0x78] sm:$0xff]  }
 0x31e   : > { %3731 = vst.msk [vmem:[#allocation2 + $0x84] sm:$0xf] %vm3697_vm0, %v3641_v40  ;;  %6393 = vmatmul.mubr.msk.bf16.gmra.mrb[16].mxu1 %vm5419_vm6, %v6466_v62 }
 0x31f   : > { %3650 = vrot.lane.b32.xlu1 %v3558_v59, %s6490_s23  ;;  %v4595_v44 = vpop.permute.xlu0 %4594  ;;  %6396 = vmatprep.mubr.msk.bf16.mxu1 %vm6495_vm14, %v6491_v39  ;;  %v3946_v59 = vrot.slane %v3944_v8, 4 }
 0x320   : > { %4704 = vst.msk [vmem:[#allocation2 + $0x38] sm:$0xf] %vm4689_vm3, %v4595_v44 }
 0x321   : > { %v4597_v35 = vpop.permute.xlu1 %4596  ;;  %3652 = vrot.lane.b32.xlu0 %v3568_v34, %s6490_s23 }
 0x322   : > { %4705 = vst.msk [vmem:[#allocation2 + $0x3c] sm:$0xf] %vm4689_vm3, %v4597_v35 }
 0x323   : > { %4606 = vrot.lane.b32.xlu1 %v4374_v17, %s6493_s8  ;;  %v4012_v63 = vpop.permute.xlu0 %4011 }
 0x324   : > { %4103 = vst.msk [vmem:[#allocation2 + $0x80] sm:$0xf] %vm4070_vm1, %v4012_v63 }
 0x325   : > { %v4014_v28 = vpop.permute.xlu1 %4013  ;;  %4608 = vrot.lane.b32.xlu0 %v4384_v16, %s6493_s8 }
 0x326   : > { %4104 = vst.msk [vmem:[#allocation2 + $0x84] sm:$0xf] %vm4070_vm1, %v4014_v28 }
 0x327   : > { %4023 = vrot.lane.b32.xlu1 %v3942_v29, %s6492_s5  ;;  %v4843_v57 = vpop.permute.xlu0 %4842 }
 0x328   : > { %4952 = vst.msk [vmem:[#allocation2 + $0x38] sm:$0xf] %vm4937_vm4, %v4843_v57 }
 0x329   : > { %v4845_v42 = vpop.permute.xlu1 %4844  ;;  %4025 = vrot.lane.b32.xlu0 %v3945_v31, %s6492_s5 }
 0x32a   : > { %4953 = vst.msk [vmem:[#allocation2 + $0x3c] sm:$0xf] %vm4937_vm4, %v4845_v42 }
 0x32b   : > { %4854 = vrot.lane.b32.xlu1 %v4752_v48, %s6494_s11  ;;  %v4631_v46 = vpop.permute.xlu0 %4630 }
 0x32c   : > { %4722 = vst.msk [vmem:[#allocation2 + $0x80] sm:$0xf] %vm4689_vm3, %v4631_v46 }
 0x32d   : > { %v4633_v50 = vpop.permute.xlu1 %4632  ;;  %4856 = vrot.lane.b32.xlu0 %v4753_v33, %s6494_s11  ;;  %v5521_v4 = vpop.f32.mrb[0].mxu0 }
 0x32e   : > { %4723 = vst.msk [vmem:[#allocation2 + $0x84] sm:$0xf] %vm4689_vm3, %v4633_v50  ;;  %v6334_v12 = vpop.f32.mrb[1].mxu0 }
 0x32f   : > { %4642 = vrot.lane.b32.xlu1 %v4554_v3, %s6493_s8  ;;  %v5091_v43 = vpop.permute.xlu0 %5090  ;;  %v5524_v36 = vpop.f32.mrb[2].mxu0 }
 0x330   : > { %5200 = vst.msk [vmem:[#allocation2 + $0x38] sm:$0xf] %vm5185_vm5, %v5091_v43  ;;  %v6335_v21 = vpop.f32.mrb[3].mxu0 }
 0x331   : > { %v5093_v52 = vpop.permute.xlu1 %5092  ;;  %4644 = vrot.lane.b32.xlu0 %v4564_v51, %s6493_s8 }
 0x332   : > { %5201 = vst.msk [vmem:[#allocation2 + $0x3c] sm:$0xf] %vm5185_vm5, %v5093_v52 }
 0x333   : > { %5102 = vrot.lane.b32.xlu1 %v5000_v26, %s6496_s19  ;;  %v4879_v7 = vpop.permute.xlu0 %4878 }
 0x334   : > { %4970 = vst.msk [vmem:[#allocation2 + $0x80] sm:$0xf] %vm4937_vm4, %v4879_v7 }
 0x335   : > { %v4881_v0 = vpop.permute.xlu1 %4880  ;;  %5104 = vrot.lane.b32.xlu0 %v5001_v9, %s6496_s19 }
 0x336   : > { %4971 = vst.msk [vmem:[#allocation2 + $0x84] sm:$0xf] %vm4937_vm4, %v4881_v0 }
 0x337   : > { %4890 = vrot.lane.b32.xlu1 %v4770_v53, %s6494_s11  ;;  %v5127_v58 = vpop.permute.xlu0 %5126 }
 0x338   : > { %5218 = vst.msk [vmem:[#allocation2 + $0x80] sm:$0xf] %vm5185_vm5, %v5127_v58 }
 0x339   : > { %v5129_v38 = vpop.permute.xlu1 %5128  ;;  %4892 = vrot.lane.b32.xlu0 %v4771_v19, %s6494_s11  ;;  %v6467_v24 = vld [vmem:[#allocation2 + $0x38] sm:$0xff]  }
 0x33a   : > { %5219 = vst.msk [vmem:[#allocation2 + $0x84] sm:$0xf] %vm5185_vm5, %v5129_v38  ;;  %6361 = vmatmul.mubr.msk.bf16.gmra.mrb[28].mxu0 %vm5419_vm6, %v6467_v24 }
 0x33b   : > { %5138 = vrot.lane.b32.xlu1 %v5018_v41, %s6496_s19  ;;  %v3609_v6 = vpop.permute.xlu0 %3608  ;;  %6364 = vmatprep.mubr.msk.bf16.mxu0 %vm6495_vm14, %v6491_v39 }
 0x33c   : > { %3715 = vst.msk [vmem:[#allocation2 + $0x44] sm:$0xf] %vm3697_vm0, %v3609_v6 }
 0x33d   : > { %v3980_v27 = vpop.permute.xlu1 %3979  ;;  %5140 = vrot.lane.b32.xlu0 %v5019_v47, %s6496_s19  ;;  %v5529_v30 = vpop.f32.mrb[4].mxu0 }
 0x33e   : > { %4087 = vst.msk [vmem:[#allocation2 + $0x40] sm:$0xf] %vm4070_vm1, %v3980_v27  ;;  %5689 = vst [vmem:[#allocation3 + $0x10] sm:$0xff] %v5529_v30  ;;  %v6338_v62 = vpop.f32.mrb[5].mxu0 }
 0x33f   : > { %3654 = vrot.lane.b32.xlu1 %v3573_v61, %s6490_s23  ;;  %v3982_v40 = vpop.permute.xlu0 %3981  ;;  %v5532_v23 = vpop.f32.mrb[6].mxu0 }
 0x340   : > { %4088 = vst.msk [vmem:[#allocation2 + $0x44] sm:$0xf] %vm4070_vm1, %v3982_v40  ;;  %5690 = vst [vmem:[#allocation3 + $0x18] sm:$0xff] %v5532_v23  ;;  %v6339_v18 = vpop.f32.mrb[7].mxu0 }
 0x341   : > { %v3643_v34 = vpop.permute.xlu1 %3642  ;;  %4027 = vrot.lane.b32.xlu0 %v3946_v59, %s6492_s5  ;;  %v6468_v37 = vld [vmem:[#allocation2 + $0x80] sm:$0xff]  }
 0x342   : > { %3732 = vst.msk [vmem:[#allocation2 + $0x88] sm:$0xf] %vm3697_vm0, %v3643_v34  ;;  %6397 = vmatmul.mubr.msk.bf16.gmra.mrb[20].mxu1 %vm5419_vm6, %v6468_v37 }
 0x343   : > { %4646 = vrot.lane.b32.xlu1 %v4565_v5, %s6493_s8  ;;  %v3645_v44 = vpop.permute.xlu0 %3644  ;;  %6400 = vmatprep.mubr.msk.bf16.mxu1 %vm6495_vm14, %v6491_v39 }
 0x344   : > { %3733 = vst.msk [vmem:[#allocation2 + $0x8c] sm:$0xf] %vm3697_vm0, %v3645_v44 }
 0x345   : > { %v4599_v17 = vpop.permute.xlu1 %4598  ;;  %4894 = vrot.lane.b32.xlu0 %v4772_v54, %s6494_s11  ;;  %s9541_s11 = scalar_lea.vmem %s9618_s3, %s6165_s17 }
 0x346   : > { %4706 = vst.msk [vmem:[#allocation2 + $0x40] sm:$0xf] %vm4689_vm3, %v4599_v17 }
 0x347   : > { %5142 = vrot.lane.b32.xlu1 %v5020_v56, %s6496_s19  ;;  %v4601_v11 = vpop.permute.xlu0 %4600  ;;  %v5728_v2 = vld [vmem:[#allocation3 + $0x13] sm:$0xff] }
 0x348   : > { %4707 = vst.msk [vmem:[#allocation2 + $0x44] sm:$0xf] %vm4689_vm3, %v4601_v11  ;;  %v6099_v45 = vclamps-f32 %v5728_v2, 1.0 }
 0x349   : > { %v4016_v35 = vpop.permute.xlu1 %4015 }
 0x34a   : > { %4105 = vst.msk [vmem:[#allocation2 + $0x88] sm:$0xf] %vm4070_vm1, %v4016_v35 }
 0x34b   : > { %v4018_v16 = vpop.permute.xlu0 %4017 }
 0x34c   : > { %4106 = vst.msk [vmem:[#allocation2 + $0x8c] sm:$0xf] %vm4070_vm1, %v4018_v16 }
 0x34d   : > { %v4847_v1 = vpop.permute.xlu1 %4846 }
 0x34e   : > { %4954 = vst.msk [vmem:[#allocation2 + $0x40] sm:$0xf] %vm4937_vm4, %v4847_v1 }
 0x34f   : > { %v4849_v8 = vpop.permute.xlu0 %4848 }
 0x350   : > { %4955 = vst.msk [vmem:[#allocation2 + $0x44] sm:$0xf] %vm4937_vm4, %v4849_v8 }
 0x351   : > { %v4635_v13 = vpop.permute.xlu1 %4634 }
 0x352   : > { %4724 = vst.msk [vmem:[#allocation2 + $0x88] sm:$0xf] %vm4689_vm3, %v4635_v13 }
 0x353   : > { %v4637_v60 = vpop.permute.xlu0 %4636 }
 0x354   : > { %4725 = vst.msk [vmem:[#allocation2 + $0x8c] sm:$0xf] %vm4689_vm3, %v4637_v60 }
 0x355   : > { %v5095_v22 = vpop.permute.xlu1 %5094 }
 0x356   : > { %5202 = vst.msk [vmem:[#allocation2 + $0x40] sm:$0xf] %vm5185_vm5, %v5095_v22 }
 0x357   : > { %v5097_v10 = vpop.permute.xlu0 %5096 }
 0x358   : > { %5203 = vst.msk [vmem:[#allocation2 + $0x44] sm:$0xf] %vm5185_vm5, %v5097_v10 }
 0x359   : > { %v4883_v63 = vpop.permute.xlu1 %4882  ;;  %v5537_v29 = vpop.f32.mrb[8].mxu0 }
 0x35a   : > { %4972 = vst.msk [vmem:[#allocation2 + $0x88] sm:$0xf] %vm4937_vm4, %v4883_v63  ;;  %5691 = vst [vmem:[#allocation3 + $0x20] sm:$0xff] %v5537_v29  ;;  %v6342_v31 = vpop.f32.mrb[9].mxu0 }
 0x35b   : > { %v4885_v28 = vpop.permute.xlu0 %4884  ;;  %v5540_v15 = vpop.f32.mrb[10].mxu0 }
 0x35c   : > { %4973 = vst.msk [vmem:[#allocation2 + $0x8c] sm:$0xf] %vm4937_vm4, %v4885_v28  ;;  %5692 = vst [vmem:[#allocation3 + $0x28] sm:$0xff] %v5540_v15  ;;  %v6343_v25 = vpop.f32.mrb[11].mxu0 }
 0x35d   : > { %v5131_v55 = vpop.permute.xlu1 %5130 }
 0x35e   : > { %5220 = vst.msk [vmem:[#allocation2 + $0x88] sm:$0xf] %vm5185_vm5, %v5131_v55 }
 0x35f   : > { %v5133_v57 = vpop.permute.xlu0 %5132  ;;  %v6469_v48 = vld [vmem:[#allocation2 + $0x40] sm:$0xff]  }
 0x360   : > { %5221 = vst.msk [vmem:[#allocation2 + $0x8c] sm:$0xf] %vm5185_vm5, %v5133_v57  ;;  %6365 = vmatmul.mubr.msk.bf16.gmra.mrb[32].mxu0 %vm5419_vm6, %v6469_v48 }
 0x361   : > { %v3611_v42 = vpop.permute.xlu1 %3610  ;;  %v5729_v33 = vld [vmem:[#allocation3 + $0x1b] sm:$0xff]  ;;  %v5609_v32 = vpop.f32.mrb[0].mxu1  ;;  %6368 = vmatprep.mubr.msk.bf16.mxu0 %vm6495_vm14, %v6491_v39 }
 0x362   : > { %3716 = vst.msk [vmem:[#allocation2 + $0x48] sm:$0xf] %vm3697_vm0, %v3611_v42  ;;  %v6100_v46 = vclamps-f32 %v5729_v33, 1.0  ;;  %5709 = vst [vmem:[#allocation3 + $0xb0] sm:$0xff] %v5609_v32  ;;  %v6378_v50 = vpop.f32.mrb[1].mxu1 }
 0x363   : > { %v3613_v3 = vpop.permute.xlu0 %3612  ;;  %v5612_v4 = vpop.f32.mrb[2].mxu1  ;;  %v5744_v59 = vld [vmem:[#allocation3 + $0x25] sm:$0xff] }
 0x364   : > { %3717 = vst.msk [vmem:[#allocation2 + $0x4c] sm:$0xf] %vm3697_vm0, %v3613_v3  ;;  %v6201_v51 = vpack.c.bf16 %v6100_v46, %v6099_v45  ;;  %5710 = vst [vmem:[#allocation3 + $0xb8] sm:$0xff] %v5612_v4  ;;  %v6379_v12 = vpop.f32.mrb[3].mxu1  ;;  %v6103_v5 = vclamps-f32 %v5744_v59, 1.0 }
 0x365   : > { %v3984_v43 = vpop.permute.xlu1 %3983 }
 0x366   : > { %4089 = vst.msk [vmem:[#allocation2 + $0x48] sm:$0xf] %vm4070_vm1, %v3984_v43  ;;  %6202 = vst [vmem:[%s9541_s11] sm:$0xff] %v6201_v51  }
 0x367   : > { %v3986_v20 = vpop.permute.xlu0 %3985  ;;  %v6470_v36 = vld [vmem:[#allocation2 + $0x88] sm:$0xff]  }
 0x368   : > { %4090 = vst.msk [vmem:[#allocation2 + $0x4c] sm:$0xf] %vm4070_vm1, %v3986_v20  ;;  %6401 = vmatmul.mubr.msk.bf16.gmra.mrb[24].mxu1 %vm5419_vm6, %v6470_v36 }
 0x369   : > { %v3647_v26 = vpop.permute.xlu1 %3646  ;;  %6404 = vmatprep.mubr.msk.bf16.mxu1 %vm6495_vm14, %v6491_v39 }
 0x36a   : > { %3734 = vst.msk [vmem:[#allocation2 + $0x90] sm:$0xf] %vm3697_vm0, %v3647_v26 }
 0x36b   : > { %v3649_v52 = vpop.permute.xlu0 %3648  ;;  %v5872_v35 = vld [vmem:[#allocation3 + $0xb5] sm:$0xff] }
 0x36c   : > { %3735 = vst.msk [vmem:[#allocation2 + $0x94] sm:$0xf] %vm3697_vm0, %v3649_v52  ;;  %v6135_v8 = vclamps-f32 %v5872_v35, 1.0 }
 0x36d   : > { %v4603_v21 = vpop.permute.xlu1 %4602 }
 0x36e   : > { %4708 = vst.msk [vmem:[#allocation2 + $0x48] sm:$0xf] %vm4689_vm3, %v4603_v21 }
 0x36f   : > { %v4605_v9 = vpop.permute.xlu0 %4604 }
 0x370   : > { %4709 = vst.msk [vmem:[#allocation2 + $0x4c] sm:$0xf] %vm4689_vm3, %v4605_v9 }
 0x371   : > { %v4020_v7 = vpop.permute.xlu1 %4019 }
 0x372   : > { %4107 = vst.msk [vmem:[#allocation2 + $0x90] sm:$0xf] %vm4070_vm1, %v4020_v7 }
 0x373   : > { %v4022_v49 = vpop.permute.xlu0 %4021 }
 0x374   : > { %4108 = vst.msk [vmem:[#allocation2 + $0x94] sm:$0xf] %vm4070_vm1, %v4022_v49 }
 0x375   : > { %v4851_v53 = vpop.permute.xlu1 %4850 }
 0x376   : > { %4956 = vst.msk [vmem:[#allocation2 + $0x48] sm:$0xf] %vm4937_vm4, %v4851_v53 }
 0x377   : > { %v4853_v0 = vpop.permute.xlu0 %4852 }
 0x378   : > { %4957 = vst.msk [vmem:[#allocation2 + $0x4c] sm:$0xf] %vm4937_vm4, %v4853_v0 }
 0x379   : > { %v4639_v19 = vpop.permute.xlu1 %4638 }
 0x37a   : > { %4726 = vst.msk [vmem:[#allocation2 + $0x90] sm:$0xf] %vm4689_vm3, %v4639_v19 }
 0x37b   : > { %v4641_v58 = vpop.permute.xlu0 %4640 }
 0x37c   : > { %4727 = vst.msk [vmem:[#allocation2 + $0x94] sm:$0xf] %vm4689_vm3, %v4641_v58 }
 0x37d   : > { %v5099_v14 = vpop.permute.xlu1 %5098  ;;  %v5545_v41 = vpop.f32.mrb[12].mxu0 }
 0x37e   : > { %5204 = vst.msk [vmem:[#allocation2 + $0x48] sm:$0xf] %vm5185_vm5, %v5099_v14  ;;  %5693 = vst [vmem:[#allocation3 + $0x30] sm:$0xff] %v5545_v41  ;;  %v6346_v24 = vpop.f32.mrb[13].mxu0 }
 0x37f   : > { %v5101_v38 = vpop.permute.xlu0 %5100  ;;  %v5548_v47 = vpop.f32.mrb[14].mxu0 }
 0x380   : > { %5205 = vst.msk [vmem:[#allocation2 + $0x4c] sm:$0xf] %vm5185_vm5, %v5101_v38  ;;  %5694 = vst [vmem:[#allocation3 + $0x38] sm:$0xff] %v5548_v47  ;;  %v6347_v61 = vpop.f32.mrb[15].mxu0 }
 0x381   : > { %v4887_v6 = vpop.permute.xlu1 %4886 }
 0x382   : > { %4974 = vst.msk [vmem:[#allocation2 + $0x90] sm:$0xf] %vm4937_vm4, %v4887_v6 }
 0x383   : > { %v4889_v27 = vpop.permute.xlu0 %4888 }
 0x384   : > { %4975 = vst.msk [vmem:[#allocation2 + $0x94] sm:$0xf] %vm4937_vm4, %v4889_v27 }
 0x385   : > { %v5135_v30 = vpop.permute.xlu1 %5134  ;;  %v5745_v40 = vld [vmem:[#allocation3 + $0x2d] sm:$0xff]  ;;  %v5617_v62 = vpop.f32.mrb[4].mxu1 }
 0x386   : > { %5222 = vst.msk [vmem:[#allocation2 + $0x90] sm:$0xf] %vm5185_vm5, %v5135_v30  ;;  %v6104_v23 = vclamps-f32 %v5745_v40, 1.0  ;;  %5711 = vst [vmem:[#allocation3 + $0xc0] sm:$0xff] %v5617_v62  ;;  %v6382_v18 = vpop.f32.mrb[5].mxu1 }
 0x387   : > { %v5137_v34 = vpop.permute.xlu0 %5136  ;;  %v6471_v37 = vld [vmem:[#allocation2 + $0x48] sm:$0xff]   ;;  %v5620_v54 = vpop.f32.mrb[6].mxu1  ;;  %v5760_v50 = vld [vmem:[#allocation3 + $0x37] sm:$0xff] }
 0x388   : > { %5223 = vst.msk [vmem:[#allocation2 + $0x94] sm:$0xf] %vm5185_vm5, %v5137_v34  ;;  %v6206_v44 = vpack.c.bf16 %v6104_v23, %v6103_v5  ;;  %5712 = vst [vmem:[#allocation3 + $0xc8] sm:$0xff] %v5620_v54  ;;  %6369 = vmatmul.mubr.msk.bf16.gmra.mrb[36].mxu0 %vm5419_vm6, %v6471_v37  ;;  %v6383_v17 = vpop.f32.mrb[7].mxu1  ;;  %v6107_v12 = vclamps-f32 %v5760_v50, 1.0 }
 0x389   : > { %v3615_v56 = vpop.permute.xlu1 %3614  ;;  %6372 = vmatprep.mubr.msk.bf16.mxu0 %vm6495_vm14, %v6491_v39 }
 0x38a   : > { %3718 = vst.msk [vmem:[#allocation2 + $0x50] sm:$0xf] %vm3697_vm0, %v3615_v56  ;;  %6278 = vst [vmem:[%s9541_s11 + $0x8] sm:$0xff] %v6206_v44  }
 0x38b   : > { %v3617_v11 = vpop.permute.xlu0 %3616 }
 0x38c   : > { %3719 = vst.msk [vmem:[#allocation2 + $0x54] sm:$0xf] %vm3697_vm0, %v3617_v11 }
 0x38d   : > { %v3988_v16 = vpop.permute.xlu1 %3987  ;;  %v5873_v1 = vld [vmem:[#allocation3 + $0xbd] sm:$0xff] }
 0x38e   : > { %4091 = vst.msk [vmem:[#allocation2 + $0x50] sm:$0xf] %vm4070_vm1, %v3988_v16  ;;  %v6136_v13 = vclamps-f32 %v5873_v1, 1.0 }
 0x38f   : > { %v3990_v60 = vpop.permute.xlu0 %3989  ;;  %v6472_v22 = vld [vmem:[#allocation2 + $0x90] sm:$0xff]  }
 0x390   : > { %4092 = vst.msk [vmem:[#allocation2 + $0x54] sm:$0xf] %vm4070_vm1, %v3990_v60  ;;  %v6246_v10 = vpack.c.bf16 %v6136_v13, %v6135_v8  ;;  %6405 = vmatmul.mubr.msk.bf16.gmra.mrb[28].mxu1 %vm5419_vm6, %v6472_v22  ;;  %v5888_v0 = vld [vmem:[#allocation3 + $0xc7] sm:$0xff] }
 0x391   : > { %v3651_v63 = vpop.permute.xlu1 %3650  ;;  %6408 = vmatprep.mubr.msk.bf16.mxu1 %vm6495_vm14, %v6491_v39  ;;  %v6139_v14 = vclamps-f32 %v5888_v0, 1.0 }
 0x392   : > { %3736 = vst.msk [vmem:[#allocation2 + $0x98] sm:$0xf] %vm3697_vm0, %v3651_v63  ;;  %6286 = vst [vmem:[%s9541_s11 + $0x48] sm:$0xff] %v6246_v10  }
 0x393   : > { %v3653_v29 = vpop.permute.xlu0 %3652 }
 0x394   : > { %3737 = vst.msk [vmem:[#allocation2 + $0x9c] sm:$0xf] %vm3697_vm0, %v3653_v29 }
 0x395   : > { %v4607_v28 = vpop.permute.xlu1 %4606 }
 0x396   : > { %4710 = vst.msk [vmem:[#allocation2 + $0x50] sm:$0xf] %vm4689_vm3, %v4607_v28 }
 0x397   : > { %v4609_v31 = vpop.permute.xlu0 %4608 }
 0x398   : > { %4711 = vst.msk [vmem:[#allocation2 + $0x54] sm:$0xf] %vm4689_vm3, %v4609_v31 }
 0x399   : > { %v4024_v15 = vpop.permute.xlu1 %4023 }
 0x39a   : > { %4109 = vst.msk [vmem:[#allocation2 + $0x98] sm:$0xf] %vm4070_vm1, %v4024_v15 }
 0x39b   : > { %v4026_v55 = vpop.permute.xlu0 %4025 }
 0x39c   : > { %4110 = vst.msk [vmem:[#allocation2 + $0x9c] sm:$0xf] %vm4070_vm1, %v4026_v55 }
 0x39d   : > { %v4855_v25 = vpop.permute.xlu1 %4854 }
 0x39e   : > { %4958 = vst.msk [vmem:[#allocation2 + $0x50] sm:$0xf] %vm4937_vm4, %v4855_v25 }
 0x39f   : > { %v4857_v57 = vpop.permute.xlu0 %4856 }
 0x3a0   : > { %4959 = vst.msk [vmem:[#allocation2 + $0x54] sm:$0xf] %vm4937_vm4, %v4857_v57 }
 0x3a1   : > { %v4643_v48 = vpop.permute.xlu1 %4642  ;;  %v5553_v2 = vpop.f32.mrb[16].mxu0 }
 0x3a2   : > { %4728 = vst.msk [vmem:[#allocation2 + $0x98] sm:$0xf] %vm4689_vm3, %v4643_v48  ;;  %5695 = vst [vmem:[#allocation3 + $0x40] sm:$0xff] %v5553_v2  ;;  %v6350_v33 = vpop.f32.mrb[17].mxu0 }
 0x3a3   : > { %v4645_v42 = vpop.permute.xlu0 %4644  ;;  %v5556_v32 = vpop.f32.mrb[18].mxu0 }
 0x3a4   : > { %4729 = vst.msk [vmem:[#allocation2 + $0x9c] sm:$0xf] %vm4689_vm3, %v4645_v42  ;;  %5696 = vst [vmem:[#allocation3 + $0x48] sm:$0xff] %v5556_v32  ;;  %v6351_v46 = vpop.f32.mrb[19].mxu0 }
 0x3a5   : > { %v5103_v45 = vpop.permute.xlu1 %5102 }
 0x3a6   : > { %5206 = vst.msk [vmem:[#allocation2 + $0x50] sm:$0xf] %vm5185_vm5, %v5103_v45 }
 0x3a7   : > { %v5105_v3 = vpop.permute.xlu0 %5104 }
 0x3a8   : > { %5207 = vst.msk [vmem:[#allocation2 + $0x54] sm:$0xf] %vm5185_vm5, %v5105_v3 }
 0x3a9   : > { %v4891_v4 = vpop.permute.xlu1 %4890  ;;  %v5761_v51 = vld [vmem:[#allocation3 + $0x3f] sm:$0xff]  ;;  %v5625_v43 = vpop.f32.mrb[8].mxu1 }
 0x3aa   : > { %4976 = vst.msk [vmem:[#allocation2 + $0x98] sm:$0xf] %vm4937_vm4, %v4891_v4  ;;  %v6108_v20 = vclamps-f32 %v5761_v51, 1.0  ;;  %5713 = vst [vmem:[#allocation3 + $0xd0] sm:$0xff] %v5625_v43  ;;  %v6386_v26 = vpop.f32.mrb[9].mxu1 }
 0x3ab   : > { %v4893_v36 = vpop.permute.xlu0 %4892  ;;  %v5628_v52 = vpop.f32.mrb[10].mxu1 }
 0x3ac   : > { %4977 = vst.msk [vmem:[#allocation2 + $0x9c] sm:$0xf] %vm4937_vm4, %v4893_v36  ;;  %v6211_v21 = vpack.c.bf16 %v6108_v20, %v6107_v12  ;;  %5714 = vst [vmem:[#allocation3 + $0xd8] sm:$0xff] %v5628_v52  ;;  %v6387_v7 = vpop.f32.mrb[11].mxu1 }
 0x3ad   : > { %v5139_v9 = vpop.permute.xlu1 %5138 }
 0x3ae   : > { %5224 = vst.msk [vmem:[#allocation2 + $0x98] sm:$0xf] %vm5185_vm5, %v5139_v9  ;;  %6279 = vst [vmem:[%s9541_s11 + $0x10] sm:$0xff] %v6211_v21  }
 0x3af   : > { %v5141_v49 = vpop.permute.xlu0 %5140  ;;  %v6473_v53 = vld [vmem:[#allocation2 + $0x50] sm:$0xff]  }
 0x3b0   : > { %5225 = vst.msk [vmem:[#allocation2 + $0x9c] sm:$0xf] %vm5185_vm5, %v5141_v49  ;;  %6373 = vmatmul.mubr.msk.bf16.gmra.mrb[40].mxu0 %vm5419_vm6, %v6473_v53 }
 0x3b1   : > { %v3655_v19 = vpop.permute.xlu1 %3654  ;;  %v5889_v58 = vld [vmem:[#allocation3 + $0xcf] sm:$0xff] }
 0x3b2   : > { %3739 = vst.msk [vmem:[#allocation2 + $0xa0] sm:$0x3] %vm3738_vm2, %v3655_v19  ;;  %v6140_v41 = vclamps-f32 %v5889_v58, 1.0 }
 0x3b3   : > { %v4028_v38 = vpop.permute.xlu0 %4027 }
 0x3b4   : > { %4112 = vst.msk [vmem:[#allocation2 + $0xa0] sm:$0x3] %vm4111_vm7, %v4028_v38  ;;  %v6251_v24 = vpack.c.bf16 %v6140_v41, %v6139_v14 }
 0x3b5   : > { %v4647_v47 = vpop.permute.xlu1 %4646 }
 0x3b6   : > { %4731 = vst.msk [vmem:[#allocation2 + $0xa0] sm:$0x3] %vm4730_vm8, %v4647_v47  ;;  %6287 = vst [vmem:[%s9541_s11 + $0x50] sm:$0xff] %v6251_v24  }
 0x3b7   : > { %v4895_v6 = vpop.permute.xlu0 %4894  ;;  %v6474_v61 = vld [vmem:[#allocation2 + $0x98] sm:$0xff]  }
 0x3b8   : > { %4979 = vst.msk [vmem:[#allocation2 + $0xa0] sm:$0x3] %vm4978_vm9, %v4895_v6  ;;  %6409 = vmatmul.mubr.msk.bf16.gmra.mrb[32].mxu1 %vm5419_vm6, %v6474_v61 }
 0x3b9   : > { %v5143_v27 = vpop.permute.xlu1 %5142  ;;  %6412 = vmatprep.mubr.msk.bf16.mxu1 %vm6495_vm14, %v6491_v39 }
 0x3ba   : > { %5227 = vst.msk [vmem:[#allocation2 + $0xa0] sm:$0x3] %vm5226_vm10, %v5143_v27 }
 0x3c1   : > { %v6475_v59 = vld [vmem:[#allocation2 + $0xa0] ss:$0 sps:$4 sm:$0xff]  }
 0x3c2   : > { %6413 = vmatmul.mubr.msk.bf16.gmra.mrb[36].mxu1 %vm5419_vm6, %v6475_v59 }
 0x3c5   : > { %v5561_v30 = vpop.f32.mrb[20].mxu0 }
 0x3c6   : > { %5697 = vst [vmem:[#allocation3 + $0x50] sm:$0xff] %v5561_v30  ;;  %v6354_v40 = vpop.f32.mrb[21].mxu0 }
 0x3c7   : > { %v5564_v62 = vpop.f32.mrb[22].mxu0 }
 0x3c8   : > { %5698 = vst [vmem:[#allocation3 + $0x58] sm:$0xff] %v5564_v62  ;;  %v6355_v5 = vpop.f32.mrb[23].mxu0 }
 0x3cd   : > { %v5776_v23 = vld [vmem:[#allocation3 + $0x49] sm:$0xff]  ;;  %v5633_v34 = vpop.f32.mrb[12].mxu1 }
 0x3ce   : > { %5715 = vst [vmem:[#allocation3 + $0xe0] sm:$0xff] %v5633_v34  ;;  %v6390_v18 = vpop.f32.mrb[13].mxu1  ;;  %v6111_v44 = vclamps-f32 %v5776_v23, 1.0 }
 0x3cf   : > { %v5777_v37 = vld [vmem:[#allocation3 + $0x51] sm:$0xff]  ;;  %v5636_v54 = vpop.f32.mrb[14].mxu1 }
 0x3d0   : > { %v6112_v56 = vclamps-f32 %v5777_v37, 1.0  ;;  %5716 = vst [vmem:[#allocation3 + $0xe8] sm:$0xff] %v5636_v54  ;;  %v6391_v39 = vpop.f32.mrb[15].mxu1 }
 0x3d2   : > { %v6216_v17 = vpack.c.bf16 %v6112_v56, %v6111_v44 }
 0x3d4   : > { %6280 = vst [vmem:[%s9541_s11 + $0x18] sm:$0xff] %v6216_v17  }
 0x3d5   : > { %v5904_v11 = vld [vmem:[#allocation3 + $0xd9] sm:$0xff] }
 0x3d6   : > { %v6143_v16 = vclamps-f32 %v5904_v11, 1.0 }
 0x3d7   : > { %v5905_v35 = vld [vmem:[#allocation3 + $0xe1] sm:$0xff] }
 0x3d8   : > { %v6144_v1 = vclamps-f32 %v5905_v35, 1.0 }
 0x3da   : > { %v6256_v8 = vpack.c.bf16 %v6144_v1, %v6143_v16 }
 0x3dc   : > { %6288 = vst [vmem:[%s9541_s11 + $0x58] sm:$0xff] %v6256_v8  }
 0x3e9   : > { %v5569_v13 = vpop.f32.mrb[24].mxu0 }
 0x3ea   : > { %5699 = vst [vmem:[#allocation3 + $0x60] sm:$0xff] %v5569_v13  ;;  %v6358_v60 = vpop.f32.mrb[25].mxu0 }
 0x3eb   : > { %v5572_v22 = vpop.f32.mrb[26].mxu0 }
 0x3ec   : > { %5700 = vst [vmem:[#allocation3 + $0x68] sm:$0xff] %v5572_v22  ;;  %v6359_v10 = vpop.f32.mrb[27].mxu0 }
 0x3f1   : > { %v5792_v63 = vld [vmem:[#allocation3 + $0x5b] sm:$0xff]  ;;  %v5641_v29 = vpop.f32.mrb[16].mxu1 }
 0x3f2   : > { %5717 = vst [vmem:[#allocation3 + $0xf0] sm:$0xff] %v5641_v29  ;;  %v6394_v28 = vpop.f32.mrb[17].mxu1  ;;  %v6115_v55 = vclamps-f32 %v5792_v63, 1.0 }
 0x3f3   : > { %v5793_v31 = vld [vmem:[#allocation3 + $0x63] sm:$0xff]  ;;  %v5644_v15 = vpop.f32.mrb[18].mxu1 }
 0x3f4   : > { %v6116_v25 = vclamps-f32 %v5793_v31, 1.0  ;;  %5718 = vst [vmem:[#allocation3 + $0xf8] sm:$0xff] %v5644_v15  ;;  %v6395_v57 = vpop.f32.mrb[19].mxu1 }
 0x3f6   : > { %v6221_v48 = vpack.c.bf16 %v6116_v25, %v6115_v55 }
 0x3f8   : > { %6281 = vst [vmem:[%s9541_s11 + $0x20] sm:$0xff] %v6221_v48  }
 0x3f9   : > { %v5920_v2 = vld [vmem:[#allocation3 + $0xeb] sm:$0xff] }
 0x3fa   : > { %v6147_v33 = vclamps-f32 %v5920_v2, 1.0 }
 0x3fb   : > { %v5921_v42 = vld [vmem:[#allocation3 + $0xf3] sm:$0xff] }
 0x3fc   : > { %v6148_v32 = vclamps-f32 %v5921_v42, 1.0 }
 0x3fe   : > { %v6261_v45 = vpack.c.bf16 %v6148_v32, %v6147_v33 }
 0x400   : > { %6289 = vst [vmem:[%s9541_s11 + $0x60] sm:$0xff] %v6261_v45  }
 0x40d   : > { %v5577_v46 = vpop.f32.mrb[28].mxu0 }
 0x40e   : > { %5701 = vst [vmem:[#allocation3 + $0x70] sm:$0xff] %v5577_v46  ;;  %v6362_v3 = vpop.f32.mrb[29].mxu0 }
 0x40f   : > { %v5580_v50 = vpop.f32.mrb[30].mxu0 }
 0x410   : > { %5702 = vst [vmem:[#allocation3 + $0x78] sm:$0xff] %v5580_v50  ;;  %v6363_v4 = vpop.f32.mrb[31].mxu0 }
 0x415   : > { %v5808_v51 = vld [vmem:[#allocation3 + $0x6d] sm:$0xff]  ;;  %v5649_v43 = vpop.f32.mrb[20].mxu1 }
 0x416   : > { %5719 = vst [vmem:[#allocation3 + $0x100] sm:$0xff] %v5649_v43  ;;  %v6398_v12 = vpop.f32.mrb[21].mxu1  ;;  %v6119_v26 = vclamps-f32 %v5808_v51, 1.0 }
 0x417   : > { %v5809_v20 = vld [vmem:[#allocation3 + $0x75] sm:$0xff]  ;;  %v5652_v36 = vpop.f32.mrb[22].mxu1 }
 0x418   : > { %v6120_v52 = vclamps-f32 %v5809_v20, 1.0  ;;  %5720 = vst [vmem:[#allocation3 + $0x108] sm:$0xff] %v5652_v36  ;;  %v6399_v21 = vpop.f32.mrb[23].mxu1 }
 0x41a   : > { %v6226_v9 = vpack.c.bf16 %v6120_v52, %v6119_v26 }
 0x41c   : > { %6282 = vst [vmem:[%s9541_s11 + $0x28] sm:$0xff] %v6226_v9  }
 0x41d   : > { %v5936_v7 = vld [vmem:[#allocation3 + $0xfd] sm:$0xff] }
 0x41e   : > { %v6151_v53 = vclamps-f32 %v5936_v7, 1.0 }
 0x41f   : > { %v5937_v49 = vld [vmem:[#allocation3 + $0x105] sm:$0xff] }
 0x420   : > { %v6152_v0 = vclamps-f32 %v5937_v49, 1.0 }
 0x422   : > { %v6266_v19 = vpack.c.bf16 %v6152_v0, %v6151_v53 }
 0x424   : > { %6290 = vst [vmem:[%s9541_s11 + $0x68] sm:$0xff] %v6266_v19  }
 0x433   : > { %v5585_v58 = vpop.f32.mrb[32].mxu0 }
 0x434   : > { %5703 = vst [vmem:[#allocation3 + $0x80] sm:$0xff] %v5585_v58  ;;  %v6366_v14 = vpop.f32.mrb[33].mxu0 }
 0x435   : > { %v5588_v41 = vpop.f32.mrb[34].mxu0 }
 0x436   : > { %5704 = vst [vmem:[#allocation3 + $0x88] sm:$0xff] %v5588_v41  ;;  %v6367_v38 = vpop.f32.mrb[35].mxu0 }
 0x43b   : > { %v5824_v24 = vld [vmem:[#allocation3 + $0x7f] sm:$0xff]  ;;  %v5657_v47 = vpop.f32.mrb[24].mxu1 }
 0x43c   : > { %5721 = vst [vmem:[#allocation3 + $0x110] sm:$0xff] %v5657_v47  ;;  %v6402_v6 = vpop.f32.mrb[25].mxu1  ;;  %v6123_v59 = vclamps-f32 %v5824_v24, 1.0 }
 0x43d   : > { %v5825_v61 = vld [vmem:[#allocation3 + $0x87] sm:$0xff]  ;;  %v5660_v27 = vpop.f32.mrb[26].mxu1 }
 0x43e   : > { %v6124_v30 = vclamps-f32 %v5825_v61, 1.0  ;;  %5722 = vst [vmem:[#allocation3 + $0x118] sm:$0xff] %v5660_v27  ;;  %v6403_v40 = vpop.f32.mrb[27].mxu1 }
 0x440   : > { %v6231_v62 = vpack.c.bf16 %v6124_v30, %v6123_v59 }
 0x442   : > { %6283 = vst [vmem:[%s9541_s11 + $0x30] sm:$0xff] %v6231_v62  }
 0x443   : > { %v5952_v5 = vld [vmem:[#allocation3 + $0x10f] sm:$0xff] }
 0x444   : > { %v6155_v34 = vclamps-f32 %v5952_v5, 1.0 }
 0x445   : > { %v5953_v23 = vld [vmem:[#allocation3 + $0x117] sm:$0xff] }
 0x446   : > { %v6156_v18 = vclamps-f32 %v5953_v23, 1.0 }
 0x448   : > { %v6271_v37 = vpack.c.bf16 %v6156_v18, %v6155_v34 }
 0x44a   : > { %6291 = vst [vmem:[%s9541_s11 + $0x70] sm:$0xff] %v6271_v37  }
 0x45b   : > { %v5593_v54 = vpop.f32.mrb[36].mxu0 }
 0x45c   : > { %5705 = vst [vmem:[#allocation3 + $0x90] sm:$0xff] %v5593_v54  ;;  %v6370_v44 = vpop.f32.mrb[37].mxu0 }
 0x45d   : > { %v5596_v56 = vpop.f32.mrb[38].mxu0 }
 0x45e   : > { %5706 = vst [vmem:[#allocation3 + $0x98] sm:$0xff] %v5596_v56  ;;  %v6371_v39 = vpop.f32.mrb[39].mxu0 }
 0x463   : > { %v5665_v17 = vpop.f32.mrb[28].mxu1 }
 0x464   : > { %5723 = vst [vmem:[#allocation3 + $0x120] sm:$0xff] %v5665_v17  ;;  %v6406_v11 = vpop.f32.mrb[29].mxu1 }
 0x465   : > { %v5668_v35 = vpop.f32.mrb[30].mxu1  ;;  %v5840_v22 = vld [vmem:[#allocation3 + $0x91] sm:$0xff] }
 0x466   : > { %5724 = vst [vmem:[#allocation3 + $0x128] sm:$0xff] %v5668_v35  ;;  %v6407_v16 = vpop.f32.mrb[31].mxu1  ;;  %v6127_v29 = vclamps-f32 %v5840_v22, 1.0 }
 0x46d   : > { %v5968_v32 = vld [vmem:[#allocation3 + $0x121] sm:$0xff] }
 0x46e   : > { %v6159_v46 = vclamps-f32 %v5968_v32, 1.0 }
 0x483   : > { %v5601_v1 = vpop.f32.mrb[40].mxu0 }
 0x484   : > { %5707 = vst [vmem:[#allocation3 + $0xa0] sm:$0xff] %v5601_v1  ;;  %v6374_v8 = vpop.f32.mrb[41].mxu0 }
 0x485   : > { %v5604_v13 = vpop.f32.mrb[42].mxu0 }
 0x486   : > { %5708 = vst [vmem:[#allocation3 + $0xa8] sm:$0xff] %v5604_v13  ;;  %v6375_v60 = vpop.f32.mrb[43].mxu0 }
 0x48b   : > { %v5841_v10 = vld [vmem:[#allocation3 + $0x99] sm:$0xff]  ;;  %v5673_v63 = vpop.f32.mrb[32].mxu1 }
 0x48c   : > { %v6128_v28 = vclamps-f32 %v5841_v10, 1.0  ;;  %5725 = vst [vmem:[#allocation3 + $0x130] sm:$0xff] %v5673_v63  ;;  %v6410_v31 = vpop.f32.mrb[33].mxu1 }
 0x48d   : > { %v5856_v15 = vld [vmem:[#allocation3 + $0xa3] sm:$0xff]  ;;  %v5857_v55 = vld [vmem:[#allocation3 + $0xab] sm:$0xff]  ;;  %v5676_v25 = vpop.f32.mrb[34].mxu1 }
 0x48e   : > { %v6236_v57 = vpack.c.bf16 %v6128_v28, %v6127_v29  ;;  %v6131_v48 = vclamps-f32 %v5856_v15, 1.0  ;;  %v6132_v2 = vclamps-f32 %v5857_v55, 1.0  ;;  %v6411_v42 = vpop.f32.mrb[35].mxu1 }
 0x490   : > { %6284 = vst [vmem:[%s9541_s11 + $0x38] sm:$0xff] %v6236_v57   ;;  %v6241_v33 = vpack.c.bf16 %v6132_v2, %v6131_v48 }
 0x492   : > { %6285 = vst [vmem:[%s9541_s11 + $0x40] sm:$0xff] %v6241_v33  }
 0x493   : > { %v5969_v45 = vld [vmem:[#allocation3 + $0x129] sm:$0xff] }
 0x494   : > { %v6160_v3 = vclamps-f32 %v5969_v45, 1.0 }
 0x495   : > { %v5681_v50 = vpop.f32.mrb[36].mxu1 }
 0x496   : > { %v6276_v4 = vpack.c.bf16 %v6160_v3, %v6159_v46  ;;  %v6414_v51 = vpop.f32.mrb[37].mxu1 }
 0x497   : > { %v5684_v43 = vpop.f32.mrb[38].mxu1 }
 0x498   : > { %6292 = vst [vmem:[%s9541_s11 + $0x78] sm:$0xff] %v6276_v4   ;;  %v6415_v12 = vpop.f32.mrb[39].mxu1 }
 0x499 PF: > { %s13_s12 = sadd.s32 1, %s6483_s12  }
 0x49a   : > { %p10_p4 = scmp.ge.s32.totalorder %s13_s12, 4  }
 0x49c   :  { %12 = sbr.rel (!%p10_p4) target bundleno = 1 (0x1), region = 62 }

</bundles_post_ra>
